<compile_context>
chip_gen: v5e
topology: v5e:2x2
jax: 0.10.0
libtpu: 0.0.40
codegen_flags: <defaults>
</compile_context>

<pallas_src>
import functools

import numpy as np
import jax
import jax.numpy as jnp
from jax import lax
from jax.experimental import pallas as pl
from jax.experimental.pallas import tpu as pltpu  # noqa: F401  (TPU backend)


# ----------------------------------------------------------------------------
# constant 0/1 selection matrices for the 2x2/2 max-pool downsample
# (flat (w_in x w_in) grid -> flat (w_out x w_out) grid picking even rows/cols)
# ----------------------------------------------------------------------------
def _pool_select(w_in, w_out):
    s = np.zeros((w_in * w_in, w_out * w_out), np.float32)
    for a in range(w_out):
        for b in range(w_out):
            s[(2 * a) * w_in + 2 * b, a * w_out + b] = 1.0
    return jnp.asarray(s)


_SEL1 = _pool_select(32, 14)   # (1024, 196): pool1 (valid 28x28 -> 14x14)
_SEL2 = _pool_select(14, 5)    # (196, 25):   pool2 (valid 10x10 -> 5x5)


def _shift_l(x, d):
    """y[..., p] = x[..., (p + d) % L] for a static d (lane rotation).

    Wrapped lanes only ever land on conv/pool positions that the valid-window
    selection matrices never read, so the wrap-around is harmless.
    """
    if d == 0:
        return x
    return jnp.concatenate([x[..., d:], x[..., :d]], axis=-1)


# ----------------------------------------------------------------------------
# the whole-network Pallas kernel
# ----------------------------------------------------------------------------
def _lenet5_kernel(x_ref, w1_ref, s1_ref, b1_ref,
                   w2_ref, s2_ref, b2_ref,
                   sel1_ref, sel2_ref,
                   w3_ref, b3_ref, fc1w_ref, fc1b_ref, fc2w_ref, fc2b_ref,
                   out_ref, *, n_batch):
    f32 = jnp.float32
    N = n_batch
    hw1 = 32 * 32        # conv1 / pool1 grid (per sample)
    hw2 = 14 * 14        # conv2 / pool2 grid

    # ---- conv1 (1->6, 5x5, valid) + folded BN1 + ReLU ----------------------
    x = x_ref[...]                                            # (N, 1024)
    acc1 = jnp.zeros((6 * N, hw1), f32)
    for i in range(5):
        for j in range(5):
            # (6N, N) batch-block-diagonal tap weight @ lane-shifted input.
            acc1 = acc1 + jnp.dot(w1_ref[i * 5 + j],
                                  _shift_l(x, i * 32 + j),
                                  preferred_element_type=f32)
    a1 = jnp.maximum(acc1 * s1_ref[...] + b1_ref[...], 0.0)   # (6N, 1024)

    # ---- maxpool1 2x2/2 : 28x28 -> 14x14 (single selection matmul) ---------
    m1 = jnp.maximum(jnp.maximum(a1, _shift_l(a1, 1)),
                     jnp.maximum(_shift_l(a1, 32), _shift_l(a1, 33)))
    p1 = jnp.dot(m1, sel1_ref[...], preferred_element_type=f32)  # (6N, 196)

    # ---- conv2 (6->16, 5x5, valid) + folded BN2 + ReLU ---------------------
    acc2 = jnp.zeros((16 * N, hw2), f32)
    for i in range(5):
        for j in range(5):
            acc2 = acc2 + jnp.dot(w2_ref[i * 5 + j],
                                  _shift_l(p1, i * 14 + j),
                                  preferred_element_type=f32)
    a2 = jnp.maximum(acc2 * s2_ref[...] + b2_ref[...], 0.0)   # (16N, 196)

    # ---- maxpool2 2x2/2 : 10x10 -> 5x5 (single selection matmul) -----------
    m2 = jnp.maximum(jnp.maximum(a2, _shift_l(a2, 1)),
                     jnp.maximum(_shift_l(a2, 14), _shift_l(a2, 15)))
    p2 = jnp.dot(m2, sel2_ref[...], preferred_element_type=f32)  # (16N, 25)

    # ---- flatten to (N, 400) in PyTorch (ci, h, w) order -------------------
    # rows of p2 are (channel-major, batch-minor): row ci*N + n.
    x3 = jnp.concatenate([p2[ci * N:(ci + 1) * N, :] for ci in range(16)],
                         axis=-1)                              # (N, 400)

    # Dropout(0.5) is identity in eval mode.
    # ---- conv3 (as FC 400->120) + ReLU, fc1 + ReLU, fc2 --------------------
    h = jnp.maximum(jnp.dot(x3, w3_ref[...], preferred_element_type=f32)
                    + b3_ref[...], 0.0)                        # (N, 120)
    h = jnp.maximum(jnp.dot(h, fc1w_ref[...], preferred_element_type=f32)
                    + fc1b_ref[...], 0.0)                      # (N, 84)
    out = jnp.dot(h, fc2w_ref[...], preferred_element_type=f32) + fc2b_ref[...]
    out_ref[...] = out.astype(out_ref.dtype)                   # (N, 10)


# ----------------------------------------------------------------------------
# wrapper: BN folding + weight re-layout (all at trace time) + one pallas_call
# ----------------------------------------------------------------------------
@jax.jit
def lenet5_forward(x, p):
    eps = 1e-5
    n = x.shape[0]
    eye = jnp.eye(n, dtype=jnp.float32)

    # fold eval-mode BatchNorm into per-channel scale / bias
    s1 = p["bn1_gamma"] * lax.rsqrt(p["bn1_var"] + eps)
    b1 = (p["conv1_b"] - p["bn1_mean"]) * s1 + p["bn1_beta"]
    s2 = p["bn2_gamma"] * lax.rsqrt(p["bn2_var"] + eps)
    b2 = (p["conv2_b"] - p["bn2_mean"]) * s2 + p["bn2_beta"]

    # tap-major conv weights, block-expanded over the batch: kron(W_tap, I_N)
    w1t = p["conv1_w"].reshape(6, 25).T                         # (25, 6)
    w1bd = jnp.einsum("to,nm->tonm", w1t, eye).reshape(25, 6 * n, n)
    w2t = p["conv2_w"].transpose(2, 3, 0, 1).reshape(25, 16, 6)  # (25, 16, 6)
    w2bd = jnp.einsum("toi,nm->tonim", w2t, eye).reshape(25, 16 * n, 6 * n)

    # per-row (channel-major, batch-minor) BN scale / bias columns
    s1bd = jnp.repeat(s1, n).reshape(6 * n, 1)
    b1bd = jnp.repeat(b1, n).reshape(6 * n, 1)
    s2bd = jnp.repeat(s2, n).reshape(16 * n, 1)
    b2bd = jnp.repeat(b2, n).reshape(16 * n, 1)

    w3t = p["conv3_w"].reshape(120, 400).T                      # (400, 120)

    return pl.pallas_call(
        functools.partial(_lenet5_kernel, n_batch=n),
        out_shape=jax.ShapeDtypeStruct((n, 10), jnp.float32),
    )(x.reshape(n, 32 * 32),
      w1bd, s1bd, b1bd,
      w2bd, s2bd, b2bd,
      _SEL1, _SEL2,
      w3t, p["conv3_b"].reshape(1, 120),
      p["fc1_w"].T, p["fc1_b"].reshape(1, 84),
      p["fc2_w"].T, p["fc2_b"].reshape(1, 10))


# ----------------------------------------------------------------------------
# deterministic synthetic parameters + pure-JAX reference (for a sanity check)
# ----------------------------------------------------------------------------
def init_params(key):
    ks = jax.random.split(key, 18)
    n = lambda k, shape, s=0.1: s * jax.random.normal(k, shape, jnp.float32)
    return {
        "conv1_w": n(ks[0], (6, 1, 5, 5)),   "conv1_b": n(ks[1], (6,)),
        "bn1_gamma": 1.0 + n(ks[2], (6,)),   "bn1_beta": n(ks[3], (6,)),
        "bn1_mean": n(ks[4], (6,)),          "bn1_var": 1.0 + jnp.abs(n(ks[5], (6,))),
        "conv2_w": n(ks[6], (16, 6, 5, 5)),  "conv2_b": n(ks[7], (16,)),
        "bn2_gamma": 1.0 + n(ks[8], (16,)),  "bn2_beta": n(ks[9], (16,)),
        "bn2_mean": n(ks[10], (16,)),        "bn2_var": 1.0 + jnp.abs(n(ks[11], (16,))),
        "conv3_w": n(ks[12], (120, 16, 5, 5)), "conv3_b": n(ks[13], (120,)),
        "fc1_w": n(ks[14], (84, 120)),       "fc1_b": n(ks[15], (84,)),
        "fc2_w": n(ks[16], (10, 84)),        "fc2_b": n(ks[17], (10,)),
    }


def lenet5_reference(x, p):
    eps = 1e-5
    dn = ("NCHW", "OIHW", "NCHW")

    def conv(y, w, b):
        y = lax.conv_general_dilated(y, w, (1, 1), "VALID", dimension_numbers=dn)
        return y + b[None, :, None, None]

    def bn(y, g, bb, m, v):
        sc = (g * lax.rsqrt(v + eps))[None, :, None, None]
        return (y - m[None, :, None, None]) * sc + bb[None, :, None, None]

    def pool(y):
        return lax.reduce_window(y, -jnp.inf, lax.max,
                                 (1, 1, 2, 2), (1, 1, 2, 2), "VALID")

    y = pool(jnp.maximum(bn(conv(x, p["conv1_w"], p["conv1_b"]),
                            p["bn1_gamma"], p["bn1_beta"],
                            p["bn1_mean"], p["bn1_var"]), 0.0))
    y = pool(jnp.maximum(bn(conv(y, p["conv2_w"], p["conv2_b"]),
                            p["bn2_gamma"], p["bn2_beta"],
                            p["bn2_mean"], p["bn2_var"]), 0.0))
    y = jnp.maximum(conv(y, p["conv3_w"], p["conv3_b"]), 0.0)
    y = y.reshape(y.shape[0], -1)
    y = jnp.maximum(y @ p["fc1_w"].T + p["fc1_b"], 0.0)
    return y @ p["fc2_w"].T + p["fc2_b"]


if __name__ == "__main__":
    key = jax.random.PRNGKey(0)
    k_x, k_p = jax.random.split(key)
    # LeNet-5 geometry requires 32x32 single-channel input (NCHW).
    x = jax.random.normal(k_x, (2, 1, 32, 32), jnp.float32)
    params = init_params(k_p)

    out = jax.block_until_ready(lenet5_forward(x, params))
    assert out.shape == (2, 10) and out.dtype == jnp.float32

    ref = jax.block_until_ready(lenet5_reference(x, params))
    diff = float(np.max(np.abs(np.asarray(out) - np.asarray(ref))))
    assert np.allclose(np.asarray(out), np.asarray(ref), rtol=5e-2, atol=5e-2), (
        "kernel/reference mismatch: max|diff|=%g" % diff)

    print("KERNEL_OK")
</pallas_src>

<mosaic_0001>
module attributes {stable_mosaic.version = 11 : i64} {
  func.func @_lenet5_kernel(%arg0: memref<2x1024xf32, #tpu.memory_space<vmem>>, %arg1: memref<25x12x2xf32, #tpu.memory_space<vmem>>, %arg2: memref<12x1xf32, #tpu.memory_space<vmem>>, %arg3: memref<12x1xf32, #tpu.memory_space<vmem>>, %arg4: memref<25x32x12xf32, #tpu.memory_space<vmem>>, %arg5: memref<32x1xf32, #tpu.memory_space<vmem>>, %arg6: memref<32x1xf32, #tpu.memory_space<vmem>>, %arg7: memref<1024x196xf32, #tpu.memory_space<vmem>>, %arg8: memref<196x25xf32, #tpu.memory_space<vmem>>, %arg9: memref<400x120xf32, #tpu.memory_space<vmem>>, %arg10: memref<1x120xf32, #tpu.memory_space<vmem>>, %arg11: memref<120x84xf32, #tpu.memory_space<vmem>>, %arg12: memref<1x84xf32, #tpu.memory_space<vmem>>, %arg13: memref<84x10xf32, #tpu.memory_space<vmem>>, %arg14: memref<1x10xf32, #tpu.memory_space<vmem>>, %arg15: memref<2x10xf32, #tpu.memory_space<vmem>>) attributes {dimension_semantics = [], scalar_prefetch = 0 : i64, scratch_operands = 0 : i64, tpu.core_type = #tpu.core_type<tc>} {
    %c0 = arith.constant 0 : index
    %c0_0 = arith.constant 0 : index
    %0 = vector.load %arg0[%c0, %c0_0] : memref<2x1024xf32, #tpu.memory_space<vmem>>, vector<2x1024xf32>
    %cst = arith.constant 0.000000e+00 : f32
    %1 = vector.broadcast %cst : f32 to vector<12x1024xf32>
    %c0_1 = arith.constant 0 : index
    %c0_2 = arith.constant 0 : index
    %c0_3 = arith.constant 0 : index
    %2 = vector.load %arg1[%c0_1, %c0_2, %c0_3] : memref<25x12x2xf32, #tpu.memory_space<vmem>>, vector<1x12x2xf32>
    %3 = vector.shape_cast %2 : vector<1x12x2xf32> to vector<12x2xf32>
    %cst_4 = arith.constant dense<0.000000e+00> : vector<12x1024xf32>
    %4 = tpu.matmul %3, %0, %cst_4 {dimension_numbers = #tpu.dot_dimension_numbers<[1], [0], [0], [1], [0, 0, 1, 1], [], []>} : vector<12x2xf32>, vector<2x1024xf32>, vector<12x1024xf32> -> vector<12x1024xf32>
    %5 = arith.addf %1, %4 : vector<12x1024xf32>
    %c1 = arith.constant 1 : index
    %c0_5 = arith.constant 0 : index
    %c0_6 = arith.constant 0 : index
    %6 = vector.load %arg1[%c1, %c0_5, %c0_6] : memref<25x12x2xf32, #tpu.memory_space<vmem>>, vector<1x12x2xf32>
    %7 = vector.shape_cast %6 : vector<1x12x2xf32> to vector<12x2xf32>
    %8 = vector.extract_strided_slice %0 {offsets = [0, 1], sizes = [2, 1023], strides = [1, 1]} : vector<2x1024xf32> to vector<2x1023xf32>
    %9 = vector.extract_strided_slice %0 {offsets = [0, 0], sizes = [2, 1], strides = [1, 1]} : vector<2x1024xf32> to vector<2x1xf32>
    %10 = tpu.concatenate %8, %9 in 1 : vector<2x1023xf32>, vector<2x1xf32> -> vector<2x1024xf32>
    %cst_7 = arith.constant dense<0.000000e+00> : vector<12x1024xf32>
    %11 = tpu.matmul %7, %10, %cst_7 {dimension_numbers = #tpu.dot_dimension_numbers<[1], [0], [0], [1], [0, 0, 1, 1], [], []>} : vector<12x2xf32>, vector<2x1024xf32>, vector<12x1024xf32> -> vector<12x1024xf32>
    %12 = arith.addf %5, %11 : vector<12x1024xf32>
    %c2 = arith.constant 2 : index
    %c0_8 = arith.constant 0 : index
    %c0_9 = arith.constant 0 : index
    %13 = vector.load %arg1[%c2, %c0_8, %c0_9] : memref<25x12x2xf32, #tpu.memory_space<vmem>>, vector<1x12x2xf32>
    %14 = vector.shape_cast %13 : vector<1x12x2xf32> to vector<12x2xf32>
    %15 = vector.extract_strided_slice %0 {offsets = [0, 2], sizes = [2, 1022], strides = [1, 1]} : vector<2x1024xf32> to vector<2x1022xf32>
    %16 = vector.extract_strided_slice %0 {offsets = [0, 0], sizes = [2, 2], strides = [1, 1]} : vector<2x1024xf32> to vector<2x2xf32>
    %17 = tpu.concatenate %15, %16 in 1 : vector<2x1022xf32>, vector<2x2xf32> -> vector<2x1024xf32>
    %cst_10 = arith.constant dense<0.000000e+00> : vector<12x1024xf32>
    %18 = tpu.matmul %14, %17, %cst_10 {dimension_numbers = #tpu.dot_dimension_numbers<[1], [0], [0], [1], [0, 0, 1, 1], [], []>} : vector<12x2xf32>, vector<2x1024xf32>, vector<12x1024xf32> -> vector<12x1024xf32>
    %19 = arith.addf %12, %18 : vector<12x1024xf32>
    %c3 = arith.constant 3 : index
    %c0_11 = arith.constant 0 : index
    %c0_12 = arith.constant 0 : index
    %20 = vector.load %arg1[%c3, %c0_11, %c0_12] : memref<25x12x2xf32, #tpu.memory_space<vmem>>, vector<1x12x2xf32>
    %21 = vector.shape_cast %20 : vector<1x12x2xf32> to vector<12x2xf32>
    %22 = vector.extract_strided_slice %0 {offsets = [0, 3], sizes = [2, 1021], strides = [1, 1]} : vector<2x1024xf32> to vector<2x1021xf32>
    %23 = vector.extract_strided_slice %0 {offsets = [0, 0], sizes = [2, 3], strides = [1, 1]} : vector<2x1024xf32> to vector<2x3xf32>
    %24 = tpu.concatenate %22, %23 in 1 : vector<2x1021xf32>, vector<2x3xf32> -> vector<2x1024xf32>
    %cst_13 = arith.constant dense<0.000000e+00> : vector<12x1024xf32>
    %25 = tpu.matmul %21, %24, %cst_13 {dimension_numbers = #tpu.dot_dimension_numbers<[1], [0], [0], [1], [0, 0, 1, 1], [], []>} : vector<12x2xf32>, vector<2x1024xf32>, vector<12x1024xf32> -> vector<12x1024xf32>
    %26 = arith.addf %19, %25 : vector<12x1024xf32>
    %c4 = arith.constant 4 : index
    %c0_14 = arith.constant 0 : index
    %c0_15 = arith.constant 0 : index
    %27 = vector.load %arg1[%c4, %c0_14, %c0_15] : memref<25x12x2xf32, #tpu.memory_space<vmem>>, vector<1x12x2xf32>
    %28 = vector.shape_cast %27 : vector<1x12x2xf32> to vector<12x2xf32>
    %29 = vector.extract_strided_slice %0 {offsets = [0, 4], sizes = [2, 1020], strides = [1, 1]} : vector<2x1024xf32> to vector<2x1020xf32>
    %30 = vector.extract_strided_slice %0 {offsets = [0, 0], sizes = [2, 4], strides = [1, 1]} : vector<2x1024xf32> to vector<2x4xf32>
    %31 = tpu.concatenate %29, %30 in 1 : vector<2x1020xf32>, vector<2x4xf32> -> vector<2x1024xf32>
    %cst_16 = arith.constant dense<0.000000e+00> : vector<12x1024xf32>
    %32 = tpu.matmul %28, %31, %cst_16 {dimension_numbers = #tpu.dot_dimension_numbers<[1], [0], [0], [1], [0, 0, 1, 1], [], []>} : vector<12x2xf32>, vector<2x1024xf32>, vector<12x1024xf32> -> vector<12x1024xf32>
    %33 = arith.addf %26, %32 : vector<12x1024xf32>
    %c5 = arith.constant 5 : index
    %c0_17 = arith.constant 0 : index
    %c0_18 = arith.constant 0 : index
    %34 = vector.load %arg1[%c5, %c0_17, %c0_18] : memref<25x12x2xf32, #tpu.memory_space<vmem>>, vector<1x12x2xf32>
    %35 = vector.shape_cast %34 : vector<1x12x2xf32> to vector<12x2xf32>
    %36 = vector.extract_strided_slice %0 {offsets = [0, 32], sizes = [2, 992], strides = [1, 1]} : vector<2x1024xf32> to vector<2x992xf32>
    %37 = vector.extract_strided_slice %0 {offsets = [0, 0], sizes = [2, 32], strides = [1, 1]} : vector<2x1024xf32> to vector<2x32xf32>
    %38 = tpu.concatenate %36, %37 in 1 : vector<2x992xf32>, vector<2x32xf32> -> vector<2x1024xf32>
    %cst_19 = arith.constant dense<0.000000e+00> : vector<12x1024xf32>
    %39 = tpu.matmul %35, %38, %cst_19 {dimension_numbers = #tpu.dot_dimension_numbers<[1], [0], [0], [1], [0, 0, 1, 1], [], []>} : vector<12x2xf32>, vector<2x1024xf32>, vector<12x1024xf32> -> vector<12x1024xf32>
    %40 = arith.addf %33, %39 : vector<12x1024xf32>
    %c6 = arith.constant 6 : index
    %c0_20 = arith.constant 0 : index
    %c0_21 = arith.constant 0 : index
    %41 = vector.load %arg1[%c6, %c0_20, %c0_21] : memref<25x12x2xf32, #tpu.memory_space<vmem>>, vector<1x12x2xf32>
    %42 = vector.shape_cast %41 : vector<1x12x2xf32> to vector<12x2xf32>
    %43 = vector.extract_strided_slice %0 {offsets = [0, 33], sizes = [2, 991], strides = [1, 1]} : vector<2x1024xf32> to vector<2x991xf32>
    %44 = vector.extract_strided_slice %0 {offsets = [0, 0], sizes = [2, 33], strides = [1, 1]} : vector<2x1024xf32> to vector<2x33xf32>
    %45 = tpu.concatenate %43, %44 in 1 : vector<2x991xf32>, vector<2x33xf32> -> vector<2x1024xf32>
    %cst_22 = arith.constant dense<0.000000e+00> : vector<12x1024xf32>
    %46 = tpu.matmul %42, %45, %cst_22 {dimension_numbers = #tpu.dot_dimension_numbers<[1], [0], [0], [1], [0, 0, 1, 1], [], []>} : vector<12x2xf32>, vector<2x1024xf32>, vector<12x1024xf32> -> vector<12x1024xf32>
    %47 = arith.addf %40, %46 : vector<12x1024xf32>
    %c7 = arith.constant 7 : index
    %c0_23 = arith.constant 0 : index
    %c0_24 = arith.constant 0 : index
    %48 = vector.load %arg1[%c7, %c0_23, %c0_24] : memref<25x12x2xf32, #tpu.memory_space<vmem>>, vector<1x12x2xf32>
    %49 = vector.shape_cast %48 : vector<1x12x2xf32> to vector<12x2xf32>
    %50 = vector.extract_strided_slice %0 {offsets = [0, 34], sizes = [2, 990], strides = [1, 1]} : vector<2x1024xf32> to vector<2x990xf32>
    %51 = vector.extract_strided_slice %0 {offsets = [0, 0], sizes = [2, 34], strides = [1, 1]} : vector<2x1024xf32> to vector<2x34xf32>
    %52 = tpu.concatenate %50, %51 in 1 : vector<2x990xf32>, vector<2x34xf32> -> vector<2x1024xf32>
    %cst_25 = arith.constant dense<0.000000e+00> : vector<12x1024xf32>
    %53 = tpu.matmul %49, %52, %cst_25 {dimension_numbers = #tpu.dot_dimension_numbers<[1], [0], [0], [1], [0, 0, 1, 1], [], []>} : vector<12x2xf32>, vector<2x1024xf32>, vector<12x1024xf32> -> vector<12x1024xf32>
    %54 = arith.addf %47, %53 : vector<12x1024xf32>
    %c8 = arith.constant 8 : index
    %c0_26 = arith.constant 0 : index
    %c0_27 = arith.constant 0 : index
    %55 = vector.load %arg1[%c8, %c0_26, %c0_27] : memref<25x12x2xf32, #tpu.memory_space<vmem>>, vector<1x12x2xf32>
    %56 = vector.shape_cast %55 : vector<1x12x2xf32> to vector<12x2xf32>
    %57 = vector.extract_strided_slice %0 {offsets = [0, 35], sizes = [2, 989], strides = [1, 1]} : vector<2x1024xf32> to vector<2x989xf32>
    %58 = vector.extract_strided_slice %0 {offsets = [0, 0], sizes = [2, 35], strides = [1, 1]} : vector<2x1024xf32> to vector<2x35xf32>
    %59 = tpu.concatenate %57, %58 in 1 : vector<2x989xf32>, vector<2x35xf32> -> vector<2x1024xf32>
    %cst_28 = arith.constant dense<0.000000e+00> : vector<12x1024xf32>
    %60 = tpu.matmul %56, %59, %cst_28 {dimension_numbers = #tpu.dot_dimension_numbers<[1], [0], [0], [1], [0, 0, 1, 1], [], []>} : vector<12x2xf32>, vector<2x1024xf32>, vector<12x1024xf32> -> vector<12x1024xf32>
    %61 = arith.addf %54, %60 : vector<12x1024xf32>
    %c9 = arith.constant 9 : index
    %c0_29 = arith.constant 0 : index
    %c0_30 = arith.constant 0 : index
    %62 = vector.load %arg1[%c9, %c0_29, %c0_30] : memref<25x12x2xf32, #tpu.memory_space<vmem>>, vector<1x12x2xf32>
    %63 = vector.shape_cast %62 : vector<1x12x2xf32> to vector<12x2xf32>
    %64 = vector.extract_strided_slice %0 {offsets = [0, 36], sizes = [2, 988], strides = [1, 1]} : vector<2x1024xf32> to vector<2x988xf32>
    %65 = vector.extract_strided_slice %0 {offsets = [0, 0], sizes = [2, 36], strides = [1, 1]} : vector<2x1024xf32> to vector<2x36xf32>
    %66 = tpu.concatenate %64, %65 in 1 : vector<2x988xf32>, vector<2x36xf32> -> vector<2x1024xf32>
    %cst_31 = arith.constant dense<0.000000e+00> : vector<12x1024xf32>
    %67 = tpu.matmul %63, %66, %cst_31 {dimension_numbers = #tpu.dot_dimension_numbers<[1], [0], [0], [1], [0, 0, 1, 1], [], []>} : vector<12x2xf32>, vector<2x1024xf32>, vector<12x1024xf32> -> vector<12x1024xf32>
    %68 = arith.addf %61, %67 : vector<12x1024xf32>
    %c10 = arith.constant 10 : index
    %c0_32 = arith.constant 0 : index
    %c0_33 = arith.constant 0 : index
    %69 = vector.load %arg1[%c10, %c0_32, %c0_33] : memref<25x12x2xf32, #tpu.memory_space<vmem>>, vector<1x12x2xf32>
    %70 = vector.shape_cast %69 : vector<1x12x2xf32> to vector<12x2xf32>
    %71 = vector.extract_strided_slice %0 {offsets = [0, 64], sizes = [2, 960], strides = [1, 1]} : vector<2x1024xf32> to vector<2x960xf32>
    %72 = vector.extract_strided_slice %0 {offsets = [0, 0], sizes = [2, 64], strides = [1, 1]} : vector<2x1024xf32> to vector<2x64xf32>
    %73 = tpu.concatenate %71, %72 in 1 : vector<2x960xf32>, vector<2x64xf32> -> vector<2x1024xf32>
    %cst_34 = arith.constant dense<0.000000e+00> : vector<12x1024xf32>
    %74 = tpu.matmul %70, %73, %cst_34 {dimension_numbers = #tpu.dot_dimension_numbers<[1], [0], [0], [1], [0, 0, 1, 1], [], []>} : vector<12x2xf32>, vector<2x1024xf32>, vector<12x1024xf32> -> vector<12x1024xf32>
    %75 = arith.addf %68, %74 : vector<12x1024xf32>
    %c11 = arith.constant 11 : index
    %c0_35 = arith.constant 0 : index
    %c0_36 = arith.constant 0 : index
    %76 = vector.load %arg1[%c11, %c0_35, %c0_36] : memref<25x12x2xf32, #tpu.memory_space<vmem>>, vector<1x12x2xf32>
    %77 = vector.shape_cast %76 : vector<1x12x2xf32> to vector<12x2xf32>
    %78 = vector.extract_strided_slice %0 {offsets = [0, 65], sizes = [2, 959], strides = [1, 1]} : vector<2x1024xf32> to vector<2x959xf32>
    %79 = vector.extract_strided_slice %0 {offsets = [0, 0], sizes = [2, 65], strides = [1, 1]} : vector<2x1024xf32> to vector<2x65xf32>
    %80 = tpu.concatenate %78, %79 in 1 : vector<2x959xf32>, vector<2x65xf32> -> vector<2x1024xf32>
    %cst_37 = arith.constant dense<0.000000e+00> : vector<12x1024xf32>
    %81 = tpu.matmul %77, %80, %cst_37 {dimension_numbers = #tpu.dot_dimension_numbers<[1], [0], [0], [1], [0, 0, 1, 1], [], []>} : vector<12x2xf32>, vector<2x1024xf32>, vector<12x1024xf32> -> vector<12x1024xf32>
    %82 = arith.addf %75, %81 : vector<12x1024xf32>
    %c12 = arith.constant 12 : index
    %c0_38 = arith.constant 0 : index
    %c0_39 = arith.constant 0 : index
    %83 = vector.load %arg1[%c12, %c0_38, %c0_39] : memref<25x12x2xf32, #tpu.memory_space<vmem>>, vector<1x12x2xf32>
    %84 = vector.shape_cast %83 : vector<1x12x2xf32> to vector<12x2xf32>
    %85 = vector.extract_strided_slice %0 {offsets = [0, 66], sizes = [2, 958], strides = [1, 1]} : vector<2x1024xf32> to vector<2x958xf32>
    %86 = vector.extract_strided_slice %0 {offsets = [0, 0], sizes = [2, 66], strides = [1, 1]} : vector<2x1024xf32> to vector<2x66xf32>
    %87 = tpu.concatenate %85, %86 in 1 : vector<2x958xf32>, vector<2x66xf32> -> vector<2x1024xf32>
    %cst_40 = arith.constant dense<0.000000e+00> : vector<12x1024xf32>
    %88 = tpu.matmul %84, %87, %cst_40 {dimension_numbers = #tpu.dot_dimension_numbers<[1], [0], [0], [1], [0, 0, 1, 1], [], []>} : vector<12x2xf32>, vector<2x1024xf32>, vector<12x1024xf32> -> vector<12x1024xf32>
    %89 = arith.addf %82, %88 : vector<12x1024xf32>
    %c13 = arith.constant 13 : index
    %c0_41 = arith.constant 0 : index
    %c0_42 = arith.constant 0 : index
    %90 = vector.load %arg1[%c13, %c0_41, %c0_42] : memref<25x12x2xf32, #tpu.memory_space<vmem>>, vector<1x12x2xf32>
    %91 = vector.shape_cast %90 : vector<1x12x2xf32> to vector<12x2xf32>
    %92 = vector.extract_strided_slice %0 {offsets = [0, 67], sizes = [2, 957], strides = [1, 1]} : vector<2x1024xf32> to vector<2x957xf32>
    %93 = vector.extract_strided_slice %0 {offsets = [0, 0], sizes = [2, 67], strides = [1, 1]} : vector<2x1024xf32> to vector<2x67xf32>
    %94 = tpu.concatenate %92, %93 in 1 : vector<2x957xf32>, vector<2x67xf32> -> vector<2x1024xf32>
    %cst_43 = arith.constant dense<0.000000e+00> : vector<12x1024xf32>
    %95 = tpu.matmul %91, %94, %cst_43 {dimension_numbers = #tpu.dot_dimension_numbers<[1], [0], [0], [1], [0, 0, 1, 1], [], []>} : vector<12x2xf32>, vector<2x1024xf32>, vector<12x1024xf32> -> vector<12x1024xf32>
    %96 = arith.addf %89, %95 : vector<12x1024xf32>
    %c14 = arith.constant 14 : index
    %c0_44 = arith.constant 0 : index
    %c0_45 = arith.constant 0 : index
    %97 = vector.load %arg1[%c14, %c0_44, %c0_45] : memref<25x12x2xf32, #tpu.memory_space<vmem>>, vector<1x12x2xf32>
    %98 = vector.shape_cast %97 : vector<1x12x2xf32> to vector<12x2xf32>
    %99 = vector.extract_strided_slice %0 {offsets = [0, 68], sizes = [2, 956], strides = [1, 1]} : vector<2x1024xf32> to vector<2x956xf32>
    %100 = vector.extract_strided_slice %0 {offsets = [0, 0], sizes = [2, 68], strides = [1, 1]} : vector<2x1024xf32> to vector<2x68xf32>
    %101 = tpu.concatenate %99, %100 in 1 : vector<2x956xf32>, vector<2x68xf32> -> vector<2x1024xf32>
    %cst_46 = arith.constant dense<0.000000e+00> : vector<12x1024xf32>
    %102 = tpu.matmul %98, %101, %cst_46 {dimension_numbers = #tpu.dot_dimension_numbers<[1], [0], [0], [1], [0, 0, 1, 1], [], []>} : vector<12x2xf32>, vector<2x1024xf32>, vector<12x1024xf32> -> vector<12x1024xf32>
    %103 = arith.addf %96, %102 : vector<12x1024xf32>
    %c15 = arith.constant 15 : index
    %c0_47 = arith.constant 0 : index
    %c0_48 = arith.constant 0 : index
    %104 = vector.load %arg1[%c15, %c0_47, %c0_48] : memref<25x12x2xf32, #tpu.memory_space<vmem>>, vector<1x12x2xf32>
    %105 = vector.shape_cast %104 : vector<1x12x2xf32> to vector<12x2xf32>
    %106 = vector.extract_strided_slice %0 {offsets = [0, 96], sizes = [2, 928], strides = [1, 1]} : vector<2x1024xf32> to vector<2x928xf32>
    %107 = vector.extract_strided_slice %0 {offsets = [0, 0], sizes = [2, 96], strides = [1, 1]} : vector<2x1024xf32> to vector<2x96xf32>
    %108 = tpu.concatenate %106, %107 in 1 : vector<2x928xf32>, vector<2x96xf32> -> vector<2x1024xf32>
    %cst_49 = arith.constant dense<0.000000e+00> : vector<12x1024xf32>
    %109 = tpu.matmul %105, %108, %cst_49 {dimension_numbers = #tpu.dot_dimension_numbers<[1], [0], [0], [1], [0, 0, 1, 1], [], []>} : vector<12x2xf32>, vector<2x1024xf32>, vector<12x1024xf32> -> vector<12x1024xf32>
    %110 = arith.addf %103, %109 : vector<12x1024xf32>
    %c16 = arith.constant 16 : index
    %c0_50 = arith.constant 0 : index
    %c0_51 = arith.constant 0 : index
    %111 = vector.load %arg1[%c16, %c0_50, %c0_51] : memref<25x12x2xf32, #tpu.memory_space<vmem>>, vector<1x12x2xf32>
    %112 = vector.shape_cast %111 : vector<1x12x2xf32> to vector<12x2xf32>
    %113 = vector.extract_strided_slice %0 {offsets = [0, 97], sizes = [2, 927], strides = [1, 1]} : vector<2x1024xf32> to vector<2x927xf32>
    %114 = vector.extract_strided_slice %0 {offsets = [0, 0], sizes = [2, 97], strides = [1, 1]} : vector<2x1024xf32> to vector<2x97xf32>
    %115 = tpu.concatenate %113, %114 in 1 : vector<2x927xf32>, vector<2x97xf32> -> vector<2x1024xf32>
    %cst_52 = arith.constant dense<0.000000e+00> : vector<12x1024xf32>
    %116 = tpu.matmul %112, %115, %cst_52 {dimension_numbers = #tpu.dot_dimension_numbers<[1], [0], [0], [1], [0, 0, 1, 1], [], []>} : vector<12x2xf32>, vector<2x1024xf32>, vector<12x1024xf32> -> vector<12x1024xf32>
    %117 = arith.addf %110, %116 : vector<12x1024xf32>
    %c17 = arith.constant 17 : index
    %c0_53 = arith.constant 0 : index
    %c0_54 = arith.constant 0 : index
    %118 = vector.load %arg1[%c17, %c0_53, %c0_54] : memref<25x12x2xf32, #tpu.memory_space<vmem>>, vector<1x12x2xf32>
    %119 = vector.shape_cast %118 : vector<1x12x2xf32> to vector<12x2xf32>
    %120 = vector.extract_strided_slice %0 {offsets = [0, 98], sizes = [2, 926], strides = [1, 1]} : vector<2x1024xf32> to vector<2x926xf32>
    %121 = vector.extract_strided_slice %0 {offsets = [0, 0], sizes = [2, 98], strides = [1, 1]} : vector<2x1024xf32> to vector<2x98xf32>
    %122 = tpu.concatenate %120, %121 in 1 : vector<2x926xf32>, vector<2x98xf32> -> vector<2x1024xf32>
    %cst_55 = arith.constant dense<0.000000e+00> : vector<12x1024xf32>
    %123 = tpu.matmul %119, %122, %cst_55 {dimension_numbers = #tpu.dot_dimension_numbers<[1], [0], [0], [1], [0, 0, 1, 1], [], []>} : vector<12x2xf32>, vector<2x1024xf32>, vector<12x1024xf32> -> vector<12x1024xf32>
    %124 = arith.addf %117, %123 : vector<12x1024xf32>
    %c18 = arith.constant 18 : index
    %c0_56 = arith.constant 0 : index
    %c0_57 = arith.constant 0 : index
    %125 = vector.load %arg1[%c18, %c0_56, %c0_57] : memref<25x12x2xf32, #tpu.memory_space<vmem>>, vector<1x12x2xf32>
    %126 = vector.shape_cast %125 : vector<1x12x2xf32> to vector<12x2xf32>
    %127 = vector.extract_strided_slice %0 {offsets = [0, 99], sizes = [2, 925], strides = [1, 1]} : vector<2x1024xf32> to vector<2x925xf32>
    %128 = vector.extract_strided_slice %0 {offsets = [0, 0], sizes = [2, 99], strides = [1, 1]} : vector<2x1024xf32> to vector<2x99xf32>
    %129 = tpu.concatenate %127, %128 in 1 : vector<2x925xf32>, vector<2x99xf32> -> vector<2x1024xf32>
    %cst_58 = arith.constant dense<0.000000e+00> : vector<12x1024xf32>
    %130 = tpu.matmul %126, %129, %cst_58 {dimension_numbers = #tpu.dot_dimension_numbers<[1], [0], [0], [1], [0, 0, 1, 1], [], []>} : vector<12x2xf32>, vector<2x1024xf32>, vector<12x1024xf32> -> vector<12x1024xf32>
    %131 = arith.addf %124, %130 : vector<12x1024xf32>
    %c19 = arith.constant 19 : index
    %c0_59 = arith.constant 0 : index
    %c0_60 = arith.constant 0 : index
    %132 = vector.load %arg1[%c19, %c0_59, %c0_60] : memref<25x12x2xf32, #tpu.memory_space<vmem>>, vector<1x12x2xf32>
    %133 = vector.shape_cast %132 : vector<1x12x2xf32> to vector<12x2xf32>
    %134 = vector.extract_strided_slice %0 {offsets = [0, 100], sizes = [2, 924], strides = [1, 1]} : vector<2x1024xf32> to vector<2x924xf32>
    %135 = vector.extract_strided_slice %0 {offsets = [0, 0], sizes = [2, 100], strides = [1, 1]} : vector<2x1024xf32> to vector<2x100xf32>
    %136 = tpu.concatenate %134, %135 in 1 : vector<2x924xf32>, vector<2x100xf32> -> vector<2x1024xf32>
    %cst_61 = arith.constant dense<0.000000e+00> : vector<12x1024xf32>
    %137 = tpu.matmul %133, %136, %cst_61 {dimension_numbers = #tpu.dot_dimension_numbers<[1], [0], [0], [1], [0, 0, 1, 1], [], []>} : vector<12x2xf32>, vector<2x1024xf32>, vector<12x1024xf32> -> vector<12x1024xf32>
    %138 = arith.addf %131, %137 : vector<12x1024xf32>
    %c20 = arith.constant 20 : index
    %c0_62 = arith.constant 0 : index
    %c0_63 = arith.constant 0 : index
    %139 = vector.load %arg1[%c20, %c0_62, %c0_63] : memref<25x12x2xf32, #tpu.memory_space<vmem>>, vector<1x12x2xf32>
    %140 = vector.shape_cast %139 : vector<1x12x2xf32> to vector<12x2xf32>
    %141 = vector.extract_strided_slice %0 {offsets = [0, 128], sizes = [2, 896], strides = [1, 1]} : vector<2x1024xf32> to vector<2x896xf32>
    %142 = vector.extract_strided_slice %0 {offsets = [0, 0], sizes = [2, 128], strides = [1, 1]} : vector<2x1024xf32> to vector<2x128xf32>
    %143 = tpu.concatenate %141, %142 in 1 : vector<2x896xf32>, vector<2x128xf32> -> vector<2x1024xf32>
    %cst_64 = arith.constant dense<0.000000e+00> : vector<12x1024xf32>
    %144 = tpu.matmul %140, %143, %cst_64 {dimension_numbers = #tpu.dot_dimension_numbers<[1], [0], [0], [1], [0, 0, 1, 1], [], []>} : vector<12x2xf32>, vector<2x1024xf32>, vector<12x1024xf32> -> vector<12x1024xf32>
    %145 = arith.addf %138, %144 : vector<12x1024xf32>
    %c21 = arith.constant 21 : index
    %c0_65 = arith.constant 0 : index
    %c0_66 = arith.constant 0 : index
    %146 = vector.load %arg1[%c21, %c0_65, %c0_66] : memref<25x12x2xf32, #tpu.memory_space<vmem>>, vector<1x12x2xf32>
    %147 = vector.shape_cast %146 : vector<1x12x2xf32> to vector<12x2xf32>
    %148 = vector.extract_strided_slice %0 {offsets = [0, 129], sizes = [2, 895], strides = [1, 1]} : vector<2x1024xf32> to vector<2x895xf32>
    %149 = vector.extract_strided_slice %0 {offsets = [0, 0], sizes = [2, 129], strides = [1, 1]} : vector<2x1024xf32> to vector<2x129xf32>
    %150 = tpu.concatenate %148, %149 in 1 : vector<2x895xf32>, vector<2x129xf32> -> vector<2x1024xf32>
    %cst_67 = arith.constant dense<0.000000e+00> : vector<12x1024xf32>
    %151 = tpu.matmul %147, %150, %cst_67 {dimension_numbers = #tpu.dot_dimension_numbers<[1], [0], [0], [1], [0, 0, 1, 1], [], []>} : vector<12x2xf32>, vector<2x1024xf32>, vector<12x1024xf32> -> vector<12x1024xf32>
    %152 = arith.addf %145, %151 : vector<12x1024xf32>
    %c22 = arith.constant 22 : index
    %c0_68 = arith.constant 0 : index
    %c0_69 = arith.constant 0 : index
    %153 = vector.load %arg1[%c22, %c0_68, %c0_69] : memref<25x12x2xf32, #tpu.memory_space<vmem>>, vector<1x12x2xf32>
    %154 = vector.shape_cast %153 : vector<1x12x2xf32> to vector<12x2xf32>
    %155 = vector.extract_strided_slice %0 {offsets = [0, 130], sizes = [2, 894], strides = [1, 1]} : vector<2x1024xf32> to vector<2x894xf32>
    %156 = vector.extract_strided_slice %0 {offsets = [0, 0], sizes = [2, 130], strides = [1, 1]} : vector<2x1024xf32> to vector<2x130xf32>
    %157 = tpu.concatenate %155, %156 in 1 : vector<2x894xf32>, vector<2x130xf32> -> vector<2x1024xf32>
    %cst_70 = arith.constant dense<0.000000e+00> : vector<12x1024xf32>
    %158 = tpu.matmul %154, %157, %cst_70 {dimension_numbers = #tpu.dot_dimension_numbers<[1], [0], [0], [1], [0, 0, 1, 1], [], []>} : vector<12x2xf32>, vector<2x1024xf32>, vector<12x1024xf32> -> vector<12x1024xf32>
    %159 = arith.addf %152, %158 : vector<12x1024xf32>
    %c23 = arith.constant 23 : index
    %c0_71 = arith.constant 0 : index
    %c0_72 = arith.constant 0 : index
    %160 = vector.load %arg1[%c23, %c0_71, %c0_72] : memref<25x12x2xf32, #tpu.memory_space<vmem>>, vector<1x12x2xf32>
    %161 = vector.shape_cast %160 : vector<1x12x2xf32> to vector<12x2xf32>
    %162 = vector.extract_strided_slice %0 {offsets = [0, 131], sizes = [2, 893], strides = [1, 1]} : vector<2x1024xf32> to vector<2x893xf32>
    %163 = vector.extract_strided_slice %0 {offsets = [0, 0], sizes = [2, 131], strides = [1, 1]} : vector<2x1024xf32> to vector<2x131xf32>
    %164 = tpu.concatenate %162, %163 in 1 : vector<2x893xf32>, vector<2x131xf32> -> vector<2x1024xf32>
    %cst_73 = arith.constant dense<0.000000e+00> : vector<12x1024xf32>
    %165 = tpu.matmul %161, %164, %cst_73 {dimension_numbers = #tpu.dot_dimension_numbers<[1], [0], [0], [1], [0, 0, 1, 1], [], []>} : vector<12x2xf32>, vector<2x1024xf32>, vector<12x1024xf32> -> vector<12x1024xf32>
    %166 = arith.addf %159, %165 : vector<12x1024xf32>
    %c24 = arith.constant 24 : index
    %c0_74 = arith.constant 0 : index
    %c0_75 = arith.constant 0 : index
    %167 = vector.load %arg1[%c24, %c0_74, %c0_75] : memref<25x12x2xf32, #tpu.memory_space<vmem>>, vector<1x12x2xf32>
    %168 = vector.shape_cast %167 : vector<1x12x2xf32> to vector<12x2xf32>
    %169 = vector.extract_strided_slice %0 {offsets = [0, 132], sizes = [2, 892], strides = [1, 1]} : vector<2x1024xf32> to vector<2x892xf32>
    %170 = vector.extract_strided_slice %0 {offsets = [0, 0], sizes = [2, 132], strides = [1, 1]} : vector<2x1024xf32> to vector<2x132xf32>
    %171 = tpu.concatenate %169, %170 in 1 : vector<2x892xf32>, vector<2x132xf32> -> vector<2x1024xf32>
    %cst_76 = arith.constant dense<0.000000e+00> : vector<12x1024xf32>
    %172 = tpu.matmul %168, %171, %cst_76 {dimension_numbers = #tpu.dot_dimension_numbers<[1], [0], [0], [1], [0, 0, 1, 1], [], []>} : vector<12x2xf32>, vector<2x1024xf32>, vector<12x1024xf32> -> vector<12x1024xf32>
    %173 = arith.addf %166, %172 : vector<12x1024xf32>
    %c0_77 = arith.constant 0 : index
    %c0_78 = arith.constant 0 : index
    %174 = vector.load %arg2[%c0_77, %c0_78] : memref<12x1xf32, #tpu.memory_space<vmem>>, vector<12x1xf32>
    %175 = vector.broadcast %174 : vector<12x1xf32> to vector<12x1024xf32>
    %176 = arith.mulf %173, %175 : vector<12x1024xf32>
    %c0_79 = arith.constant 0 : index
    %c0_80 = arith.constant 0 : index
    %177 = vector.load %arg3[%c0_79, %c0_80] : memref<12x1xf32, #tpu.memory_space<vmem>>, vector<12x1xf32>
    %178 = vector.broadcast %177 : vector<12x1xf32> to vector<12x1024xf32>
    %179 = arith.addf %176, %178 : vector<12x1024xf32>
    %cst_81 = arith.constant 0.000000e+00 : f32
    %180 = vector.broadcast %cst_81 : f32 to vector<12x1024xf32>
    %181 = arith.maximumf %179, %180 : vector<12x1024xf32>
    %182 = vector.extract_strided_slice %181 {offsets = [0, 1], sizes = [12, 1023], strides = [1, 1]} : vector<12x1024xf32> to vector<12x1023xf32>
    %183 = vector.extract_strided_slice %181 {offsets = [0, 0], sizes = [12, 1], strides = [1, 1]} : vector<12x1024xf32> to vector<12x1xf32>
    %184 = tpu.concatenate %182, %183 in 1 : vector<12x1023xf32>, vector<12x1xf32> -> vector<12x1024xf32>
    %185 = arith.maximumf %181, %184 : vector<12x1024xf32>
    %186 = vector.extract_strided_slice %181 {offsets = [0, 32], sizes = [12, 992], strides = [1, 1]} : vector<12x1024xf32> to vector<12x992xf32>
    %187 = vector.extract_strided_slice %181 {offsets = [0, 0], sizes = [12, 32], strides = [1, 1]} : vector<12x1024xf32> to vector<12x32xf32>
    %188 = tpu.concatenate %186, %187 in 1 : vector<12x992xf32>, vector<12x32xf32> -> vector<12x1024xf32>
    %189 = vector.extract_strided_slice %181 {offsets = [0, 33], sizes = [12, 991], strides = [1, 1]} : vector<12x1024xf32> to vector<12x991xf32>
    %190 = vector.extract_strided_slice %181 {offsets = [0, 0], sizes = [12, 33], strides = [1, 1]} : vector<12x1024xf32> to vector<12x33xf32>
    %191 = tpu.concatenate %189, %190 in 1 : vector<12x991xf32>, vector<12x33xf32> -> vector<12x1024xf32>
    %192 = arith.maximumf %188, %191 : vector<12x1024xf32>
    %193 = arith.maximumf %185, %192 : vector<12x1024xf32>
    %c0_82 = arith.constant 0 : index
    %c0_83 = arith.constant 0 : index
    %194 = vector.load %arg7[%c0_82, %c0_83] : memref<1024x196xf32, #tpu.memory_space<vmem>>, vector<1024x196xf32>
    %cst_84 = arith.constant dense<0.000000e+00> : vector<12x196xf32>
    %195 = tpu.matmul %193, %194, %cst_84 {dimension_numbers = #tpu.dot_dimension_numbers<[1], [0], [0], [1], [0, 0, 1, 1], [], []>} : vector<12x1024xf32>, vector<1024x196xf32>, vector<12x196xf32> -> vector<12x196xf32>
    %cst_85 = arith.constant 0.000000e+00 : f32
    %196 = vector.broadcast %cst_85 : f32 to vector<32x196xf32>
    %c0_86 = arith.constant 0 : index
    %c0_87 = arith.constant 0 : index
    %c0_88 = arith.constant 0 : index
    %197 = vector.load %arg4[%c0_86, %c0_87, %c0_88] : memref<25x32x12xf32, #tpu.memory_space<vmem>>, vector<1x32x12xf32>
    %198 = vector.shape_cast %197 : vector<1x32x12xf32> to vector<32x12xf32>
    %cst_89 = arith.constant dense<0.000000e+00> : vector<32x196xf32>
    %199 = tpu.matmul %198, %195, %cst_89 {dimension_numbers = #tpu.dot_dimension_numbers<[1], [0], [0], [1], [0, 0, 1, 1], [], []>} : vector<32x12xf32>, vector<12x196xf32>, vector<32x196xf32> -> vector<32x196xf32>
    %200 = arith.addf %196, %199 : vector<32x196xf32>
    %c1_90 = arith.constant 1 : index
    %c0_91 = arith.constant 0 : index
    %c0_92 = arith.constant 0 : index
    %201 = vector.load %arg4[%c1_90, %c0_91, %c0_92] : memref<25x32x12xf32, #tpu.memory_space<vmem>>, vector<1x32x12xf32>
    %202 = vector.shape_cast %201 : vector<1x32x12xf32> to vector<32x12xf32>
    %203 = vector.extract_strided_slice %195 {offsets = [0, 1], sizes = [12, 195], strides = [1, 1]} : vector<12x196xf32> to vector<12x195xf32>
    %204 = vector.extract_strided_slice %195 {offsets = [0, 0], sizes = [12, 1], strides = [1, 1]} : vector<12x196xf32> to vector<12x1xf32>
    %205 = tpu.concatenate %203, %204 in 1 : vector<12x195xf32>, vector<12x1xf32> -> vector<12x196xf32>
    %cst_93 = arith.constant dense<0.000000e+00> : vector<32x196xf32>
    %206 = tpu.matmul %202, %205, %cst_93 {dimension_numbers = #tpu.dot_dimension_numbers<[1], [0], [0], [1], [0, 0, 1, 1], [], []>} : vector<32x12xf32>, vector<12x196xf32>, vector<32x196xf32> -> vector<32x196xf32>
    %207 = arith.addf %200, %206 : vector<32x196xf32>
    %c2_94 = arith.constant 2 : index
    %c0_95 = arith.constant 0 : index
    %c0_96 = arith.constant 0 : index
    %208 = vector.load %arg4[%c2_94, %c0_95, %c0_96] : memref<25x32x12xf32, #tpu.memory_space<vmem>>, vector<1x32x12xf32>
    %209 = vector.shape_cast %208 : vector<1x32x12xf32> to vector<32x12xf32>
    %210 = vector.extract_strided_slice %195 {offsets = [0, 2], sizes = [12, 194], strides = [1, 1]} : vector<12x196xf32> to vector<12x194xf32>
    %211 = vector.extract_strided_slice %195 {offsets = [0, 0], sizes = [12, 2], strides = [1, 1]} : vector<12x196xf32> to vector<12x2xf32>
    %212 = tpu.concatenate %210, %211 in 1 : vector<12x194xf32>, vector<12x2xf32> -> vector<12x196xf32>
    %cst_97 = arith.constant dense<0.000000e+00> : vector<32x196xf32>
    %213 = tpu.matmul %209, %212, %cst_97 {dimension_numbers = #tpu.dot_dimension_numbers<[1], [0], [0], [1], [0, 0, 1, 1], [], []>} : vector<32x12xf32>, vector<12x196xf32>, vector<32x196xf32> -> vector<32x196xf32>
    %214 = arith.addf %207, %213 : vector<32x196xf32>
    %c3_98 = arith.constant 3 : index
    %c0_99 = arith.constant 0 : index
    %c0_100 = arith.constant 0 : index
    %215 = vector.load %arg4[%c3_98, %c0_99, %c0_100] : memref<25x32x12xf32, #tpu.memory_space<vmem>>, vector<1x32x12xf32>
    %216 = vector.shape_cast %215 : vector<1x32x12xf32> to vector<32x12xf32>
    %217 = vector.extract_strided_slice %195 {offsets = [0, 3], sizes = [12, 193], strides = [1, 1]} : vector<12x196xf32> to vector<12x193xf32>
    %218 = vector.extract_strided_slice %195 {offsets = [0, 0], sizes = [12, 3], strides = [1, 1]} : vector<12x196xf32> to vector<12x3xf32>
    %219 = tpu.concatenate %217, %218 in 1 : vector<12x193xf32>, vector<12x3xf32> -> vector<12x196xf32>
    %cst_101 = arith.constant dense<0.000000e+00> : vector<32x196xf32>
    %220 = tpu.matmul %216, %219, %cst_101 {dimension_numbers = #tpu.dot_dimension_numbers<[1], [0], [0], [1], [0, 0, 1, 1], [], []>} : vector<32x12xf32>, vector<12x196xf32>, vector<32x196xf32> -> vector<32x196xf32>
    %221 = arith.addf %214, %220 : vector<32x196xf32>
    %c4_102 = arith.constant 4 : index
    %c0_103 = arith.constant 0 : index
    %c0_104 = arith.constant 0 : index
    %222 = vector.load %arg4[%c4_102, %c0_103, %c0_104] : memref<25x32x12xf32, #tpu.memory_space<vmem>>, vector<1x32x12xf32>
    %223 = vector.shape_cast %222 : vector<1x32x12xf32> to vector<32x12xf32>
    %224 = vector.extract_strided_slice %195 {offsets = [0, 4], sizes = [12, 192], strides = [1, 1]} : vector<12x196xf32> to vector<12x192xf32>
    %225 = vector.extract_strided_slice %195 {offsets = [0, 0], sizes = [12, 4], strides = [1, 1]} : vector<12x196xf32> to vector<12x4xf32>
    %226 = tpu.concatenate %224, %225 in 1 : vector<12x192xf32>, vector<12x4xf32> -> vector<12x196xf32>
    %cst_105 = arith.constant dense<0.000000e+00> : vector<32x196xf32>
    %227 = tpu.matmul %223, %226, %cst_105 {dimension_numbers = #tpu.dot_dimension_numbers<[1], [0], [0], [1], [0, 0, 1, 1], [], []>} : vector<32x12xf32>, vector<12x196xf32>, vector<32x196xf32> -> vector<32x196xf32>
    %228 = arith.addf %221, %227 : vector<32x196xf32>
    %c5_106 = arith.constant 5 : index
    %c0_107 = arith.constant 0 : index
    %c0_108 = arith.constant 0 : index
    %229 = vector.load %arg4[%c5_106, %c0_107, %c0_108] : memref<25x32x12xf32, #tpu.memory_space<vmem>>, vector<1x32x12xf32>
    %230 = vector.shape_cast %229 : vector<1x32x12xf32> to vector<32x12xf32>
    %231 = vector.extract_strided_slice %195 {offsets = [0, 14], sizes = [12, 182], strides = [1, 1]} : vector<12x196xf32> to vector<12x182xf32>
    %232 = vector.extract_strided_slice %195 {offsets = [0, 0], sizes = [12, 14], strides = [1, 1]} : vector<12x196xf32> to vector<12x14xf32>
    %233 = tpu.concatenate %231, %232 in 1 : vector<12x182xf32>, vector<12x14xf32> -> vector<12x196xf32>
    %cst_109 = arith.constant dense<0.000000e+00> : vector<32x196xf32>
    %234 = tpu.matmul %230, %233, %cst_109 {dimension_numbers = #tpu.dot_dimension_numbers<[1], [0], [0], [1], [0, 0, 1, 1], [], []>} : vector<32x12xf32>, vector<12x196xf32>, vector<32x196xf32> -> vector<32x196xf32>
    %235 = arith.addf %228, %234 : vector<32x196xf32>
    %c6_110 = arith.constant 6 : index
    %c0_111 = arith.constant 0 : index
    %c0_112 = arith.constant 0 : index
    %236 = vector.load %arg4[%c6_110, %c0_111, %c0_112] : memref<25x32x12xf32, #tpu.memory_space<vmem>>, vector<1x32x12xf32>
    %237 = vector.shape_cast %236 : vector<1x32x12xf32> to vector<32x12xf32>
    %238 = vector.extract_strided_slice %195 {offsets = [0, 15], sizes = [12, 181], strides = [1, 1]} : vector<12x196xf32> to vector<12x181xf32>
    %239 = vector.extract_strided_slice %195 {offsets = [0, 0], sizes = [12, 15], strides = [1, 1]} : vector<12x196xf32> to vector<12x15xf32>
    %240 = tpu.concatenate %238, %239 in 1 : vector<12x181xf32>, vector<12x15xf32> -> vector<12x196xf32>
    %cst_113 = arith.constant dense<0.000000e+00> : vector<32x196xf32>
    %241 = tpu.matmul %237, %240, %cst_113 {dimension_numbers = #tpu.dot_dimension_numbers<[1], [0], [0], [1], [0, 0, 1, 1], [], []>} : vector<32x12xf32>, vector<12x196xf32>, vector<32x196xf32> -> vector<32x196xf32>
    %242 = arith.addf %235, %241 : vector<32x196xf32>
    %c7_114 = arith.constant 7 : index
    %c0_115 = arith.constant 0 : index
    %c0_116 = arith.constant 0 : index
    %243 = vector.load %arg4[%c7_114, %c0_115, %c0_116] : memref<25x32x12xf32, #tpu.memory_space<vmem>>, vector<1x32x12xf32>
    %244 = vector.shape_cast %243 : vector<1x32x12xf32> to vector<32x12xf32>
    %245 = vector.extract_strided_slice %195 {offsets = [0, 16], sizes = [12, 180], strides = [1, 1]} : vector<12x196xf32> to vector<12x180xf32>
    %246 = vector.extract_strided_slice %195 {offsets = [0, 0], sizes = [12, 16], strides = [1, 1]} : vector<12x196xf32> to vector<12x16xf32>
    %247 = tpu.concatenate %245, %246 in 1 : vector<12x180xf32>, vector<12x16xf32> -> vector<12x196xf32>
    %cst_117 = arith.constant dense<0.000000e+00> : vector<32x196xf32>
    %248 = tpu.matmul %244, %247, %cst_117 {dimension_numbers = #tpu.dot_dimension_numbers<[1], [0], [0], [1], [0, 0, 1, 1], [], []>} : vector<32x12xf32>, vector<12x196xf32>, vector<32x196xf32> -> vector<32x196xf32>
    %249 = arith.addf %242, %248 : vector<32x196xf32>
    %c8_118 = arith.constant 8 : index
    %c0_119 = arith.constant 0 : index
    %c0_120 = arith.constant 0 : index
    %250 = vector.load %arg4[%c8_118, %c0_119, %c0_120] : memref<25x32x12xf32, #tpu.memory_space<vmem>>, vector<1x32x12xf32>
    %251 = vector.shape_cast %250 : vector<1x32x12xf32> to vector<32x12xf32>
    %252 = vector.extract_strided_slice %195 {offsets = [0, 17], sizes = [12, 179], strides = [1, 1]} : vector<12x196xf32> to vector<12x179xf32>
    %253 = vector.extract_strided_slice %195 {offsets = [0, 0], sizes = [12, 17], strides = [1, 1]} : vector<12x196xf32> to vector<12x17xf32>
    %254 = tpu.concatenate %252, %253 in 1 : vector<12x179xf32>, vector<12x17xf32> -> vector<12x196xf32>
    %cst_121 = arith.constant dense<0.000000e+00> : vector<32x196xf32>
    %255 = tpu.matmul %251, %254, %cst_121 {dimension_numbers = #tpu.dot_dimension_numbers<[1], [0], [0], [1], [0, 0, 1, 1], [], []>} : vector<32x12xf32>, vector<12x196xf32>, vector<32x196xf32> -> vector<32x196xf32>
    %256 = arith.addf %249, %255 : vector<32x196xf32>
    %c9_122 = arith.constant 9 : index
    %c0_123 = arith.constant 0 : index
    %c0_124 = arith.constant 0 : index
    %257 = vector.load %arg4[%c9_122, %c0_123, %c0_124] : memref<25x32x12xf32, #tpu.memory_space<vmem>>, vector<1x32x12xf32>
    %258 = vector.shape_cast %257 : vector<1x32x12xf32> to vector<32x12xf32>
    %259 = vector.extract_strided_slice %195 {offsets = [0, 18], sizes = [12, 178], strides = [1, 1]} : vector<12x196xf32> to vector<12x178xf32>
    %260 = vector.extract_strided_slice %195 {offsets = [0, 0], sizes = [12, 18], strides = [1, 1]} : vector<12x196xf32> to vector<12x18xf32>
    %261 = tpu.concatenate %259, %260 in 1 : vector<12x178xf32>, vector<12x18xf32> -> vector<12x196xf32>
    %cst_125 = arith.constant dense<0.000000e+00> : vector<32x196xf32>
    %262 = tpu.matmul %258, %261, %cst_125 {dimension_numbers = #tpu.dot_dimension_numbers<[1], [0], [0], [1], [0, 0, 1, 1], [], []>} : vector<32x12xf32>, vector<12x196xf32>, vector<32x196xf32> -> vector<32x196xf32>
    %263 = arith.addf %256, %262 : vector<32x196xf32>
    %c10_126 = arith.constant 10 : index
    %c0_127 = arith.constant 0 : index
    %c0_128 = arith.constant 0 : index
    %264 = vector.load %arg4[%c10_126, %c0_127, %c0_128] : memref<25x32x12xf32, #tpu.memory_space<vmem>>, vector<1x32x12xf32>
    %265 = vector.shape_cast %264 : vector<1x32x12xf32> to vector<32x12xf32>
    %266 = vector.extract_strided_slice %195 {offsets = [0, 28], sizes = [12, 168], strides = [1, 1]} : vector<12x196xf32> to vector<12x168xf32>
    %267 = vector.extract_strided_slice %195 {offsets = [0, 0], sizes = [12, 28], strides = [1, 1]} : vector<12x196xf32> to vector<12x28xf32>
    %268 = tpu.concatenate %266, %267 in 1 : vector<12x168xf32>, vector<12x28xf32> -> vector<12x196xf32>
    %cst_129 = arith.constant dense<0.000000e+00> : vector<32x196xf32>
    %269 = tpu.matmul %265, %268, %cst_129 {dimension_numbers = #tpu.dot_dimension_numbers<[1], [0], [0], [1], [0, 0, 1, 1], [], []>} : vector<32x12xf32>, vector<12x196xf32>, vector<32x196xf32> -> vector<32x196xf32>
    %270 = arith.addf %263, %269 : vector<32x196xf32>
    %c11_130 = arith.constant 11 : index
    %c0_131 = arith.constant 0 : index
    %c0_132 = arith.constant 0 : index
    %271 = vector.load %arg4[%c11_130, %c0_131, %c0_132] : memref<25x32x12xf32, #tpu.memory_space<vmem>>, vector<1x32x12xf32>
    %272 = vector.shape_cast %271 : vector<1x32x12xf32> to vector<32x12xf32>
    %273 = vector.extract_strided_slice %195 {offsets = [0, 29], sizes = [12, 167], strides = [1, 1]} : vector<12x196xf32> to vector<12x167xf32>
    %274 = vector.extract_strided_slice %195 {offsets = [0, 0], sizes = [12, 29], strides = [1, 1]} : vector<12x196xf32> to vector<12x29xf32>
    %275 = tpu.concatenate %273, %274 in 1 : vector<12x167xf32>, vector<12x29xf32> -> vector<12x196xf32>
    %cst_133 = arith.constant dense<0.000000e+00> : vector<32x196xf32>
    %276 = tpu.matmul %272, %275, %cst_133 {dimension_numbers = #tpu.dot_dimension_numbers<[1], [0], [0], [1], [0, 0, 1, 1], [], []>} : vector<32x12xf32>, vector<12x196xf32>, vector<32x196xf32> -> vector<32x196xf32>
    %277 = arith.addf %270, %276 : vector<32x196xf32>
    %c12_134 = arith.constant 12 : index
    %c0_135 = arith.constant 0 : index
    %c0_136 = arith.constant 0 : index
    %278 = vector.load %arg4[%c12_134, %c0_135, %c0_136] : memref<25x32x12xf32, #tpu.memory_space<vmem>>, vector<1x32x12xf32>
    %279 = vector.shape_cast %278 : vector<1x32x12xf32> to vector<32x12xf32>
    %280 = vector.extract_strided_slice %195 {offsets = [0, 30], sizes = [12, 166], strides = [1, 1]} : vector<12x196xf32> to vector<12x166xf32>
    %281 = vector.extract_strided_slice %195 {offsets = [0, 0], sizes = [12, 30], strides = [1, 1]} : vector<12x196xf32> to vector<12x30xf32>
    %282 = tpu.concatenate %280, %281 in 1 : vector<12x166xf32>, vector<12x30xf32> -> vector<12x196xf32>
    %cst_137 = arith.constant dense<0.000000e+00> : vector<32x196xf32>
    %283 = tpu.matmul %279, %282, %cst_137 {dimension_numbers = #tpu.dot_dimension_numbers<[1], [0], [0], [1], [0, 0, 1, 1], [], []>} : vector<32x12xf32>, vector<12x196xf32>, vector<32x196xf32> -> vector<32x196xf32>
    %284 = arith.addf %277, %283 : vector<32x196xf32>
    %c13_138 = arith.constant 13 : index
    %c0_139 = arith.constant 0 : index
    %c0_140 = arith.constant 0 : index
    %285 = vector.load %arg4[%c13_138, %c0_139, %c0_140] : memref<25x32x12xf32, #tpu.memory_space<vmem>>, vector<1x32x12xf32>
    %286 = vector.shape_cast %285 : vector<1x32x12xf32> to vector<32x12xf32>
    %287 = vector.extract_strided_slice %195 {offsets = [0, 31], sizes = [12, 165], strides = [1, 1]} : vector<12x196xf32> to vector<12x165xf32>
    %288 = vector.extract_strided_slice %195 {offsets = [0, 0], sizes = [12, 31], strides = [1, 1]} : vector<12x196xf32> to vector<12x31xf32>
    %289 = tpu.concatenate %287, %288 in 1 : vector<12x165xf32>, vector<12x31xf32> -> vector<12x196xf32>
    %cst_141 = arith.constant dense<0.000000e+00> : vector<32x196xf32>
    %290 = tpu.matmul %286, %289, %cst_141 {dimension_numbers = #tpu.dot_dimension_numbers<[1], [0], [0], [1], [0, 0, 1, 1], [], []>} : vector<32x12xf32>, vector<12x196xf32>, vector<32x196xf32> -> vector<32x196xf32>
    %291 = arith.addf %284, %290 : vector<32x196xf32>
    %c14_142 = arith.constant 14 : index
    %c0_143 = arith.constant 0 : index
    %c0_144 = arith.constant 0 : index
    %292 = vector.load %arg4[%c14_142, %c0_143, %c0_144] : memref<25x32x12xf32, #tpu.memory_space<vmem>>, vector<1x32x12xf32>
    %293 = vector.shape_cast %292 : vector<1x32x12xf32> to vector<32x12xf32>
    %294 = vector.extract_strided_slice %195 {offsets = [0, 32], sizes = [12, 164], strides = [1, 1]} : vector<12x196xf32> to vector<12x164xf32>
    %295 = vector.extract_strided_slice %195 {offsets = [0, 0], sizes = [12, 32], strides = [1, 1]} : vector<12x196xf32> to vector<12x32xf32>
    %296 = tpu.concatenate %294, %295 in 1 : vector<12x164xf32>, vector<12x32xf32> -> vector<12x196xf32>
    %cst_145 = arith.constant dense<0.000000e+00> : vector<32x196xf32>
    %297 = tpu.matmul %293, %296, %cst_145 {dimension_numbers = #tpu.dot_dimension_numbers<[1], [0], [0], [1], [0, 0, 1, 1], [], []>} : vector<32x12xf32>, vector<12x196xf32>, vector<32x196xf32> -> vector<32x196xf32>
    %298 = arith.addf %291, %297 : vector<32x196xf32>
    %c15_146 = arith.constant 15 : index
    %c0_147 = arith.constant 0 : index
    %c0_148 = arith.constant 0 : index
    %299 = vector.load %arg4[%c15_146, %c0_147, %c0_148] : memref<25x32x12xf32, #tpu.memory_space<vmem>>, vector<1x32x12xf32>
    %300 = vector.shape_cast %299 : vector<1x32x12xf32> to vector<32x12xf32>
    %301 = vector.extract_strided_slice %195 {offsets = [0, 42], sizes = [12, 154], strides = [1, 1]} : vector<12x196xf32> to vector<12x154xf32>
    %302 = vector.extract_strided_slice %195 {offsets = [0, 0], sizes = [12, 42], strides = [1, 1]} : vector<12x196xf32> to vector<12x42xf32>
    %303 = tpu.concatenate %301, %302 in 1 : vector<12x154xf32>, vector<12x42xf32> -> vector<12x196xf32>
    %cst_149 = arith.constant dense<0.000000e+00> : vector<32x196xf32>
    %304 = tpu.matmul %300, %303, %cst_149 {dimension_numbers = #tpu.dot_dimension_numbers<[1], [0], [0], [1], [0, 0, 1, 1], [], []>} : vector<32x12xf32>, vector<12x196xf32>, vector<32x196xf32> -> vector<32x196xf32>
    %305 = arith.addf %298, %304 : vector<32x196xf32>
    %c16_150 = arith.constant 16 : index
    %c0_151 = arith.constant 0 : index
    %c0_152 = arith.constant 0 : index
    %306 = vector.load %arg4[%c16_150, %c0_151, %c0_152] : memref<25x32x12xf32, #tpu.memory_space<vmem>>, vector<1x32x12xf32>
    %307 = vector.shape_cast %306 : vector<1x32x12xf32> to vector<32x12xf32>
    %308 = vector.extract_strided_slice %195 {offsets = [0, 43], sizes = [12, 153], strides = [1, 1]} : vector<12x196xf32> to vector<12x153xf32>
    %309 = vector.extract_strided_slice %195 {offsets = [0, 0], sizes = [12, 43], strides = [1, 1]} : vector<12x196xf32> to vector<12x43xf32>
    %310 = tpu.concatenate %308, %309 in 1 : vector<12x153xf32>, vector<12x43xf32> -> vector<12x196xf32>
    %cst_153 = arith.constant dense<0.000000e+00> : vector<32x196xf32>
    %311 = tpu.matmul %307, %310, %cst_153 {dimension_numbers = #tpu.dot_dimension_numbers<[1], [0], [0], [1], [0, 0, 1, 1], [], []>} : vector<32x12xf32>, vector<12x196xf32>, vector<32x196xf32> -> vector<32x196xf32>
    %312 = arith.addf %305, %311 : vector<32x196xf32>
    %c17_154 = arith.constant 17 : index
    %c0_155 = arith.constant 0 : index
    %c0_156 = arith.constant 0 : index
    %313 = vector.load %arg4[%c17_154, %c0_155, %c0_156] : memref<25x32x12xf32, #tpu.memory_space<vmem>>, vector<1x32x12xf32>
    %314 = vector.shape_cast %313 : vector<1x32x12xf32> to vector<32x12xf32>
    %315 = vector.extract_strided_slice %195 {offsets = [0, 44], sizes = [12, 152], strides = [1, 1]} : vector<12x196xf32> to vector<12x152xf32>
    %316 = vector.extract_strided_slice %195 {offsets = [0, 0], sizes = [12, 44], strides = [1, 1]} : vector<12x196xf32> to vector<12x44xf32>
    %317 = tpu.concatenate %315, %316 in 1 : vector<12x152xf32>, vector<12x44xf32> -> vector<12x196xf32>
    %cst_157 = arith.constant dense<0.000000e+00> : vector<32x196xf32>
    %318 = tpu.matmul %314, %317, %cst_157 {dimension_numbers = #tpu.dot_dimension_numbers<[1], [0], [0], [1], [0, 0, 1, 1], [], []>} : vector<32x12xf32>, vector<12x196xf32>, vector<32x196xf32> -> vector<32x196xf32>
    %319 = arith.addf %312, %318 : vector<32x196xf32>
    %c18_158 = arith.constant 18 : index
    %c0_159 = arith.constant 0 : index
    %c0_160 = arith.constant 0 : index
    %320 = vector.load %arg4[%c18_158, %c0_159, %c0_160] : memref<25x32x12xf32, #tpu.memory_space<vmem>>, vector<1x32x12xf32>
    %321 = vector.shape_cast %320 : vector<1x32x12xf32> to vector<32x12xf32>
    %322 = vector.extract_strided_slice %195 {offsets = [0, 45], sizes = [12, 151], strides = [1, 1]} : vector<12x196xf32> to vector<12x151xf32>
    %323 = vector.extract_strided_slice %195 {offsets = [0, 0], sizes = [12, 45], strides = [1, 1]} : vector<12x196xf32> to vector<12x45xf32>
    %324 = tpu.concatenate %322, %323 in 1 : vector<12x151xf32>, vector<12x45xf32> -> vector<12x196xf32>
    %cst_161 = arith.constant dense<0.000000e+00> : vector<32x196xf32>
    %325 = tpu.matmul %321, %324, %cst_161 {dimension_numbers = #tpu.dot_dimension_numbers<[1], [0], [0], [1], [0, 0, 1, 1], [], []>} : vector<32x12xf32>, vector<12x196xf32>, vector<32x196xf32> -> vector<32x196xf32>
    %326 = arith.addf %319, %325 : vector<32x196xf32>
    %c19_162 = arith.constant 19 : index
    %c0_163 = arith.constant 0 : index
    %c0_164 = arith.constant 0 : index
    %327 = vector.load %arg4[%c19_162, %c0_163, %c0_164] : memref<25x32x12xf32, #tpu.memory_space<vmem>>, vector<1x32x12xf32>
    %328 = vector.shape_cast %327 : vector<1x32x12xf32> to vector<32x12xf32>
    %329 = vector.extract_strided_slice %195 {offsets = [0, 46], sizes = [12, 150], strides = [1, 1]} : vector<12x196xf32> to vector<12x150xf32>
    %330 = vector.extract_strided_slice %195 {offsets = [0, 0], sizes = [12, 46], strides = [1, 1]} : vector<12x196xf32> to vector<12x46xf32>
    %331 = tpu.concatenate %329, %330 in 1 : vector<12x150xf32>, vector<12x46xf32> -> vector<12x196xf32>
    %cst_165 = arith.constant dense<0.000000e+00> : vector<32x196xf32>
    %332 = tpu.matmul %328, %331, %cst_165 {dimension_numbers = #tpu.dot_dimension_numbers<[1], [0], [0], [1], [0, 0, 1, 1], [], []>} : vector<32x12xf32>, vector<12x196xf32>, vector<32x196xf32> -> vector<32x196xf32>
    %333 = arith.addf %326, %332 : vector<32x196xf32>
    %c20_166 = arith.constant 20 : index
    %c0_167 = arith.constant 0 : index
    %c0_168 = arith.constant 0 : index
    %334 = vector.load %arg4[%c20_166, %c0_167, %c0_168] : memref<25x32x12xf32, #tpu.memory_space<vmem>>, vector<1x32x12xf32>
    %335 = vector.shape_cast %334 : vector<1x32x12xf32> to vector<32x12xf32>
    %336 = vector.extract_strided_slice %195 {offsets = [0, 56], sizes = [12, 140], strides = [1, 1]} : vector<12x196xf32> to vector<12x140xf32>
    %337 = vector.extract_strided_slice %195 {offsets = [0, 0], sizes = [12, 56], strides = [1, 1]} : vector<12x196xf32> to vector<12x56xf32>
    %338 = tpu.concatenate %336, %337 in 1 : vector<12x140xf32>, vector<12x56xf32> -> vector<12x196xf32>
    %cst_169 = arith.constant dense<0.000000e+00> : vector<32x196xf32>
    %339 = tpu.matmul %335, %338, %cst_169 {dimension_numbers = #tpu.dot_dimension_numbers<[1], [0], [0], [1], [0, 0, 1, 1], [], []>} : vector<32x12xf32>, vector<12x196xf32>, vector<32x196xf32> -> vector<32x196xf32>
    %340 = arith.addf %333, %339 : vector<32x196xf32>
    %c21_170 = arith.constant 21 : index
    %c0_171 = arith.constant 0 : index
    %c0_172 = arith.constant 0 : index
    %341 = vector.load %arg4[%c21_170, %c0_171, %c0_172] : memref<25x32x12xf32, #tpu.memory_space<vmem>>, vector<1x32x12xf32>
    %342 = vector.shape_cast %341 : vector<1x32x12xf32> to vector<32x12xf32>
    %343 = vector.extract_strided_slice %195 {offsets = [0, 57], sizes = [12, 139], strides = [1, 1]} : vector<12x196xf32> to vector<12x139xf32>
    %344 = vector.extract_strided_slice %195 {offsets = [0, 0], sizes = [12, 57], strides = [1, 1]} : vector<12x196xf32> to vector<12x57xf32>
    %345 = tpu.concatenate %343, %344 in 1 : vector<12x139xf32>, vector<12x57xf32> -> vector<12x196xf32>
    %cst_173 = arith.constant dense<0.000000e+00> : vector<32x196xf32>
    %346 = tpu.matmul %342, %345, %cst_173 {dimension_numbers = #tpu.dot_dimension_numbers<[1], [0], [0], [1], [0, 0, 1, 1], [], []>} : vector<32x12xf32>, vector<12x196xf32>, vector<32x196xf32> -> vector<32x196xf32>
    %347 = arith.addf %340, %346 : vector<32x196xf32>
    %c22_174 = arith.constant 22 : index
    %c0_175 = arith.constant 0 : index
    %c0_176 = arith.constant 0 : index
    %348 = vector.load %arg4[%c22_174, %c0_175, %c0_176] : memref<25x32x12xf32, #tpu.memory_space<vmem>>, vector<1x32x12xf32>
    %349 = vector.shape_cast %348 : vector<1x32x12xf32> to vector<32x12xf32>
    %350 = vector.extract_strided_slice %195 {offsets = [0, 58], sizes = [12, 138], strides = [1, 1]} : vector<12x196xf32> to vector<12x138xf32>
    %351 = vector.extract_strided_slice %195 {offsets = [0, 0], sizes = [12, 58], strides = [1, 1]} : vector<12x196xf32> to vector<12x58xf32>
    %352 = tpu.concatenate %350, %351 in 1 : vector<12x138xf32>, vector<12x58xf32> -> vector<12x196xf32>
    %cst_177 = arith.constant dense<0.000000e+00> : vector<32x196xf32>
    %353 = tpu.matmul %349, %352, %cst_177 {dimension_numbers = #tpu.dot_dimension_numbers<[1], [0], [0], [1], [0, 0, 1, 1], [], []>} : vector<32x12xf32>, vector<12x196xf32>, vector<32x196xf32> -> vector<32x196xf32>
    %354 = arith.addf %347, %353 : vector<32x196xf32>
    %c23_178 = arith.constant 23 : index
    %c0_179 = arith.constant 0 : index
    %c0_180 = arith.constant 0 : index
    %355 = vector.load %arg4[%c23_178, %c0_179, %c0_180] : memref<25x32x12xf32, #tpu.memory_space<vmem>>, vector<1x32x12xf32>
    %356 = vector.shape_cast %355 : vector<1x32x12xf32> to vector<32x12xf32>
    %357 = vector.extract_strided_slice %195 {offsets = [0, 59], sizes = [12, 137], strides = [1, 1]} : vector<12x196xf32> to vector<12x137xf32>
    %358 = vector.extract_strided_slice %195 {offsets = [0, 0], sizes = [12, 59], strides = [1, 1]} : vector<12x196xf32> to vector<12x59xf32>
    %359 = tpu.concatenate %357, %358 in 1 : vector<12x137xf32>, vector<12x59xf32> -> vector<12x196xf32>
    %cst_181 = arith.constant dense<0.000000e+00> : vector<32x196xf32>
    %360 = tpu.matmul %356, %359, %cst_181 {dimension_numbers = #tpu.dot_dimension_numbers<[1], [0], [0], [1], [0, 0, 1, 1], [], []>} : vector<32x12xf32>, vector<12x196xf32>, vector<32x196xf32> -> vector<32x196xf32>
    %361 = arith.addf %354, %360 : vector<32x196xf32>
    %c24_182 = arith.constant 24 : index
    %c0_183 = arith.constant 0 : index
    %c0_184 = arith.constant 0 : index
    %362 = vector.load %arg4[%c24_182, %c0_183, %c0_184] : memref<25x32x12xf32, #tpu.memory_space<vmem>>, vector<1x32x12xf32>
    %363 = vector.shape_cast %362 : vector<1x32x12xf32> to vector<32x12xf32>
    %364 = vector.extract_strided_slice %195 {offsets = [0, 60], sizes = [12, 136], strides = [1, 1]} : vector<12x196xf32> to vector<12x136xf32>
    %365 = vector.extract_strided_slice %195 {offsets = [0, 0], sizes = [12, 60], strides = [1, 1]} : vector<12x196xf32> to vector<12x60xf32>
    %366 = tpu.concatenate %364, %365 in 1 : vector<12x136xf32>, vector<12x60xf32> -> vector<12x196xf32>
    %cst_185 = arith.constant dense<0.000000e+00> : vector<32x196xf32>
    %367 = tpu.matmul %363, %366, %cst_185 {dimension_numbers = #tpu.dot_dimension_numbers<[1], [0], [0], [1], [0, 0, 1, 1], [], []>} : vector<32x12xf32>, vector<12x196xf32>, vector<32x196xf32> -> vector<32x196xf32>
    %368 = arith.addf %361, %367 : vector<32x196xf32>
    %c0_186 = arith.constant 0 : index
    %c0_187 = arith.constant 0 : index
    %369 = vector.load %arg5[%c0_186, %c0_187] : memref<32x1xf32, #tpu.memory_space<vmem>>, vector<32x1xf32>
    %370 = vector.broadcast %369 : vector<32x1xf32> to vector<32x196xf32>
    %371 = arith.mulf %368, %370 : vector<32x196xf32>
    %c0_188 = arith.constant 0 : index
    %c0_189 = arith.constant 0 : index
    %372 = vector.load %arg6[%c0_188, %c0_189] : memref<32x1xf32, #tpu.memory_space<vmem>>, vector<32x1xf32>
    %373 = vector.broadcast %372 : vector<32x1xf32> to vector<32x196xf32>
    %374 = arith.addf %371, %373 : vector<32x196xf32>
    %cst_190 = arith.constant 0.000000e+00 : f32
    %375 = vector.broadcast %cst_190 : f32 to vector<32x196xf32>
    %376 = arith.maximumf %374, %375 : vector<32x196xf32>
    %377 = vector.extract_strided_slice %376 {offsets = [0, 1], sizes = [32, 195], strides = [1, 1]} : vector<32x196xf32> to vector<32x195xf32>
    %378 = vector.extract_strided_slice %376 {offsets = [0, 0], sizes = [32, 1], strides = [1, 1]} : vector<32x196xf32> to vector<32x1xf32>
    %379 = tpu.concatenate %377, %378 in 1 : vector<32x195xf32>, vector<32x1xf32> -> vector<32x196xf32>
    %380 = arith.maximumf %376, %379 : vector<32x196xf32>
    %381 = vector.extract_strided_slice %376 {offsets = [0, 14], sizes = [32, 182], strides = [1, 1]} : vector<32x196xf32> to vector<32x182xf32>
    %382 = vector.extract_strided_slice %376 {offsets = [0, 0], sizes = [32, 14], strides = [1, 1]} : vector<32x196xf32> to vector<32x14xf32>
    %383 = tpu.concatenate %381, %382 in 1 : vector<32x182xf32>, vector<32x14xf32> -> vector<32x196xf32>
    %384 = vector.extract_strided_slice %376 {offsets = [0, 15], sizes = [32, 181], strides = [1, 1]} : vector<32x196xf32> to vector<32x181xf32>
    %385 = vector.extract_strided_slice %376 {offsets = [0, 0], sizes = [32, 15], strides = [1, 1]} : vector<32x196xf32> to vector<32x15xf32>
    %386 = tpu.concatenate %384, %385 in 1 : vector<32x181xf32>, vector<32x15xf32> -> vector<32x196xf32>
    %387 = arith.maximumf %383, %386 : vector<32x196xf32>
    %388 = arith.maximumf %380, %387 : vector<32x196xf32>
    %c0_191 = arith.constant 0 : index
    %c0_192 = arith.constant 0 : index
    %389 = vector.load %arg8[%c0_191, %c0_192] : memref<196x25xf32, #tpu.memory_space<vmem>>, vector<196x25xf32>
    %cst_193 = arith.constant dense<0.000000e+00> : vector<32x25xf32>
    %390 = tpu.matmul %388, %389, %cst_193 {dimension_numbers = #tpu.dot_dimension_numbers<[1], [0], [0], [1], [0, 0, 1, 1], [], []>} : vector<32x196xf32>, vector<196x25xf32>, vector<32x25xf32> -> vector<32x25xf32>
    %391 = vector.extract_strided_slice %390 {offsets = [0, 0], sizes = [2, 25], strides = [1, 1]} : vector<32x25xf32> to vector<2x25xf32>
    %392 = vector.extract_strided_slice %390 {offsets = [2, 0], sizes = [2, 25], strides = [1, 1]} : vector<32x25xf32> to vector<2x25xf32>
    %393 = vector.extract_strided_slice %390 {offsets = [4, 0], sizes = [2, 25], strides = [1, 1]} : vector<32x25xf32> to vector<2x25xf32>
    %394 = vector.extract_strided_slice %390 {offsets = [6, 0], sizes = [2, 25], strides = [1, 1]} : vector<32x25xf32> to vector<2x25xf32>
    %395 = vector.extract_strided_slice %390 {offsets = [8, 0], sizes = [2, 25], strides = [1, 1]} : vector<32x25xf32> to vector<2x25xf32>
    %396 = vector.extract_strided_slice %390 {offsets = [10, 0], sizes = [2, 25], strides = [1, 1]} : vector<32x25xf32> to vector<2x25xf32>
    %397 = vector.extract_strided_slice %390 {offsets = [12, 0], sizes = [2, 25], strides = [1, 1]} : vector<32x25xf32> to vector<2x25xf32>
    %398 = vector.extract_strided_slice %390 {offsets = [14, 0], sizes = [2, 25], strides = [1, 1]} : vector<32x25xf32> to vector<2x25xf32>
    %399 = vector.extract_strided_slice %390 {offsets = [16, 0], sizes = [2, 25], strides = [1, 1]} : vector<32x25xf32> to vector<2x25xf32>
    %400 = vector.extract_strided_slice %390 {offsets = [18, 0], sizes = [2, 25], strides = [1, 1]} : vector<32x25xf32> to vector<2x25xf32>
    %401 = vector.extract_strided_slice %390 {offsets = [20, 0], sizes = [2, 25], strides = [1, 1]} : vector<32x25xf32> to vector<2x25xf32>
    %402 = vector.extract_strided_slice %390 {offsets = [22, 0], sizes = [2, 25], strides = [1, 1]} : vector<32x25xf32> to vector<2x25xf32>
    %403 = vector.extract_strided_slice %390 {offsets = [24, 0], sizes = [2, 25], strides = [1, 1]} : vector<32x25xf32> to vector<2x25xf32>
    %404 = vector.extract_strided_slice %390 {offsets = [26, 0], sizes = [2, 25], strides = [1, 1]} : vector<32x25xf32> to vector<2x25xf32>
    %405 = vector.extract_strided_slice %390 {offsets = [28, 0], sizes = [2, 25], strides = [1, 1]} : vector<32x25xf32> to vector<2x25xf32>
    %406 = vector.extract_strided_slice %390 {offsets = [30, 0], sizes = [2, 25], strides = [1, 1]} : vector<32x25xf32> to vector<2x25xf32>
    %407 = tpu.concatenate %391, %392, %393, %394, %395, %396, %397, %398, %399, %400, %401, %402, %403, %404, %405, %406 in 1 : vector<2x25xf32>, vector<2x25xf32>, vector<2x25xf32>, vector<2x25xf32>, vector<2x25xf32>, vector<2x25xf32>, vector<2x25xf32>, vector<2x25xf32>, vector<2x25xf32>, vector<2x25xf32>, vector<2x25xf32>, vector<2x25xf32>, vector<2x25xf32>, vector<2x25xf32>, vector<2x25xf32>, vector<2x25xf32> -> vector<2x400xf32>
    %c0_194 = arith.constant 0 : index
    %c0_195 = arith.constant 0 : index
    %408 = vector.load %arg9[%c0_194, %c0_195] : memref<400x120xf32, #tpu.memory_space<vmem>>, vector<400x120xf32>
    %cst_196 = arith.constant dense<0.000000e+00> : vector<2x120xf32>
    %409 = tpu.matmul %407, %408, %cst_196 {dimension_numbers = #tpu.dot_dimension_numbers<[1], [0], [0], [1], [0, 0, 1, 1], [], []>} : vector<2x400xf32>, vector<400x120xf32>, vector<2x120xf32> -> vector<2x120xf32>
    %c0_197 = arith.constant 0 : index
    %c0_198 = arith.constant 0 : index
    %410 = vector.load %arg10[%c0_197, %c0_198] : memref<1x120xf32, #tpu.memory_space<vmem>>, vector<1x120xf32>
    %411 = vector.broadcast %410 : vector<1x120xf32> to vector<2x120xf32>
    %412 = arith.addf %409, %411 : vector<2x120xf32>
    %cst_199 = arith.constant 0.000000e+00 : f32
    %413 = vector.broadcast %cst_199 : f32 to vector<2x120xf32>
    %414 = arith.maximumf %412, %413 : vector<2x120xf32>
    %c0_200 = arith.constant 0 : index
    %c0_201 = arith.constant 0 : index
    %415 = vector.load %arg11[%c0_200, %c0_201] : memref<120x84xf32, #tpu.memory_space<vmem>>, vector<120x84xf32>
    %cst_202 = arith.constant dense<0.000000e+00> : vector<2x84xf32>
    %416 = tpu.matmul %414, %415, %cst_202 {dimension_numbers = #tpu.dot_dimension_numbers<[1], [0], [0], [1], [0, 0, 1, 1], [], []>} : vector<2x120xf32>, vector<120x84xf32>, vector<2x84xf32> -> vector<2x84xf32>
    %c0_203 = arith.constant 0 : index
    %c0_204 = arith.constant 0 : index
    %417 = vector.load %arg12[%c0_203, %c0_204] : memref<1x84xf32, #tpu.memory_space<vmem>>, vector<1x84xf32>
    %418 = vector.broadcast %417 : vector<1x84xf32> to vector<2x84xf32>
    %419 = arith.addf %416, %418 : vector<2x84xf32>
    %cst_205 = arith.constant 0.000000e+00 : f32
    %420 = vector.broadcast %cst_205 : f32 to vector<2x84xf32>
    %421 = arith.maximumf %419, %420 : vector<2x84xf32>
    %c0_206 = arith.constant 0 : index
    %c0_207 = arith.constant 0 : index
    %422 = vector.load %arg13[%c0_206, %c0_207] : memref<84x10xf32, #tpu.memory_space<vmem>>, vector<84x10xf32>
    %cst_208 = arith.constant dense<0.000000e+00> : vector<2x10xf32>
    %423 = tpu.matmul %421, %422, %cst_208 {dimension_numbers = #tpu.dot_dimension_numbers<[1], [0], [0], [1], [0, 0, 1, 1], [], []>} : vector<2x84xf32>, vector<84x10xf32>, vector<2x10xf32> -> vector<2x10xf32>
    %c0_209 = arith.constant 0 : index
    %c0_210 = arith.constant 0 : index
    %424 = vector.load %arg14[%c0_209, %c0_210] : memref<1x10xf32, #tpu.memory_space<vmem>>, vector<1x10xf32>
    %425 = vector.broadcast %424 : vector<1x10xf32> to vector<2x10xf32>
    %426 = arith.addf %423, %425 : vector<2x10xf32>
    %c0_211 = arith.constant 0 : index
    %c0_212 = arith.constant 0 : index
    %427 = vector.load %arg15[%c0_211, %c0_212] : memref<2x10xf32, #tpu.memory_space<vmem>>, vector<2x10xf32>
    tpu.vector_store %arg15[%c0_211, %c0_212], %426 {strides = array<i32>} : memref<2x10xf32, #tpu.memory_space<vmem>>, vector<2x10xf32>,
    return
  }
}

</mosaic_0001>

<bundles_post_ra>
// kernel: lenet5_forward.1
= control target key start
LH: loop header
LB: loop body
LE: loop exit
PB: predicated region body
PF: predicated region fallthrough
CT: control target
= control target key end

     0   :  { %s19068_s0 = inlined_call_operand.vmem [shape: f32[2,1024], index: 0, kind: input, shape index: {}]   ;;  %s19069_s1 = inlined_call_operand.vmem [shape: f32[25,12,2], index: 1, kind: input, shape index: {}]   ;;  %s19070_s2 = inlined_call_operand.vmem [shape: f32[12,1], index: 2, kind: input, shape index: {}]   ;;  %s19071_s3 = inlined_call_operand.vmem [shape: f32[12,1], index: 3, kind: input, shape index: {}]   ;;  %s19072_s4 = inlined_call_operand.vmem [shape: f32[25,32,12], index: 4, kind: input, shape index: {}]   ;;  %s19073_s5 = inlined_call_operand.vmem [shape: f32[32,1], index: 5, kind: input, shape index: {}]   ;;  %s19074_s6 = inlined_call_operand.vmem [shape: f32[32,1], index: 6, kind: input, shape index: {}]   ;;  %s19075_s7 = inlined_call_operand.vmem [shape: f32[1024,196], index: 7, kind: input, shape index: {}]   ;;  %s19076_s8 = inlined_call_operand.vmem [shape: f32[196,25], index: 8, kind: input, shape index: {}]   ;;  %s19077_s9 = inlined_call_operand.vmem [shape: f32[400,120], index: 9, kind: input, shape index: {}]   ;;  %s19078_s10 = inlined_call_operand.vmem [shape: f32[1,120], index: 10, kind: input, shape index: {}]   ;;  %s19079_s11 = inlined_call_operand.vmem [shape: f32[120,84], index: 11, kind: input, shape index: {}]   ;;  %s19080_s12 = inlined_call_operand.vmem [shape: f32[1,84], index: 12, kind: input, shape index: {}]   ;;  %s19081_s13 = inlined_call_operand.vmem [shape: f32[84,10], index: 13, kind: input, shape index: {}]   ;;  %s19082_s14 = inlined_call_operand.vmem [shape: f32[1,10], index: 14, kind: input, shape index: {}]   ;;  %s19083_s15 = inlined_call_operand.hbm [shape: f32[2,10], index: 15, kind: output, shape index: {}]  }
   0x1   :  { %v12530_v0 = vld [vmem:[%s19068_s0 + $0x8] sm:$0xff]  ;;  %v12535_v1 = vld [vmem:[%s19068_s0] sm:$0xff] }
   0x2   :  { %62 = vst [vmem:[#allocation1 + $0x20] ss:$4 sm:$0xff] %v12530_v0 }
   0x3   :  { %60 = vst [vmem:[#allocation1] ss:$4 sm:$0xff] %v12535_v1 }
   0x4   :  { %20 = vsyncpa [#allocation3], 0  ;;  %s12378_s22 = smov 127   ;;  %s12379_s0 = smov 126   ;;  %vm87_vm0 = vcmask 1039360   ;;  %vm109_vm1 = vcmask 1041408  }
   0x5   :  { %s12380_s23 = smov 125   ;;  %s12381_s24 = smov 124   ;;  %v12605_v46 = vld [vmem:[%s19069_s1 + $0x10] sm:$0xff]  ;;  %vm102_vm2 = vcmask 15360   ;;  %v12622_v52 = vld [vmem:[%s19069_s1 + $0x18] sm:$0xf] }
   0x6   :  { %s12382_s27 = smov 96   ;;  %v12631_v55 = vld [vmem:[%s19069_s1] sm:$0xff]  ;;  %s12383_s19 = smov 95   ;;  %vm558_vm3 = vcmask 1031168   ;;  %vm19104_vm4 = vcmask 1022976   ;;  %vm1094_vm5 = vcmask 1014784  }
   0x7   :  { %s19100_s28 = smov 94   ;;  %s12385_s18 = smov 93   ;;  %vm1362_vm6 = vcmask 785408   ;;  %vm1630_vm7 = vcmask 777216   ;;  %vm1898_vm8 = vcmask 769024   ;;  %vm2166_vm9 = vcmask 760832  }
   0x8   :  { %s12386_s29 = smov 92   ;;  %s12387_s20 = smov 64   ;;  %vm2434_vm10 = vcmask 752640   ;;  %vm2702_vm11 = vcmask 523264   ;;  %vm2970_vm12 = vcmask 515072   ;;  %vm3238_vm13 = vcmask 506880  }
   0x9   :  { %v67_v2 = vld.sshfl [vmem:[#allocation1 + $0x20] sm:$0xff pattern:$0x73625140]  ;;  %v68_v7 = vld.sshfl [vmem:[#allocation1 + $0x28] sm:$0xff pattern:$0x73625140] }
   0xa   :  { %79 = vrot.lane.b32.xlu2 %v67_v2, %s12378_s22  ;;  %v65_v3 = vld.sshfl [vmem:[#allocation1 + $0x10] sm:$0xff pattern:$0x73625140]  ;;  %v63_v4 = vld.sshfl [vmem:[#allocation1] sm:$0xff pattern:$0x73625140] }
   0xb   :  { %75 = vrot.lane.b32.xlu1 %v65_v3, %s12378_s22  ;;  %71 = vrot.lane.b32.xlu0 %v63_v4, %s12378_s22  ;;  %v66_v5 = vld.sshfl [vmem:[#allocation1 + $0x18] sm:$0xff pattern:$0x73625140]  ;;  %v64_v6 = vld.sshfl [vmem:[#allocation1 + $0x8] sm:$0xff pattern:$0x73625140] }
   0xc   :  { %96 = vst [vmem:[#allocation1] ss:$4 sm:$0xff] %v12535_v1  ;;  %v70_v8 = vld.sshfl [vmem:[#allocation1 + $0x38] sm:$0xff pattern:$0x73625140]  ;;  %s12388_s30 = smov 63  }
   0xd   :  { %v69_v9 = vld.sshfl [vmem:[#allocation1 + $0x30] sm:$0xff pattern:$0x73625140]  ;;  %s12389_s25 = smov 62   ;;  %s12390_s17 = smov 61   ;;  %vm3506_vm14 = vcmask 498688  }
   0xe   :  { %313 = vst [vmem:[#allocation1 + $0x20] ss:$4 sm:$0xff] %v12530_v0  ;;  %s12392_s21 = smov 32   ;;  %s12393_s16 = smov 31   ;;  %vm3774_vm15 = vcmask 490496  }
   0xf   :  { %s12394_s26 = smov 30  }
  0x12   :  { %81 = vrot.lane.b32.xlu2 %v68_v7, %s12378_s22 }
  0x13   :  { %77 = vrot.lane.b32.xlu1 %v66_v5, %s12378_s22  ;;  %73 = vrot.lane.b32.xlu0 %v64_v6, %s12378_s22  ;;  %v97_v10 = vld.sshfl [vmem:[#allocation1] sm:$0xff pattern:$0x73625140]  ;;  %v12649_v6 = vld [vmem:[%s19069_s1 + $0x8] sm:$0xf] }
  0x14   :  { %311 = vst [vmem:[#allocation1] ss:$4 sm:$0xff] %v12535_v1 }
  0x15   :  { %v12548_v11 = vld.sshfl [vmem:[#allocation1 + $0x20] sm:$0xff pattern:$0x73625140]  ;;  %v12550_v12 = vld.sshfl [vmem:[#allocation1 + $0x28] sm:$0xff pattern:$0x73625140] }
  0x16   :  { %v12552_v13 = vld.sshfl [vmem:[#allocation1 + $0x30] sm:$0xff pattern:$0x73625140]  ;;  %v12554_v14 = vld.sshfl [vmem:[#allocation1 + $0x38] sm:$0xff pattern:$0x73625140] }
  0x17   :  { %533 = vst [vmem:[#allocation1 + $0x20] ss:$4 sm:$0xff] %v12530_v0 }
  0x1a   :  { %98 = vrot.lane.b32.xlu2 %v97_v10, %s12378_s22 }
  0x1b   :  { %85 = vrot.lane.b32.xlu1 %v70_v8, %s12378_s22  ;;  %83 = vrot.lane.b32.xlu0 %v69_v9, %s12378_s22  ;;  %v12560_v15 = vld.sshfl [vmem:[#allocation1] sm:$0xff pattern:$0x73625140]  ;;  %v12562_v16 = vld.sshfl [vmem:[#allocation1 + $0x8] sm:$0xff pattern:$0x73625140] }
  0x1c   :  { %v12564_v17 = vld.sshfl [vmem:[#allocation1 + $0x10] sm:$0xff pattern:$0x73625140]  ;;  %v12566_v18 = vld.sshfl [vmem:[#allocation1 + $0x18] sm:$0xff pattern:$0x73625140] }
  0x1d   :  { %531 = vst [vmem:[#allocation1] ss:$4 sm:$0xff] %v12535_v1 }
  0x1e   :  { %v538_v19 = vld.sshfl [vmem:[#allocation1 + $0x20] sm:$0xff pattern:$0x73625140]  ;;  %v541_v20 = vld.sshfl [vmem:[#allocation1 + $0x38] sm:$0xff pattern:$0x73625140] }
  0x1f   :  { %v540_v21 = vld.sshfl [vmem:[#allocation1 + $0x30] sm:$0xff pattern:$0x73625140]  ;;  %v539_v22 = vld.sshfl [vmem:[#allocation1 + $0x28] sm:$0xff pattern:$0x73625140] }
  0x20   :  { %801 = vst [vmem:[#allocation1 + $0x20] ss:$4 sm:$0xff] %v12530_v0 }
  0x24   :  { %v535_v23 = vld.sshfl [vmem:[#allocation1 + $0x8] sm:$0xff pattern:$0x73625140]  ;;  %v534_v24 = vld.sshfl [vmem:[#allocation1] sm:$0xff pattern:$0x73625140] }
  0x25   :  { %544 = vrot.lane.b32.xlu1 %v535_v23, %s12379_s0  ;;  %542 = vrot.lane.b32.xlu0 %v534_v24, %s12379_s0  ;;  %v537_v25 = vld.sshfl [vmem:[#allocation1 + $0x18] sm:$0xff pattern:$0x73625140]  ;;  %v536_v26 = vld.sshfl [vmem:[#allocation1 + $0x10] sm:$0xff pattern:$0x73625140] }
  0x26   :  { %546 = vrot.lane.b32.xlu2 %v536_v26, %s12379_s0  ;;  %567 = vst [vmem:[#allocation1] ss:$4 sm:$0xff] %v12535_v1 }
  0x27   :  { %v806_v32 = vld.sshfl [vmem:[#allocation1 + $0x20] sm:$0xff pattern:$0x73625140]  ;;  %v809_v34 = vld.sshfl [vmem:[#allocation1 + $0x38] sm:$0xff pattern:$0x73625140] }
  0x28   :  { %v808_v35 = vld.sshfl [vmem:[#allocation1 + $0x30] sm:$0xff pattern:$0x73625140]  ;;  %v807_v36 = vld.sshfl [vmem:[#allocation1 + $0x28] sm:$0xff pattern:$0x73625140] }
  0x29   :  { %1069 = vst [vmem:[#allocation1 + $0x20] ss:$4 sm:$0xff] %v12530_v0 }
  0x2d   :  { %550 = vrot.lane.b32.xlu1 %v538_v19, %s12379_s0  ;;  %548 = vrot.lane.b32.xlu0 %v537_v25, %s12379_s0  ;;  %v568_v27 = vld.sshfl [vmem:[#allocation1] sm:$0xff pattern:$0x73625140] }
  0x2e   :  { %799 = vst [vmem:[#allocation1] ss:$4 sm:$0xff] %v12535_v1  ;;  %552 = vrot.lane.b32.xlu2 %v539_v22, %s12379_s0 }
  0x30   :  { %v1074_v39 = vld.sshfl [vmem:[#allocation1 + $0x20] sm:$0xff pattern:$0x73625140]  ;;  %v1077_v42 = vld.sshfl [vmem:[#allocation1 + $0x38] sm:$0xff pattern:$0x73625140] }
  0x31   :  { %v1076_v43 = vld.sshfl [vmem:[#allocation1 + $0x30] sm:$0xff pattern:$0x73625140]  ;;  %v1075_v51 = vld.sshfl [vmem:[#allocation1 + $0x28] sm:$0xff pattern:$0x73625140] }
  0x32   :  { %1337 = vst [vmem:[#allocation1 + $0x20] ss:$4 sm:$0xff] %v12530_v0 }
  0x35   :  { %556 = vrot.lane.b32.xlu1 %v541_v20, %s12379_s0  ;;  %554 = vrot.lane.b32.xlu0 %v540_v21, %s12379_s0  ;;  %v805_v28 = vld.sshfl [vmem:[#allocation1 + $0x18] sm:$0xff pattern:$0x73625140]  ;;  %v803_v29 = vld.sshfl [vmem:[#allocation1 + $0x8] sm:$0xff pattern:$0x73625140] }
  0x36   :  { %569 = vrot.lane.b32.xlu2 %v568_v27, %s12379_s0  ;;  %v802_v30 = vld.sshfl [vmem:[#allocation1] sm:$0xff pattern:$0x73625140]  ;;  %v804_v31 = vld.sshfl [vmem:[#allocation1 + $0x10] sm:$0xff pattern:$0x73625140] }
  0x37   :  { %835 = vst [vmem:[#allocation1] ss:$4 sm:$0xff] %v12535_v1 }
  0x39   :  { %v1342_v53 = vld.sshfl [vmem:[#allocation1 + $0x20] sm:$0xff pattern:$0x73625140]  ;;  %v1345_v59 = vld.sshfl [vmem:[#allocation1 + $0x38] sm:$0xff pattern:$0x73625140] }
  0x3a   :  { %v1344_v60 = vld.sshfl [vmem:[#allocation1 + $0x30] sm:$0xff pattern:$0x73625140]  ;;  %v1343_v22 = vld.sshfl [vmem:[#allocation1 + $0x28] sm:$0xff pattern:$0x73625140] }
  0x3b   :  { %1605 = vst [vmem:[#allocation1 + $0x20] ss:$4 sm:$0xff] %v12530_v0 }
  0x3d   :  { %812 = vrot.lane.b32.xlu1 %v803_v29, %s12380_s23  ;;  %810 = vrot.lane.b32.xlu0 %v802_v30, %s12380_s23 }
  0x3e   :  { %814 = vrot.lane.b32.xlu2 %v804_v31, %s12380_s23  ;;  %v836_v33 = vld.sshfl [vmem:[#allocation1] sm:$0xff pattern:$0x73625140] }
  0x3f   :  { %1067 = vst [vmem:[#allocation1] ss:$4 sm:$0xff] %v12535_v1 }
  0x42   :  { %v1613_v31 = vld.sshfl [vmem:[#allocation1 + $0x38] sm:$0xff pattern:$0x73625140] }
  0x45   :  { %818 = vrot.lane.b32.xlu1 %v806_v32, %s12380_s23  ;;  %816 = vrot.lane.b32.xlu0 %v805_v28, %s12380_s23  ;;  %v12710_v28 = vld [vmem:[%s19069_s1 + $0x20] sm:$0xff]  ;;  %v1612_v32 = vld.sshfl [vmem:[#allocation1 + $0x30] sm:$0xff pattern:$0x73625140] }
  0x46   :  { %820 = vrot.lane.b32.xlu2 %v807_v36, %s12380_s23  ;;  %v1071_v37 = vld.sshfl [vmem:[#allocation1 + $0x8] sm:$0xff pattern:$0x73625140]  ;;  %v1070_v38 = vld.sshfl [vmem:[#allocation1] sm:$0xff pattern:$0x73625140] }
  0x47   :  { %v1073_v40 = vld.sshfl [vmem:[#allocation1 + $0x18] sm:$0xff pattern:$0x73625140]  ;;  %v1072_v41 = vld.sshfl [vmem:[#allocation1 + $0x10] sm:$0xff pattern:$0x73625140] }
  0x48   :  { %1103 = vst [vmem:[#allocation1] ss:$4 sm:$0xff] %v12535_v1 }
  0x4d   :  { %824 = vrot.lane.b32.xlu1 %v809_v34, %s12380_s23  ;;  %822 = vrot.lane.b32.xlu0 %v808_v35, %s12380_s23  ;;  %v12734_v34 = vld [vmem:[%s19069_s1 + $0x28] sm:$0xf] }
  0x4e   :  { %837 = vrot.lane.b32.xlu2 %v836_v33, %s12380_s23 }
  0x4f   :  { %v1104_v45 = vld.sshfl [vmem:[#allocation1] sm:$0xff pattern:$0x73625140] }
  0x50   :  { %1335 = vst [vmem:[#allocation1] ss:$4 sm:$0xff] %v12535_v1 }
  0x55   :  { %1080 = vrot.lane.b32.xlu1 %v1071_v37, %s12381_s24  ;;  %1078 = vrot.lane.b32.xlu0 %v1070_v38, %s12381_s24 }
  0x56   :  { %1082 = vrot.lane.b32.xlu2 %v1072_v41, %s12381_s24 }
  0x57   :  { %v1339_v48 = vld.sshfl [vmem:[#allocation1 + $0x8] sm:$0xff pattern:$0x73625140]  ;;  %v1338_v49 = vld.sshfl [vmem:[#allocation1] sm:$0xff pattern:$0x73625140] }
  0x58   :  { %v1341_v54 = vld.sshfl [vmem:[#allocation1 + $0x18] sm:$0xff pattern:$0x73625140]  ;;  %v1340_v56 = vld.sshfl [vmem:[#allocation1 + $0x10] sm:$0xff pattern:$0x73625140] }
  0x59   :  { %1371 = vst [vmem:[#allocation1] ss:$4 sm:$0xff] %v12535_v1 }
  0x5d   :  { %1086 = vrot.lane.b32.xlu1 %v1074_v39, %s12381_s24  ;;  %1084 = vrot.lane.b32.xlu0 %v1073_v40, %s12381_s24 }
  0x5e   :  { %1088 = vrot.lane.b32.xlu2 %v1075_v51, %s12381_s24 }
  0x60   :  { %v1372_v62 = vld.sshfl [vmem:[#allocation1] sm:$0xff pattern:$0x73625140] }
  0x61   :  { %1603 = vst [vmem:[#allocation1] ss:$4 sm:$0xff] %v12535_v1 }
  0x64   :  { %v80_v44 = vpop.permute.xlu2 %79 }
  0x65   :  { %1092 = vrot.lane.b32.xlu1 %v1077_v42, %s12381_s24  ;;  %1090 = vrot.lane.b32.xlu0 %v1076_v43, %s12381_s24 }
  0x66   :  { %1105 = vrot.lane.b32.xlu2 %v1104_v45, %s12381_s24  ;;  %v1611_v45 = vld.sshfl [vmem:[#allocation1 + $0x28] sm:$0xff pattern:$0x73625140] }
  0x68   :  { %v1607_v9 = vld.sshfl [vmem:[#allocation1 + $0x8] sm:$0xff pattern:$0x73625140]  ;;  %v1606_v10 = vld.sshfl [vmem:[#allocation1] sm:$0xff pattern:$0x73625140] }
  0x69   :  { %v1608_v26 = vld.sshfl [vmem:[#allocation1 + $0x10] sm:$0xff pattern:$0x73625140] }
  0x6c   :  { %v82_v47 = vpop.permute.xlu2 %81 }
  0x6d   :  { %v92_v50 = vsel %vm87_vm0, %v80_v44, %v82_v47  ;;  %1348 = vrot.lane.b32.xlu1 %v1339_v48, %s12382_s27  ;;  %1346 = vrot.lane.b32.xlu0 %v1338_v49, %s12382_s27 }
  0x6e   :  { %11017 = vmatpush.msk.msra.mxu0 %vm109_vm1, %v92_v50  ;;  %1350 = vrot.lane.b32.xlu2 %v1340_v56, %s12382_s27  ;;  %v12797_v56 = vld [vmem:[%s19069_s1 + $0x30] sm:$0xff] }
  0x6f   :  { %11018 = vmatmul.msk.f32.vlgmr.msra.gmra.mxu0 %vm102_vm2, %v12605_v46 }
  0x70   :  { %11029 = vmatpush.msk.msrb.mxu0 %vm109_vm1, %v12560_v15 }
  0x72   :  { %11041 = vmatpush.msk.msra.mxu0 %vm109_vm1, %v12548_v11 }
  0x74   :  { %v99_v61 = vpop.permute.xlu2 %98 }
  0x75   :  { %1354 = vrot.lane.b32.xlu1 %v1342_v53, %s12382_s27  ;;  %1352 = vrot.lane.b32.xlu0 %v1341_v54, %s12382_s27 }
  0x76   :  { %1356 = vrot.lane.b32.xlu2 %v1343_v22, %s12382_s27 }
  0x77   :  { %11019 = vmatmul.msk.f32.gmra.mxu0 %vm102_vm2, %v12622_v52 }
  0x7d   :  { %v76_v57 = vpop.permute.xlu1 %75  ;;  %v72_v58 = vpop.permute.xlu0 %71  ;;  %1360 = vrot.lane.b32.xlu1 %v1345_v59, %s12382_s27  ;;  %1358 = vrot.lane.b32.xlu0 %v1344_v60, %s12382_s27 }
  0x7e   :  { %1373 = vrot.lane.b32.xlu2 %v1372_v62, %s12382_s27 }
  0x7f   :  { %11030 = vmatmul.msk.f32.vlgmr.msrb.gmra.mxu0 %vm102_vm2, %v12631_v55 }
  0x80   :  { %v12663_v8 = vpop.permute.xlu2 %546 }
  0x85   :  { %v78_v63 = vpop.permute.xlu1 %77  ;;  %v74_v2 = vpop.permute.xlu0 %73  ;;  %1616 = vrot.lane.b32.xlu1 %v1607_v9, %s12383_s19  ;;  %1614 = vrot.lane.b32.xlu0 %v1606_v10, %s12383_s19 }
  0x86   :  { %v88_v3 = vsel %vm87_vm0, %v72_v58, %v74_v2  ;;  %v91_v4 = vsel %vm87_vm0, %v78_v63, %v80_v44  ;;  %v89_v5 = vsel %vm87_vm0, %v74_v2, %v76_v57  ;;  %v90_v7 = vsel %vm87_vm0, %v76_v57, %v78_v63  ;;  %1618 = vrot.lane.b32.xlu2 %v1608_v26, %s12383_s19  ;;  %v12823_v63 = vld [vmem:[%s19069_s1 + $0x38] sm:$0xf]  ;;  %v12892_v26 = vld [vmem:[%s19069_s1 + $0x40] sm:$0xff] }
  0x87   :  { %11005 = vmatpush.msk.msra.mxu1 %vm109_vm1, %v88_v3  ;;  %12006 = vmatpush.msk.msra.mxu2 %vm109_vm1, %v88_v3 }
  0x88   :  { %11014 = vmatpush.msk.msra.mxu3 %vm109_vm1, %v91_v4  ;;  %11006 = vmatmul.msk.f32.vlgmr.msra.gmra.mxu1 %vm102_vm2, %v12605_v46  ;;  %v12689_v23 = vpop.permute.xlu2 %552 }
  0x89   :  { %11007 = vmatmul.msk.f32.vlgmr.msra.gmra.mxu2 %vm102_vm2, %v12622_v52  ;;  %11008 = vmatpush.msk.msrb.mxu1 %vm109_vm1, %v89_v5 }
  0x8a   :  { %11015 = vmatmul.msk.f32.vlgmr.msra.gmra.mxu3 %vm102_vm2, %v12605_v46  ;;  %11031 = vmatmul.msk.f32.gmra.mxu0 %vm102_vm2, %v12649_v6 }
  0x8b   :  { %11011 = vmatpush.msk.msrb.mxu2 %vm109_vm1, %v90_v7 }
  0x8d   :  { %v86_v11 = vpop.permute.xlu1 %85  ;;  %v84_v15 = vpop.permute.xlu0 %83 }
  0x8e   :  { %v93_v19 = vsel %vm87_vm0, %v82_v47, %v84_v15  ;;  %v94_v20 = vsel %vm87_vm0, %v84_v15, %v86_v11  ;;  %v101_v21 = vsel %vm87_vm0, %v86_v11, %v99_v61  ;;  %1624 = vrot.lane.b32.xlu2 %v1611_v45, %s12383_s19 }
  0x8f   :  { %11026 = vmatpush.msk.msrb.mxu3 %vm109_vm1, %v101_v21  ;;  %11020 = vmatpush.msk.msra.mxu1 %vm109_vm1, %v93_v19 }
  0x90   :  { %11009 = vmatmul.msk.f32.vlgmr.msrb.gmra.mxu1 %vm102_vm2, %v12605_v46  ;;  %11023 = vmatpush.msk.msra.mxu2 %vm109_vm1, %v94_v20  ;;  %v570_v27 = vpop.permute.xlu2 %569 }
  0x91   :  { %11012 = vmatmul.msk.f32.vlgmr.msrb.gmra.mxu2 %vm102_vm2, %v12605_v46  ;;  %11038 = vmatpush.msk.msra.mxu3 %vm109_vm1, %v12566_v18 }
  0x92   :  { %11016 = vmatmul.msk.f32.gmra.mxu3 %vm102_vm2, %v12622_v52  ;;  %11042 = vmatmul.msk.f32.vlgmr.msra.gmra.mxu0 %vm102_vm2, %v12631_v55 }
  0x93   :  { %11032 = vmatpush.msk.msrb.mxu1 %vm109_vm1, %v12562_v16  ;;  %11035 = vmatpush.msk.msrb.mxu2 %vm109_vm1, %v12564_v17  ;;  %v1610_v16 = vld.sshfl [vmem:[#allocation1 + $0x20] sm:$0xff pattern:$0x73625140]  ;;  %v1609_v17 = vld.sshfl [vmem:[#allocation1 + $0x18] sm:$0xff pattern:$0x73625140] }
  0x94   :  { %1622 = vrot.lane.b32.xlu1 %v1610_v16, %s12383_s19  ;;  %1620 = vrot.lane.b32.xlu0 %v1609_v17, %s12383_s19  ;;  %1639 = vst [vmem:[#allocation1] ss:$4 sm:$0xff] %v12535_v1 }
  0x95   :  { %1873 = vst [vmem:[#allocation1 + $0x20] ss:$4 sm:$0xff] %v12530_v0 }
  0x97   :  { %v545_v18 = vpop.permute.xlu1 %544  ;;  %v543_v24 = vpop.permute.xlu0 %542 }
  0x98   :  { %11010 = vmatmul.msk.f32.gmra.mxu1 %vm102_vm2, %v12622_v52  ;;  %v559_v25 = vsel %vm558_vm3, %v543_v24, %v545_v18  ;;  %v560_v41 = vsel %vm558_vm3, %v545_v18, %v12663_v8 }
  0x99   :  { %11013 = vmatmul.msk.f32.gmra.mxu2 %vm102_vm2, %v12622_v52  ;;  %11055 = vmatpush.msk.msrb.mxu0 %vm109_vm1, %v559_v25 }
  0x9a   :  { %11027 = vmatmul.msk.f32.vlgmr.msrb.gmra.mxu3 %vm102_vm2, %v12605_v46  ;;  %11043 = vmatmul.msk.f32.gmra.mxu0 %vm102_vm2, %v12649_v6 }
  0x9b   :  { %11050 = vmatpush.msk.msrb.mxu3 %vm109_vm1, %v12554_v14  ;;  %v1640_v33 = vld.sshfl [vmem:[#allocation1] sm:$0xff pattern:$0x73625140] }
  0x9c   :  { %1628 = vrot.lane.b32.xlu1 %v1613_v31, %s12383_s19  ;;  %1626 = vrot.lane.b32.xlu0 %v1612_v32, %s12383_s19  ;;  %1871 = vst [vmem:[#allocation1] ss:$4 sm:$0xff] %v12535_v1  ;;  %v1878_v50 = vld.sshfl [vmem:[#allocation1 + $0x20] sm:$0xff pattern:$0x73625140] }
  0x9d   :  { %1641 = vrot.lane.b32.xlu2 %v1640_v33, %s12383_s19  ;;  %v1881_v60 = vld.sshfl [vmem:[#allocation1 + $0x38] sm:$0xff pattern:$0x73625140]  ;;  %v1880_v61 = vld.sshfl [vmem:[#allocation1 + $0x30] sm:$0xff pattern:$0x73625140] }
  0x9e   :  { %v1879_v20 = vld.sshfl [vmem:[#allocation1 + $0x28] sm:$0xff pattern:$0x73625140] }
  0x9f   :  { %v551_v29 = vpop.permute.xlu1 %550  ;;  %v549_v30 = vpop.permute.xlu0 %548  ;;  %2141 = vst [vmem:[#allocation1 + $0x20] ss:$4 sm:$0xff] %v12530_v0 }
  0xa0   :  { %11021 = vmatmul.msk.f32.vlgmr.msra.gmra.mxu1 %vm102_vm2, %v12605_v46  ;;  %v563_v14 = vsel %vm558_vm3, %v551_v29, %v12689_v23  ;;  %v561_v42 = vsel %vm558_vm3, %v12663_v8, %v549_v30 }
  0xa1   :  { %11024 = vmatmul.msk.f32.vlgmr.msra.gmra.mxu2 %vm102_vm2, %v12605_v46  ;;  %11067 = vmatpush.msk.msra.mxu0 %vm109_vm1, %v563_v14 }
  0xa2   :  { %11028 = vmatmul.msk.f32.gmra.mxu3 %vm102_vm2, %v12622_v52  ;;  %11056 = vmatmul.msk.f32.vlgmr.msrb.gmra.mxu0 %vm102_vm2, %v12710_v28 }
  0xa3   :  { %11044 = vmatpush.msk.msra.mxu1 %vm109_vm1, %v12550_v12  ;;  %11047 = vmatpush.msk.msra.mxu2 %vm109_vm1, %v12552_v13  ;;  %v562_v12 = vsel %vm558_vm3, %v549_v30, %v551_v29  ;;  %v12739_v13 = vpop.permute.xlu2 %814  ;;  %v1875_v37 = vld.sshfl [vmem:[#allocation1 + $0x8] sm:$0xff pattern:$0x73625140]  ;;  %v1874_v38 = vld.sshfl [vmem:[#allocation1] sm:$0xff pattern:$0x73625140] }
  0xa4   :  { %1884 = vrot.lane.b32.xlu1 %v1875_v37, %s19100_s28  ;;  %1882 = vrot.lane.b32.xlu0 %v1874_v38, %s19100_s28  ;;  %v1877_v51 = vld.sshfl [vmem:[#allocation1 + $0x18] sm:$0xff pattern:$0x73625140]  ;;  %v1876_v53 = vld.sshfl [vmem:[#allocation1 + $0x10] sm:$0xff pattern:$0x73625140] }
  0xa5   :  { %1907 = vst [vmem:[#allocation1] ss:$4 sm:$0xff] %v12535_v1  ;;  %1886 = vrot.lane.b32.xlu2 %v1876_v53, %s19100_s28 }
  0xa6   :  { %v2146_v18 = vld.sshfl [vmem:[#allocation1 + $0x20] sm:$0xff pattern:$0x73625140]  ;;  %v2149_v31 = vld.sshfl [vmem:[#allocation1 + $0x38] sm:$0xff pattern:$0x73625140] }
  0xa7   :  { %v557_v35 = vpop.permute.xlu1 %556  ;;  %v555_v36 = vpop.permute.xlu0 %554  ;;  %v2148_v32 = vld.sshfl [vmem:[#allocation1 + $0x30] sm:$0xff pattern:$0x73625140] }
  0xa8   :  { %11022 = vmatmul.msk.f32.gmra.mxu1 %vm102_vm2, %v12622_v52  ;;  %v572_v48 = vsel %vm558_vm3, %v557_v35, %v570_v27  ;;  %v564_v54 = vsel %vm558_vm3, %v12689_v23, %v555_v36  ;;  %v565_v59 = vsel %vm558_vm3, %v555_v36, %v557_v35  ;;  %v12921_v35 = vld [vmem:[%s19069_s1 + $0x48] sm:$0xf] }
  0xa9   :  { %11025 = vmatmul.msk.f32.gmra.mxu2 %vm102_vm2, %v12622_v52 }
  0xaa   :  { %11039 = vmatmul.msk.f32.vlgmr.msra.gmra.mxu3 %vm102_vm2, %v12631_v55  ;;  %11057 = vmatmul.msk.f32.gmra.mxu0 %vm102_vm2, %v12734_v34 }
  0xab   :  { %11064 = vmatpush.msk.msra.mxu3 %vm109_vm1, %v562_v12  ;;  %v12767_v44 = vpop.permute.xlu2 %820 }
  0xac   :  { %1890 = vrot.lane.b32.xlu1 %v1878_v50, %s19100_s28  ;;  %1888 = vrot.lane.b32.xlu0 %v1877_v51, %s19100_s28 }
  0xad   :  { %1892 = vrot.lane.b32.xlu2 %v1879_v20, %s19100_s28 }
  0xaf   :  { %v12750_v39 = vpop.permute.xlu1 %812  ;;  %v811_v40 = vpop.permute.xlu0 %810 }
  0xb0   :  { %11033 = vmatmul.msk.f32.vlgmr.msrb.gmra.mxu1 %vm102_vm2, %v12631_v55  ;;  %v827_v43 = vsel %vm19104_vm4, %v811_v40, %v12750_v39 }
  0xb1   :  { %11036 = vmatmul.msk.f32.vlgmr.msrb.gmra.mxu2 %vm102_vm2, %v12631_v55  ;;  %11081 = vmatpush.msk.msrb.mxu0 %vm109_vm1, %v827_v43 }
  0xb2   :  { %11040 = vmatmul.msk.f32.gmra.mxu3 %vm102_vm2, %v12649_v6  ;;  %11068 = vmatmul.msk.f32.vlgmr.msra.gmra.mxu0 %vm102_vm2, %v12710_v28 }
  0xb3   :  { %11058 = vmatpush.msk.msrb.mxu1 %vm109_vm1, %v560_v41  ;;  %11061 = vmatpush.msk.msrb.mxu2 %vm109_vm1, %v561_v42  ;;  %v12785_v52 = vpop.permute.xlu2 %837 }
  0xb4   :  { %1896 = vrot.lane.b32.xlu1 %v1881_v60, %s19100_s28  ;;  %1894 = vrot.lane.b32.xlu0 %v1880_v61, %s19100_s28 }
  0xb7   :  { %v819_v46 = vpop.permute.xlu1 %818  ;;  %v817_v47 = vpop.permute.xlu0 %816 }
  0xb8   :  { %11034 = vmatmul.msk.f32.gmra.mxu1 %vm102_vm2, %v12649_v6  ;;  %v831_v49 = vsel %vm19104_vm4, %v819_v46, %v12767_v44  ;;  %v830_v4 = vsel %vm19104_vm4, %v817_v47, %v819_v46  ;;  %v829_v15 = vsel %vm19104_vm4, %v12739_v13, %v817_v47 }
  0xb9   :  { %11037 = vmatmul.msk.f32.gmra.mxu2 %vm102_vm2, %v12649_v6  ;;  %11093 = vmatpush.msk.msra.mxu0 %vm109_vm1, %v831_v49 }
  0xba   :  { %11051 = vmatmul.msk.f32.vlgmr.msrb.gmra.mxu3 %vm102_vm2, %v12631_v55  ;;  %11069 = vmatmul.msk.f32.gmra.mxu0 %vm102_vm2, %v12734_v34 }
  0xbb   :  { %11076 = vmatpush.msk.msrb.mxu3 %vm109_vm1, %v572_v48  ;;  %v12815_v62 = vpop.permute.xlu2 %1082 }
  0xbf   :  { %v12799_v57 = vpop.permute.xlu1 %824  ;;  %v12801_v58 = vpop.permute.xlu0 %822 }
  0xc0   :  { %11045 = vmatmul.msk.f32.vlgmr.msra.gmra.mxu1 %vm102_vm2, %v12631_v55  ;;  %v840_v23 = vsel %vm19104_vm4, %v12799_v57, %v12785_v52  ;;  %v832_v17 = vsel %vm19104_vm4, %v12767_v44, %v12801_v58  ;;  %v833_v30 = vsel %vm19104_vm4, %v12801_v58, %v12799_v57  ;;  %v2147_v44 = vld.sshfl [vmem:[#allocation1 + $0x28] sm:$0xff pattern:$0x73625140] }
  0xc1   :  { %11048 = vmatmul.msk.f32.vlgmr.msra.gmra.mxu2 %vm102_vm2, %v12631_v55  ;;  %11070 = vmatpush.msk.msra.mxu1 %vm109_vm1, %v564_v54  ;;  %v1908_v55 = vld.sshfl [vmem:[#allocation1] sm:$0xff pattern:$0x73625140]  ;;  %2409 = vst [vmem:[#allocation1 + $0x20] ss:$4 sm:$0xff] %v12530_v0  ;;  %v12994_v54 = vld [vmem:[%s19069_s1 + $0x50] sm:$0xff] }
  0xc2   :  { %11052 = vmatmul.msk.f32.gmra.mxu3 %vm102_vm2, %v12649_v6  ;;  %11082 = vmatmul.msk.f32.vlgmr.msrb.gmra.mxu0 %vm102_vm2, %v12797_v56  ;;  %2139 = vst [vmem:[#allocation1] ss:$4 sm:$0xff] %v12535_v1 }
  0xc3   :  { %11073 = vmatpush.msk.msra.mxu2 %vm109_vm1, %v565_v59  ;;  %v12842_v9 = vpop.permute.xlu2 %1088  ;;  %1909 = vrot.lane.b32.xlu2 %v1908_v55, %s19100_s28  ;;  %s12438_s28 = smov 9  }
  0xc7   :  { %v12825_v2 = vpop.permute.xlu1 %1080  ;;  %v1079_v3 = vpop.permute.xlu0 %1078 }
  0xc8   :  { %11046 = vmatmul.msk.f32.gmra.mxu1 %vm102_vm2, %v12649_v6  ;;  %v1095_v5 = vsel %vm1094_vm5, %v1079_v3, %v12825_v2  ;;  %v2414_v48 = vld.sshfl [vmem:[#allocation1 + $0x20] sm:$0xff pattern:$0x73625140]  ;;  %v2417_v61 = vld.sshfl [vmem:[#allocation1 + $0x38] sm:$0xff pattern:$0x73625140] }
  0xc9   :  { %11049 = vmatmul.msk.f32.gmra.mxu2 %vm102_vm2, %v12649_v6  ;;  %11107 = vmatpush.msk.msrb.mxu0 %vm109_vm1, %v1095_v5  ;;  %v2143_v7 = vld.sshfl [vmem:[#allocation1 + $0x8] sm:$0xff pattern:$0x73625140]  ;;  %v2142_v8 = vld.sshfl [vmem:[#allocation1] sm:$0xff pattern:$0x73625140]  ;;  %v828_v6 = vsel %vm19104_vm4, %v12750_v39, %v12739_v13 }
  0xca   :  { %11065 = vmatmul.msk.f32.vlgmr.msra.gmra.mxu3 %vm102_vm2, %v12710_v28  ;;  %11083 = vmatmul.msk.f32.gmra.mxu0 %vm102_vm2, %v12823_v63  ;;  %v2145_v24 = vld.sshfl [vmem:[#allocation1 + $0x18] sm:$0xff pattern:$0x73625140]  ;;  %v2144_v16 = vld.sshfl [vmem:[#allocation1 + $0x10] sm:$0xff pattern:$0x73625140] }
  0xcb   :  { %11090 = vmatpush.msk.msra.mxu3 %vm109_vm1, %v830_v4  ;;  %2152 = vrot.lane.b32.xlu1 %v2143_v7, %s12385_s18  ;;  %v1106_v25 = vpop.permute.xlu2 %1105  ;;  %2175 = vst [vmem:[#allocation1] ss:$4 sm:$0xff] %v12535_v1  ;;  %v13025_v4 = vld [vmem:[%s19069_s1 + $0x58] sm:$0xf] }
  0xcc   :  { %2150 = vrot.lane.b32.xlu0 %v2142_v8, %s12385_s18  ;;  %2154 = vrot.lane.b32.xlu2 %v2144_v16, %s12385_s18 }
  0xcf   :  { %v1087_v10 = vpop.permute.xlu1 %1086  ;;  %v12847_v11 = vpop.permute.xlu0 %1084 }
  0xd0   :  { %11059 = vmatmul.msk.f32.vlgmr.msrb.gmra.mxu1 %vm102_vm2, %v12710_v28  ;;  %v1099_v19 = vsel %vm1094_vm5, %v1087_v10, %v12842_v9  ;;  %v1098_v36 = vsel %vm1094_vm5, %v12847_v11, %v1087_v10  ;;  %v1097_v41 = vsel %vm1094_vm5, %v12815_v62, %v12847_v11 }
  0xd1   :  { %11062 = vmatmul.msk.f32.vlgmr.msrb.gmra.mxu2 %vm102_vm2, %v12710_v28  ;;  %11084 = vmatpush.msk.msrb.mxu1 %vm109_vm1, %v828_v6 }
  0xd2   :  { %11066 = vmatmul.msk.f32.gmra.mxu3 %vm102_vm2, %v12734_v34  ;;  %11094 = vmatmul.msk.f32.vlgmr.msra.gmra.mxu0 %vm102_vm2, %v12797_v56  ;;  %v2176_v33 = vld.sshfl [vmem:[#allocation1] sm:$0xff pattern:$0x73625140] }
  0xd3   :  { %11087 = vmatpush.msk.msrb.mxu2 %vm109_vm1, %v829_v15  ;;  %11119 = vmatpush.msk.msra.mxu0 %vm109_vm1, %v1099_v19  ;;  %2407 = vst [vmem:[#allocation1] ss:$4 sm:$0xff] %v12535_v1 }
  0xd4   :  { %2158 = vrot.lane.b32.xlu1 %v2146_v18, %s12385_s18  ;;  %2156 = vrot.lane.b32.xlu0 %v2145_v24, %s12385_s18  ;;  %v2415_v24 = vld.sshfl [vmem:[#allocation1 + $0x28] sm:$0xff pattern:$0x73625140] }
  0xd5   :  { %2160 = vrot.lane.b32.xlu2 %v2147_v44, %s12385_s18 }
  0xd7   :  { %v12866_v21 = vpop.permute.xlu1 %1092  ;;  %v12868_v22 = vpop.permute.xlu0 %1090 }
  0xd8   :  { %11060 = vmatmul.msk.f32.gmra.mxu1 %vm102_vm2, %v12734_v34  ;;  %v1108_v47 = vsel %vm1094_vm5, %v12866_v21, %v1106_v25  ;;  %v1100_v53 = vsel %vm1094_vm5, %v12842_v9, %v12868_v22  ;;  %v1101_v59 = vsel %vm1094_vm5, %v12868_v22, %v12866_v21 }
  0xd9   :  { %11063 = vmatmul.msk.f32.gmra.mxu2 %vm102_vm2, %v12734_v34 }
  0xda   :  { %11077 = vmatmul.msk.f32.vlgmr.msrb.gmra.mxu3 %vm102_vm2, %v12710_v28  ;;  %11095 = vmatmul.msk.f32.gmra.mxu0 %vm102_vm2, %v12823_v63  ;;  %v2411_v13 = vld.sshfl [vmem:[#allocation1 + $0x8] sm:$0xff pattern:$0x73625140]  ;;  %v2410_v37 = vld.sshfl [vmem:[#allocation1] sm:$0xff pattern:$0x73625140] }
  0xdb   :  { %11102 = vmatpush.msk.msrb.mxu3 %vm109_vm1, %v840_v23  ;;  %v2413_v49 = vld.sshfl [vmem:[#allocation1 + $0x18] sm:$0xff pattern:$0x73625140]  ;;  %v2412_v52 = vld.sshfl [vmem:[#allocation1 + $0x10] sm:$0xff pattern:$0x73625140] }
  0xdc   :  { %2164 = vrot.lane.b32.xlu1 %v2149_v31, %s12385_s18  ;;  %2162 = vrot.lane.b32.xlu0 %v2148_v32, %s12385_s18  ;;  %2443 = vst [vmem:[#allocation1] ss:$4 sm:$0xff] %v12535_v1 }
  0xdd   :  { %2177 = vrot.lane.b32.xlu2 %v2176_v33, %s12385_s18  ;;  %s12395_s18 = smov 29  }
  0xdf   :  { %v12894_v27 = vpop.permute.xlu1 %1348  ;;  %v1347_v29 = vpop.permute.xlu0 %1346 }
  0xe0   :  { %11071 = vmatmul.msk.f32.vlgmr.msra.gmra.mxu1 %vm102_vm2, %v12710_v28  ;;  %v1363_v14 = vsel %vm1362_vm6, %v1347_v29, %v12894_v27 }
  0xe1   :  { %11074 = vmatmul.msk.f32.vlgmr.msra.gmra.mxu2 %vm102_vm2, %v12710_v28  ;;  %11096 = vmatpush.msk.msra.mxu1 %vm109_vm1, %v832_v17  ;;  %v12916_v28 = vpop.permute.xlu2 %1350 }
  0xe2   :  { %11078 = vmatmul.msk.f32.gmra.mxu3 %vm102_vm2, %v12734_v34  ;;  %11108 = vmatmul.msk.f32.vlgmr.msrb.gmra.mxu0 %vm102_vm2, %v12892_v26 }
  0xe3   :  { %11099 = vmatpush.msk.msra.mxu2 %vm109_vm1, %v833_v30  ;;  %11133 = vmatpush.msk.msrb.mxu0 %vm109_vm1, %v1363_v14 }
  0xe4   :  { %2420 = vrot.lane.b32.xlu1 %v2411_v13, %s12386_s29  ;;  %2418 = vrot.lane.b32.xlu0 %v2410_v37, %s12386_s29 }
  0xe5   :  { %2422 = vrot.lane.b32.xlu2 %v2412_v52, %s12386_s29  ;;  %v13159_v52 = vld [vmem:[%s19069_s1 + $0x68] sm:$0xf] }
  0xe7   :  { %v1355_v38 = vpop.permute.xlu1 %1354  ;;  %v12938_v39 = vpop.permute.xlu0 %1352 }
  0xe8   :  { %11072 = vmatmul.msk.f32.gmra.mxu1 %vm102_vm2, %v12734_v34  ;;  %v1366_v5 = vsel %vm1362_vm6, %v12938_v39, %v1355_v38  ;;  %v1365_v22 = vsel %vm1362_vm6, %v12916_v28, %v12938_v39  ;;  %v13120_v39 = vld [vmem:[%s19069_s1 + $0x60] sm:$0xff] }
  0xe9   :  { %11075 = vmatmul.msk.f32.gmra.mxu2 %vm102_vm2, %v12734_v34  ;;  %v1096_v34 = vsel %vm1094_vm5, %v12825_v2, %v12815_v62  ;;  %v12943_v40 = vpop.permute.xlu2 %1356  ;;  %v2416_v62 = vld.sshfl [vmem:[#allocation1 + $0x30] sm:$0xff pattern:$0x73625140]  ;;  %v2444_v2 = vld.sshfl [vmem:[#allocation1] sm:$0xff pattern:$0x73625140] }
  0xea   :  { %11091 = vmatmul.msk.f32.vlgmr.msra.gmra.mxu3 %vm102_vm2, %v12797_v56  ;;  %11109 = vmatmul.msk.f32.gmra.mxu0 %vm102_vm2, %v12921_v35  ;;  %v1367_v42 = vsel %vm1362_vm6, %v1355_v38, %v12943_v40  ;;  %2675 = vst [vmem:[#allocation1] ss:$4 sm:$0xff] %v12535_v1 }
  0xeb   :  { %11116 = vmatpush.msk.msra.mxu3 %vm109_vm1, %v1098_v36  ;;  %2677 = vst [vmem:[#allocation1 + $0x20] ss:$4 sm:$0xff] %v12530_v0 }
  0xec   :  { %v12934_v12 = vpop.f32.mrf.mxu0  ;;  %2426 = vrot.lane.b32.xlu1 %v2414_v48, %s12386_s29  ;;  %2424 = vrot.lane.b32.xlu0 %v2413_v49, %s12386_s29 }
  0xed   :  { %19108 = vst [vmem:[#allocation5_spill] sm:$0xff] %v12934_v12  ;;  %2428 = vrot.lane.b32.xlu2 %v2415_v24, %s12386_s29 }
  0xef   :  { %v12965_v45 = vpop.permute.xlu1 %1360  ;;  %v12967_v46 = vpop.permute.xlu0 %1358 }
  0xf0   :  { %11085 = vmatmul.msk.f32.vlgmr.msrb.gmra.mxu1 %vm102_vm2, %v12797_v56  ;;  %v1368_v13 = vsel %vm1362_vm6, %v12943_v40, %v12967_v46  ;;  %v1369_v40 = vsel %vm1362_vm6, %v12967_v46, %v12965_v45 }
  0xf1   :  { %11088 = vmatmul.msk.f32.vlgmr.msrb.gmra.mxu2 %vm102_vm2, %v12797_v56  ;;  %11110 = vmatpush.msk.msrb.mxu1 %vm109_vm1, %v1096_v34  ;;  %v12984_v51 = vpop.permute.xlu2 %1373  ;;  %v2679_v10 = vld.sshfl [vmem:[#allocation1 + $0x8] sm:$0xff pattern:$0x73625140]  ;;  %v2678_v11 = vld.sshfl [vmem:[#allocation1] sm:$0xff pattern:$0x73625140] }
  0xf2   :  { %11092 = vmatmul.msk.f32.gmra.mxu3 %vm102_vm2, %v12823_v63  ;;  %11120 = vmatmul.msk.f32.vlgmr.msra.gmra.mxu0 %vm102_vm2, %v12892_v26  ;;  %v1376_v30 = vsel %vm1362_vm6, %v12965_v45, %v12984_v51  ;;  %v2682_v31 = vld.sshfl [vmem:[#allocation1 + $0x20] sm:$0xff pattern:$0x73625140]  ;;  %v2681_v32 = vld.sshfl [vmem:[#allocation1 + $0x18] sm:$0xff pattern:$0x73625140] }
  0xf3   :  { %11113 = vmatpush.msk.msrb.mxu2 %vm109_vm1, %v1097_v41  ;;  %11145 = vmatpush.msk.msra.mxu0 %vm109_vm1, %v1367_v42  ;;  %v2680_v36 = vld.sshfl [vmem:[#allocation1 + $0x10] sm:$0xff pattern:$0x73625140]  ;;  %v2685_v45 = vld.sshfl [vmem:[#allocation1 + $0x38] sm:$0xff pattern:$0x73625140] }
  0xf4   :  { %v12961_v43 = vpop.f32.mrf.mxu0  ;;  %2432 = vrot.lane.b32.xlu1 %v2417_v61, %s12386_s29  ;;  %2430 = vrot.lane.b32.xlu0 %v2416_v62, %s12386_s29  ;;  %2711 = vst [vmem:[#allocation1] ss:$4 sm:$0xff] %v12535_v1  ;;  %v2684_v46 = vld.sshfl [vmem:[#allocation1 + $0x30] sm:$0xff pattern:$0x73625140] }
  0xf5   :  { %19109 = vst [vmem:[#allocation6_spill] sm:$0xff] %v12961_v43  ;;  %2445 = vrot.lane.b32.xlu2 %v2444_v2, %s12386_s29  ;;  %s12391_s29 = smov 60  }
  0xf7   :  { %v12996_v57 = vpop.permute.xlu1 %1616  ;;  %v1615_v58 = vpop.permute.xlu0 %1614 }
  0xf8   :  { %11086 = vmatmul.msk.f32.gmra.mxu1 %vm102_vm2, %v12823_v63  ;;  %v1631_v60 = vsel %vm1630_vm7, %v1615_v58, %v12996_v57 }
  0xf9   :  { %11089 = vmatmul.msk.f32.gmra.mxu2 %vm102_vm2, %v12823_v63 }
  0xfa   :  { %11103 = vmatmul.msk.f32.vlgmr.msrb.gmra.mxu3 %vm102_vm2, %v12797_v56  ;;  %11121 = vmatmul.msk.f32.gmra.mxu0 %vm102_vm2, %v12921_v35 }
  0xfb   :  { %11128 = vmatpush.msk.msrb.mxu3 %vm109_vm1, %v1108_v47  ;;  %v13148_v48 = vld.sshfl [vmem:[#allocation1] sm:$0xff pattern:$0x73625140] }
  0xfc   :  { %v12980_v50 = vpop.f32.mrf.mxu0  ;;  %2688 = vrot.lane.b32.xlu1 %v2679_v10, %s12387_s20  ;;  %2686 = vrot.lane.b32.xlu0 %v2678_v11, %s12387_s20  ;;  %2943 = vst [vmem:[#allocation1] ss:$4 sm:$0xff] %v12535_v1  ;;  %v2683_v11 = vld.sshfl [vmem:[#allocation1 + $0x28] sm:$0xff pattern:$0x73625140] }
  0xfd   :  { %2690 = vrot.lane.b32.xlu2 %v2680_v36, %s12387_s20  ;;  %2945 = vst [vmem:[#allocation1 + $0x20] ss:$4 sm:$0xff] %v12530_v0 }
 0x100   :  { %11097 = vmatmul.msk.f32.vlgmr.msra.gmra.mxu1 %vm102_vm2, %v12797_v56 }
 0x101   :  { %11100 = vmatmul.msk.f32.vlgmr.msra.gmra.mxu2 %vm102_vm2, %v12797_v56  ;;  %11122 = vmatpush.msk.msra.mxu1 %vm109_vm1, %v1100_v53  ;;  %v13018_v56 = vpop.permute.xlu2 %1618 }
 0x102   :  { %11104 = vmatmul.msk.f32.gmra.mxu3 %vm102_vm2, %v12823_v63  ;;  %11134 = vmatmul.msk.f32.vlgmr.msrb.gmra.mxu0 %vm102_vm2, %v12994_v54  ;;  %v1632_v2 = vsel %vm1630_vm7, %v12996_v57, %v13018_v56 }
 0x103   :  { %11125 = vmatpush.msk.msra.mxu2 %vm109_vm1, %v1101_v59  ;;  %11159 = vmatpush.msk.msrb.mxu0 %vm109_vm1, %v1631_v60  ;;  %v2947_v61 = vld.sshfl [vmem:[#allocation1 + $0x8] sm:$0xff pattern:$0x73625140]  ;;  %v2946_v62 = vld.sshfl [vmem:[#allocation1] sm:$0xff pattern:$0x73625140] }
 0x104   :  { %2694 = vrot.lane.b32.xlu1 %v2682_v31, %s12387_s20  ;;  %2692 = vrot.lane.b32.xlu0 %v2681_v32, %s12387_s20  ;;  %v2950_v31 = vld.sshfl [vmem:[#allocation1 + $0x20] sm:$0xff pattern:$0x73625140]  ;;  %v2949_v32 = vld.sshfl [vmem:[#allocation1 + $0x18] sm:$0xff pattern:$0x73625140] }
 0x105   :  { %v13014_v55 = vpop.f32.mrf.mxu1  ;;  %2696 = vrot.lane.b32.xlu2 %v2683_v11, %s12387_s20 }
 0x106   :  { %v13051_v19 = vpop.permute.xlu1 %1622  ;;  %v13055_v21 = vpop.permute.xlu0 %1620 }
 0x107   :  { %v364_v3 = vpop.f32.mrf.mxu0  ;;  %v1634_v53 = vsel %vm1630_vm7, %v13055_v21, %v13051_v19  ;;  %v1633_v57 = vsel %vm1630_vm7, %v13018_v56, %v13055_v21 }
 0x108   :  { %11098 = vmatmul.msk.f32.gmra.mxu1 %vm102_vm2, %v12823_v63 }
 0x109   :  { %11101 = vmatmul.msk.f32.gmra.mxu2 %vm102_vm2, %v12823_v63  ;;  %v1364_v63 = vsel %vm1362_vm6, %v12894_v27, %v12916_v28  ;;  %v13049_v15 = vpop.permute.xlu2 %1624 }
 0x10a   :  { %11117 = vmatmul.msk.f32.vlgmr.msra.gmra.mxu3 %vm102_vm2, %v12892_v26  ;;  %11135 = vmatmul.msk.f32.gmra.mxu0 %vm102_vm2, %v13025_v4  ;;  %v1635_v23 = vsel %vm1630_vm7, %v13051_v19, %v13049_v15 }
 0x10b   :  { %11142 = vmatpush.msk.msra.mxu3 %vm109_vm1, %v1366_v5 }
 0x10c   :  { %v147_v7 = vpop.f32.mrf.mxu2  ;;  %2700 = vrot.lane.b32.xlu1 %v2685_v45, %s12387_s20  ;;  %2698 = vrot.lane.b32.xlu0 %v2684_v46, %s12387_s20  ;;  %v13261_v46 = vld [vmem:[%s19069_s1 + $0x70] sm:$0xff] }
 0x10d   :  { %v13038_v8 = vadd.f32 %v364_v3, %v147_v7  ;;  %v13040_v9 = vpop.f32.mrf.mxu3  ;;  %v13042_v6 = vpop.f32.mrf.mxu1  ;;  %2713 = vrot.lane.b32.xlu2 %v13148_v48, %s12387_s20 }
 0x10e   :  { %v13082_v17 = vpop.permute.xlu1 %1628  ;;  %v13086_v29 = vpop.permute.xlu0 %1626 }
 0x10f   :  { %v13053_v20 = vpop.f32.mrf.mxu0 }
 0x110   :  { %19110 = vst [vmem:[#allocation7_spill] sm:$0xff] %v13053_v20  ;;  %11111 = vmatmul.msk.f32.vlgmr.msrb.gmra.mxu1 %vm102_vm2, %v12892_v26 }
 0x111   :  { %11114 = vmatmul.msk.f32.vlgmr.msrb.gmra.mxu2 %vm102_vm2, %v12892_v26  ;;  %11136 = vmatpush.msk.msrb.mxu1 %vm109_vm1, %v1364_v63  ;;  %v13111_v37 = vpop.permute.xlu2 %1641 }
 0x112   :  { %11118 = vmatmul.msk.f32.gmra.mxu3 %vm102_vm2, %v12921_v35  ;;  %11146 = vmatmul.msk.f32.vlgmr.msra.gmra.mxu0 %vm102_vm2, %v12994_v54 }
 0x113   :  { %11139 = vmatpush.msk.msrb.mxu2 %vm109_vm1, %v1365_v22  ;;  %11171 = vmatpush.msk.msra.mxu0 %vm109_vm1, %v1635_v23 }
 0x114   :  { %v13074_v18 = vpop.f32.mrf.mxu2  ;;  %2956 = vrot.lane.b32.xlu1 %v2947_v61, %s12388_s30  ;;  %2954 = vrot.lane.b32.xlu0 %v2946_v62, %s12388_s30 }
 0x115   :  { %v13076_v25 = vpop.f32.mrf.mxu3  ;;  %v13078_v16 = vpop.f32.mrf.mxu1 }
 0x116   :  { %19111 = vst [vmem:[#allocation8_spill] sm:$0xff] %v13078_v16  ;;  %v13122_v34 = vpop.permute.xlu1 %1884  ;;  %v1883_v41 = vpop.permute.xlu0 %1882 }
 0x117   :  { %v13084_v27 = vpop.f32.mrf.mxu0  ;;  %v1899_v42 = vsel %vm1898_vm8, %v1883_v41, %v13122_v34  ;;  %v1636_v41 = vsel %vm1630_vm7, %v13049_v15, %v13086_v29  ;;  %v1637_v15 = vsel %vm1630_vm7, %v13086_v29, %v13082_v17  ;;  %v2953_v29 = vld.sshfl [vmem:[#allocation1 + $0x38] sm:$0xff pattern:$0x73625140] }
 0x118   :  { %19112 = vst [vmem:[#allocation9_spill] sm:$0xff] %v13084_v27  ;;  %11112 = vmatmul.msk.f32.gmra.mxu1 %vm102_vm2, %v12921_v35 }
 0x119   :  { %11115 = vmatmul.msk.f32.gmra.mxu2 %vm102_vm2, %v12921_v35  ;;  %v13150_v49 = vpop.permute.xlu2 %1886 }
 0x11a   :  { %11129 = vmatmul.msk.f32.vlgmr.msrb.gmra.mxu3 %vm102_vm2, %v12892_v26  ;;  %11147 = vmatmul.msk.f32.gmra.mxu0 %vm102_vm2, %v13025_v4 }
 0x11b   :  { %11154 = vmatpush.msk.msrb.mxu3 %vm109_vm1, %v1376_v30 }
 0x11c   :  { %v13100_v14 = vpop.f32.mrf.mxu2  ;;  %2962 = vrot.lane.b32.xlu1 %v2950_v31, %s12388_s30  ;;  %2960 = vrot.lane.b32.xlu0 %v2949_v32, %s12388_s30 }
 0x11d   :  { %v13102_v33 = vpop.f32.mrf.mxu3  ;;  %v13104_v28 = vpop.f32.mrf.mxu1 }
 0x11e   :  { %19113 = vst [vmem:[#allocation10_spill] sm:$0xff] %v13104_v28  ;;  %v13187_v5 = vpop.permute.xlu1 %1890  ;;  %v13191_v10 = vpop.permute.xlu0 %1888 }
 0x11f   :  { %v13115_v38 = vpop.f32.mrf.mxu0 }
 0x120   :  { %11123 = vmatmul.msk.f32.vlgmr.msra.gmra.mxu1 %vm102_vm2, %v12892_v26 }
 0x121   :  { %11126 = vmatmul.msk.f32.vlgmr.msra.gmra.mxu2 %vm102_vm2, %v12892_v26  ;;  %11148 = vmatpush.msk.msra.mxu1 %vm109_vm1, %v1368_v13  ;;  %v13185_v3 = vpop.permute.xlu2 %1892 }
 0x122   :  { %11130 = vmatmul.msk.f32.gmra.mxu3 %vm102_vm2, %v12921_v35  ;;  %11160 = vmatmul.msk.f32.vlgmr.msrb.gmra.mxu0 %vm102_vm2, %v13120_v39 }
 0x123   :  { %11151 = vmatpush.msk.msra.mxu2 %vm109_vm1, %v1369_v40  ;;  %11185 = vmatpush.msk.msrb.mxu0 %vm109_vm1, %v1899_v42 }
 0x124   :  { %v13140_v44 = vpop.f32.mrf.mxu2  ;;  %2968 = vrot.lane.b32.xlu1 %v2953_v29, %s12388_s30 }
 0x125   :  { %v13142_v26 = vpop.f32.mrf.mxu3  ;;  %v13144_v47 = vpop.f32.mrf.mxu1 }
 0x126   :  { %19114 = vst [vmem:[#allocation11_spill] sm:$0xff] %v13144_v47  ;;  %v13220_v23 = vpop.permute.xlu1 %1896  ;;  %v13224_v30 = vpop.permute.xlu0 %1894 }
 0x127   :  { %v13154_v51 = vpop.f32.mrf.mxu0 }
 0x128   :  { %11124 = vmatmul.msk.f32.gmra.mxu1 %vm102_vm2, %v12921_v35 }
 0x129   :  { %11127 = vmatmul.msk.f32.gmra.mxu2 %vm102_vm2, %v12921_v35  ;;  %v13251_v45 = vpop.permute.xlu2 %1909 }
 0x12a   :  { %11143 = vmatmul.msk.f32.vlgmr.msra.gmra.mxu3 %vm102_vm2, %v12994_v54  ;;  %11161 = vmatmul.msk.f32.gmra.mxu0 %vm102_vm2, %v13159_v52 }
 0x12b   :  { %11168 = vmatpush.msk.msra.mxu3 %vm109_vm1, %v1634_v53 }
 0x12c   :  { %v13173_v58 = vpop.f32.mrf.mxu2 }
 0x12d   :  { %v430_v59 = vpop.f32.mrf.mxu3  ;;  %v13175_v60 = vpop.f32.mrf.mxu1 }
 0x12e   :  { %v13181_v35 = vadd.f32 %v430_v59, %v13040_v9  ;;  %v1903_v9 = vsel %vm1898_vm8, %v13187_v5, %v13185_v3  ;;  %v2952_v59 = vld.sshfl [vmem:[#allocation1 + $0x30] sm:$0xff pattern:$0x73625140] }
 0x12f   :  { %v13189_v7 = vpop.f32.mrf.mxu0  ;;  %2966 = vrot.lane.b32.xlu0 %v2952_v59, %s12388_s30 }
 0x130   :  { %19115 = vst [vmem:[#allocation12_spill] sm:$0xff] %v13189_v7  ;;  %11137 = vmatmul.msk.f32.vlgmr.msrb.gmra.mxu1 %vm102_vm2, %v12994_v54 }
 0x131   :  { %11140 = vmatmul.msk.f32.vlgmr.msrb.gmra.mxu2 %vm102_vm2, %v12994_v54  ;;  %11162 = vmatpush.msk.msrb.mxu1 %vm109_vm1, %v1632_v2 }
 0x132   :  { %11144 = vmatmul.msk.f32.gmra.mxu3 %vm102_vm2, %v13025_v4  ;;  %11172 = vmatmul.msk.f32.vlgmr.msra.gmra.mxu0 %vm102_vm2, %v13120_v39 }
 0x133   :  { %11165 = vmatpush.msk.msrb.mxu2 %vm109_vm1, %v1633_v57  ;;  %11197 = vmatpush.msk.msra.mxu0 %vm109_vm1, %v1903_v9  ;;  %v13293_v9 = vpop.permute.xlu2 %2154 }
 0x134   :  { %v407_v56 = vpop.f32.mrf.mxu2 }
 0x135   :  { %v13211_v63 = vadd.f32 %v407_v56, %v13074_v18  ;;  %v433_v19 = vpop.f32.mrf.mxu3  ;;  %v13213_v21 = vpop.f32.mrf.mxu1  ;;  %v1644_v18 = vsel %vm1630_vm7, %v13082_v17, %v13111_v37  ;;  %v2948_v37 = vld.sshfl [vmem:[#allocation1 + $0x10] sm:$0xff pattern:$0x73625140]  ;;  %v13302_v56 = vld [vmem:[%s19069_s1 + $0x78] sm:$0xf] }
 0x136   :  { %19116 = vst [vmem:[#allocation13_spill] sm:$0xff] %v13213_v21  ;;  %v13218_v22 = vadd.f32 %v433_v19, %v13076_v25  ;;  %2958 = vrot.lane.b32.xlu2 %v2948_v37, %s12388_s30 }
 0x137   :  { %v13222_v24 = vpop.f32.mrf.mxu0  ;;  %2979 = vst [vmem:[#allocation1] ss:$4 sm:$0xff] %v12535_v1 }
 0x138   :  { %19117 = vst [vmem:[#allocation14_spill] sm:$0xff] %v13222_v24  ;;  %11138 = vmatmul.msk.f32.gmra.mxu1 %vm102_vm2, %v13025_v4 }
 0x139   :  { %11141 = vmatmul.msk.f32.gmra.mxu2 %vm102_vm2, %v13025_v4 }
 0x13a   :  { %11155 = vmatmul.msk.f32.vlgmr.msrb.gmra.mxu3 %vm102_vm2, %v12994_v54  ;;  %11173 = vmatmul.msk.f32.gmra.mxu0 %vm102_vm2, %v13159_v52 }
 0x13b   :  { %11180 = vmatpush.msk.msrb.mxu3 %vm109_vm1, %v1644_v18 }
 0x13c   :  { %v410_v25 = vpop.f32.mrf.mxu2 }
 0x13d   :  { %v13239_v36 = vadd.f32 %v410_v25, %v13100_v14  ;;  %v522_v13 = vpop.f32.mrf.mxu3  ;;  %v13241_v40 = vpop.f32.mrf.mxu1 }
 0x13e   :  { %19118 = vst [vmem:[#allocation15_spill] sm:$0xff] %v13241_v40  ;;  %v13249_v42 = vadd.f32 %v522_v13, %v13102_v33  ;;  %v13263_v53 = vpop.permute.xlu1 %2152  ;;  %v2151_v33 = vpop.permute.xlu0 %2150  ;;  %v13288_v2 = vld.sshfl [vmem:[#allocation1] sm:$0xff pattern:$0x73625140] }
 0x13f   :  { %v13256_v14 = vpop.f32.mrf.mxu0  ;;  %v2167_v48 = vsel %vm2166_vm9, %v2151_v33, %v13263_v53  ;;  %3211 = vst [vmem:[#allocation1] ss:$4 sm:$0xff] %v12535_v1 }
 0x140   :  { %11149 = vmatmul.msk.f32.vlgmr.msra.gmra.mxu1 %vm102_vm2, %v12994_v54 }
 0x141   :  { %11152 = vmatmul.msk.f32.vlgmr.msra.gmra.mxu2 %vm102_vm2, %v12994_v54  ;;  %11174 = vmatpush.msk.msra.mxu1 %vm109_vm1, %v1636_v41  ;;  %v13335_v41 = vpop.permute.xlu2 %2160 }
 0x142   :  { %11156 = vmatmul.msk.f32.gmra.mxu3 %vm102_vm2, %v13025_v4  ;;  %11186 = vmatmul.msk.f32.vlgmr.msrb.gmra.mxu0 %vm102_vm2, %v13261_v46 }
 0x143   :  { %11177 = vmatpush.msk.msra.mxu2 %vm109_vm1, %v1637_v15  ;;  %11211 = vmatpush.msk.msrb.mxu0 %vm109_vm1, %v2167_v48 }
 0x144   :  { %v499_v17 = vpop.f32.mrf.mxu2 }
 0x145   :  { %v13282_v54 = vadd.f32 %v499_v17, %v13140_v44  ;;  %v525_v61 = vpop.f32.mrf.mxu3  ;;  %v13284_v62 = vpop.f32.mrf.mxu1 }
 0x146   :  { %19119 = vst [vmem:[#allocation16_spill] sm:$0xff] %v13284_v62  ;;  %v13291_v57 = vadd.f32 %v525_v61, %v13142_v26  ;;  %v1902_v26 = vsel %vm1898_vm8, %v13191_v10, %v13187_v5  ;;  %v3215_v31 = vld.sshfl [vmem:[#allocation1 + $0x8] sm:$0xff pattern:$0x73625140]  ;;  %v13329_v13 = vpop.permute.xlu1 %2158 }
 0x147   :  { %v13297_v44 = vpop.f32.mrf.mxu0  ;;  %v3214_v5 = vld.sshfl [vmem:[#allocation1] sm:$0xff pattern:$0x73625140]  ;;  %3224 = vrot.lane.b32.xlu1 %v3215_v31, %s12389_s25 }
 0x148   :  { %11150 = vmatmul.msk.f32.gmra.mxu1 %vm102_vm2, %v13025_v4  ;;  %3222 = vrot.lane.b32.xlu0 %v3214_v5, %s12389_s25 }
 0x149   :  { %11153 = vmatmul.msk.f32.gmra.mxu2 %vm102_vm2, %v13025_v4  ;;  %v1900_v4 = vsel %vm1898_vm8, %v13122_v34, %v13150_v49  ;;  %v1901_v34 = vsel %vm1898_vm8, %v13150_v49, %v13191_v10  ;;  %v2951_v10 = vld.sshfl [vmem:[#allocation1 + $0x28] sm:$0xff pattern:$0x73625140] }
 0x14a   :  { %11169 = vmatmul.msk.f32.vlgmr.msra.gmra.mxu3 %vm102_vm2, %v13120_v39  ;;  %11187 = vmatmul.msk.f32.gmra.mxu0 %vm102_vm2, %v13302_v56  ;;  %3213 = vst [vmem:[#allocation1 + $0x20] ss:$4 sm:$0xff] %v12530_v0 }
 0x14b   :  { %11194 = vmatpush.msk.msra.mxu3 %vm109_vm1, %v1902_v26  ;;  %2964 = vrot.lane.b32.xlu2 %v2951_v10, %s12388_s30 }
 0x14c   :  { %v502_v11 = vpop.f32.mrf.mxu2 }
 0x14d   :  { %v13317_v19 = vadd.f32 %v502_v11, %v13173_v58  ;;  %v682_v18 = vpop.f32.mrf.mxu3  ;;  %v13319_v25 = vpop.f32.mrf.mxu1  ;;  %v3217_v11 = vld.sshfl [vmem:[#allocation1 + $0x18] sm:$0xff pattern:$0x73625140] }
 0x14e   :  { %v13325_v32 = vadd.f32 %v682_v18, %v13181_v35  ;;  %v13331_v58 = vpop.permute.xlu0 %2156  ;;  %v2171_v35 = vsel %vm2166_vm9, %v13329_v13, %v13335_v41  ;;  %v13364_v29 = vpop.permute.xlu1 %2164 }
 0x14f   :  { %v13333_v37 = vpop.f32.mrf.mxu0 }
 0x150   :  { %19120 = vst [vmem:[#allocation17_spill] sm:$0xff] %v13333_v37  ;;  %11163 = vmatmul.msk.f32.vlgmr.msrb.gmra.mxu1 %vm102_vm2, %v13120_v39  ;;  %3228 = vrot.lane.b32.xlu0 %v3217_v11, %s12389_s25 }
 0x151   :  { %11166 = vmatmul.msk.f32.vlgmr.msrb.gmra.mxu2 %vm102_vm2, %v13120_v39  ;;  %11188 = vmatpush.msk.msrb.mxu1 %vm109_vm1, %v1900_v4  ;;  %v3218_v26 = vld.sshfl [vmem:[#allocation1 + $0x20] sm:$0xff pattern:$0x73625140]  ;;  %v1904_v4 = vsel %vm1898_vm8, %v13185_v3, %v13224_v30  ;;  %v1905_v3 = vsel %vm1898_vm8, %v13224_v30, %v13220_v23  ;;  %v3221_v30 = vld.sshfl [vmem:[#allocation1 + $0x38] sm:$0xff pattern:$0x73625140] }
 0x152   :  { %11170 = vmatmul.msk.f32.gmra.mxu3 %vm102_vm2, %v13159_v52  ;;  %11198 = vmatmul.msk.f32.vlgmr.msra.gmra.mxu0 %vm102_vm2, %v13261_v46 }
 0x153   :  { %11191 = vmatpush.msk.msrb.mxu2 %vm109_vm1, %v1901_v34  ;;  %11223 = vmatpush.msk.msra.mxu0 %vm109_vm1, %v2171_v35  ;;  %v13395_v35 = vpop.permute.xlu2 %2177 }
 0x154   :  { %v659_v49 = vpop.f32.mrf.mxu2  ;;  %3230 = vrot.lane.b32.xlu1 %v3218_v26, %s12389_s25  ;;  %2981 = vrot.lane.b32.xlu2 %v13288_v2, %s12388_s30  ;;  %s12396_s30 = smov 28  }
 0x155   :  { %v13355_v15 = vadd.f32 %v659_v49, %v13211_v63  ;;  %v685_v33 = vpop.f32.mrf.mxu3  ;;  %v13357_v48 = vpop.f32.mrf.mxu1  ;;  %v1912_v63 = vsel %vm1898_vm8, %v13220_v23, %v13251_v45  ;;  %v3216_v45 = vld.sshfl [vmem:[#allocation1 + $0x10] sm:$0xff pattern:$0x73625140]  ;;  %v13405_v49 = vld [vmem:[%s19069_s1 + $0x80] sm:$0xff] }
 0x156   :  { %19121 = vst [vmem:[#allocation18_spill] sm:$0xff] %v13357_v48  ;;  %v13362_v17 = vadd.f32 %v685_v33, %v13218_v22  ;;  %v13366_v59 = vpop.permute.xlu0 %2162  ;;  %v13407_v10 = vpop.permute.xlu1 %2420  ;;  %v3220_v33 = vld.sshfl [vmem:[#allocation1 + $0x30] sm:$0xff pattern:$0x73625140] }
 0x157   :  { %v13368_v61 = vpop.f32.mrf.mxu0  ;;  %3247 = vst [vmem:[#allocation1] ss:$4 sm:$0xff] %v12535_v1  ;;  %v2172_v62 = vsel %vm2166_vm9, %v13335_v41, %v13366_v59  ;;  %v2173_v41 = vsel %vm2166_vm9, %v13366_v59, %v13364_v29 }
 0x158   :  { %19122 = vst [vmem:[#allocation19_spill] sm:$0xff] %v13368_v61  ;;  %11164 = vmatmul.msk.f32.gmra.mxu1 %vm102_vm2, %v13159_v52  ;;  %3234 = vrot.lane.b32.xlu0 %v3220_v33, %s12389_s25 }
 0x159   :  { %11167 = vmatmul.msk.f32.gmra.mxu2 %vm102_vm2, %v13159_v52 }
 0x15a   :  { %11181 = vmatmul.msk.f32.vlgmr.msrb.gmra.mxu3 %vm102_vm2, %v13120_v39  ;;  %11199 = vmatmul.msk.f32.gmra.mxu0 %vm102_vm2, %v13302_v56 }
 0x15b   :  { %11206 = vmatpush.msk.msrb.mxu3 %vm109_vm1, %v1912_v63 }
 0x15c   :  { %v662_v22 = vpop.f32.mrf.mxu2  ;;  %3236 = vrot.lane.b32.xlu1 %v3221_v30, %s12389_s25  ;;  %3226 = vrot.lane.b32.xlu2 %v3216_v45, %s12389_s25 }
 0x15d   :  { %v13383_v18 = vadd.f32 %v662_v22, %v13239_v36  ;;  %v774_v31 = vpop.f32.mrf.mxu3  ;;  %v13385_v5 = vpop.f32.mrf.mxu1 }
 0x15e   :  { %19123 = vst [vmem:[#allocation20_spill] sm:$0xff] %v13385_v5  ;;  %v13393_v34 = vadd.f32 %v774_v31, %v13249_v42  ;;  %v2419_v42 = vpop.permute.xlu0 %2418  ;;  %v13432_v26 = vld.sshfl [vmem:[#allocation1] sm:$0xff pattern:$0x73625140]  ;;  %v13437_v31 = vpop.permute.xlu2 %2422 }
 0x15f   :  { %v13400_v36 = vpop.f32.mrf.mxu0  ;;  %v2435_v2 = vsel %vm2434_vm10, %v2419_v42, %v13407_v10  ;;  %3479 = vst [vmem:[#allocation1] ss:$4 sm:$0xff] %v12535_v1 }
 0x160   :  { %11175 = vmatmul.msk.f32.vlgmr.msra.gmra.mxu1 %vm102_vm2, %v13120_v39 }
 0x161   :  { %11178 = vmatmul.msk.f32.vlgmr.msra.gmra.mxu2 %vm102_vm2, %v13120_v39  ;;  %11200 = vmatpush.msk.msra.mxu1 %vm109_vm1, %v1904_v4  ;;  %v13446_v4 = vld [vmem:[%s19069_s1 + $0x88] sm:$0xf] }
 0x162   :  { %11182 = vmatmul.msk.f32.gmra.mxu3 %vm102_vm2, %v13159_v52  ;;  %11212 = vmatmul.msk.f32.vlgmr.msrb.gmra.mxu0 %vm102_vm2, %v13405_v49 }
 0x163   :  { %11203 = vmatpush.msk.msra.mxu2 %vm109_vm1, %v1905_v3  ;;  %11237 = vmatpush.msk.msrb.mxu0 %vm109_vm1, %v2435_v2 }
 0x164   :  { %v751_v23 = vpop.f32.mrf.mxu2 }
 0x165   :  { %v13426_v39 = vadd.f32 %v751_v23, %v13282_v54  ;;  %v777_v63 = vpop.f32.mrf.mxu3  ;;  %v13428_v22 = vpop.f32.mrf.mxu1 }
 0x166   :  { %19124 = vst [vmem:[#allocation21_spill] sm:$0xff] %v13428_v22  ;;  %v13435_v11 = vadd.f32 %v777_v63, %v13291_v57  ;;  %v2170_v57 = vsel %vm2166_vm9, %v13331_v58, %v13329_v13  ;;  %v3483_v23 = vld.sshfl [vmem:[#allocation1 + $0x8] sm:$0xff pattern:$0x73625140]  ;;  %v2169_v63 = vsel %vm2166_vm9, %v13293_v9, %v13331_v58 }
 0x167   :  { %v13441_v54 = vpop.f32.mrf.mxu0  ;;  %v3482_v13 = vld.sshfl [vmem:[#allocation1] sm:$0xff pattern:$0x73625140]  ;;  %3492 = vrot.lane.b32.xlu1 %v3483_v23, %s12390_s17  ;;  %v3219_v58 = vld.sshfl [vmem:[#allocation1 + $0x28] sm:$0xff pattern:$0x73625140] }
 0x168   :  { %19125 = vst [vmem:[#allocation22_spill] sm:$0xff] %v13441_v54  ;;  %11176 = vmatmul.msk.f32.gmra.mxu1 %vm102_vm2, %v13159_v52  ;;  %3490 = vrot.lane.b32.xlu0 %v3482_v13, %s12390_s17  ;;  %v3484_v5 = vld.sshfl [vmem:[#allocation1 + $0x10] sm:$0xff pattern:$0x73625140] }
 0x169   :  { %11179 = vmatmul.msk.f32.gmra.mxu2 %vm102_vm2, %v13159_v52  ;;  %v2168_v52 = vsel %vm2166_vm9, %v13263_v53, %v13293_v9  ;;  %v13482_v53 = vpop.permute.xlu1 %2426  ;;  %3232 = vrot.lane.b32.xlu2 %v3219_v58, %s12389_s25  ;;  %3481 = vst [vmem:[#allocation1 + $0x20] ss:$4 sm:$0xff] %v12530_v0  ;;  %v3485_v58 = vld.sshfl [vmem:[#allocation1 + $0x18] sm:$0xff pattern:$0x73625140] }
 0x16a   :  { %11195 = vmatmul.msk.f32.vlgmr.msra.gmra.mxu3 %vm102_vm2, %v13261_v46  ;;  %11213 = vmatmul.msk.f32.gmra.mxu0 %vm102_vm2, %v13446_v4  ;;  %3515 = vst [vmem:[#allocation1] ss:$4 sm:$0xff] %v12535_v1 }
 0x16b   :  { %11220 = vmatpush.msk.msra.mxu3 %vm109_vm1, %v2170_v57 }
 0x16c   :  { %v754_v45 = vpop.f32.mrf.mxu2 }
 0x16d   :  { %v13461_v3 = vadd.f32 %v754_v45, %v13317_v19  ;;  %v950_v42 = vpop.f32.mrf.mxu3  ;;  %v13463_v2 = vpop.f32.mrf.mxu1 }
 0x16e   :  { %v13469_v30 = vadd.f32 %v950_v42, %v13325_v32  ;;  %v13475_v19 = vpop.permute.xlu2 %2428  ;;  %v13484_v32 = vpop.permute.xlu0 %2424 }
 0x16f   :  { %v13473_v33 = vpop.f32.mrf.mxu0  ;;  %v2439_v57 = vsel %vm2434_vm10, %v13482_v53, %v13475_v19 }
 0x170   :  { %19126 = vst [vmem:[#allocation23_spill] sm:$0xff] %v13473_v33  ;;  %11189 = vmatmul.msk.f32.vlgmr.msrb.gmra.mxu1 %vm102_vm2, %v13261_v46  ;;  %3496 = vrot.lane.b32.xlu0 %v3485_v58, %s12390_s17  ;;  %v3489_v59 = vld.sshfl [vmem:[#allocation1 + $0x38] sm:$0xff pattern:$0x73625140] }
 0x171   :  { %11192 = vmatmul.msk.f32.vlgmr.msrb.gmra.mxu2 %vm102_vm2, %v13261_v46  ;;  %11214 = vmatpush.msk.msrb.mxu1 %vm109_vm1, %v2168_v52  ;;  %v3488_v58 = vld.sshfl [vmem:[#allocation1 + $0x30] sm:$0xff pattern:$0x73625140] }
 0x172   :  { %11196 = vmatmul.msk.f32.gmra.mxu3 %vm102_vm2, %v13302_v56  ;;  %11224 = vmatmul.msk.f32.vlgmr.msra.gmra.mxu0 %vm102_vm2, %v13405_v49 }
 0x173   :  { %11217 = vmatpush.msk.msrb.mxu2 %vm109_vm1, %v2169_v63  ;;  %11249 = vmatpush.msk.msra.mxu0 %vm109_vm1, %v2439_v57  ;;  %v13515_v63 = vpop.permute.xlu1 %2432 }
 0x174   :  { %v927_v9 = vpop.f32.mrf.mxu2  ;;  %3249 = vrot.lane.b32.xlu2 %v13432_v26, %s12389_s25  ;;  %s12409_s25 = smov 110  }
 0x175   :  { %v13499_v45 = vadd.f32 %v927_v9, %v13355_v15  ;;  %v953_v42 = vpop.f32.mrf.mxu3  ;;  %v13501_v23 = vpop.f32.mrf.mxu1  ;;  %v2180_v15 = vsel %vm2166_vm9, %v13364_v29, %v13395_v35  ;;  %v3486_v9 = vld.sshfl [vmem:[#allocation1 + $0x20] sm:$0xff pattern:$0x73625140]  ;;  %vm4042_vm9 = vcmask 261120  }
 0x176   :  { %19127 = vst [vmem:[#allocation24_spill] sm:$0xff] %v13501_v23  ;;  %v13506_v13 = vadd.f32 %v953_v42, %v13362_v17  ;;  %v13517_v57 = vpop.permute.xlu0 %2430  ;;  %3498 = vrot.lane.b32.xlu1 %v3486_v9, %s12390_s17  ;;  %v13539_v47 = vpop.permute.xlu2 %2445 }
 0x177   :  { %v13508_v52 = vpop.f32.mrf.mxu0 }
 0x178   :  { %19128 = vst [vmem:[#allocation25_spill] sm:$0xff] %v13508_v52  ;;  %11190 = vmatmul.msk.f32.gmra.mxu1 %vm102_vm2, %v13302_v56  ;;  %3502 = vrot.lane.b32.xlu0 %v3488_v58, %s12390_s17 }
 0x179   :  { %11193 = vmatmul.msk.f32.gmra.mxu2 %vm102_vm2, %v13302_v56 }
 0x17a   :  { %11207 = vmatmul.msk.f32.vlgmr.msrb.gmra.mxu3 %vm102_vm2, %v13261_v46  ;;  %11225 = vmatmul.msk.f32.gmra.mxu0 %vm102_vm2, %v13446_v4 }
 0x17b   :  { %11232 = vmatpush.msk.msrb.mxu3 %vm109_vm1, %v2180_v15 }
 0x17c   :  { %v930_v17 = vpop.f32.mrf.mxu2  ;;  %3494 = vrot.lane.b32.xlu2 %v3484_v5, %s12390_s17 }
 0x17d   :  { %v13527_v35 = vadd.f32 %v930_v17, %v13383_v18  ;;  %v1042_v42 = vpop.f32.mrf.mxu3  ;;  %v13529_v22 = vpop.f32.mrf.mxu1  ;;  %v13549_v17 = vld [vmem:[%s19069_s1 + $0x90] sm:$0xff] }
 0x17e   :  { %19129 = vst [vmem:[#allocation26_spill] sm:$0xff] %v13529_v22  ;;  %v13537_v15 = vadd.f32 %v1042_v42, %v13393_v34  ;;  %v13556_v34 = vpop.permute.xlu1 %2688  ;;  %v2687_v9 = vpop.permute.xlu0 %2686  ;;  %3504 = vrot.lane.b32.xlu1 %v3489_v59, %s12390_s17 }
 0x17f   :  { %v13544_v18 = vpop.f32.mrf.mxu0  ;;  %v2703_v26 = vsel %vm2702_vm11, %v2687_v9, %v13556_v34  ;;  %v13576_v9 = vld.sshfl [vmem:[#allocation1] sm:$0xff pattern:$0x73625140] }
 0x180   :  { %11201 = vmatmul.msk.f32.vlgmr.msra.gmra.mxu1 %vm102_vm2, %v13261_v46  ;;  %3747 = vst [vmem:[#allocation1] ss:$4 sm:$0xff] %v12535_v1 }
 0x181   :  { %11204 = vmatmul.msk.f32.vlgmr.msra.gmra.mxu2 %vm102_vm2, %v13261_v46  ;;  %11226 = vmatpush.msk.msra.mxu1 %vm109_vm1, %v2172_v62 }
 0x182   :  { %11208 = vmatmul.msk.f32.gmra.mxu3 %vm102_vm2, %v13302_v56  ;;  %11238 = vmatmul.msk.f32.vlgmr.msrb.gmra.mxu0 %vm102_vm2, %v13549_v17 }
 0x183   :  { %11229 = vmatpush.msk.msra.mxu2 %vm109_vm1, %v2173_v41  ;;  %11263 = vmatpush.msk.msrb.mxu0 %vm109_vm1, %v2703_v26  ;;  %v13581_v41 = vpop.permute.xlu2 %2690  ;;  %v13590_v26 = vld [vmem:[%s19069_s1 + $0x98] sm:$0xf] }
 0x184   :  { %v1019_v29 = vpop.f32.mrf.mxu2 }
 0x185   :  { %v13570_v46 = vadd.f32 %v1019_v29, %v13426_v39  ;;  %v1045_v62 = vpop.f32.mrf.mxu3  ;;  %v13572_v42 = vpop.f32.mrf.mxu1 }
 0x186   :  { %19130 = vst [vmem:[#allocation27_spill] sm:$0xff] %v13572_v42  ;;  %v13579_v22 = vadd.f32 %v1045_v62, %v13435_v11  ;;  %v2438_v11 = vsel %vm2434_vm10, %v13484_v32, %v13482_v53 }
 0x187   :  { %v13585_v39 = vpop.f32.mrf.mxu0  ;;  %v3751_v62 = vld.sshfl [vmem:[#allocation1 + $0x8] sm:$0xff pattern:$0x73625140]  ;;  %v3750_v53 = vld.sshfl [vmem:[#allocation1] sm:$0xff pattern:$0x73625140] }
 0x188   :  { %19131 = vst [vmem:[#allocation28_spill] sm:$0xff] %v13585_v39  ;;  %11202 = vmatmul.msk.f32.gmra.mxu1 %vm102_vm2, %v13302_v56  ;;  %3760 = vrot.lane.b32.xlu1 %v3751_v62, %s12391_s29  ;;  %v3752_v28 = vld.sshfl [vmem:[#allocation1 + $0x10] sm:$0xff pattern:$0x73625140] }
 0x189   :  { %11205 = vmatmul.msk.f32.gmra.mxu2 %vm102_vm2, %v13302_v56  ;;  %v2436_v56 = vsel %vm2434_vm10, %v13407_v10, %v13437_v31  ;;  %3758 = vrot.lane.b32.xlu0 %v3750_v53, %s12391_s29  ;;  %v13626_v10 = vpop.permute.xlu1 %2694 }
 0x18a   :  { %11221 = vmatmul.msk.f32.vlgmr.msra.gmra.mxu3 %vm102_vm2, %v13405_v49  ;;  %11239 = vmatmul.msk.f32.gmra.mxu0 %vm102_vm2, %v13590_v26 }
 0x18b   :  { %11246 = vmatpush.msk.msra.mxu3 %vm109_vm1, %v2438_v11 }
 0x18c   :  { %v1022_v5 = vpop.f32.mrf.mxu2 }
 0x18d   :  { %v13605_v29 = vadd.f32 %v1022_v5, %v13461_v3  ;;  %v1218_v59 = vpop.f32.mrf.mxu3  ;;  %v13607_v58 = vpop.f32.mrf.mxu1  ;;  %v2437_v5 = vsel %vm2434_vm10, %v13437_v31, %v13484_v32  ;;  %v3487_v32 = vld.sshfl [vmem:[#allocation1 + $0x28] sm:$0xff pattern:$0x73625140] }
 0x18e   :  { %v13613_v42 = vadd.f32 %v1218_v59, %v13469_v30  ;;  %v13619_v3 = vpop.permute.xlu2 %2696  ;;  %v13628_v30 = vpop.permute.xlu0 %2692  ;;  %3500 = vrot.lane.b32.xlu2 %v3487_v32, %s12390_s17  ;;  %3749 = vst [vmem:[#allocation1 + $0x20] ss:$4 sm:$0xff] %v12530_v0  ;;  %v3753_v32 = vld.sshfl [vmem:[#allocation1 + $0x18] sm:$0xff pattern:$0x73625140] }
 0x18f   :  { %v13617_v11 = vpop.f32.mrf.mxu0  ;;  %v2707_v59 = vsel %vm2702_vm11, %v13626_v10, %v13619_v3  ;;  %3783 = vst [vmem:[#allocation1] ss:$4 sm:$0xff] %v12535_v1 }
 0x190   :  { %19132 = vst [vmem:[#allocation29_spill] sm:$0xff] %v13617_v11  ;;  %11215 = vmatmul.msk.f32.vlgmr.msrb.gmra.mxu1 %vm102_vm2, %v13405_v49 }
 0x191   :  { %11218 = vmatmul.msk.f32.vlgmr.msrb.gmra.mxu2 %vm102_vm2, %v13405_v49  ;;  %11240 = vmatpush.msk.msrb.mxu1 %vm109_vm1, %v2436_v56 }
 0x192   :  { %11222 = vmatmul.msk.f32.gmra.mxu3 %vm102_vm2, %v13446_v4  ;;  %11250 = vmatmul.msk.f32.vlgmr.msra.gmra.mxu0 %vm102_vm2, %v13549_v17 }
 0x193   :  { %11243 = vmatpush.msk.msrb.mxu2 %vm109_vm1, %v2437_v5  ;;  %11275 = vmatpush.msk.msra.mxu0 %vm109_vm1, %v2707_v59  ;;  %v13659_v5 = vpop.permute.xlu1 %2700 }
 0x194   :  { %v1195_v31 = vpop.f32.mrf.mxu2  ;;  %3764 = vrot.lane.b32.xlu0 %v3753_v32, %s12391_s29 }
 0x195   :  { %v13643_v62 = vadd.f32 %v1195_v31, %v13499_v45  ;;  %v1221_v53 = vpop.f32.mrf.mxu3  ;;  %v13645_v56 = vpop.f32.mrf.mxu1  ;;  %v2448_v45 = vsel %vm2434_vm10, %v13515_v63, %v13539_v47  ;;  %v3754_v31 = vld.sshfl [vmem:[#allocation1 + $0x20] sm:$0xff pattern:$0x73625140]  ;;  %v3756_v32 = vld.sshfl [vmem:[#allocation1 + $0x30] sm:$0xff pattern:$0x73625140] }
 0x196   :  { %19133 = vst [vmem:[#allocation30_spill] sm:$0xff] %v13645_v56  ;;  %v13650_v11 = vadd.f32 %v1221_v53, %v13506_v13  ;;  %v13661_v59 = vpop.permute.xlu0 %2698  ;;  %3766 = vrot.lane.b32.xlu1 %v3754_v31, %s12391_s29  ;;  %v13683_v37 = vpop.permute.xlu2 %2713  ;;  %3517 = vrot.lane.b32.xlu2 %v13576_v9, %s12390_s17  ;;  %s12404_s17 = smov 53  }
 0x197   :  { %v13652_v33 = vpop.f32.mrf.mxu0  ;;  %v2708_v7 = vsel %vm2702_vm11, %v13619_v3, %v13661_v59  ;;  %v2709_v3 = vsel %vm2702_vm11, %v13661_v59, %v13659_v5 }
 0x198   :  { %19134 = vst [vmem:[#allocation31_spill] sm:$0xff] %v13652_v33  ;;  %11216 = vmatmul.msk.f32.gmra.mxu1 %vm102_vm2, %v13446_v4  ;;  %v2440_v33 = vsel %vm2434_vm10, %v13475_v19, %v13517_v57  ;;  %v2441_v19 = vsel %vm2434_vm10, %v13517_v57, %v13515_v63  ;;  %v3757_v57 = vld.sshfl [vmem:[#allocation1 + $0x38] sm:$0xff pattern:$0x73625140]  ;;  %vm4310_vm10 = vcmask 252928  }
 0x199   :  { %11219 = vmatmul.msk.f32.gmra.mxu2 %vm102_vm2, %v13446_v4 }
 0x19a   :  { %11233 = vmatmul.msk.f32.vlgmr.msrb.gmra.mxu3 %vm102_vm2, %v13405_v49  ;;  %11251 = vmatmul.msk.f32.gmra.mxu0 %vm102_vm2, %v13590_v26 }
 0x19b   :  { %11258 = vmatpush.msk.msrb.mxu3 %vm109_vm1, %v2448_v45 }
 0x19c   :  { %v1198_v13 = vpop.f32.mrf.mxu2  ;;  %3770 = vrot.lane.b32.xlu0 %v3756_v32, %s12391_s29 }
 0x19d   :  { %v13671_v47 = vadd.f32 %v1198_v13, %v13527_v35  ;;  %v1310_v53 = vpop.f32.mrf.mxu3  ;;  %v13673_v40 = vpop.f32.mrf.mxu1  ;;  %v13693_v13 = vld [vmem:[%s19069_s1 + $0xa0] sm:$0xff] }
 0x19e   :  { %19135 = vst [vmem:[#allocation32_spill] sm:$0xff] %v13673_v40  ;;  %v13681_v45 = vadd.f32 %v1310_v53, %v13537_v15  ;;  %v13700_v15 = vpop.permute.xlu1 %2956  ;;  %v2955_v31 = vpop.permute.xlu0 %2954  ;;  %3772 = vrot.lane.b32.xlu1 %v3757_v57, %s12391_s29  ;;  %3762 = vrot.lane.b32.xlu2 %v3752_v28, %s12391_s29 }
 0x19f   :  { %v13688_v35 = vpop.f32.mrf.mxu0  ;;  %v2971_v9 = vsel %vm2970_vm12, %v2955_v31, %v13700_v15  ;;  %v13720_v31 = vld.sshfl [vmem:[#allocation1] sm:$0xff pattern:$0x73625140] }
 0x1a0   :  { %11227 = vmatmul.msk.f32.vlgmr.msra.gmra.mxu1 %vm102_vm2, %v13405_v49  ;;  %4015 = vst [vmem:[#allocation1] ss:$4 sm:$0xff] %v12535_v1 }
 0x1a1   :  { %11230 = vmatmul.msk.f32.vlgmr.msra.gmra.mxu2 %vm102_vm2, %v13405_v49  ;;  %11252 = vmatpush.msk.msra.mxu1 %vm109_vm1, %v2440_v33 }
 0x1a2   :  { %11234 = vmatmul.msk.f32.gmra.mxu3 %vm102_vm2, %v13446_v4  ;;  %11264 = vmatmul.msk.f32.vlgmr.msrb.gmra.mxu0 %vm102_vm2, %v13693_v13 }
 0x1a3   :  { %11255 = vmatpush.msk.msra.mxu2 %vm109_vm1, %v2441_v19  ;;  %11289 = vmatpush.msk.msrb.mxu0 %vm109_vm1, %v2971_v9  ;;  %v13725_v19 = vpop.permute.xlu2 %2958  ;;  %v13734_v9 = vld [vmem:[%s19069_s1 + $0xa8] sm:$0xf] }
 0x1a4   :  { %v1287_v63 = vpop.f32.mrf.mxu2 }
 0x1a5   :  { %v13714_v49 = vadd.f32 %v1287_v63, %v13570_v46  ;;  %v1313_v33 = vpop.f32.mrf.mxu3  ;;  %v13716_v53 = vpop.f32.mrf.mxu1 }
 0x1a6   :  { %19136 = vst [vmem:[#allocation33_spill] sm:$0xff] %v13716_v53  ;;  %v13723_v40 = vadd.f32 %v1313_v33, %v13579_v22  ;;  %v2706_v22 = vsel %vm2702_vm11, %v13628_v30, %v13626_v10 }
 0x1a7   :  { %v13729_v46 = vpop.f32.mrf.mxu0  ;;  %v4019_v33 = vld.sshfl [vmem:[#allocation1 + $0x8] sm:$0xff pattern:$0x73625140]  ;;  %v4018_v10 = vld.sshfl [vmem:[#allocation1] sm:$0xff pattern:$0x73625140] }
 0x1a8   :  { %19137 = vst [vmem:[#allocation34_spill] sm:$0xff] %v13729_v46  ;;  %11228 = vmatmul.msk.f32.gmra.mxu1 %vm102_vm2, %v13446_v4  ;;  %4028 = vrot.lane.b32.xlu1 %v4019_v33, %s12392_s21 }
 0x1a9   :  { %11231 = vmatmul.msk.f32.gmra.mxu2 %vm102_vm2, %v13446_v4  ;;  %v2704_v4 = vsel %vm2702_vm11, %v13556_v34, %v13581_v41  ;;  %4026 = vrot.lane.b32.xlu0 %v4018_v10, %s12392_s21  ;;  %v13770_v34 = vpop.permute.xlu1 %2962 }
 0x1aa   :  { %11247 = vmatmul.msk.f32.vlgmr.msra.gmra.mxu3 %vm102_vm2, %v13549_v17  ;;  %11265 = vmatmul.msk.f32.gmra.mxu0 %vm102_vm2, %v13734_v9 }
 0x1ab   :  { %11272 = vmatpush.msk.msra.mxu3 %vm109_vm1, %v2706_v22 }
 0x1ac   :  { %v1290_v28 = vpop.f32.mrf.mxu2 }
 0x1ad   :  { %v13749_v63 = vadd.f32 %v1290_v28, %v13605_v29  ;;  %v1486_v57 = vpop.f32.mrf.mxu3  ;;  %v13751_v32 = vpop.f32.mrf.mxu1  ;;  %v2705_v28 = vsel %vm2702_vm11, %v13581_v41, %v13628_v30  ;;  %v3755_v30 = vld.sshfl [vmem:[#allocation1 + $0x28] sm:$0xff pattern:$0x73625140] }
 0x1ae   :  { %v13757_v53 = vadd.f32 %v1486_v57, %v13613_v42  ;;  %v13763_v29 = vpop.permute.xlu2 %2964  ;;  %v13772_v42 = vpop.permute.xlu0 %2960  ;;  %3768 = vrot.lane.b32.xlu2 %v3755_v30, %s12391_s29  ;;  %4017 = vst [vmem:[#allocation1 + $0x20] ss:$4 sm:$0xff] %v12530_v0  ;;  %v4021_v30 = vld.sshfl [vmem:[#allocation1 + $0x18] sm:$0xff pattern:$0x73625140] }
 0x1af   :  { %v13761_v22 = vpop.f32.mrf.mxu0  ;;  %v2975_v57 = vsel %vm2970_vm12, %v13770_v34, %v13763_v29 }
 0x1b0   :  { %19138 = vst [vmem:[#allocation35_spill] sm:$0xff] %v13761_v22  ;;  %11241 = vmatmul.msk.f32.vlgmr.msrb.gmra.mxu1 %vm102_vm2, %v13549_v17 }
 0x1b1   :  { %11244 = vmatmul.msk.f32.vlgmr.msrb.gmra.mxu2 %vm102_vm2, %v13549_v17  ;;  %11266 = vmatpush.msk.msrb.mxu1 %vm109_vm1, %v2704_v4 }
 0x1b2   :  { %11248 = vmatmul.msk.f32.gmra.mxu3 %vm102_vm2, %v13590_v26  ;;  %11276 = vmatmul.msk.f32.vlgmr.msra.gmra.mxu0 %vm102_vm2, %v13693_v13 }
 0x1b3   :  { %11269 = vmatpush.msk.msrb.mxu2 %vm109_vm1, %v2705_v28  ;;  %11301 = vmatpush.msk.msra.mxu0 %vm109_vm1, %v2975_v57  ;;  %v13803_v28 = vpop.permute.xlu1 %2968 }
 0x1b4   :  { %v1463_v41 = vpop.f32.mrf.mxu2  ;;  %4032 = vrot.lane.b32.xlu0 %v4021_v30, %s12392_s21 }
 0x1b5   :  { %v13787_v33 = vadd.f32 %v1463_v41, %v13643_v62  ;;  %v1489_v10 = vpop.f32.mrf.mxu3  ;;  %v13789_v4 = vpop.f32.mrf.mxu1  ;;  %v2716_v62 = vsel %vm2702_vm11, %v13659_v5, %v13683_v37  ;;  %v4022_v41 = vld.sshfl [vmem:[#allocation1 + $0x20] sm:$0xff pattern:$0x73625140]  ;;  %v4025_v59 = vld.sshfl [vmem:[#allocation1 + $0x38] sm:$0xff pattern:$0x73625140] }
 0x1b6   :  { %19139 = vst [vmem:[#allocation36_spill] sm:$0xff] %v13789_v4  ;;  %v13794_v22 = vadd.f32 %v1489_v10, %v13650_v11  ;;  %v13805_v57 = vpop.permute.xlu0 %2966  ;;  %4034 = vrot.lane.b32.xlu1 %v4022_v41, %s12392_s21  ;;  %v4020_v4 = vld.sshfl [vmem:[#allocation1 + $0x10] sm:$0xff pattern:$0x73625140]  ;;  %v13827_v56 = vpop.permute.xlu2 %2981  ;;  %3785 = vrot.lane.b32.xlu2 %v13720_v31, %s12391_s29  ;;  %s12400_s29 = smov 66  }
 0x1b7   :  { %v13796_v52 = vpop.f32.mrf.mxu0  ;;  %4051 = vst [vmem:[#allocation1] ss:$4 sm:$0xff] %v12535_v1  ;;  %v4024_v30 = vld.sshfl [vmem:[#allocation1 + $0x30] sm:$0xff pattern:$0x73625140]  ;;  %v2976_v61 = vsel %vm2970_vm12, %v13763_v29, %v13805_v57  ;;  %v2977_v29 = vsel %vm2970_vm12, %v13805_v57, %v13803_v28 }
 0x1b8   :  { %19140 = vst [vmem:[#allocation37_spill] sm:$0xff] %v13796_v52  ;;  %11242 = vmatmul.msk.f32.gmra.mxu1 %vm102_vm2, %v13590_v26 }
 0x1b9   :  { %11245 = vmatmul.msk.f32.gmra.mxu2 %vm102_vm2, %v13590_v26 }
 0x1ba   :  { %11259 = vmatmul.msk.f32.vlgmr.msrb.gmra.mxu3 %vm102_vm2, %v13549_v17  ;;  %11277 = vmatmul.msk.f32.gmra.mxu0 %vm102_vm2, %v13734_v9 }
 0x1bb   :  { %11284 = vmatpush.msk.msrb.mxu3 %vm109_vm1, %v2716_v62 }
 0x1bc   :  { %v1466_v11 = vpop.f32.mrf.mxu2  ;;  %4038 = vrot.lane.b32.xlu0 %v4024_v30, %s12392_s21 }
 0x1bd   :  { %v13815_v37 = vadd.f32 %v1466_v11, %v13671_v47  ;;  %v1578_v10 = vpop.f32.mrf.mxu3  ;;  %v13817_v52 = vpop.f32.mrf.mxu1  ;;  %v13837_v11 = vld [vmem:[%s19069_s1 + $0xb0] sm:$0xff] }
 0x1be   :  { %19141 = vst [vmem:[#allocation38_spill] sm:$0xff] %v13817_v52  ;;  %v13825_v62 = vadd.f32 %v1578_v10, %v13681_v45  ;;  %v13844_v45 = vpop.permute.xlu1 %3224  ;;  %v3223_v41 = vpop.permute.xlu0 %3222  ;;  %4040 = vrot.lane.b32.xlu1 %v4025_v59, %s12392_s21  ;;  %4030 = vrot.lane.b32.xlu2 %v4020_v4, %s12392_s21 }
 0x1bf   :  { %v13832_v47 = vpop.f32.mrf.mxu0  ;;  %v3239_v31 = vsel %vm3238_vm13, %v3223_v41, %v13844_v45  ;;  %v13864_v41 = vld.sshfl [vmem:[#allocation1] sm:$0xff pattern:$0x73625140] }
 0x1c0   :  { %11253 = vmatmul.msk.f32.vlgmr.msra.gmra.mxu1 %vm102_vm2, %v13549_v17  ;;  %4283 = vst [vmem:[#allocation1] ss:$4 sm:$0xff] %v12535_v1 }
 0x1c1   :  { %11256 = vmatmul.msk.f32.vlgmr.msra.gmra.mxu2 %vm102_vm2, %v13549_v17  ;;  %11278 = vmatpush.msk.msra.mxu1 %vm109_vm1, %v2708_v7 }
 0x1c2   :  { %11260 = vmatmul.msk.f32.gmra.mxu3 %vm102_vm2, %v13590_v26  ;;  %11290 = vmatmul.msk.f32.vlgmr.msrb.gmra.mxu0 %vm102_vm2, %v13837_v11 }
 0x1c3   :  { %11281 = vmatpush.msk.msra.mxu2 %vm109_vm1, %v2709_v3  ;;  %11315 = vmatpush.msk.msrb.mxu0 %vm109_vm1, %v3239_v31  ;;  %v13869_v3 = vpop.permute.xlu2 %3226  ;;  %v13878_v31 = vld [vmem:[%s19069_s1 + $0xb8] sm:$0xf] }
 0x1c4   :  { %v1555_v5 = vpop.f32.mrf.mxu2 }
 0x1c5   :  { %v13858_v17 = vadd.f32 %v1555_v5, %v13714_v49  ;;  %v1581_v7 = vpop.f32.mrf.mxu3  ;;  %v13860_v10 = vpop.f32.mrf.mxu1 }
 0x1c6   :  { %19142 = vst [vmem:[#allocation39_spill] sm:$0xff] %v13860_v10  ;;  %v13867_v52 = vadd.f32 %v1581_v7, %v13723_v40  ;;  %v2974_v40 = vsel %vm2970_vm12, %v13772_v42, %v13770_v34 }
 0x1c7   :  { %v13873_v49 = vpop.f32.mrf.mxu0  ;;  %v4287_v7 = vld.sshfl [vmem:[#allocation1 + $0x8] sm:$0xff pattern:$0x73625140]  ;;  %v4286_v34 = vld.sshfl [vmem:[#allocation1] sm:$0xff pattern:$0x73625140] }
 0x1c8   :  { %19143 = vst [vmem:[#allocation40_spill] sm:$0xff] %v13873_v49  ;;  %11254 = vmatmul.msk.f32.gmra.mxu1 %vm102_vm2, %v13590_v26  ;;  %4296 = vrot.lane.b32.xlu1 %v4287_v7, %s12393_s16 }
 0x1c9   :  { %11257 = vmatmul.msk.f32.gmra.mxu2 %vm102_vm2, %v13590_v26  ;;  %v2972_v26 = vsel %vm2970_vm12, %v13700_v15, %v13725_v19  ;;  %4294 = vrot.lane.b32.xlu0 %v4286_v34, %s12393_s16  ;;  %v13914_v15 = vpop.permute.xlu1 %3230 }
 0x1ca   :  { %11273 = vmatmul.msk.f32.vlgmr.msra.gmra.mxu3 %vm102_vm2, %v13693_v13  ;;  %11291 = vmatmul.msk.f32.gmra.mxu0 %vm102_vm2, %v13878_v31 }
 0x1cb   :  { %11298 = vmatpush.msk.msra.mxu3 %vm109_vm1, %v2974_v40 }
 0x1cc   :  { %v1558_v4 = vpop.f32.mrf.mxu2 }
 0x1cd   :  { %v13893_v5 = vadd.f32 %v1558_v4, %v13749_v63  ;;  %v1754_v59 = vpop.f32.mrf.mxu3  ;;  %v13895_v30 = vpop.f32.mrf.mxu1  ;;  %v2973_v4 = vsel %vm2970_vm12, %v13725_v19, %v13772_v42  ;;  %v4023_v42 = vld.sshfl [vmem:[#allocation1 + $0x28] sm:$0xff pattern:$0x73625140] }
 0x1ce   :  { %v13901_v10 = vadd.f32 %v1754_v59, %v13757_v53  ;;  %v13907_v63 = vpop.permute.xlu2 %3232  ;;  %v13916_v53 = vpop.permute.xlu0 %3228  ;;  %4036 = vrot.lane.b32.xlu2 %v4023_v42, %s12392_s21  ;;  %4285 = vst [vmem:[#allocation1 + $0x20] ss:$4 sm:$0xff] %v12530_v0  ;;  %v4289_v42 = vld.sshfl [vmem:[#allocation1 + $0x18] sm:$0xff pattern:$0x73625140] }
 0x1cf   :  { %v13905_v40 = vpop.f32.mrf.mxu0  ;;  %v3243_v59 = vsel %vm3238_vm13, %v13914_v15, %v13907_v63 }
 0x1d0   :  { %19144 = vst [vmem:[#allocation41_spill] sm:$0xff] %v13905_v40  ;;  %11267 = vmatmul.msk.f32.vlgmr.msrb.gmra.mxu1 %vm102_vm2, %v13693_v13 }
 0x1d1   :  { %11270 = vmatmul.msk.f32.vlgmr.msrb.gmra.mxu2 %vm102_vm2, %v13693_v13  ;;  %11292 = vmatpush.msk.msrb.mxu1 %vm109_vm1, %v2972_v26 }
 0x1d2   :  { %11274 = vmatmul.msk.f32.gmra.mxu3 %vm102_vm2, %v13734_v9  ;;  %11302 = vmatmul.msk.f32.vlgmr.msra.gmra.mxu0 %vm102_vm2, %v13837_v11 }
 0x1d3   :  { %11295 = vmatpush.msk.msrb.mxu2 %vm109_vm1, %v2973_v4  ;;  %11327 = vmatpush.msk.msra.mxu0 %vm109_vm1, %v3243_v59  ;;  %v13947_v4 = vpop.permute.xlu1 %3236 }
 0x1d4   :  { %v1731_v19 = vpop.f32.mrf.mxu2  ;;  %4300 = vrot.lane.b32.xlu0 %v4289_v42, %s12393_s16 }
 0x1d5   :  { %v13931_v7 = vadd.f32 %v1731_v19, %v13787_v33  ;;  %v1757_v34 = vpop.f32.mrf.mxu3  ;;  %v13933_v26 = vpop.f32.mrf.mxu1  ;;  %v2984_v33 = vsel %vm2970_vm12, %v13803_v28, %v13827_v56  ;;  %v4290_v19 = vld.sshfl [vmem:[#allocation1 + $0x20] sm:$0xff pattern:$0x73625140]  ;;  %v4293_v57 = vld.sshfl [vmem:[#allocation1 + $0x38] sm:$0xff pattern:$0x73625140] }
 0x1d6   :  { %19145 = vst [vmem:[#allocation42_spill] sm:$0xff] %v13933_v26  ;;  %v13938_v40 = vadd.f32 %v1757_v34, %v13794_v22  ;;  %v13949_v59 = vpop.permute.xlu0 %3234  ;;  %4302 = vrot.lane.b32.xlu1 %v4290_v19, %s12393_s16  ;;  %v4288_v26 = vld.sshfl [vmem:[#allocation1 + $0x10] sm:$0xff pattern:$0x73625140]  ;;  %v13971_v20 = vpop.permute.xlu2 %3249  ;;  %4053 = vrot.lane.b32.xlu2 %v13864_v41, %s12392_s21  ;;  %vm4578_vm12 = vcmask 244736   ;;  %s12416_s21 = smov 38  }
 0x1d7   :  { %v13940_v49 = vpop.f32.mrf.mxu0  ;;  %4319 = vst [vmem:[#allocation1] ss:$4 sm:$0xff] %v12535_v1  ;;  %v4292_v42 = vld.sshfl [vmem:[#allocation1 + $0x30] sm:$0xff pattern:$0x73625140]  ;;  %v3244_v12 = vsel %vm3238_vm13, %v13907_v63, %v13949_v59  ;;  %v3245_v63 = vsel %vm3238_vm13, %v13949_v59, %v13947_v4 }
 0x1d8   :  { %19146 = vst [vmem:[#allocation43_spill] sm:$0xff] %v13940_v49  ;;  %11268 = vmatmul.msk.f32.gmra.mxu1 %vm102_vm2, %v13734_v9 }
 0x1d9   :  { %11271 = vmatmul.msk.f32.gmra.mxu2 %vm102_vm2, %v13734_v9 }
 0x1da   :  { %11285 = vmatmul.msk.f32.vlgmr.msrb.gmra.mxu3 %vm102_vm2, %v13693_v13  ;;  %11303 = vmatmul.msk.f32.gmra.mxu0 %vm102_vm2, %v13878_v31 }
 0x1db   :  { %11310 = vmatpush.msk.msrb.mxu3 %vm109_vm1, %v2984_v33 }
 0x1dc   :  { %v1734_v22 = vpop.f32.mrf.mxu2  ;;  %4306 = vrot.lane.b32.xlu0 %v4292_v42, %s12393_s16 }
 0x1dd   :  { %v13959_v56 = vadd.f32 %v1734_v22, %v13815_v37  ;;  %v1846_v34 = vpop.f32.mrf.mxu3  ;;  %v13961_v49 = vpop.f32.mrf.mxu1  ;;  %v13981_v22 = vld [vmem:[%s19069_s1 + $0xc0] sm:$0xff] }
 0x1de   :  { %19147 = vst [vmem:[#allocation44_spill] sm:$0xff] %v13961_v49  ;;  %v13969_v33 = vadd.f32 %v1846_v34, %v13825_v62  ;;  %v13988_v62 = vpop.permute.xlu1 %3492  ;;  %v3491_v19 = vpop.permute.xlu0 %3490  ;;  %4308 = vrot.lane.b32.xlu1 %v4293_v57, %s12393_s16  ;;  %4298 = vrot.lane.b32.xlu2 %v4288_v26, %s12393_s16 }
 0x1df   :  { %v13976_v37 = vpop.f32.mrf.mxu0  ;;  %v3507_v41 = vsel %vm3506_vm14, %v3491_v19, %v13988_v62  ;;  %v14008_v19 = vld.sshfl [vmem:[#allocation1] sm:$0xff pattern:$0x73625140] }
 0x1e0   :  { %11279 = vmatmul.msk.f32.vlgmr.msra.gmra.mxu1 %vm102_vm2, %v13693_v13  ;;  %4551 = vst [vmem:[#allocation1] ss:$4 sm:$0xff] %v12535_v1 }
 0x1e1   :  { %11282 = vmatmul.msk.f32.vlgmr.msra.gmra.mxu2 %vm102_vm2, %v13693_v13  ;;  %11304 = vmatpush.msk.msra.mxu1 %vm109_vm1, %v2976_v61 }
 0x1e2   :  { %11286 = vmatmul.msk.f32.gmra.mxu3 %vm102_vm2, %v13734_v9  ;;  %11316 = vmatmul.msk.f32.vlgmr.msrb.gmra.mxu0 %vm102_vm2, %v13981_v22 }
 0x1e3   :  { %11307 = vmatpush.msk.msra.mxu2 %vm109_vm1, %v2977_v29  ;;  %11341 = vmatpush.msk.msrb.mxu0 %vm109_vm1, %v3507_v41  ;;  %v14013_v29 = vpop.permute.xlu2 %3494  ;;  %v14022_v41 = vld [vmem:[%s19069_s1 + $0xc8] sm:$0xf] }
 0x1e4   :  { %v1823_v28 = vpop.f32.mrf.mxu2 }
 0x1e5   :  { %v14002_v13 = vadd.f32 %v1823_v28, %v13858_v17  ;;  %v1849_v61 = vpop.f32.mrf.mxu3  ;;  %v14004_v34 = vpop.f32.mrf.mxu1 }
 0x1e6   :  { %19148 = vst [vmem:[#allocation45_spill] sm:$0xff] %v14004_v34  ;;  %v14011_v49 = vadd.f32 %v1849_v61, %v13867_v52  ;;  %v3242_v52 = vsel %vm3238_vm13, %v13916_v53, %v13914_v15 }
 0x1e7   :  { %v14017_v17 = vpop.f32.mrf.mxu0  ;;  %v4555_v61 = vld.sshfl [vmem:[#allocation1 + $0x8] sm:$0xff pattern:$0x73625140]  ;;  %v4554_v15 = vld.sshfl [vmem:[#allocation1] sm:$0xff pattern:$0x73625140] }
 0x1e8   :  { %19149 = vst [vmem:[#allocation46_spill] sm:$0xff] %v14017_v17  ;;  %11280 = vmatmul.msk.f32.gmra.mxu1 %vm102_vm2, %v13734_v9  ;;  %4564 = vrot.lane.b32.xlu1 %v4555_v61, %s12394_s26 }
 0x1e9   :  { %11283 = vmatmul.msk.f32.gmra.mxu2 %vm102_vm2, %v13734_v9  ;;  %v3240_v9 = vsel %vm3238_vm13, %v13844_v45, %v13869_v3  ;;  %4562 = vrot.lane.b32.xlu0 %v4554_v15, %s12394_s26  ;;  %v14058_v45 = vpop.permute.xlu1 %3498 }
 0x1ea   :  { %11299 = vmatmul.msk.f32.vlgmr.msra.gmra.mxu3 %vm102_vm2, %v13837_v11  ;;  %11317 = vmatmul.msk.f32.gmra.mxu0 %vm102_vm2, %v14022_v41 }
 0x1eb   :  { %11324 = vmatpush.msk.msra.mxu3 %vm109_vm1, %v3242_v52 }
 0x1ec   :  { %v1826_v26 = vpop.f32.mrf.mxu2 }
 0x1ed   :  { %v14037_v28 = vadd.f32 %v1826_v26, %v13893_v5  ;;  %v2022_v57 = vpop.f32.mrf.mxu3  ;;  %v14039_v42 = vpop.f32.mrf.mxu1  ;;  %v3241_v26 = vsel %vm3238_vm13, %v13869_v3, %v13916_v53  ;;  %v4291_v53 = vld.sshfl [vmem:[#allocation1 + $0x28] sm:$0xff pattern:$0x73625140] }
 0x1ee   :  { %v14045_v34 = vadd.f32 %v2022_v57, %v13901_v10  ;;  %v14051_v5 = vpop.permute.xlu2 %3500  ;;  %v14060_v10 = vpop.permute.xlu0 %3496  ;;  %4304 = vrot.lane.b32.xlu2 %v4291_v53, %s12393_s16  ;;  %4553 = vst [vmem:[#allocation1 + $0x20] ss:$4 sm:$0xff] %v12530_v0  ;;  %v4557_v53 = vld.sshfl [vmem:[#allocation1 + $0x18] sm:$0xff pattern:$0x73625140] }
 0x1ef   :  { %v14049_v52 = vpop.f32.mrf.mxu0  ;;  %v3511_v57 = vsel %vm3506_vm14, %v14058_v45, %v14051_v5 }
 0x1f0   :  { %19150 = vst [vmem:[#allocation47_spill] sm:$0xff] %v14049_v52  ;;  %11293 = vmatmul.msk.f32.vlgmr.msrb.gmra.mxu1 %vm102_vm2, %v13837_v11 }
 0x1f1   :  { %11296 = vmatmul.msk.f32.vlgmr.msrb.gmra.mxu2 %vm102_vm2, %v13837_v11  ;;  %11318 = vmatpush.msk.msrb.mxu1 %vm109_vm1, %v3240_v9 }
 0x1f2   :  { %11300 = vmatmul.msk.f32.gmra.mxu3 %vm102_vm2, %v13878_v31  ;;  %11328 = vmatmul.msk.f32.vlgmr.msra.gmra.mxu0 %vm102_vm2, %v13981_v22 }
 0x1f3   :  { %11321 = vmatpush.msk.msrb.mxu2 %vm109_vm1, %v3241_v26  ;;  %11353 = vmatpush.msk.msra.mxu0 %vm109_vm1, %v3511_v57  ;;  %v14091_v26 = vpop.permute.xlu1 %3504 }
 0x1f4   :  { %v1999_v3 = vpop.f32.mrf.mxu2  ;;  %4568 = vrot.lane.b32.xlu0 %v4557_v53, %s12394_s26 }
 0x1f5   :  { %v14075_v61 = vadd.f32 %v1999_v3, %v13931_v7  ;;  %v2025_v15 = vpop.f32.mrf.mxu3  ;;  %v14077_v9 = vpop.f32.mrf.mxu1  ;;  %v3252_v7 = vsel %vm3238_vm13, %v13947_v4, %v13971_v20  ;;  %v4558_v3 = vld.sshfl [vmem:[#allocation1 + $0x20] sm:$0xff pattern:$0x73625140]  ;;  %v4561_v59 = vld.sshfl [vmem:[#allocation1 + $0x38] sm:$0xff pattern:$0x73625140] }
 0x1f6   :  { %19151 = vst [vmem:[#allocation48_spill] sm:$0xff] %v14077_v9  ;;  %v14082_v52 = vadd.f32 %v2025_v15, %v13938_v40  ;;  %v14093_v57 = vpop.permute.xlu0 %3502  ;;  %4570 = vrot.lane.b32.xlu1 %v4558_v3, %s12394_s26  ;;  %v4556_v9 = vld.sshfl [vmem:[#allocation1 + $0x10] sm:$0xff pattern:$0x73625140]  ;;  %v14115_v46 = vpop.permute.xlu2 %3517  ;;  %4321 = vrot.lane.b32.xlu2 %v14008_v19, %s12393_s16  ;;  %vm4846_vm13 = vcmask 236544   ;;  %s12402_s16 = smov 113  }
 0x1f7   :  { %v14084_v17 = vpop.f32.mrf.mxu0  ;;  %4587 = vst [vmem:[#allocation1] ss:$4 sm:$0xff] %v12535_v1  ;;  %v4560_v53 = vld.sshfl [vmem:[#allocation1 + $0x30] sm:$0xff pattern:$0x73625140]  ;;  %v3512_v23 = vsel %vm3506_vm14, %v14051_v5, %v14093_v57  ;;  %v3513_v5 = vsel %vm3506_vm14, %v14093_v57, %v14091_v26 }
 0x1f8   :  { %19152 = vst [vmem:[#allocation49_spill] sm:$0xff] %v14084_v17  ;;  %11294 = vmatmul.msk.f32.gmra.mxu1 %vm102_vm2, %v13878_v31 }
 0x1f9   :  { %11297 = vmatmul.msk.f32.gmra.mxu2 %vm102_vm2, %v13878_v31 }
 0x1fa   :  { %11311 = vmatmul.msk.f32.vlgmr.msrb.gmra.mxu3 %vm102_vm2, %v13837_v11  ;;  %11329 = vmatmul.msk.f32.gmra.mxu0 %vm102_vm2, %v14022_v41 }
 0x1fb   :  { %11336 = vmatpush.msk.msrb.mxu3 %vm109_vm1, %v3252_v7 }
 0x1fc   :  { %v2002_v40 = vpop.f32.mrf.mxu2  ;;  %4574 = vrot.lane.b32.xlu0 %v4560_v53, %s12394_s26 }
 0x1fd   :  { %v14103_v20 = vadd.f32 %v2002_v40, %v13959_v56  ;;  %v2114_v15 = vpop.f32.mrf.mxu3  ;;  %v14105_v17 = vpop.f32.mrf.mxu1  ;;  %v14125_v40 = vld [vmem:[%s19069_s1 + $0xd0] sm:$0xff] }
 0x1fe   :  { %19153 = vst [vmem:[#allocation50_spill] sm:$0xff] %v14105_v17  ;;  %v14113_v7 = vadd.f32 %v2114_v15, %v13969_v33  ;;  %v14132_v33 = vpop.permute.xlu1 %3760  ;;  %v3759_v3 = vpop.permute.xlu0 %3758  ;;  %4576 = vrot.lane.b32.xlu1 %v4561_v59, %s12394_s26  ;;  %4566 = vrot.lane.b32.xlu2 %v4556_v9, %s12394_s26 }
 0x1ff   :  { %v14120_v56 = vpop.f32.mrf.mxu0  ;;  %v3775_v19 = vsel %vm3774_vm15, %v3759_v3, %v14132_v33  ;;  %v14152_v3 = vld.sshfl [vmem:[#allocation1] sm:$0xff pattern:$0x73625140] }
 0x200   :  { %11305 = vmatmul.msk.f32.vlgmr.msra.gmra.mxu1 %vm102_vm2, %v13837_v11  ;;  %4819 = vst [vmem:[#allocation1] ss:$4 sm:$0xff] %v12535_v1 }
 0x201   :  { %11308 = vmatmul.msk.f32.vlgmr.msra.gmra.mxu2 %vm102_vm2, %v13837_v11  ;;  %11330 = vmatpush.msk.msra.mxu1 %vm109_vm1, %v3244_v12 }
 0x202   :  { %11312 = vmatmul.msk.f32.gmra.mxu3 %vm102_vm2, %v13878_v31  ;;  %11342 = vmatmul.msk.f32.vlgmr.msrb.gmra.mxu0 %vm102_vm2, %v14125_v40 }
 0x203   :  { %11333 = vmatpush.msk.msra.mxu2 %vm109_vm1, %v3245_v63  ;;  %11367 = vmatpush.msk.msrb.mxu0 %vm109_vm1, %v3775_v19  ;;  %v14157_v63 = vpop.permute.xlu2 %3762  ;;  %v14166_v19 = vld [vmem:[%s19069_s1 + $0xd8] sm:$0xf] }
 0x204   :  { %v2091_v4 = vpop.f32.mrf.mxu2 }
 0x205   :  { %v14146_v11 = vadd.f32 %v2091_v4, %v14002_v13  ;;  %v2117_v12 = vpop.f32.mrf.mxu3  ;;  %v14148_v15 = vpop.f32.mrf.mxu1 }
 0x206   :  { %19154 = vst [vmem:[#allocation51_spill] sm:$0xff] %v14148_v15  ;;  %v14155_v17 = vadd.f32 %v2117_v12, %v14011_v49  ;;  %v3510_v49 = vsel %vm3506_vm14, %v14060_v10, %v14058_v45 }
 0x207   :  { %v14161_v13 = vpop.f32.mrf.mxu0  ;;  %v4823_v12 = vld.sshfl [vmem:[#allocation1 + $0x8] sm:$0xff pattern:$0x73625140]  ;;  %v4822_v45 = vld.sshfl [vmem:[#allocation1] sm:$0xff pattern:$0x73625140] }
 0x208   :  { %19155 = vst [vmem:[#allocation52_spill] sm:$0xff] %v14161_v13  ;;  %11306 = vmatmul.msk.f32.gmra.mxu1 %vm102_vm2, %v13878_v31  ;;  %4832 = vrot.lane.b32.xlu1 %v4823_v12, %s12395_s18 }
 0x209   :  { %11309 = vmatmul.msk.f32.gmra.mxu2 %vm102_vm2, %v13878_v31  ;;  %v3508_v31 = vsel %vm3506_vm14, %v13988_v62, %v14013_v29  ;;  %4830 = vrot.lane.b32.xlu0 %v4822_v45, %s12395_s18  ;;  %v14202_v62 = vpop.permute.xlu1 %3766 }
 0x20a   :  { %11325 = vmatmul.msk.f32.vlgmr.msra.gmra.mxu3 %vm102_vm2, %v13981_v22  ;;  %11343 = vmatmul.msk.f32.gmra.mxu0 %vm102_vm2, %v14166_v19 }
 0x20b   :  { %11350 = vmatpush.msk.msra.mxu3 %vm109_vm1, %v3510_v49 }
 0x20c   :  { %v2094_v9 = vpop.f32.mrf.mxu2 }
 0x20d   :  { %v14181_v4 = vadd.f32 %v2094_v9, %v14037_v28  ;;  %v2290_v59 = vpop.f32.mrf.mxu3  ;;  %v14183_v53 = vpop.f32.mrf.mxu1  ;;  %v3509_v9 = vsel %vm3506_vm14, %v14013_v29, %v14060_v10  ;;  %v4559_v10 = vld.sshfl [vmem:[#allocation1 + $0x28] sm:$0xff pattern:$0x73625140] }
 0x20e   :  { %19156 = vst [vmem:[#allocation53_spill] sm:$0xff] %v14183_v53  ;;  %v14189_v15 = vadd.f32 %v2290_v59, %v14045_v34  ;;  %v14195_v28 = vpop.permute.xlu2 %3768  ;;  %v14204_v34 = vpop.permute.xlu0 %3764  ;;  %4572 = vrot.lane.b32.xlu2 %v4559_v10, %s12394_s26  ;;  %v4825_v10 = vld.sshfl [vmem:[#allocation1 + $0x18] sm:$0xff pattern:$0x73625140] }
 0x20f   :  { %v14193_v49 = vpop.f32.mrf.mxu0  ;;  %v3779_v59 = vsel %vm3774_vm15, %v14202_v62, %v14195_v28  ;;  %4821 = vst [vmem:[#allocation1 + $0x20] ss:$4 sm:$0xff] %v12530_v0 }
 0x210   :  { %19157 = vst [vmem:[#allocation54_spill] sm:$0xff] %v14193_v49  ;;  %11319 = vmatmul.msk.f32.vlgmr.msrb.gmra.mxu1 %vm102_vm2, %v13981_v22 }
 0x211   :  { %11322 = vmatmul.msk.f32.vlgmr.msrb.gmra.mxu2 %vm102_vm2, %v13981_v22  ;;  %11344 = vmatpush.msk.msrb.mxu1 %vm109_vm1, %v3508_v31 }
 0x212   :  { %11326 = vmatmul.msk.f32.gmra.mxu3 %vm102_vm2, %v14022_v41  ;;  %11354 = vmatmul.msk.f32.vlgmr.msra.gmra.mxu0 %vm102_vm2, %v14125_v40 }
 0x213   :  { %11347 = vmatpush.msk.msrb.mxu2 %vm109_vm1, %v3509_v9  ;;  %11379 = vmatpush.msk.msra.mxu0 %vm109_vm1, %v3779_v59  ;;  %v14235_v9 = vpop.permute.xlu1 %3772 }
 0x214   :  { %v2267_v29 = vpop.f32.mrf.mxu2  ;;  %4836 = vrot.lane.b32.xlu0 %v4825_v10, %s12395_s18 }
 0x215   :  { %v14219_v12 = vadd.f32 %v2267_v29, %v14075_v61  ;;  %v2293_v45 = vpop.f32.mrf.mxu3  ;;  %v14221_v31 = vpop.f32.mrf.mxu1  ;;  %v3520_v61 = vsel %vm3506_vm14, %v14091_v26, %v14115_v46  ;;  %vm5114_vm14 = vcmask 228352  }
 0x216   :  { %19158 = vst [vmem:[#allocation55_spill] sm:$0xff] %v14221_v31  ;;  %v14226_v49 = vadd.f32 %v2293_v45, %v14082_v52  ;;  %v14237_v59 = vpop.permute.xlu0 %3770  ;;  %v4826_v29 = vld.sshfl [vmem:[#allocation1 + $0x20] sm:$0xff pattern:$0x73625140]  ;;  %v14259_v24 = vpop.permute.xlu2 %3785  ;;  %4589 = vrot.lane.b32.xlu2 %v14152_v3, %s12394_s26  ;;  %s12437_s26 = smov 68  }
 0x217   :  { %v14228_v13 = vpop.f32.mrf.mxu0  ;;  %4838 = vrot.lane.b32.xlu1 %v4826_v29, %s12395_s18  ;;  %v4824_v31 = vld.sshfl [vmem:[#allocation1 + $0x10] sm:$0xff pattern:$0x73625140]  ;;  %v4829_v57 = vld.sshfl [vmem:[#allocation1 + $0x38] sm:$0xff pattern:$0x73625140] }
 0x218   :  { %19159 = vst [vmem:[#allocation56_spill] sm:$0xff] %v14228_v13  ;;  %11320 = vmatmul.msk.f32.gmra.mxu1 %vm102_vm2, %v14022_v41  ;;  %v4828_v10 = vld.sshfl [vmem:[#allocation1 + $0x30] sm:$0xff pattern:$0x73625140] }
 0x219   :  { %11323 = vmatmul.msk.f32.gmra.mxu2 %vm102_vm2, %v14022_v41  ;;  %4855 = vst [vmem:[#allocation1] ss:$4 sm:$0xff] %v12535_v1 }
 0x21a   :  { %11337 = vmatmul.msk.f32.vlgmr.msrb.gmra.mxu3 %vm102_vm2, %v13981_v22  ;;  %11355 = vmatmul.msk.f32.gmra.mxu0 %vm102_vm2, %v14166_v19 }
 0x21b   :  { %11362 = vmatpush.msk.msrb.mxu3 %vm109_vm1, %v3520_v61 }
 0x21c   :  { %v2270_v52 = vpop.f32.mrf.mxu2  ;;  %4842 = vrot.lane.b32.xlu0 %v4828_v10, %s12395_s18 }
 0x21d   :  { %v14247_v46 = vadd.f32 %v2270_v52, %v14103_v20  ;;  %v2382_v45 = vpop.f32.mrf.mxu3  ;;  %v14249_v13 = vpop.f32.mrf.mxu1  ;;  %v14269_v52 = vld [vmem:[%s19069_s1 + $0xe0] sm:$0xff] }
 0x21e   :  { %19160 = vst [vmem:[#allocation57_spill] sm:$0xff] %v14249_v13  ;;  %v14257_v61 = vadd.f32 %v2382_v45, %v14113_v7  ;;  %v14276_v7 = vpop.permute.xlu1 %4028  ;;  %v4027_v29 = vpop.permute.xlu0 %4026  ;;  %4834 = vrot.lane.b32.xlu2 %v4824_v31, %s12395_s18 }
 0x21f   :  { %v14264_v20 = vpop.f32.mrf.mxu0  ;;  %v4043_v3 = vsel %vm4042_vm9, %v4027_v29, %v14276_v7  ;;  %4844 = vrot.lane.b32.xlu1 %v4829_v57, %s12395_s18 }
 0x220   :  { %11331 = vmatmul.msk.f32.vlgmr.msra.gmra.mxu1 %vm102_vm2, %v13981_v22  ;;  %v4856_v29 = vld.sshfl [vmem:[#allocation1] sm:$0xff pattern:$0x73625140] }
 0x221   :  { %11334 = vmatmul.msk.f32.vlgmr.msra.gmra.mxu2 %vm102_vm2, %v13981_v22  ;;  %11356 = vmatpush.msk.msra.mxu1 %vm109_vm1, %v3512_v23  ;;  %5087 = vst [vmem:[#allocation1] ss:$4 sm:$0xff] %v12535_v1 }
 0x222   :  { %11338 = vmatmul.msk.f32.gmra.mxu3 %vm102_vm2, %v14022_v41  ;;  %11368 = vmatmul.msk.f32.vlgmr.msrb.gmra.mxu0 %vm102_vm2, %v14269_v52 }
 0x223   :  { %11359 = vmatpush.msk.msra.mxu2 %vm109_vm1, %v3513_v5  ;;  %11393 = vmatpush.msk.msrb.mxu0 %vm109_vm1, %v4043_v3  ;;  %v14299_v5 = vpop.permute.xlu2 %4030 }
 0x224   :  { %v2359_v26 = vpop.f32.mrf.mxu2 }
 0x225   :  { %v14290_v22 = vadd.f32 %v2359_v26, %v14146_v11  ;;  %v2385_v23 = vpop.f32.mrf.mxu3  ;;  %v14292_v45 = vpop.f32.mrf.mxu1  ;;  %v14308_v11 = vld [vmem:[%s19069_s1 + $0xe8] sm:$0xf] }
 0x226   :  { %19161 = vst [vmem:[#allocation58_spill] sm:$0xff] %v14292_v45  ;;  %v14297_v13 = vadd.f32 %v2385_v23, %v14155_v17  ;;  %v3778_v17 = vsel %vm3774_vm15, %v14204_v34, %v14202_v62 }
 0x227   :  { %v14303_v3 = vpop.f32.mrf.mxu0 }
 0x228   :  { %19162 = vst [vmem:[#allocation59_spill] sm:$0xff] %v14303_v3  ;;  %11332 = vmatmul.msk.f32.gmra.mxu1 %vm102_vm2, %v14022_v41  ;;  %v5091_v23 = vld.sshfl [vmem:[#allocation1 + $0x8] sm:$0xff pattern:$0x73625140]  ;;  %v14344_v3 = vpop.permute.xlu0 %4032 }
 0x229   :  { %11335 = vmatmul.msk.f32.gmra.mxu2 %vm102_vm2, %v14022_v41  ;;  %v5090_v62 = vld.sshfl [vmem:[#allocation1] sm:$0xff pattern:$0x73625140]  ;;  %v3776_v41 = vsel %vm3774_vm15, %v14132_v33, %v14157_v63  ;;  %5100 = vrot.lane.b32.xlu1 %v5091_v23, %s12396_s30  ;;  %v4035_v33 = vpop.permute.xlu1 %4034 }
 0x22a   :  { %11351 = vmatmul.msk.f32.vlgmr.msra.gmra.mxu3 %vm102_vm2, %v14125_v40  ;;  %11369 = vmatmul.msk.f32.gmra.mxu0 %vm102_vm2, %v14308_v11 }
 0x22b   :  { %11376 = vmatpush.msk.msra.mxu3 %vm109_vm1, %v3778_v17  ;;  %5098 = vrot.lane.b32.xlu0 %v5090_v62, %s12396_s30 }
 0x22c   :  { %v2362_v31 = vpop.f32.mrf.mxu2 }
 0x22d   :  { %v14323_v26 = vadd.f32 %v2362_v31, %v14181_v4  ;;  %v2558_v57 = vpop.f32.mrf.mxu3  ;;  %v14325_v10 = vpop.f32.mrf.mxu1  ;;  %v3777_v31 = vsel %vm3774_vm15, %v14157_v63, %v14204_v34  ;;  %v4827_v34 = vld.sshfl [vmem:[#allocation1 + $0x28] sm:$0xff pattern:$0x73625140] }
 0x22e   :  { %19163 = vst [vmem:[#allocation60_spill] sm:$0xff] %v14325_v10  ;;  %v14331_v45 = vadd.f32 %v2558_v57, %v14189_v15  ;;  %v14337_v4 = vpop.permute.xlu2 %4036  ;;  %4840 = vrot.lane.b32.xlu2 %v4827_v34, %s12395_s18 }
 0x22f   :  { %v14335_v17 = vpop.f32.mrf.mxu0  ;;  %v4047_v15 = vsel %vm4042_vm9, %v4035_v33, %v14337_v4  ;;  %5089 = vst [vmem:[#allocation1 + $0x20] ss:$4 sm:$0xff] %v12530_v0 }
 0x230   :  { %19164 = vst [vmem:[#allocation61_spill] sm:$0xff] %v14335_v17  ;;  %11345 = vmatmul.msk.f32.vlgmr.msrb.gmra.mxu1 %vm102_vm2, %v14125_v40 }
 0x231   :  { %11348 = vmatmul.msk.f32.vlgmr.msrb.gmra.mxu2 %vm102_vm2, %v14125_v40  ;;  %11370 = vmatpush.msk.msrb.mxu1 %vm109_vm1, %v3776_v41 }
 0x232   :  { %11352 = vmatmul.msk.f32.gmra.mxu3 %vm102_vm2, %v14166_v19  ;;  %11380 = vmatmul.msk.f32.vlgmr.msra.gmra.mxu0 %vm102_vm2, %v14269_v52 }
 0x233   :  { %11373 = vmatpush.msk.msrb.mxu2 %vm109_vm1, %v3777_v31  ;;  %11405 = vmatpush.msk.msra.mxu0 %vm109_vm1, %v4047_v15  ;;  %v14374_v31 = vpop.permute.xlu1 %4040  ;;  %v14376_v15 = vpop.permute.xlu0 %4038 }
 0x234   :  { %v2535_v63 = vpop.f32.mrf.mxu2 }
 0x235   :  { %v14358_v57 = vadd.f32 %v2535_v63, %v14219_v12  ;;  %v2561_v23 = vpop.f32.mrf.mxu3  ;;  %v14360_v62 = vpop.f32.mrf.mxu1  ;;  %v3788_v12 = vsel %vm3774_vm15, %v14235_v9, %v14259_v24 }
 0x236   :  { %19165 = vst [vmem:[#allocation62_spill] sm:$0xff] %v14360_v62  ;;  %v14365_v41 = vadd.f32 %v2561_v23, %v14226_v49  ;;  %v5094_v63 = vld.sshfl [vmem:[#allocation1 + $0x20] sm:$0xff pattern:$0x73625140]  ;;  %4857 = vrot.lane.b32.xlu2 %v4856_v29, %s12395_s18  ;;  %v3781_v29 = vsel %vm3774_vm15, %v14237_v59, %v14235_v9  ;;  %s12426_s18 = smov 24  }
 0x237   :  { %v14367_v17 = vpop.f32.mrf.mxu0  ;;  %5106 = vrot.lane.b32.xlu1 %v5094_v63, %s12396_s30  ;;  %v5097_v48 = vld.sshfl [vmem:[#allocation1 + $0x38] sm:$0xff pattern:$0x73625140] }
 0x238   :  { %19166 = vst [vmem:[#allocation63_spill] sm:$0xff] %v14367_v17  ;;  %11346 = vmatmul.msk.f32.gmra.mxu1 %vm102_vm2, %v14166_v19  ;;  %v3780_v17 = vsel %vm3774_vm15, %v14195_v28, %v14237_v59  ;;  %vm7933_vm15 = vcmask 531456  }
 0x239   :  { %11349 = vmatmul.msk.f32.gmra.mxu2 %vm102_vm2, %v14166_v19 }
 0x23a   :  { %11363 = vmatmul.msk.f32.vlgmr.msrb.gmra.mxu3 %vm102_vm2, %v14125_v40  ;;  %11381 = vmatmul.msk.f32.gmra.mxu0 %vm102_vm2, %v14308_v11 }
 0x23b   :  { %11388 = vmatpush.msk.msrb.mxu3 %vm109_vm1, %v3788_v12  ;;  %v14398_v12 = vpop.permute.xlu2 %4053  ;;  %v14412_v28 = vpop.permute.xlu1 %4296 }
 0x23c   :  { %v2538_v49 = vpop.f32.mrf.mxu2 }
 0x23d   :  { %v14386_v34 = vadd.f32 %v2538_v49, %v14247_v46  ;;  %v2650_v24 = vpop.f32.mrf.mxu3  ;;  %v14388_v23 = vpop.f32.mrf.mxu1  ;;  %v14405_v46 = vld [vmem:[%s19069_s1 + $0xf0] sm:$0xff] }
 0x23e   :  { %19167 = vst [vmem:[#allocation64_spill] sm:$0xff] %v14388_v23  ;;  %v14396_v62 = vadd.f32 %v2650_v24, %v14257_v61  ;;  %v4295_v61 = vpop.permute.xlu0 %4294 }
 0x23f   :  { %v14400_v39 = vpop.f32.mrf.mxu0  ;;  %v4311_v49 = vsel %vm4310_vm10, %v4295_v61, %v14412_v28  ;;  %5112 = vrot.lane.b32.xlu1 %v5097_v48, %s12396_s30 }
 0x240   :  { %19168 = vst [vmem:[#allocation65_spill] sm:$0xff] %v14400_v39  ;;  %11357 = vmatmul.msk.f32.vlgmr.msra.gmra.mxu1 %vm102_vm2, %v14125_v40 }
 0x241   :  { %11360 = vmatmul.msk.f32.vlgmr.msra.gmra.mxu2 %vm102_vm2, %v14125_v40  ;;  %11382 = vmatpush.msk.msra.mxu1 %vm109_vm1, %v3780_v17 }
 0x242   :  { %11364 = vmatmul.msk.f32.gmra.mxu3 %vm102_vm2, %v14166_v19  ;;  %11394 = vmatmul.msk.f32.vlgmr.msrb.gmra.mxu0 %vm102_vm2, %v14405_v46 }
 0x243   :  { %11385 = vmatpush.msk.msra.mxu2 %vm109_vm1, %v3781_v29  ;;  %11419 = vmatpush.msk.msrb.mxu0 %vm109_vm1, %v4311_v49  ;;  %v14433_v24 = vpop.permute.xlu2 %4298  ;;  %v14440_v29 = vld [vmem:[%s19069_s1 + $0xf8] sm:$0xf]  ;;  %v5092_v49 = vld.sshfl [vmem:[#allocation1 + $0x10] sm:$0xff pattern:$0x73625140] }
 0x244   :  { %v2627_v9 = vpop.f32.mrf.mxu2  ;;  %5102 = vrot.lane.b32.xlu2 %v5092_v49, %s12396_s30 }
 0x245   :  { %v14426_v59 = vadd.f32 %v2627_v9, %v14290_v22  ;;  %v2653_v40 = vpop.f32.mrf.mxu3  ;;  %v14428_v63 = vpop.f32.mrf.mxu1  ;;  %v4046_v22 = vsel %vm4042_vm9, %v14344_v3, %v4035_v33 }
 0x246   :  { %19169 = vst [vmem:[#allocation66_spill] sm:$0xff] %v14428_v63  ;;  %v14431_v17 = vadd.f32 %v2653_v40, %v14297_v13  ;;  %v14476_v49 = vpop.permute.xlu0 %4300 }
 0x247   :  { %v14435_v61 = vpop.f32.mrf.mxu0 }
 0x248   :  { %19170 = vst [vmem:[#allocation67_spill] sm:$0xff] %v14435_v61  ;;  %11358 = vmatmul.msk.f32.gmra.mxu1 %vm102_vm2, %v14166_v19 }
 0x249   :  { %11361 = vmatmul.msk.f32.gmra.mxu2 %vm102_vm2, %v14166_v19  ;;  %v4044_v19 = vsel %vm4042_vm9, %v14276_v7, %v14299_v5 }
 0x24a   :  { %11377 = vmatmul.msk.f32.vlgmr.msra.gmra.mxu3 %vm102_vm2, %v14269_v52  ;;  %11395 = vmatmul.msk.f32.gmra.mxu0 %vm102_vm2, %v14440_v29 }
 0x24b   :  { %11402 = vmatpush.msk.msra.mxu3 %vm109_vm1, %v4046_v22  ;;  %v14467_v22 = vpop.permute.xlu2 %4304 }
 0x24c   :  { %v2630_v13 = vpop.f32.mrf.mxu2 }
 0x24d   :  { %v14454_v9 = vadd.f32 %v2630_v13, %v14323_v26  ;;  %v2826_v40 = vpop.f32.mrf.mxu3  ;;  %v14456_v63 = vpop.f32.mrf.mxu1  ;;  %v4045_v26 = vsel %vm4042_vm9, %v14299_v5, %v14344_v3  ;;  %v5095_v5 = vld.sshfl [vmem:[#allocation1 + $0x28] sm:$0xff pattern:$0x73625140]  ;;  %v5093_v3 = vld.sshfl [vmem:[#allocation1 + $0x18] sm:$0xff pattern:$0x73625140] }
 0x24e   :  { %19171 = vst [vmem:[#allocation68_spill] sm:$0xff] %v14456_v63  ;;  %v14463_v33 = vadd.f32 %v2826_v40, %v14331_v45  ;;  %v14474_v13 = vpop.permute.xlu1 %4302  ;;  %5108 = vrot.lane.b32.xlu2 %v5095_v5, %s12396_s30  ;;  %5104 = vrot.lane.b32.xlu0 %v5093_v3, %s12396_s30 }
 0x24f   :  { %v14465_v23 = vpop.f32.mrf.mxu0  ;;  %v4315_v7 = vsel %vm4310_vm10, %v14474_v13, %v14467_v22  ;;  %5123 = vst [vmem:[#allocation1] ss:$4 sm:$0xff] %v12535_v1  ;;  %v4314_v48 = vsel %vm4310_vm10, %v14476_v49, %v14474_v13 }
 0x250   :  { %19172 = vst [vmem:[#allocation69_spill] sm:$0xff] %v14465_v23  ;;  %11371 = vmatmul.msk.f32.vlgmr.msrb.gmra.mxu1 %vm102_vm2, %v14269_v52 }
 0x251   :  { %11374 = vmatmul.msk.f32.vlgmr.msrb.gmra.mxu2 %vm102_vm2, %v14269_v52  ;;  %11396 = vmatpush.msk.msrb.mxu1 %vm109_vm1, %v4044_v19 }
 0x252   :  { %11378 = vmatmul.msk.f32.gmra.mxu3 %vm102_vm2, %v14308_v11  ;;  %11406 = vmatmul.msk.f32.vlgmr.msra.gmra.mxu0 %vm102_vm2, %v14405_v46 }
 0x253   :  { %11399 = vmatpush.msk.msrb.mxu2 %vm109_vm1, %v4045_v26  ;;  %11431 = vmatpush.msk.msra.mxu0 %vm109_vm1, %v4315_v7 }
 0x254   :  { %v2803_v45 = vpop.f32.mrf.mxu2 }
 0x255   :  { %v14491_v40 = vadd.f32 %v2803_v45, %v14358_v57  ;;  %v2829_v19 = vpop.f32.mrf.mxu3  ;;  %v14493_v23 = vpop.f32.mrf.mxu1  ;;  %v4056_v57 = vsel %vm4042_vm9, %v14374_v31, %v14398_v12 }
 0x256   :  { %19173 = vst [vmem:[#allocation70_spill] sm:$0xff] %v14493_v23  ;;  %v14499_v61 = vadd.f32 %v2829_v19, %v14365_v41  ;;  %v14508_v7 = vpop.permute.xlu1 %4308  ;;  %v14510_v45 = vpop.permute.xlu0 %4306  ;;  %v5124_v5 = vld.sshfl [vmem:[#allocation1] sm:$0xff pattern:$0x73625140] }
 0x257   :  { %v14501_v26 = vpop.f32.mrf.mxu0  ;;  %5355 = vst [vmem:[#allocation1] ss:$4 sm:$0xff] %v12535_v1  ;;  %5125 = vrot.lane.b32.xlu2 %v5124_v5, %s12396_s30 }
 0x258   :  { %19174 = vst [vmem:[#allocation71_spill] sm:$0xff] %v14501_v26  ;;  %11372 = vmatmul.msk.f32.gmra.mxu1 %vm102_vm2, %v14308_v11  ;;  %v4048_v26 = vsel %vm4042_vm9, %v14337_v4, %v14376_v15 }
 0x259   :  { %11375 = vmatmul.msk.f32.gmra.mxu2 %vm102_vm2, %v14308_v11 }
 0x25a   :  { %11389 = vmatmul.msk.f32.vlgmr.msrb.gmra.mxu3 %vm102_vm2, %v14269_v52  ;;  %11407 = vmatmul.msk.f32.gmra.mxu0 %vm102_vm2, %v14440_v29 }
 0x25b   :  { %11414 = vmatpush.msk.msrb.mxu3 %vm109_vm1, %v4056_v57  ;;  %v14532_v57 = vpop.permute.xlu2 %4321 }
 0x25c   :  { %v2806_v41 = vpop.f32.mrf.mxu2 }
 0x25d   :  { %v14520_v3 = vadd.f32 %v2806_v41, %v14386_v34  ;;  %v2918_v12 = vpop.f32.mrf.mxu3  ;;  %v14522_v19 = vpop.f32.mrf.mxu1  ;;  %v14539_v34 = vld [vmem:[%s19069_s1 + $0x100] sm:$0xff]  ;;  %v4049_v41 = vsel %vm4042_vm9, %v14376_v15, %v14374_v31  ;;  %vm8141_vm9 = vcmask 932864  }
 0x25e   :  { %19175 = vst [vmem:[#allocation72_spill] sm:$0xff] %v14522_v19  ;;  %v14530_v23 = vadd.f32 %v2918_v12, %v14396_v62  ;;  %v14546_v4 = vpop.permute.xlu1 %4564  ;;  %v4563_v62 = vpop.permute.xlu0 %4562  ;;  %v14559_v15 = vld.sshfl [vmem:[#allocation1 + $0x8] sm:$0xff pattern:$0x73625140] }
 0x25f   :  { %v14534_v63 = vpop.f32.mrf.mxu0  ;;  %v4579_v5 = vsel %vm4578_vm12, %v4563_v62, %v14546_v4  ;;  %v14561_v12 = vld.sshfl [vmem:[#allocation1 + $0x10] sm:$0xff pattern:$0x73625140]  ;;  %v14568_v19 = vld.sshfl [vmem:[#allocation1 + $0x18] sm:$0xff pattern:$0x73625140] }
 0x260   :  { %19176 = vst [vmem:[#allocation73_spill] sm:$0xff] %v14534_v63  ;;  %11383 = vmatmul.msk.f32.vlgmr.msra.gmra.mxu1 %vm102_vm2, %v14269_v52 }
 0x261   :  { %11386 = vmatmul.msk.f32.vlgmr.msra.gmra.mxu2 %vm102_vm2, %v14269_v52  ;;  %11408 = vmatpush.msk.msra.mxu1 %vm109_vm1, %v4048_v26  ;;  %5590 = vst [vmem:[#allocation1] ss:$4 sm:$0xff] %v12535_v1 }
 0x262   :  { %11390 = vmatmul.msk.f32.gmra.mxu3 %vm102_vm2, %v14308_v11  ;;  %11420 = vmatmul.msk.f32.vlgmr.msrb.gmra.mxu0 %vm102_vm2, %v14539_v34 }
 0x263   :  { %11411 = vmatpush.msk.msra.mxu2 %vm109_vm1, %v4049_v41  ;;  %11445 = vmatpush.msk.msrb.mxu0 %vm109_vm1, %v4579_v5  ;;  %v5096_v41 = vld.sshfl [vmem:[#allocation1 + $0x30] sm:$0xff pattern:$0x73625140]  ;;  %v14575_v5 = vpop.permute.xlu2 %4566 }
 0x264   :  { %v2895_v31 = vpop.f32.mrf.mxu2  ;;  %5357 = vst [vmem:[#allocation1 + $0x20] ss:$4 sm:$0xff] %v12530_v0  ;;  %5110 = vrot.lane.b32.xlu0 %v5096_v41, %s12396_s30  ;;  %s12403_s30 = smov 54  }
 0x265   :  { %v14564_v52 = vadd.f32 %v2895_v31, %v14426_v59  ;;  %v2921_v26 = vpop.f32.mrf.mxu3  ;;  %v14566_v62 = vpop.f32.mrf.mxu1  ;;  %v14582_v59 = vld [vmem:[%s19069_s1 + $0x108] sm:$0xf] }
 0x266   :  { %19177 = vst [vmem:[#allocation74_spill] sm:$0xff] %v14566_v62  ;;  %v14571_v27 = vadd.f32 %v2921_v26, %v14431_v17 }
 0x267   :  { %v14577_v43 = vpop.f32.mrf.mxu0 }
 0x268   :  { %19178 = vst [vmem:[#allocation75_spill] sm:$0xff] %v14577_v43  ;;  %11384 = vmatmul.msk.f32.gmra.mxu1 %vm102_vm2, %v14308_v11  ;;  %v5594_v62 = vld.sshfl [vmem:[#allocation1 + $0x10] sm:$0xff pattern:$0x73625140] }
 0x269   :  { %11387 = vmatmul.msk.f32.gmra.mxu2 %vm102_vm2, %v14308_v11  ;;  %v5593_v13 = vld.sshfl [vmem:[#allocation1 + $0x8] sm:$0xff pattern:$0x73625140]  ;;  %v4312_v11 = vsel %vm4310_vm10, %v14412_v28, %v14433_v24  ;;  %5602 = vrot.lane.b32.xlu1 %v5594_v62, %s12378_s22  ;;  %v4313_v28 = vsel %vm4310_vm10, %v14433_v24, %v14476_v49  ;;  %v14629_v62 = vpop.permute.xlu1 %4570 }
 0x26a   :  { %11403 = vmatmul.msk.f32.vlgmr.msra.gmra.mxu3 %vm102_vm2, %v14405_v46  ;;  %11421 = vmatmul.msk.f32.gmra.mxu0 %vm102_vm2, %v14582_v59 }
 0x26b   :  { %11428 = vmatpush.msk.msra.mxu3 %vm109_vm1, %v4314_v48  ;;  %v14609_v63 = vld.sshfl [vmem:[#allocation1 + $0x20] sm:$0xff pattern:$0x73625140]  ;;  %v14611_v10 = vld.sshfl [vmem:[#allocation1 + $0x28] sm:$0xff pattern:$0x73625140] }
 0x26c   :  { %v2898_v17 = vpop.f32.mrf.mxu2  ;;  %v14616_v48 = vld.sshfl [vmem:[#allocation1 + $0x30] sm:$0xff pattern:$0x73625140]  ;;  %5600 = vrot.lane.b32.xlu0 %v5593_v13, %s12378_s22 }
 0x26d   :  { %v14599_v31 = vadd.f32 %v2898_v17, %v14454_v9  ;;  %v3094_v26 = vpop.f32.mrf.mxu3  ;;  %v14601_v41 = vpop.f32.mrf.mxu1  ;;  %v14618_v17 = vld.sshfl [vmem:[#allocation1 + $0x38] sm:$0xff pattern:$0x73625140] }
 0x26e   :  { %19179 = vst [vmem:[#allocation76_spill] sm:$0xff] %v14601_v41  ;;  %v14607_v43 = vadd.f32 %v3094_v26, %v14463_v33  ;;  %v14621_v41 = vpop.permute.xlu2 %4572  ;;  %v5595_v33 = vld.sshfl [vmem:[#allocation1 + $0x18] sm:$0xff pattern:$0x73625140]  ;;  %v14631_v26 = vpop.permute.xlu0 %4568 }
 0x26f   :  { %v14614_v9 = vpop.f32.mrf.mxu0  ;;  %5592 = vst [vmem:[#allocation1 + $0x20] ss:$4 sm:$0xff] %v12530_v0  ;;  %v4583_v24 = vsel %vm4578_vm12, %v14629_v62, %v14621_v41  ;;  %5604 = vrot.lane.b32.xlu2 %v5595_v33, %s12378_s22 }
 0x270   :  { %19180 = vst [vmem:[#allocation77_spill] sm:$0xff] %v14614_v9  ;;  %11397 = vmatmul.msk.f32.vlgmr.msrb.gmra.mxu1 %vm102_vm2, %v14405_v46 }
 0x271   :  { %11400 = vmatmul.msk.f32.vlgmr.msrb.gmra.mxu2 %vm102_vm2, %v14405_v46  ;;  %11422 = vmatpush.msk.msrb.mxu1 %vm109_vm1, %v4312_v11  ;;  %5621 = vst [vmem:[#allocation1] ss:$4 sm:$0xff] %v12535_v1 }
 0x272   :  { %11404 = vmatmul.msk.f32.gmra.mxu3 %vm102_vm2, %v14440_v29  ;;  %11432 = vmatmul.msk.f32.vlgmr.msra.gmra.mxu0 %vm102_vm2, %v14539_v34 }
 0x273   :  { %11425 = vmatpush.msk.msrb.mxu2 %vm109_vm1, %v4313_v28  ;;  %11457 = vmatpush.msk.msra.mxu0 %vm109_vm1, %v4583_v24  ;;  %v4324_v28 = vsel %vm4310_vm10, %v14508_v7, %v14532_v57  ;;  %v14662_v24 = vpop.permute.xlu1 %4576 }
 0x274   :  { %v3071_v49 = vpop.f32.mrf.mxu2 }
 0x275   :  { %v14648_v13 = vadd.f32 %v3071_v49, %v14491_v40  ;;  %v3097_v11 = vpop.f32.mrf.mxu3  ;;  %v14650_v9 = vpop.f32.mrf.mxu1 }
 0x276   :  { %19181 = vst [vmem:[#allocation78_spill] sm:$0xff] %v14650_v9  ;;  %v14653_v54 = vadd.f32 %v3097_v11, %v14499_v61  ;;  %v14664_v33 = vpop.permute.xlu0 %4574  ;;  %v5597_v40 = vld.sshfl [vmem:[#allocation1 + $0x28] sm:$0xff pattern:$0x73625140]  ;;  %v4316_v9 = vsel %vm4310_vm10, %v14467_v22, %v14510_v45 }
 0x277   :  { %v14655_v21 = vpop.f32.mrf.mxu0  ;;  %v5596_v49 = vld.sshfl [vmem:[#allocation1 + $0x20] sm:$0xff pattern:$0x73625140]  ;;  %5608 = vrot.lane.b32.xlu1 %v5597_v40, %s12378_s22 }
 0x278   :  { %19182 = vst [vmem:[#allocation79_spill] sm:$0xff] %v14655_v21  ;;  %11398 = vmatmul.msk.f32.gmra.mxu1 %vm102_vm2, %v14440_v29  ;;  %5606 = vrot.lane.b32.xlu0 %v5596_v49, %s12378_s22  ;;  %v5622_v49 = vld.sshfl [vmem:[#allocation1] sm:$0xff pattern:$0x73625140] }
 0x279   :  { %11401 = vmatmul.msk.f32.gmra.mxu2 %vm102_vm2, %v14440_v29 }
 0x27a   :  { %11415 = vmatmul.msk.f32.vlgmr.msrb.gmra.mxu3 %vm102_vm2, %v14405_v46  ;;  %11433 = vmatmul.msk.f32.gmra.mxu0 %vm102_vm2, %v14582_v59 }
 0x27b   :  { %11440 = vmatpush.msk.msrb.mxu3 %vm109_vm1, %v4324_v28  ;;  %v14686_v28 = vpop.permute.xlu2 %4589  ;;  %v14700_v22 = vpop.permute.xlu1 %4832 }
 0x27c   :  { %v3074_v61 = vpop.f32.mrf.mxu2 }
 0x27d   :  { %v14674_v57 = vadd.f32 %v3074_v61, %v14520_v3  ;;  %v3186_v11 = vpop.f32.mrf.mxu3  ;;  %v14676_v21 = vpop.f32.mrf.mxu1  ;;  %v14693_v3 = vld [vmem:[%s19069_s1 + $0x110] sm:$0xff]  ;;  %v4317_v61 = vsel %vm4310_vm10, %v14510_v45, %v14508_v7  ;;  %v5599_v45 = vld.sshfl [vmem:[#allocation1 + $0x38] sm:$0xff pattern:$0x73625140]  ;;  %vm8264_vm10 = vcmask 433152  }
 0x27e   :  { %19183 = vst [vmem:[#allocation80_spill] sm:$0xff] %v14676_v21  ;;  %v14684_v16 = vadd.f32 %v3186_v11, %v14530_v23  ;;  %v4831_v23 = vpop.permute.xlu0 %4830 }
 0x27f   :  { %v14688_v39 = vpop.f32.mrf.mxu0  ;;  %v4847_v40 = vsel %vm4846_vm13, %v4831_v23, %v14700_v22  ;;  %v14719_v23 = vld.sshfl [vmem:[#allocation1 + $0x8] sm:$0xff pattern:$0x73625140]  ;;  %5624 = vrot.lane.b32.xlu1 %v5622_v49, %s12378_s22 }
 0x280   :  { %19184 = vst [vmem:[#allocation81_spill] sm:$0xff] %v14688_v39  ;;  %11409 = vmatmul.msk.f32.vlgmr.msra.gmra.mxu1 %vm102_vm2, %v14405_v46  ;;  %5612 = vrot.lane.b32.xlu0 %v5599_v45, %s12378_s22 }
 0x281   :  { %11412 = vmatmul.msk.f32.vlgmr.msra.gmra.mxu2 %vm102_vm2, %v14405_v46  ;;  %11434 = vmatpush.msk.msra.mxu1 %vm109_vm1, %v4316_v9  ;;  %5857 = vst [vmem:[#allocation1] ss:$4 sm:$0xff] %v12535_v1 }
 0x282   :  { %11416 = vmatmul.msk.f32.gmra.mxu3 %vm102_vm2, %v14440_v29  ;;  %11446 = vmatmul.msk.f32.vlgmr.msrb.gmra.mxu0 %vm102_vm2, %v14693_v3 }
 0x283   :  { %11437 = vmatpush.msk.msra.mxu2 %vm109_vm1, %v4317_v61  ;;  %11471 = vmatpush.msk.msrb.mxu0 %vm109_vm1, %v4847_v40  ;;  %v14726_v61 = vpop.permute.xlu2 %4834 }
 0x284   :  { %v3163_v7 = vpop.f32.mrf.mxu2 }
 0x285   :  { %v14714_v46 = vadd.f32 %v3163_v7, %v14564_v52  ;;  %v3189_v9 = vpop.f32.mrf.mxu3  ;;  %v14716_v11 = vpop.f32.mrf.mxu1  ;;  %v14733_v52 = vld [vmem:[%s19069_s1 + $0x118] sm:$0xf]  ;;  %v4582_v7 = vsel %vm4578_vm12, %v14631_v26, %v14629_v62 }
 0x286   :  { %19185 = vst [vmem:[#allocation82_spill] sm:$0xff] %v14716_v11  ;;  %v14723_v21 = vadd.f32 %v3189_v9, %v14571_v27 }
 0x287   :  { %v14728_v40 = vpop.f32.mrf.mxu0 }
 0x288   :  { %19186 = vst [vmem:[#allocation83_spill] sm:$0xff] %v14728_v40  ;;  %11410 = vmatmul.msk.f32.gmra.mxu1 %vm102_vm2, %v14440_v29  ;;  %v5861_v11 = vld.sshfl [vmem:[#allocation1 + $0x10] sm:$0xff pattern:$0x73625140] }
 0x289   :  { %11413 = vmatmul.msk.f32.gmra.mxu2 %vm102_vm2, %v14440_v29  ;;  %v5860_v62 = vld.sshfl [vmem:[#allocation1 + $0x8] sm:$0xff pattern:$0x73625140]  ;;  %v4580_v29 = vsel %vm4578_vm12, %v14546_v4, %v14575_v5  ;;  %v14758_v39 = vld.sshfl [vmem:[#allocation1 + $0x18] sm:$0xff pattern:$0x73625140]  ;;  %5869 = vrot.lane.b32.xlu1 %v5861_v11, %s12379_s0  ;;  %v14774_v4 = vpop.permute.xlu0 %4836 }
 0x28a   :  { %11429 = vmatmul.msk.f32.vlgmr.msra.gmra.mxu3 %vm102_vm2, %v14539_v34  ;;  %11447 = vmatmul.msk.f32.gmra.mxu0 %vm102_vm2, %v14733_v52  ;;  %5888 = vst [vmem:[#allocation1] ss:$4 sm:$0xff] %v12535_v1 }
 0x28b   :  { %11454 = vmatpush.msk.msra.mxu3 %vm109_vm1, %v4582_v7  ;;  %5867 = vrot.lane.b32.xlu0 %v5860_v62, %s12379_s0  ;;  %v14765_v7 = vpop.permute.xlu2 %4840 }
 0x28c   :  { %v3166_v27 = vpop.f32.mrf.mxu2 }
 0x28d   :  { %v14748_v45 = vadd.f32 %v3166_v27, %v14599_v31  ;;  %v3362_v49 = vpop.f32.mrf.mxu3  ;;  %v14750_v9 = vpop.f32.mrf.mxu1  ;;  %v4581_v27 = vsel %vm4578_vm12, %v14575_v5, %v14631_v26  ;;  %v5598_v26 = vld.sshfl [vmem:[#allocation1 + $0x30] sm:$0xff pattern:$0x73625140] }
 0x28e   :  { %19187 = vst [vmem:[#allocation84_spill] sm:$0xff] %v14750_v9  ;;  %v14756_v40 = vadd.f32 %v3362_v49, %v14607_v43  ;;  %v14772_v43 = vpop.permute.xlu1 %4838  ;;  %5610 = vrot.lane.b32.xlu2 %v5598_v26, %s12378_s22 }
 0x28f   :  { %v14762_v31 = vpop.f32.mrf.mxu0  ;;  %v4851_v11 = vsel %vm4846_vm13, %v14772_v43, %v14765_v7  ;;  %5859 = vst [vmem:[#allocation1 + $0x20] ss:$4 sm:$0xff] %v12530_v0 }
 0x290   :  { %19188 = vst [vmem:[#allocation85_spill] sm:$0xff] %v14762_v31  ;;  %11423 = vmatmul.msk.f32.vlgmr.msrb.gmra.mxu1 %vm102_vm2, %v14539_v34 }
 0x291   :  { %11426 = vmatmul.msk.f32.vlgmr.msrb.gmra.mxu2 %vm102_vm2, %v14539_v34  ;;  %11448 = vmatpush.msk.msrb.mxu1 %vm109_vm1, %v4580_v29 }
 0x292   :  { %11430 = vmatmul.msk.f32.gmra.mxu3 %vm102_vm2, %v14582_v59  ;;  %11458 = vmatmul.msk.f32.vlgmr.msra.gmra.mxu0 %vm102_vm2, %v14693_v3 }
 0x293   :  { %11451 = vmatpush.msk.msrb.mxu2 %vm109_vm1, %v4581_v27  ;;  %11483 = vmatpush.msk.msra.mxu0 %vm109_vm1, %v4851_v11  ;;  %v14807_v11 = vpop.permute.xlu0 %4842 }
 0x294   :  { %v3339_v5 = vpop.f32.mrf.mxu2 }
 0x295   :  { %v14789_v49 = vadd.f32 %v3339_v5, %v14648_v13  ;;  %v3365_v62 = vpop.f32.mrf.mxu3  ;;  %v14791_v29 = vpop.f32.mrf.mxu1  ;;  %v4592_v13 = vsel %vm4578_vm12, %v14662_v24, %v14686_v28 }
 0x296   :  { %19189 = vst [vmem:[#allocation86_spill] sm:$0xff] %v14791_v29  ;;  %v14796_v31 = vadd.f32 %v3365_v62, %v14653_v54  ;;  %v14805_v27 = vpop.permute.xlu1 %4844  ;;  %v5864_v5 = vld.sshfl [vmem:[#allocation1 + $0x28] sm:$0xff pattern:$0x73625140]  ;;  %v4584_v29 = vsel %vm4578_vm12, %v14621_v41, %v14664_v33  ;;  %5626 = vrot.lane.b32.xlu2 %v14719_v23, %s12378_s22  ;;  %v4585_v41 = vsel %vm4578_vm12, %v14664_v33, %v14662_v24  ;;  %vm8474_vm12 = vcmask 908288  }
 0x297   :  { %v14798_v9 = vpop.f32.mrf.mxu0  ;;  %v5863_v26 = vld.sshfl [vmem:[#allocation1 + $0x20] sm:$0xff pattern:$0x73625140]  ;;  %5875 = vrot.lane.b32.xlu1 %v5864_v5, %s12379_s0  ;;  %v5866_v33 = vld.sshfl [vmem:[#allocation1 + $0x38] sm:$0xff pattern:$0x73625140] }
 0x298   :  { %19190 = vst [vmem:[#allocation87_spill] sm:$0xff] %v14798_v9  ;;  %11424 = vmatmul.msk.f32.gmra.mxu1 %vm102_vm2, %v14582_v59  ;;  %5873 = vrot.lane.b32.xlu0 %v5863_v26, %s12379_s0  ;;  %v5889_v26 = vld.sshfl [vmem:[#allocation1] sm:$0xff pattern:$0x73625140] }
 0x299   :  { %11427 = vmatmul.msk.f32.gmra.mxu2 %vm102_vm2, %v14582_v59 }
 0x29a   :  { %11441 = vmatmul.msk.f32.vlgmr.msrb.gmra.mxu3 %vm102_vm2, %v14539_v34  ;;  %11459 = vmatmul.msk.f32.gmra.mxu0 %vm102_vm2, %v14733_v52 }
 0x29b   :  { %11466 = vmatpush.msk.msrb.mxu3 %vm109_vm1, %v4592_v13  ;;  %v14829_v13 = vpop.permute.xlu2 %4857 }
 0x29c   :  { %v3342_v54 = vpop.f32.mrf.mxu2 }
 0x29d   :  { %v14817_v28 = vadd.f32 %v3342_v54, %v14674_v57  ;;  %v3454_v62 = vpop.f32.mrf.mxu3  ;;  %v14819_v9 = vpop.f32.mrf.mxu1  ;;  %v14838_v54 = vld [vmem:[%s19069_s1 + $0x120] sm:$0xff] }
 0x29e   :  { %19191 = vst [vmem:[#allocation88_spill] sm:$0xff] %v14819_v9  ;;  %v14827_v53 = vadd.f32 %v3454_v62, %v14684_v16  ;;  %v14845_v16 = vpop.permute.xlu1 %5100  ;;  %v5099_v5 = vpop.permute.xlu0 %5098  ;;  %5871 = vrot.lane.b32.xlu2 %v14758_v39, %s12379_s0 }
 0x29f   :  { %v14833_v57 = vpop.f32.mrf.mxu0  ;;  %v5115_v23 = vsel %vm5114_vm14, %v5099_v5, %v14845_v16  ;;  %v14864_v5 = vld.sshfl [vmem:[#allocation1 + $0x8] sm:$0xff pattern:$0x73625140]  ;;  %5891 = vrot.lane.b32.xlu1 %v5889_v26, %s12379_s0 }
 0x2a0   :  { %11435 = vmatmul.msk.f32.vlgmr.msra.gmra.mxu1 %vm102_vm2, %v14539_v34  ;;  %5879 = vrot.lane.b32.xlu0 %v5866_v33, %s12379_s0  ;;  %6124 = vst [vmem:[#allocation1] ss:$4 sm:$0xff] %v12535_v1 }
 0x2a1   :  { %11438 = vmatmul.msk.f32.vlgmr.msra.gmra.mxu2 %vm102_vm2, %v14539_v34  ;;  %11460 = vmatpush.msk.msra.mxu1 %vm109_vm1, %v4584_v29 }
 0x2a2   :  { %11442 = vmatmul.msk.f32.gmra.mxu3 %vm102_vm2, %v14582_v59  ;;  %11472 = vmatmul.msk.f32.vlgmr.msrb.gmra.mxu0 %vm102_vm2, %v14838_v54 }
 0x2a3   :  { %11463 = vmatpush.msk.msra.mxu2 %vm109_vm1, %v4585_v41  ;;  %11497 = vmatpush.msk.msrb.mxu0 %vm109_vm1, %v5115_v23  ;;  %v14880_v23 = vpop.permute.xlu2 %5102 }
 0x2a4   :  { %v3431_v24 = vpop.f32.mrf.mxu2 }
 0x2a5   :  { %v14859_v34 = vadd.f32 %v3431_v24, %v14714_v46  ;;  %v3457_v29 = vpop.f32.mrf.mxu3  ;;  %v14861_v62 = vpop.f32.mrf.mxu1  ;;  %v14878_v46 = vld [vmem:[%s19069_s1 + $0x128] sm:$0xf] }
 0x2a6   :  { %19192 = vst [vmem:[#allocation89_spill] sm:$0xff] %v14861_v62  ;;  %v14868_v9 = vadd.f32 %v3457_v29, %v14723_v21  ;;  %v4850_v21 = vsel %vm4846_vm13, %v14774_v4, %v14772_v43 }
 0x2a7   :  { %v14873_v41 = vpop.f32.mrf.mxu0  ;;  %v6128_v29 = vld.sshfl [vmem:[#allocation1 + $0x10] sm:$0xff pattern:$0x73625140]  ;;  %v6127_v43 = vld.sshfl [vmem:[#allocation1 + $0x8] sm:$0xff pattern:$0x73625140] }
 0x2a8   :  { %19193 = vst [vmem:[#allocation90_spill] sm:$0xff] %v14873_v41  ;;  %11436 = vmatmul.msk.f32.gmra.mxu1 %vm102_vm2, %v14582_v59  ;;  %v6129_v41 = vld.sshfl [vmem:[#allocation1 + $0x18] sm:$0xff pattern:$0x73625140]  ;;  %6136 = vrot.lane.b32.xlu1 %v6128_v29, %s12380_s23 }
 0x2a9   :  { %11439 = vmatmul.msk.f32.gmra.mxu2 %vm102_vm2, %v14582_v59  ;;  %v4848_v59 = vsel %vm4846_vm13, %v14700_v22, %v14726_v61  ;;  %6134 = vrot.lane.b32.xlu0 %v6127_v43, %s12380_s23  ;;  %6155 = vst [vmem:[#allocation1] ss:$4 sm:$0xff] %v12535_v1  ;;  %v5107_v22 = vpop.permute.xlu1 %5106 }
 0x2aa   :  { %11455 = vmatmul.msk.f32.vlgmr.msra.gmra.mxu3 %vm102_vm2, %v14693_v3  ;;  %11473 = vmatmul.msk.f32.gmra.mxu0 %vm102_vm2, %v14878_v46 }
 0x2ab   :  { %11480 = vmatpush.msk.msra.mxu3 %vm109_vm1, %v4850_v21 }
 0x2ac   :  { %v3434_v39 = vpop.f32.mrf.mxu2 }
 0x2ad   :  { %v14895_v24 = vadd.f32 %v3434_v39, %v14748_v45  ;;  %v3630_v33 = vpop.f32.mrf.mxu3  ;;  %v14897_v26 = vpop.f32.mrf.mxu1  ;;  %v4849_v39 = vsel %vm4846_vm13, %v14726_v61, %v14774_v4  ;;  %v5865_v4 = vld.sshfl [vmem:[#allocation1 + $0x30] sm:$0xff pattern:$0x73625140] }
 0x2ae   :  { %v14903_v62 = vadd.f32 %v3630_v33, %v14756_v40  ;;  %v14910_v45 = vpop.permute.xlu2 %5108  ;;  %5877 = vrot.lane.b32.xlu2 %v5865_v4, %s12379_s0  ;;  %6126 = vst [vmem:[#allocation1 + $0x20] ss:$4 sm:$0xff] %v12530_v0 }
 0x2af   :  { %v14907_v21 = vpop.f32.mrf.mxu0  ;;  %v5119_v40 = vsel %vm5114_vm14, %v5107_v22, %v14910_v45 }
 0x2b0   :  { %19194 = vst [vmem:[#allocation91_spill] sm:$0xff] %v14907_v21  ;;  %11449 = vmatmul.msk.f32.vlgmr.msrb.gmra.mxu1 %vm102_vm2, %v14693_v3 }
 0x2b1   :  { %11452 = vmatmul.msk.f32.vlgmr.msrb.gmra.mxu2 %vm102_vm2, %v14693_v3  ;;  %11474 = vmatpush.msk.msrb.mxu1 %vm109_vm1, %v4848_v59 }
 0x2b2   :  { %11456 = vmatmul.msk.f32.gmra.mxu3 %vm102_vm2, %v14733_v52  ;;  %11484 = vmatmul.msk.f32.vlgmr.msra.gmra.mxu0 %vm102_vm2, %v14838_v54 }
 0x2b3   :  { %11477 = vmatpush.msk.msrb.mxu2 %vm109_vm1, %v4849_v39  ;;  %11509 = vmatpush.msk.msra.mxu0 %vm109_vm1, %v5119_v40 }
 0x2b4   :  { %v3607_v61 = vpop.f32.mrf.mxu2 }
 0x2b5   :  { %v14929_v33 = vadd.f32 %v3607_v61, %v14789_v49  ;;  %v3633_v29 = vpop.f32.mrf.mxu3  ;;  %v14931_v43 = vpop.f32.mrf.mxu1  ;;  %v4860_v49 = vsel %vm4846_vm13, %v14805_v27, %v14829_v13  ;;  %v6131_v39 = vld.sshfl [vmem:[#allocation1 + $0x28] sm:$0xff pattern:$0x73625140]  ;;  %v6130_v40 = vld.sshfl [vmem:[#allocation1 + $0x20] sm:$0xff pattern:$0x73625140]  ;;  %v4852_v13 = vsel %vm4846_vm13, %v14765_v7, %v14807_v11 }
 0x2b6   :  { %19195 = vst [vmem:[#allocation92_spill] sm:$0xff] %v14931_v43  ;;  %v14936_v59 = vadd.f32 %v3633_v29, %v14796_v31  ;;  %6142 = vrot.lane.b32.xlu1 %v6131_v39, %s12380_s23  ;;  %6140 = vrot.lane.b32.xlu0 %v6130_v40, %s12380_s23  ;;  %v6133_v7 = vld.sshfl [vmem:[#allocation1 + $0x38] sm:$0xff pattern:$0x73625140] }
 0x2b7   :  { %v14938_v21 = vpop.f32.mrf.mxu0  ;;  %5893 = vrot.lane.b32.xlu2 %v14864_v5, %s12379_s0  ;;  %v6157_v39 = vld.sshfl [vmem:[#allocation1 + $0x8] sm:$0xff pattern:$0x73625140] }
 0x2b8   :  { %19196 = vst [vmem:[#allocation93_spill] sm:$0xff] %v14938_v21  ;;  %11450 = vmatmul.msk.f32.gmra.mxu1 %vm102_vm2, %v14733_v52 }
 0x2b9   :  { %11453 = vmatmul.msk.f32.gmra.mxu2 %vm102_vm2, %v14733_v52 }
 0x2ba   :  { %11467 = vmatmul.msk.f32.vlgmr.msrb.gmra.mxu3 %vm102_vm2, %v14693_v3  ;;  %11485 = vmatmul.msk.f32.gmra.mxu0 %vm102_vm2, %v14878_v46 }
 0x2bb   :  { %11492 = vmatpush.msk.msrb.mxu3 %vm109_vm1, %v4860_v49 }
 0x2bc   :  { %v3610_v31 = vpop.f32.mrf.mxu2 }
 0x2bd   :  { %v14953_v61 = vadd.f32 %v3610_v31, %v14817_v28  ;;  %v3722_v4 = vpop.f32.mrf.mxu3  ;;  %v14955_v29 = vpop.f32.mrf.mxu1  ;;  %v14972_v28 = vld [vmem:[%s19069_s1 + $0x130] sm:$0xff]  ;;  %v4853_v31 = vsel %vm4846_vm13, %v14807_v11, %v14805_v27  ;;  %v6156_v27 = vld.sshfl [vmem:[#allocation1] sm:$0xff pattern:$0x73625140]  ;;  %vm8363_vm13 = vcmask 916480  }
 0x2be   :  { %19197 = vst [vmem:[#allocation94_spill] sm:$0xff] %v14955_v29  ;;  %v14963_v21 = vadd.f32 %v3722_v4, %v14827_v53  ;;  %6146 = vrot.lane.b32.xlu0 %v6133_v7, %s12380_s23  ;;  %6158 = vrot.lane.b32.xlu1 %v6156_v27, %s12380_s23 }
 0x2bf   :  { %v14967_v49 = vpop.f32.mrf.mxu0  ;;  %6391 = vst [vmem:[#allocation1] ss:$4 sm:$0xff] %v12535_v1  ;;  %6138 = vrot.lane.b32.xlu2 %v6129_v41, %s12380_s23 }
 0x2c0   :  { %11461 = vmatmul.msk.f32.vlgmr.msra.gmra.mxu1 %vm102_vm2, %v14693_v3  ;;  %v5105_v4 = vpop.permute.xlu0 %5104 }
 0x2c1   :  { %11464 = vmatmul.msk.f32.vlgmr.msra.gmra.mxu2 %vm102_vm2, %v14693_v3  ;;  %11486 = vmatpush.msk.msra.mxu1 %vm109_vm1, %v4852_v13  ;;  %v5118_v13 = vsel %vm5114_vm14, %v5105_v4, %v5107_v22 }
 0x2c2   :  { %11468 = vmatmul.msk.f32.gmra.mxu3 %vm102_vm2, %v14733_v52  ;;  %11498 = vmatmul.msk.f32.vlgmr.msrb.gmra.mxu0 %vm102_vm2, %v14972_v28 }
 0x2c3   :  { %11489 = vmatpush.msk.msra.mxu2 %vm109_vm1, %v4853_v31  ;;  %11523 = vmatpush.msk.msrb.mxu0 %vm109_vm1, %v14559_v15 }
 0x2c4   :  { %v3699_v53 = vpop.f32.mrf.mxu2 }
 0x2c5   :  { %v14990_v11 = vadd.f32 %v3699_v53, %v14859_v34  ;;  %v3725_v3 = vpop.f32.mrf.mxu3  ;;  %v14992_v5 = vpop.f32.mrf.mxu1  ;;  %v15006_v34 = vld [vmem:[%s19069_s1 + $0x138] sm:$0xf] }
 0x2c6   :  { %19198 = vst [vmem:[#allocation95_spill] sm:$0xff] %v14992_v5  ;;  %v14997_v40 = vadd.f32 %v3725_v3, %v14868_v9  ;;  %v6395_v7 = vld.sshfl [vmem:[#allocation1 + $0x10] sm:$0xff pattern:$0x73625140] }
 0x2c7   :  { %v15001_v15 = vpop.f32.mrf.mxu0  ;;  %v6394_v22 = vld.sshfl [vmem:[#allocation1 + $0x8] sm:$0xff pattern:$0x73625140]  ;;  %6403 = vrot.lane.b32.xlu1 %v6395_v7, %s12381_s24 }
 0x2c8   :  { %11462 = vmatmul.msk.f32.gmra.mxu1 %vm102_vm2, %v14733_v52  ;;  %6401 = vrot.lane.b32.xlu0 %v6394_v22, %s12381_s24 }
 0x2c9   :  { %11465 = vmatmul.msk.f32.gmra.mxu2 %vm102_vm2, %v14733_v52  ;;  %v5116_v52 = vsel %vm5114_vm14, %v14845_v16, %v14880_v23 }
 0x2ca   :  { %11481 = vmatmul.msk.f32.vlgmr.msra.gmra.mxu3 %vm102_vm2, %v14838_v54  ;;  %11499 = vmatmul.msk.f32.gmra.mxu0 %vm102_vm2, %v15006_v34 }
 0x2cb   :  { %11506 = vmatpush.msk.msra.mxu3 %vm109_vm1, %v5118_v13 }
 0x2cc   :  { %v3702_v9 = vpop.f32.mrf.mxu2 }
 0x2cd   :  { %v15019_v41 = vadd.f32 %v3702_v9, %v14895_v24  ;;  %v3898_v31 = vpop.f32.mrf.mxu3  ;;  %v15021_v53 = vpop.f32.mrf.mxu1  ;;  %v5117_v24 = vsel %vm5114_vm14, %v14880_v23, %v5105_v4 }
 0x2ce   :  { %v15027_v27 = vadd.f32 %v3898_v31, %v14903_v62  ;;  %v6132_v62 = vld.sshfl [vmem:[#allocation1 + $0x30] sm:$0xff pattern:$0x73625140]  ;;  %v5126_v31 = vpop.permute.xlu2 %5125 }
 0x2cf   :  { %v15031_v3 = vpop.f32.mrf.mxu0  ;;  %6144 = vrot.lane.b32.xlu2 %v6132_v62, %s12380_s23  ;;  %6393 = vst [vmem:[#allocation1 + $0x20] ss:$4 sm:$0xff] %v12530_v0 }
 0x2d0   :  { %19199 = vst [vmem:[#allocation96_spill] sm:$0xff] %v15031_v3  ;;  %11475 = vmatmul.msk.f32.vlgmr.msrb.gmra.mxu1 %vm102_vm2, %v14838_v54 }
 0x2d1   :  { %11478 = vmatmul.msk.f32.vlgmr.msrb.gmra.mxu2 %vm102_vm2, %v14838_v54  ;;  %11500 = vmatpush.msk.msrb.mxu1 %vm109_vm1, %v5116_v52 }
 0x2d2   :  { %11482 = vmatmul.msk.f32.gmra.mxu3 %vm102_vm2, %v14878_v46  ;;  %11510 = vmatmul.msk.f32.vlgmr.msra.gmra.mxu0 %vm102_vm2, %v14972_v28 }
 0x2d3   :  { %11503 = vmatpush.msk.msrb.mxu2 %vm109_vm1, %v5117_v24  ;;  %11535 = vmatpush.msk.msra.mxu0 %vm109_vm1, %v14611_v10  ;;  %v5113_v10 = vpop.permute.xlu1 %5112 }
 0x2d4   :  { %v3875_v16 = vpop.f32.mrf.mxu2  ;;  %v5128_v22 = vsel %vm5114_vm14, %v5113_v10, %v5126_v31 }
 0x2d5   :  { %v15048_v23 = vadd.f32 %v3875_v16, %v14929_v33  ;;  %v3901_v4 = vpop.f32.mrf.mxu3  ;;  %v15050_v13 = vpop.f32.mrf.mxu1 }
 0x2d6   :  { %19200 = vst [vmem:[#allocation97_spill] sm:$0xff] %v15050_v13  ;;  %v15055_v9 = vadd.f32 %v3901_v4, %v14936_v59  ;;  %v5111_v33 = vpop.permute.xlu0 %5110  ;;  %v6398_v59 = vld.sshfl [vmem:[#allocation1 + $0x28] sm:$0xff pattern:$0x73625140] }
 0x2d7   :  { %v15057_v7 = vpop.f32.mrf.mxu0  ;;  %6409 = vrot.lane.b32.xlu1 %v6398_v59, %s12381_s24  ;;  %6160 = vrot.lane.b32.xlu2 %v6157_v39, %s12380_s23  ;;  %v5120_v4 = vsel %vm5114_vm14, %v14910_v45, %v5111_v33 }
 0x2d8   :  { %19201 = vst [vmem:[#allocation98_spill] sm:$0xff] %v15057_v7  ;;  %11476 = vmatmul.msk.f32.gmra.mxu1 %vm102_vm2, %v14878_v46 }
 0x2d9   :  { %11479 = vmatmul.msk.f32.gmra.mxu2 %vm102_vm2, %v14878_v46 }
 0x2da   :  { %11493 = vmatmul.msk.f32.vlgmr.msrb.gmra.mxu3 %vm102_vm2, %v14838_v54  ;;  %11511 = vmatmul.msk.f32.gmra.mxu0 %vm102_vm2, %v15006_v34 }
 0x2db   :  { %11518 = vmatpush.msk.msrb.mxu3 %vm109_vm1, %v5128_v22  ;;  %v5121_v22 = vsel %vm5114_vm14, %v5111_v33, %v5113_v10  ;;  %vm8375_vm14 = vcmask 424960  }
 0x2dc   :  { %v3878_v0 = vpop.f32.mrf.mxu2 }
 0x2dd   :  { %v15070_v52 = vadd.f32 %v3878_v0, %v14953_v61  ;;  %v3990_v24 = vpop.f32.mrf.mxu3  ;;  %v15072_v16 = vpop.f32.mrf.mxu1  ;;  %v15086_v61 = vld [vmem:[%s19069_s1 + $0x140] sm:$0xff] }
 0x2de   :  { %19202 = vst [vmem:[#allocation99_spill] sm:$0xff] %v15072_v16  ;;  %v15077_v62 = vadd.f32 %v3990_v24, %v14963_v21  ;;  %v15091_v0 = vpop.permute.xlu1 %5602  ;;  %v5601_v21 = vpop.permute.xlu0 %5600 }
 0x2df   :  { %v15081_v31 = vpop.f32.mrf.mxu0  ;;  %v5614_v45 = vsel %vm87_vm0, %v5601_v21, %v15091_v0  ;;  %v15112_v24 = vpop.permute.xlu2 %5604 }
 0x2e0   :  { %11487 = vmatmul.msk.f32.vlgmr.msra.gmra.mxu1 %vm102_vm2, %v14838_v54 }
 0x2e1   :  { %11490 = vmatmul.msk.f32.vlgmr.msra.gmra.mxu2 %vm102_vm2, %v14838_v54  ;;  %11512 = vmatpush.msk.msra.mxu1 %vm109_vm1, %v5120_v4 }
 0x2e2   :  { %11494 = vmatmul.msk.f32.gmra.mxu3 %vm102_vm2, %v14878_v46  ;;  %11524 = vmatmul.msk.f32.vlgmr.msrb.gmra.mxu0 %vm102_vm2, %v15086_v61 }
 0x2e3   :  { %11515 = vmatpush.msk.msra.mxu2 %vm109_vm1, %v5121_v22  ;;  %11549 = vmatpush.msk.msrb.mxu0 %vm109_vm1, %v5614_v45  ;;  %v15119_v22 = vld [vmem:[%s19069_s1 + $0x148] sm:$0xf] }
 0x2e4   :  { %v3967_v39 = vpop.f32.mrf.mxu2 }
 0x2e5   :  { %v15105_v10 = vadd.f32 %v3967_v39, %v14990_v11  ;;  %v3993_v54 = vpop.f32.mrf.mxu3  ;;  %v15107_v33 = vpop.f32.mrf.mxu1 }
 0x2e6   :  { %19203 = vst [vmem:[#allocation100_spill] sm:$0xff] %v15107_v33  ;;  %v15110_v59 = vadd.f32 %v3993_v54, %v14997_v40  ;;  %v6396_v40 = vld.sshfl [vmem:[#allocation1 + $0x18] sm:$0xff pattern:$0x73625140] }
 0x2e7   :  { %v15114_v4 = vpop.f32.mrf.mxu0  ;;  %6405 = vrot.lane.b32.xlu2 %v6396_v40, %s12381_s24  ;;  %6422 = vst [vmem:[#allocation1] ss:$4 sm:$0xff] %v12535_v1  ;;  %v6399_v40 = vld.sshfl [vmem:[#allocation1 + $0x30] sm:$0xff pattern:$0x73625140] }
 0x2e8   :  { %19204 = vst [vmem:[#allocation101_spill] sm:$0xff] %v15114_v4  ;;  %11488 = vmatmul.msk.f32.gmra.mxu1 %vm102_vm2, %v14878_v46  ;;  %v15143_v33 = vpop.permute.xlu2 %5610 }
 0x2e9   :  { %11491 = vmatmul.msk.f32.gmra.mxu2 %vm102_vm2, %v14878_v46 }
 0x2ea   :  { %11507 = vmatmul.msk.f32.vlgmr.msra.gmra.mxu3 %vm102_vm2, %v14972_v28  ;;  %11525 = vmatmul.msk.f32.gmra.mxu0 %vm102_vm2, %v15119_v22 }
 0x2eb   :  { %11532 = vmatpush.msk.msra.mxu3 %vm109_vm1, %v14609_v63  ;;  %v5609_v63 = vpop.permute.xlu1 %5608 }
 0x2ec   :  { %v3970_v11 = vpop.f32.mrf.mxu2 }
 0x2ed   :  { %v15132_v21 = vadd.f32 %v3970_v11, %v15019_v41  ;;  %v4166_v45 = vpop.f32.mrf.mxu3  ;;  %v15134_v39 = vpop.f32.mrf.mxu1  ;;  %v5618_v11 = vsel %vm87_vm0, %v5609_v63, %v15143_v33 }
 0x2ee   :  { %v15139_v46 = vadd.f32 %v4166_v45, %v15027_v27  ;;  %v15147_v41 = vpop.permute.xlu0 %5606  ;;  %v6397_v45 = vld.sshfl [vmem:[#allocation1 + $0x20] sm:$0xff pattern:$0x73625140] }
 0x2ef   :  { %v15141_v54 = vpop.f32.mrf.mxu0  ;;  %6411 = vrot.lane.b32.xlu2 %v6399_v40, %s12381_s24  ;;  %6407 = vrot.lane.b32.xlu0 %v6397_v45, %s12381_s24 }
 0x2f0   :  { %19205 = vst [vmem:[#allocation102_spill] sm:$0xff] %v15141_v54  ;;  %11501 = vmatmul.msk.f32.vlgmr.msrb.gmra.mxu1 %vm102_vm2, %v14972_v28  ;;  %v5627_v45 = vpop.permute.xlu2 %5626 }
 0x2f1   :  { %11504 = vmatmul.msk.f32.vlgmr.msrb.gmra.mxu2 %vm102_vm2, %v14972_v28  ;;  %11526 = vmatpush.msk.msrb.mxu1 %vm109_vm1, %v14561_v12 }
 0x2f2   :  { %11508 = vmatmul.msk.f32.gmra.mxu3 %vm102_vm2, %v15006_v34  ;;  %11536 = vmatmul.msk.f32.vlgmr.msra.gmra.mxu0 %vm102_vm2, %v15086_v61 }
 0x2f3   :  { %11529 = vmatpush.msk.msrb.mxu2 %vm109_vm1, %v14568_v19  ;;  %11561 = vmatpush.msk.msra.mxu0 %vm109_vm1, %v5618_v11  ;;  %v15178_v11 = vpop.permute.xlu1 %5624 }
 0x2f4   :  { %v4143_v27 = vpop.f32.mrf.mxu2 }
 0x2f5   :  { %v15163_v5 = vadd.f32 %v4143_v27, %v15048_v23  ;;  %v4169_v16 = vpop.f32.mrf.mxu3  ;;  %v15165_v29 = vpop.f32.mrf.mxu1 }
 0x2f6   :  { %19206 = vst [vmem:[#allocation103_spill] sm:$0xff] %v15165_v29  ;;  %v15170_v12 = vadd.f32 %v4169_v16, %v15055_v9  ;;  %v15176_v19 = vpop.permute.xlu0 %5612 }
 0x2f7   :  { %v15172_v54 = vpop.f32.mrf.mxu0 }
 0x2f8   :  { %19207 = vst [vmem:[#allocation104_spill] sm:$0xff] %v15172_v54  ;;  %11502 = vmatmul.msk.f32.gmra.mxu1 %vm102_vm2, %v15006_v34  ;;  %v15201_v54 = vld [vmem:[%s19069_s1 + $0x150] sm:$0xff]  ;;  %v15229_v7 = vpop.permute.xlu2 %5871 }
 0x2f9   :  { %11505 = vmatmul.msk.f32.gmra.mxu2 %vm102_vm2, %v15006_v34 }
 0x2fa   :  { %11519 = vmatmul.msk.f32.vlgmr.msrb.gmra.mxu3 %vm102_vm2, %v14972_v28  ;;  %11537 = vmatmul.msk.f32.gmra.mxu0 %vm102_vm2, %v15119_v22 }
 0x2fb   :  { %11544 = vmatpush.msk.msrb.mxu3 %vm109_vm1, %v12535_v1  ;;  %v15205_v1 = vpop.permute.xlu1 %5869 }
 0x2fc   :  { %v4146_v23 = vpop.f32.mrf.mxu2 }
 0x2fd   :  { %v15189_v9 = vadd.f32 %v4146_v23, %v15070_v52  ;;  %v4258_v16 = vpop.f32.mrf.mxu3  ;;  %v15191_v27 = vpop.f32.mrf.mxu1 }
 0x2fe   :  { %19208 = vst [vmem:[#allocation105_spill] sm:$0xff] %v15191_v27  ;;  %v15194_v40 = vadd.f32 %v4258_v16, %v15077_v62  ;;  %v5868_v52 = vpop.permute.xlu0 %5867  ;;  %v6423_v16 = vld.sshfl [vmem:[#allocation1] sm:$0xff pattern:$0x73625140] }
 0x2ff   :  { %v15196_v3 = vpop.f32.mrf.mxu0  ;;  %v5881_v62 = vsel %vm558_vm3, %v5868_v52, %v15205_v1  ;;  %6425 = vrot.lane.b32.xlu1 %v6423_v16, %s12381_s24 }
 0x300   :  { %11513 = vmatmul.msk.f32.vlgmr.msra.gmra.mxu1 %vm102_vm2, %v14972_v28 }
 0x301   :  { %11516 = vmatmul.msk.f32.vlgmr.msra.gmra.mxu2 %vm102_vm2, %v14972_v28  ;;  %11538 = vmatpush.msk.msra.mxu1 %vm109_vm1, %v14616_v48 }
 0x302   :  { %11520 = vmatmul.msk.f32.gmra.mxu3 %vm102_vm2, %v15006_v34  ;;  %11550 = vmatmul.msk.f32.vlgmr.msrb.gmra.mxu0 %vm102_vm2, %v15201_v54 }
 0x303   :  { %11541 = vmatpush.msk.msra.mxu2 %vm109_vm1, %v14618_v17  ;;  %11575 = vmatpush.msk.msrb.mxu0 %vm109_vm1, %v5881_v62  ;;  %v15236_v17 = vld [vmem:[%s19069_s1 + $0x158] sm:$0xf] }
 0x304   :  { %v4235_v23 = vpop.f32.mrf.mxu2  ;;  %v6400_v62 = vld.sshfl [vmem:[#allocation1 + $0x38] sm:$0xff pattern:$0x73625140] }
 0x305   :  { %v15221_v28 = vadd.f32 %v4235_v23, %v15105_v10  ;;  %v4261_v52 = vpop.f32.mrf.mxu3  ;;  %v15223_v27 = vpop.f32.mrf.mxu1  ;;  %v5617_v10 = vsel %vm87_vm0, %v15147_v41, %v5609_v63  ;;  %6413 = vrot.lane.b32.xlu0 %v6400_v62, %s12381_s24 }
 0x306   :  { %19209 = vst [vmem:[#allocation106_spill] sm:$0xff] %v15223_v27  ;;  %v15227_v48 = vadd.f32 %v4261_v52, %v15110_v59 }
 0x307   :  { %v15231_v29 = vpop.f32.mrf.mxu0 }
 0x308   :  { %19210 = vst [vmem:[#allocation107_spill] sm:$0xff] %v15231_v29  ;;  %11514 = vmatmul.msk.f32.gmra.mxu1 %vm102_vm2, %v15006_v34 }
 0x309   :  { %11517 = vmatmul.msk.f32.gmra.mxu2 %vm102_vm2, %v15006_v34  ;;  %v5615_v34 = vsel %vm87_vm0, %v15091_v0, %v15112_v24 }
 0x30a   :  { %11533 = vmatmul.msk.f32.vlgmr.msra.gmra.mxu3 %vm102_vm2, %v15086_v61  ;;  %11551 = vmatmul.msk.f32.gmra.mxu0 %vm102_vm2, %v15236_v17  ;;  %v15270_v62 = vpop.permute.xlu0 %5873 }
 0x30b   :  { %11558 = vmatpush.msk.msra.mxu3 %vm109_vm1, %v5617_v10  ;;  %v15263_v10 = vpop.permute.xlu2 %5877 }
 0x30c   :  { %v4238_v59 = vpop.f32.mrf.mxu2 }
 0x30d   :  { %v15250_v23 = vadd.f32 %v4238_v59, %v15132_v21  ;;  %v4434_v16 = vpop.f32.mrf.mxu3  ;;  %v15252_v52 = vpop.f32.mrf.mxu1  ;;  %v5616_v21 = vsel %vm87_vm0, %v15112_v24, %v15147_v41 }
 0x30e   :  { %v15259_v63 = vadd.f32 %v4434_v16, %v15139_v46  ;;  %v5876_v59 = vpop.permute.xlu1 %5875 }
 0x30f   :  { %v15261_v27 = vpop.f32.mrf.mxu0  ;;  %v5885_v0 = vsel %vm558_vm3, %v5876_v59, %v15263_v10 }
 0x310   :  { %19211 = vst [vmem:[#allocation108_spill] sm:$0xff] %v15261_v27  ;;  %11527 = vmatmul.msk.f32.vlgmr.msrb.gmra.mxu1 %vm102_vm2, %v15086_v61 }
 0x311   :  { %11530 = vmatmul.msk.f32.vlgmr.msrb.gmra.mxu2 %vm102_vm2, %v15086_v61  ;;  %11552 = vmatpush.msk.msrb.mxu1 %vm109_vm1, %v5615_v34 }
 0x312   :  { %11534 = vmatmul.msk.f32.gmra.mxu3 %vm102_vm2, %v15119_v22  ;;  %11562 = vmatmul.msk.f32.vlgmr.msra.gmra.mxu0 %vm102_vm2, %v15201_v54  ;;  %v15297_v29 = vpop.permute.xlu0 %5879 }
 0x313   :  { %11555 = vmatpush.msk.msrb.mxu2 %vm109_vm1, %v5616_v21  ;;  %11587 = vmatpush.msk.msra.mxu0 %vm109_vm1, %v5885_v0  ;;  %v5628_v21 = vsel %vm87_vm0, %v15178_v11, %v5627_v45  ;;  %v5894_v13 = vpop.permute.xlu2 %5893 }
 0x314   :  { %v4411_v24 = vpop.f32.mrf.mxu2 }
 0x315   :  { %v15284_v46 = vadd.f32 %v4411_v24, %v15163_v5  ;;  %v4437_v41 = vpop.f32.mrf.mxu3  ;;  %v15286_v16 = vpop.f32.mrf.mxu1 }
 0x316   :  { %19212 = vst [vmem:[#allocation109_spill] sm:$0xff] %v15286_v16  ;;  %v15289_v34 = vadd.f32 %v4437_v41, %v15170_v12  ;;  %v15299_v0 = vpop.permute.xlu1 %5891  ;;  %v6424_v12 = vld.sshfl [vmem:[#allocation1 + $0x8] sm:$0xff pattern:$0x73625140] }
 0x317   :  { %v15291_v27 = vpop.f32.mrf.mxu0  ;;  %6427 = vrot.lane.b32.xlu2 %v6424_v12, %s12381_s24 }
 0x318   :  { %19213 = vst [vmem:[#allocation110_spill] sm:$0xff] %v15291_v27  ;;  %11528 = vmatmul.msk.f32.gmra.mxu1 %vm102_vm2, %v15119_v22  ;;  %v5619_v27 = vsel %vm87_vm0, %v15143_v33, %v15176_v19 }
 0x319   :  { %11531 = vmatmul.msk.f32.gmra.mxu2 %vm102_vm2, %v15119_v22 }
 0x31a   :  { %11545 = vmatmul.msk.f32.vlgmr.msrb.gmra.mxu3 %vm102_vm2, %v15086_v61  ;;  %11563 = vmatmul.msk.f32.gmra.mxu0 %vm102_vm2, %v15236_v17 }
 0x31b   :  { %11570 = vmatpush.msk.msrb.mxu3 %vm109_vm1, %v5628_v21  ;;  %v5630_v21 = vsel %vm87_vm0, %v15176_v19, %v15178_v11  ;;  %v6135_v33 = vpop.permute.xlu0 %6134 }
 0x31c   :  { %v4414_v5 = vpop.f32.mrf.mxu2 }
 0x31d   :  { %v15309_v24 = vadd.f32 %v4414_v5, %v15189_v9  ;;  %v4526_v45 = vpop.f32.mrf.mxu3  ;;  %v15311_v41 = vpop.f32.mrf.mxu1  ;;  %v15325_v9 = vld [vmem:[%s19069_s1 + $0x160] sm:$0xff] }
 0x31e   :  { %19214 = vst [vmem:[#allocation111_spill] sm:$0xff] %v15311_v41  ;;  %v15318_v16 = vadd.f32 %v4526_v45, %v15194_v40  ;;  %v15332_v5 = vpop.permute.xlu1 %6136  ;;  %v15353_v45 = vpop.permute.xlu2 %6138 }
 0x31f   :  { %v15320_v4 = vpop.f32.mrf.mxu0  ;;  %v6148_v40 = vsel %vm19104_vm4, %v6135_v33, %v15332_v5 }
 0x320   :  { %11539 = vmatmul.msk.f32.vlgmr.msra.gmra.mxu1 %vm102_vm2, %v15086_v61 }
 0x321   :  { %11542 = vmatmul.msk.f32.vlgmr.msra.gmra.mxu2 %vm102_vm2, %v15086_v61  ;;  %11564 = vmatpush.msk.msra.mxu1 %vm109_vm1, %v5619_v27 }
 0x322   :  { %11546 = vmatmul.msk.f32.gmra.mxu3 %vm102_vm2, %v15119_v22  ;;  %11576 = vmatmul.msk.f32.vlgmr.msrb.gmra.mxu0 %vm102_vm2, %v15325_v9 }
 0x323   :  { %11567 = vmatpush.msk.msra.mxu2 %vm109_vm1, %v5630_v21  ;;  %11601 = vmatpush.msk.msrb.mxu0 %vm109_vm1, %v6148_v40  ;;  %v15360_v21 = vld [vmem:[%s19069_s1 + $0x168] sm:$0xf] }
 0x324   :  { %v4503_v19 = vpop.f32.mrf.mxu2 }
 0x325   :  { %v15346_v11 = vadd.f32 %v4503_v19, %v15221_v28  ;;  %v4529_v61 = vpop.f32.mrf.mxu3  ;;  %v15348_v12 = vpop.f32.mrf.mxu1  ;;  %v5884_v28 = vsel %vm558_vm3, %v15270_v62, %v5876_v59  ;;  %v5882_v59 = vsel %vm558_vm3, %v15205_v1, %v15229_v7 }
 0x326   :  { %19215 = vst [vmem:[#allocation112_spill] sm:$0xff] %v15348_v12  ;;  %v15351_v27 = vadd.f32 %v4529_v61, %v15227_v48 }
 0x327   :  { %v15355_v33 = vpop.f32.mrf.mxu0 }
 0x328   :  { %19216 = vst [vmem:[#allocation113_spill] sm:$0xff] %v15355_v33  ;;  %11540 = vmatmul.msk.f32.gmra.mxu1 %vm102_vm2, %v15119_v22 }
 0x329   :  { %11543 = vmatmul.msk.f32.gmra.mxu2 %vm102_vm2, %v15119_v22  ;;  %v15386_v41 = vpop.permute.xlu2 %6144 }
 0x32a   :  { %11559 = vmatmul.msk.f32.vlgmr.msra.gmra.mxu3 %vm102_vm2, %v15201_v54  ;;  %11577 = vmatmul.msk.f32.gmra.mxu0 %vm102_vm2, %v15360_v21 }
 0x32b   :  { %11584 = vmatpush.msk.msra.mxu3 %vm109_vm1, %v5884_v28  ;;  %v5883_v28 = vsel %vm558_vm3, %v15229_v7, %v15270_v62 }
 0x32c   :  { %v4506_v48 = vpop.f32.mrf.mxu2 }
 0x32d   :  { %v15374_v40 = vadd.f32 %v4506_v48, %v15250_v23  ;;  %v4702_v19 = vpop.f32.mrf.mxu3  ;;  %v15376_v61 = vpop.f32.mrf.mxu1 }
 0x32e   :  { %v15382_v22 = vadd.f32 %v4702_v19, %v15259_v63  ;;  %v6143_v23 = vpop.permute.xlu1 %6142  ;;  %v15393_v48 = vpop.permute.xlu0 %6140 }
 0x32f   :  { %v15384_v12 = vpop.f32.mrf.mxu0  ;;  %v6152_v1 = vsel %vm19104_vm4, %v6143_v23, %v15386_v41 }
 0x330   :  { %19217 = vst [vmem:[#allocation114_spill] sm:$0xff] %v15384_v12  ;;  %11553 = vmatmul.msk.f32.vlgmr.msrb.gmra.mxu1 %vm102_vm2, %v15201_v54 }
 0x331   :  { %11556 = vmatmul.msk.f32.vlgmr.msrb.gmra.mxu2 %vm102_vm2, %v15201_v54  ;;  %11578 = vmatpush.msk.msrb.mxu1 %vm109_vm1, %v5882_v59 }
 0x332   :  { %11560 = vmatmul.msk.f32.gmra.mxu3 %vm102_vm2, %v15236_v17  ;;  %11588 = vmatmul.msk.f32.vlgmr.msra.gmra.mxu0 %vm102_vm2, %v15325_v9 }
 0x333   :  { %11581 = vmatpush.msk.msrb.mxu2 %vm109_vm1, %v5883_v28  ;;  %11613 = vmatpush.msk.msra.mxu0 %vm109_vm1, %v6152_v1  ;;  %v5895_v28 = vsel %vm558_vm3, %v15299_v0, %v5894_v13 }
 0x334   :  { %v4679_v7 = vpop.f32.mrf.mxu2 }
 0x335   :  { %v15407_v63 = vadd.f32 %v4679_v7, %v15284_v46  ;;  %v4705_v62 = vpop.f32.mrf.mxu3  ;;  %v15409_v19 = vpop.f32.mrf.mxu1 }
 0x336   :  { %19218 = vst [vmem:[#allocation115_spill] sm:$0xff] %v15409_v19  ;;  %v15412_v59 = vadd.f32 %v4705_v62, %v15289_v34  ;;  %v15420_v33 = vpop.permute.xlu0 %6146  ;;  %v15422_v1 = vpop.permute.xlu1 %6158  ;;  %v5886_v62 = vsel %vm558_vm3, %v15263_v10, %v15297_v29 }
 0x337   :  { %v15414_v12 = vpop.f32.mrf.mxu0  ;;  %v6161_v19 = vpop.permute.xlu2 %6160 }
 0x338   :  { %19219 = vst [vmem:[#allocation116_spill] sm:$0xff] %v15414_v12  ;;  %11554 = vmatmul.msk.f32.gmra.mxu1 %vm102_vm2, %v15236_v17 }
 0x339   :  { %11557 = vmatmul.msk.f32.gmra.mxu2 %vm102_vm2, %v15236_v17 }
 0x33a   :  { %11571 = vmatmul.msk.f32.vlgmr.msrb.gmra.mxu3 %vm102_vm2, %v15201_v54  ;;  %11589 = vmatmul.msk.f32.gmra.mxu0 %vm102_vm2, %v15360_v21 }
 0x33b   :  { %11596 = vmatpush.msk.msrb.mxu3 %vm109_vm1, %v5895_v28  ;;  %v15447_v28 = vld [vmem:[%s19069_s1 + $0x170] sm:$0xff] }
 0x33c   :  { %v4682_v46 = vpop.f32.mrf.mxu2 }
 0x33d   :  { %v15432_v34 = vadd.f32 %v4682_v46, %v15309_v24  ;;  %v4794_v13 = vpop.f32.mrf.mxu3  ;;  %v15434_v7 = vpop.f32.mrf.mxu1  ;;  %v5897_v24 = vsel %vm558_vm3, %v15297_v29, %v15299_v0 }
 0x33e   :  { %19220 = vst [vmem:[#allocation117_spill] sm:$0xff] %v15434_v7  ;;  %v15440_v12 = vadd.f32 %v4794_v13, %v15318_v16  ;;  %v15454_v46 = vpop.permute.xlu1 %6403  ;;  %v6402_v10 = vpop.permute.xlu0 %6401  ;;  %v15480_v7 = vld [vmem:[%s19069_s1 + $0x178] sm:$0xf] }
 0x33f   :  { %v15442_v43 = vpop.f32.mrf.mxu0  ;;  %v6415_v16 = vsel %vm1094_vm5, %v6402_v10, %v15454_v46 }
 0x340   :  { %11565 = vmatmul.msk.f32.vlgmr.msra.gmra.mxu1 %vm102_vm2, %v15201_v54 }
 0x341   :  { %11568 = vmatmul.msk.f32.vlgmr.msra.gmra.mxu2 %vm102_vm2, %v15201_v54  ;;  %11590 = vmatpush.msk.msra.mxu1 %vm109_vm1, %v5886_v62 }
 0x342   :  { %11572 = vmatmul.msk.f32.gmra.mxu3 %vm102_vm2, %v15236_v17  ;;  %11602 = vmatmul.msk.f32.vlgmr.msrb.gmra.mxu0 %vm102_vm2, %v15447_v28 }
 0x343   :  { %11593 = vmatpush.msk.msra.mxu2 %vm109_vm1, %v5897_v24  ;;  %11627 = vmatpush.msk.msrb.mxu0 %vm109_vm1, %v6415_v16  ;;  %v15482_v24 = vpop.permute.xlu2 %6405 }
 0x344   :  { %v4771_v29 = vpop.f32.mrf.mxu2 }
 0x345   :  { %v15468_v0 = vadd.f32 %v4771_v29, %v15346_v11  ;;  %v4797_v54 = vpop.f32.mrf.mxu3  ;;  %v15470_v13 = vpop.f32.mrf.mxu1  ;;  %v6151_v11 = vsel %vm19104_vm4, %v15393_v48, %v6143_v23  ;;  %v6149_v23 = vsel %vm19104_vm4, %v15332_v5, %v15353_v45  ;;  %v6150_v5 = vsel %vm19104_vm4, %v15353_v45, %v15393_v48 }
 0x346   :  { %19221 = vst [vmem:[#allocation118_spill] sm:$0xff] %v15470_v13  ;;  %v15473_v62 = vadd.f32 %v4797_v54, %v15351_v27  ;;  %v12397_v13 = vmov 0  }
 0x347   :  { %v15475_v10 = vpop.f32.mrf.mxu0  ;;  %12076 = vset.pattern.permute.xlu0 %v12397_v13  ;;  %12077 = vset.pattern.permute.xlu1 %v12397_v13 }
 0x348   :  { %19222 = vst [vmem:[#allocation119_spill] sm:$0xff] %v15475_v10  ;;  %11566 = vmatmul.msk.f32.gmra.mxu1 %vm102_vm2, %v15236_v17  ;;  %12078 = vset.pattern.permute.xlu2 %v12397_v13 }
 0x349   :  { %11569 = vmatmul.msk.f32.gmra.mxu2 %vm102_vm2, %v15236_v17 }
 0x34a   :  { %11585 = vmatmul.msk.f32.vlgmr.msra.gmra.mxu3 %vm102_vm2, %v15325_v9  ;;  %11603 = vmatmul.msk.f32.gmra.mxu0 %vm102_vm2, %v15480_v7 }
 0x34b   :  { %11610 = vmatpush.msk.msra.mxu3 %vm109_vm1, %v6151_v11  ;;  %v6655_v11 = vld [vmem:[%s19070_s2] sm:$0xff] }
 0x34c   :  { %v4774_v27 = vpop.f32.mrf.mxu2  ;;  %6659 = vperm.xlu0 %12076, %v6655_v11  }
 0x34d   :  { %v15496_v16 = vadd.f32 %v4774_v27, %v15374_v40  ;;  %v4970_v29 = vpop.f32.mrf.mxu3  ;;  %v15498_v54 = vpop.f32.mrf.mxu1  ;;  %v6683_v27 = vld [vmem:[%s19071_s3] sm:$0xff] }
 0x34e   :  { %v15504_v17 = vadd.f32 %v4970_v29, %v15382_v22  ;;  %v15511_v40 = vpop.permute.xlu2 %6411  ;;  %v6410_v22 = vpop.permute.xlu1 %6409  ;;  %6687 = vperm.xlu1 %12077, %v6683_v27   ;;  %v6684_v27 = vld [vmem:[%s19071_s3 + $0x8] sm:$0xf]  ;;  %s12407_s3 = smov 112  }
 0x34f   :  { %v15509_v10 = vpop.f32.mrf.mxu0  ;;  %v6419_v13 = vsel %vm1094_vm5, %v6410_v22, %v15511_v40 }
 0x350   :  { %19223 = vst [vmem:[#allocation120_spill] sm:$0xff] %v15509_v10  ;;  %11579 = vmatmul.msk.f32.vlgmr.msrb.gmra.mxu1 %vm102_vm2, %v15325_v9 }
 0x351   :  { %11582 = vmatmul.msk.f32.vlgmr.msrb.gmra.mxu2 %vm102_vm2, %v15325_v9  ;;  %11604 = vmatpush.msk.msrb.mxu1 %vm109_vm1, %v6149_v23 }
 0x352   :  { %11586 = vmatmul.msk.f32.gmra.mxu3 %vm102_vm2, %v15360_v21  ;;  %11614 = vmatmul.msk.f32.vlgmr.msra.gmra.mxu0 %vm102_vm2, %v15447_v28 }
 0x353   :  { %11607 = vmatpush.msk.msrb.mxu2 %vm109_vm1, %v6150_v5  ;;  %11639 = vmatpush.msk.msra.mxu0 %vm109_vm1, %v6419_v13  ;;  %v6162_v5 = vsel %vm19104_vm4, %v15422_v1, %v6161_v19 }
 0x354   :  { %v4947_v45 = vpop.f32.mrf.mxu2 }
 0x355   :  { %v15533_v48 = vadd.f32 %v4947_v45, %v15407_v63  ;;  %v4973_v29 = vpop.f32.mrf.mxu3  ;;  %v15535_v23 = vpop.f32.mrf.mxu1  ;;  %v6153_v45 = vsel %vm19104_vm4, %v15386_v41, %v15420_v33 }
 0x356   :  { %19224 = vst [vmem:[#allocation121_spill] sm:$0xff] %v15535_v23  ;;  %v15538_v11 = vadd.f32 %v4973_v29, %v15412_v59  ;;  %6692 = vperm.xlu1 %12077, %v6684_v27  }
 0x357   :  { %v15540_v10 = vpop.f32.mrf.mxu0 }
 0x358   :  { %19225 = vst [vmem:[#allocation122_spill] sm:$0xff] %v15540_v10  ;;  %11580 = vmatmul.msk.f32.gmra.mxu1 %vm102_vm2, %v15360_v21 }
 0x359   :  { %11583 = vmatmul.msk.f32.gmra.mxu2 %vm102_vm2, %v15360_v21 }
 0x35a   :  { %11597 = vmatmul.msk.f32.vlgmr.msrb.gmra.mxu3 %vm102_vm2, %v15325_v9  ;;  %11615 = vmatmul.msk.f32.gmra.mxu0 %vm102_vm2, %v15480_v7 }
 0x35b   :  { %11622 = vmatpush.msk.msrb.mxu3 %vm109_vm1, %v6162_v5  ;;  %v15572_v5 = vld [vmem:[%s19069_s1 + $0x180] sm:$0xff] }
 0x35c   :  { %v4950_v63 = vpop.f32.mrf.mxu2 }
 0x35d   :  { %v15557_v59 = vadd.f32 %v4950_v63, %v15432_v34  ;;  %v5062_v19 = vpop.f32.mrf.mxu3  ;;  %v15559_v13 = vpop.f32.mrf.mxu1  ;;  %v6164_v34 = vsel %vm19104_vm4, %v15420_v33, %v15422_v1 }
 0x35e   :  { %19227 = vst [vmem:[#allocation124_spill] sm:$0xff] %v15559_v13  ;;  %v15565_v29 = vadd.f32 %v5062_v19, %v15440_v12 }
 0x35f   :  { %19226 = vst [vmem:[#allocation123_spill] sm:$0xff] %v15557_v59  ;;  %v15567_v10 = vpop.f32.mrf.mxu0 }
 0x360   :  { %19228 = vst [vmem:[#allocation125_spill] sm:$0xff] %v15565_v29  ;;  %11591 = vmatmul.msk.f32.vlgmr.msra.gmra.mxu1 %vm102_vm2, %v15325_v9 }
 0x361   :  { %11594 = vmatmul.msk.f32.vlgmr.msra.gmra.mxu2 %vm102_vm2, %v15325_v9  ;;  %11616 = vmatpush.msk.msra.mxu1 %vm109_vm1, %v6153_v45  ;;  %v15598_v9 = vld [vmem:[%s19069_s1 + $0x188] sm:$0xf]  ;;  %v6408_v63 = vpop.permute.xlu0 %6407  ;;  %s19099_s1 = smov 100  }
 0x362   :  { %11598 = vmatmul.msk.f32.gmra.mxu3 %vm102_vm2, %v15360_v21  ;;  %11628 = vmatmul.msk.f32.vlgmr.msrb.gmra.mxu0 %vm102_vm2, %v15572_v5 }
 0x363   :  { %11619 = vmatpush.msk.msra.mxu2 %vm109_vm1, %v6164_v34 }
 0x364   :  { %v5039_v41 = vpop.f32.mrf.mxu2 }
 0x365   :  { %v15588_v12 = vadd.f32 %v5039_v41, %v15468_v0  ;;  %v5065_v33 = vpop.f32.mrf.mxu3  ;;  %v15590_v1 = vpop.f32.mrf.mxu1  ;;  %v6418_v0 = vsel %vm1094_vm5, %v6408_v63, %v6410_v22  ;;  %v6656_v22 = vld [vmem:[%s19070_s2 + $0x8] sm:$0xf]  ;;  %s12399_s2 = smov 65  }
 0x366   :  { %19230 = vst [vmem:[#allocation127_spill] sm:$0xff] %v15590_v1  ;;  %v15593_v27 = vadd.f32 %v5065_v33, %v15473_v62  ;;  %6664 = vperm.xlu2 %12078, %v6656_v22  }
 0x367   :  { %19229 = vst [vmem:[#allocation126_spill] sm:$0xff] %v15588_v12  ;;  %v15600_v19 = vpop.f32.mrf.mxu0 }
 0x368   :  { %19231 = vst [vmem:[#allocation128_spill] sm:$0xff] %v15593_v27  ;;  %11592 = vmatmul.msk.f32.gmra.mxu1 %vm102_vm2, %v15360_v21 }
 0x369   :  { %19232 = vst [vmem:[#allocation129_spill] sm:$0xff] %v15600_v19  ;;  %11595 = vmatmul.msk.f32.gmra.mxu2 %vm102_vm2, %v15360_v21  ;;  %v6416_v21 = vsel %vm1094_vm5, %v15454_v46, %v15482_v24 }
 0x36a   :  { %11611 = vmatmul.msk.f32.vlgmr.msra.gmra.mxu3 %vm102_vm2, %v15447_v28  ;;  %11629 = vmatmul.msk.f32.gmra.mxu0 %vm102_vm2, %v15598_v9 }
 0x36b   :  { %11636 = vmatpush.msk.msra.mxu3 %vm109_vm1, %v6418_v0 }
 0x36c   :  { %v5042_v62 = vpop.f32.mrf.mxu2 }
 0x36d   :  { %v15613_v45 = vadd.f32 %v5042_v62, %v15496_v16  ;;  %v15615_v34 = vpop.f32.mrf.mxu3  ;;  %v15617_v41 = vpop.f32.mrf.mxu1  ;;  %v6417_v16 = vsel %vm1094_vm5, %v15482_v24, %v6408_v63 }
 0x36f   :  { %19233 = vst [vmem:[#allocation130_spill] sm:$0xff] %v15613_v45  ;;  %v15632_v33 = vpop.f32.mrf.mxu0 }
 0x370   :  { %11605 = vmatmul.msk.f32.vlgmr.msrb.gmra.mxu1 %vm102_vm2, %v15447_v28  ;;  %19234 = vst [vmem:[#allocation131_spill] sm:$0xff] %v15632_v33 }
 0x371   :  { %11608 = vmatmul.msk.f32.vlgmr.msrb.gmra.mxu2 %vm102_vm2, %v15447_v28  ;;  %11630 = vmatpush.msk.msrb.mxu1 %vm109_vm1, %v6416_v21  ;;  %v6428_v63 = vpop.permute.xlu2 %6427  ;;  %v6426_v62 = vpop.permute.xlu1 %6425 }
 0x372   :  { %11612 = vmatmul.msk.f32.gmra.mxu3 %vm102_vm2, %v15480_v7  ;;  %11640 = vmatmul.msk.f32.vlgmr.msra.gmra.mxu0 %vm102_vm2, %v15572_v5  ;;  %v6429_v21 = vsel %vm1094_vm5, %v6426_v62, %v6428_v63 }
 0x373   :  { %11633 = vmatpush.msk.msrb.mxu2 %vm109_vm1, %v6417_v16 }
 0x374   :  { %v15639_v46 = vpop.f32.mrf.mxu2 }
 0x375   :  { %v15641_v0 = vpop.f32.mrf.mxu3  ;;  %v15643_v24 = vpop.f32.mrf.mxu1 }
 0x376   :  { %19235 = vst [vmem:[#allocation132_spill] sm:$0xff] %v15643_v24 }
 0x377   :  { %v15655_v22 = vpop.f32.mrf.mxu0  ;;  %v6414_v45 = vpop.permute.xlu0 %6413 }
 0x378   :  { %11606 = vmatmul.msk.f32.gmra.mxu1 %vm102_vm2, %v15480_v7  ;;  %19236 = vst [vmem:[#allocation133_spill] sm:$0xff] %v15655_v22  ;;  %v6420_v63 = vsel %vm1094_vm5, %v15511_v40, %v6414_v45  ;;  %v6431_v13 = vsel %vm1094_vm5, %v6414_v45, %v6426_v62 }
 0x379   :  { %11609 = vmatmul.msk.f32.gmra.mxu2 %vm102_vm2, %v15480_v7 }
 0x37a   :  { %11623 = vmatmul.msk.f32.vlgmr.msrb.gmra.mxu3 %vm102_vm2, %v15447_v28  ;;  %11641 = vmatmul.msk.f32.gmra.mxu0 %vm102_vm2, %v15598_v9 }
 0x37b   :  { %11648 = vmatpush.msk.msrb.mxu3 %vm109_vm1, %v6429_v21 }
 0x37c   :  { %v15657_v16 = vpop.f32.mrf.mxu2 }
 0x37d   :  { %19237 = vst [vmem:[#allocation134_spill] sm:$0xff] %v15657_v16  ;;  %v15659_v27 = vpop.f32.mrf.mxu3  ;;  %v15661_v1 = vpop.f32.mrf.mxu1 }
 0x37e   :  { %19238 = vst [vmem:[#allocation135_spill] sm:$0xff] %v15659_v27 }
 0x37f   :  { %19239 = vst [vmem:[#allocation136_spill] sm:$0xff] %v15661_v1  ;;  %v15680_v29 = vpop.f32.mrf.mxu0 }
 0x380   :  { %11617 = vmatmul.msk.f32.vlgmr.msra.gmra.mxu1 %vm102_vm2, %v15447_v28 }
 0x381   :  { %11620 = vmatmul.msk.f32.vlgmr.msra.gmra.mxu2 %vm102_vm2, %v15447_v28  ;;  %11642 = vmatpush.msk.msra.mxu1 %vm109_vm1, %v6420_v63 }
 0x382   :  { %11624 = vmatmul.msk.f32.gmra.mxu3 %vm102_vm2, %v15480_v7  ;;  %11645 = vmatpush.msk.msra.mxu2 %vm109_vm1, %v6431_v13  ;;  %vm7661_vm1 = vcmask 1043456  }
 0x384   :  { %v15674_v21 = vpop.f32.mrf.mxu2 }
 0x385   :  { %19240 = vst [vmem:[#allocation137_spill] sm:$0xff] %v15674_v21  ;;  %v15676_v1 = vpop.f32.mrf.mxu3  ;;  %v15678_v27 = vpop.f32.mrf.mxu1 }
 0x386   :  { %19241 = vst [vmem:[#allocation138_spill] sm:$0xff] %v15676_v1 }
 0x387   :  { %19242 = vst [vmem:[#allocation139_spill] sm:$0xff] %v15678_v27  ;;  %v15694_v45 = vpop.f32.mrf.mxu0 }
 0x388   :  { %11618 = vmatmul.msk.f32.gmra.mxu1 %vm102_vm2, %v15480_v7  ;;  %19244 = vst [vmem:[#allocation141_spill] sm:$0xff] %v15694_v45 }
 0x389   :  { %11621 = vmatmul.msk.f32.gmra.mxu2 %vm102_vm2, %v15480_v7 }
 0x38a   :  { %11637 = vmatmul.msk.f32.vlgmr.msra.gmra.mxu3 %vm102_vm2, %v15572_v5 }
 0x38c   :  { %v15688_v28 = vpop.f32.mrf.mxu2 }
 0x38d   :  { %19243 = vst [vmem:[#allocation140_spill] sm:$0xff] %v15688_v28  ;;  %v15690_v40 = vpop.f32.mrf.mxu3  ;;  %v15692_v13 = vpop.f32.mrf.mxu1 }
 0x38f   :  { %v15712_v1 = vpop.f32.mrf.mxu0 }
 0x390   :  { %11631 = vmatmul.msk.f32.vlgmr.msrb.gmra.mxu1 %vm102_vm2, %v15572_v5  ;;  %19246 = vst [vmem:[#allocation143_spill] sm:$0xff] %v15712_v1 }
 0x391   :  { %11634 = vmatmul.msk.f32.vlgmr.msrb.gmra.mxu2 %vm102_vm2, %v15572_v5 }
 0x392   :  { %11638 = vmatmul.msk.f32.gmra.mxu3 %vm102_vm2, %v15598_v9 }
 0x394   :  { %v15702_v7 = vpop.f32.mrf.mxu2 }
 0x395   :  { %v15704_v62 = vpop.f32.mrf.mxu3  ;;  %v15706_v63 = vpop.f32.mrf.mxu1 }
 0x396   :  { %19245 = vst [vmem:[#allocation142_spill] sm:$0xff] %v15706_v63 }
 0x397   :  { %v15728_v12 = vpop.f32.mrf.mxu0 }
 0x398   :  { %11632 = vmatmul.msk.f32.gmra.mxu1 %vm102_vm2, %v15598_v9  ;;  %19250 = vst [vmem:[#allocation147_spill] sm:$0xff] %v15728_v12 }
 0x399   :  { %11635 = vmatmul.msk.f32.gmra.mxu2 %vm102_vm2, %v15598_v9 }
 0x39a   :  { %11649 = vmatmul.msk.f32.vlgmr.msrb.gmra.mxu3 %vm102_vm2, %v15572_v5 }
 0x39c   :  { %v15716_v27 = vpop.f32.mrf.mxu2 }
 0x39d   :  { %19247 = vst [vmem:[#allocation144_spill] sm:$0xff] %v15716_v27  ;;  %v15718_v28 = vpop.f32.mrf.mxu3  ;;  %v15720_v21 = vpop.f32.mrf.mxu1 }
 0x39e   :  { %19248 = vst [vmem:[#allocation145_spill] sm:$0xff] %v15718_v28 }
 0x39f   :  { %19249 = vst [vmem:[#allocation146_spill] sm:$0xff] %v15720_v21  ;;  %v15746_v16 = vpop.f32.mrf.mxu0 }
 0x3a0   :  { %11643 = vmatmul.msk.f32.vlgmr.msra.gmra.mxu1 %vm102_vm2, %v15572_v5 }
 0x3a1   :  { %11646 = vmatmul.msk.f32.vlgmr.msra.gmra.mxu2 %vm102_vm2, %v15572_v5 }
 0x3a2   :  { %11650 = vmatmul.msk.f32.gmra.mxu3 %vm102_vm2, %v15598_v9 }
 0x3a4   :  { %v15730_v1 = vpop.f32.mrf.mxu2 }
 0x3a5   :  { %19251 = vst [vmem:[#allocation148_spill] sm:$0xff] %v15730_v1  ;;  %v15732_v33 = vpop.f32.mrf.mxu3  ;;  %v15734_v27 = vpop.f32.mrf.mxu1 }
 0x3a6   :  { %19252 = vst [vmem:[#allocation149_spill] sm:$0xff] %v15732_v33 }
 0x3a7   :  { %19253 = vst [vmem:[#allocation150_spill] sm:$0xff] %v15734_v27  ;;  %v15754_v27 = vpop.f32.mrf.mxu0 }
 0x3a8   :  { %11644 = vmatmul.msk.f32.gmra.mxu1 %vm102_vm2, %v15598_v9  ;;  %19258 = vst [vmem:[#allocation155_spill] sm:$0xff] %v15754_v27 }
 0x3a9   :  { %11647 = vmatmul.msk.f32.gmra.mxu2 %vm102_vm2, %v15598_v9  ;;  %vm7648_vm2 = vcmask 97280  }
 0x3ac   :  { %v15740_v21 = vpop.f32.mrf.mxu2 }
 0x3ad   :  { %19254 = vst [vmem:[#allocation151_spill] sm:$0xff] %v15740_v21  ;;  %v15742_v5 = vpop.f32.mrf.mxu3  ;;  %v15744_v28 = vpop.f32.mrf.mxu1 }
 0x3af   :  { %v15762_v21 = vpop.f32.mrf.mxu0 }
 0x3b0   :  { %19262 = vst [vmem:[#allocation159_spill] sm:$0xff] %v15762_v21 }
 0x3b4   :  { %v15748_v59 = vpop.f32.mrf.mxu2 }
 0x3b5   :  { %19255 = vst [vmem:[#allocation152_spill] sm:$0xff] %v15748_v59  ;;  %v15750_v1 = vpop.f32.mrf.mxu3  ;;  %v15752_v33 = vpop.f32.mrf.mxu1 }
 0x3b6   :  { %19256 = vst [vmem:[#allocation153_spill] sm:$0xff] %v15750_v1 }
 0x3b7   :  { %19257 = vst [vmem:[#allocation154_spill] sm:$0xff] %v15752_v33  ;;  %v15770_v23 = vpop.f32.mrf.mxu0 }
 0x3b8   :  { %19266 = vst [vmem:[#allocation163_spill] sm:$0xff] %v15770_v23 }
 0x3bc   :  { %v15756_v12 = vpop.f32.mrf.mxu2 }
 0x3bd   :  { %19259 = vst [vmem:[#allocation156_spill] sm:$0xff] %v15756_v12  ;;  %v15758_v22 = vpop.f32.mrf.mxu3  ;;  %v15760_v9 = vpop.f32.mrf.mxu1 }
 0x3be   :  { %19260 = vst [vmem:[#allocation157_spill] sm:$0xff] %v15758_v22 }
 0x3bf   :  { %19261 = vst [vmem:[#allocation158_spill] sm:$0xff] %v15760_v9  ;;  %v15784_v21 = vpop.f32.mrf.mxu0 }
 0x3c4   :  { %v15764_v63 = vpop.f32.mrf.mxu2 }
 0x3c5   :  { %19263 = vst [vmem:[#allocation160_spill] sm:$0xff] %v15764_v63  ;;  %v15766_v24 = vpop.f32.mrf.mxu3  ;;  %v15768_v45 = vpop.f32.mrf.mxu1 }
 0x3c6   :  { %19264 = vst [vmem:[#allocation161_spill] sm:$0xff] %v15766_v24  ;;  %v362_v24 = vadd.f32 %v12980_v50, %v13014_v55 }
 0x3c7   :  { %19265 = vst [vmem:[#allocation162_spill] sm:$0xff] %v15768_v45 }
 0x3c8   :  { %v780_v45 = vadd.f32 %v13115_v38, %v362_v24 }
 0x3ca   :  { %v1048_v59 = vadd.f32 %v13256_v14, %v780_v45 }
 0x3cc   :  { %v15772_v1 = vpop.f32.mrf.mxu2 }
 0x3cd   :  { %19267 = vst [vmem:[#allocation164_spill] sm:$0xff] %v15772_v1  ;;  %v15774_v33 = vpop.f32.mrf.mxu3  ;;  %v15776_v27 = vpop.f32.mrf.mxu1 }
 0x3d4   :  { %v15778_v12 = vpop.f32.mrf.mxu2 }
 0x3d5   :  { %19268 = vst [vmem:[#allocation165_spill] sm:$0xff] %v15778_v12  ;;  %v15780_v22 = vpop.f32.mrf.mxu3  ;;  %v15782_v9 = vpop.f32.mrf.mxu1 }
 0x3d6   :  { %19269 = vst [vmem:[#allocation166_spill] sm:$0xff] %v15780_v22  ;;  %v385_v22 = vadd.f32 %v13175_v60, %v13042_v6  ;;  %v15799_v12 = vpop.f32.mrf.mxu0 }
 0x3d7   :  { %19270 = vst [vmem:[#allocation167_spill] sm:$0xff] %v15782_v9  ;;  %v1316_v9 = vadd.f32 %v13400_v36, %v1048_v59 }
 0x3d8   :  { %v781_v19 = vadd.f32 %v13319_v25, %v385_v22 }
 0x3d9   :  { %v1584_v50 = vadd.f32 %v13544_v18, %v1316_v9 }
 0x3da   :  { %v1049_v55 = vadd.f32 %v13463_v2, %v781_v19 }
 0x3db   :  { %v1852_v38 = vadd.f32 %v13688_v35, %v1584_v50  ;;  %v788_v35 = vadd.f32 %v13154_v51, %v13038_v8  ;;  %v19279_v50 = vld [vmem:[#allocation8_spill] sm:$0xff]  ;;  %v19281_v8 = vld [vmem:[#allocation22_spill] sm:$0xff] }
 0x3dc   :  { %v15789_v63 = vpop.f32.mrf.mxu2  ;;  %v1317_v6 = vadd.f32 %v13607_v58, %v1049_v55  ;;  %v19280_v55 = vld [vmem:[#allocation13_spill] sm:$0xff] }
 0x3dd   :  { %v15791_v1 = vpop.f32.mrf.mxu3  ;;  %v15793_v23 = vpop.f32.mrf.mxu1  ;;  %v2120_v60 = vadd.f32 %v13832_v47, %v1852_v38  ;;  %v1056_v47 = vadd.f32 %v13297_v44, %v788_v35  ;;  %v388_v38 = vadd.f32 %v19280_v55, %v19279_v50  ;;  %v19287_v35 = vld [vmem:[#allocation28_spill] sm:$0xff] }
 0x3de   :  { %19271 = vst [vmem:[#allocation168_spill] sm:$0xff] %v15791_v1  ;;  %v1585_v36 = vadd.f32 %v13751_v32, %v1317_v6  ;;  %v15817_v59 = vpop.f32.mrf.mxu0  ;;  %v19291_v50 = vld [vmem:[#allocation24_spill] sm:$0xff] }
 0x3df   :  { %19272 = vst [vmem:[#allocation169_spill] sm:$0xff] %v15793_v23  ;;  %v2388_v25 = vadd.f32 %v13976_v37, %v2120_v60  ;;  %v1324_v51 = vadd.f32 %v19281_v8, %v1056_v47  ;;  %v19292_v47 = vld [vmem:[#allocation34_spill] sm:$0xff] }
 0x3e0   :  { %v1853_v18 = vadd.f32 %v13895_v30, %v1585_v36  ;;  %v19277_v30 = vld [vmem:[#allocation53_spill] sm:$0xff]  ;;  %v19284_v36 = vld [vmem:[#allocation6_spill] sm:$0xff] }
 0x3e1   :  { %v2656_v2 = vadd.f32 %v14120_v56, %v2388_v25  ;;  %v19278_v56 = vld [vmem:[#allocation65_spill] sm:$0xff] }
 0x3e2   :  { %v2121_v19 = vadd.f32 %v14039_v42, %v1853_v18  ;;  %v19282_v42 = vld [vmem:[#allocation60_spill] sm:$0xff]  ;;  %v19285_v25 = vld [vmem:[#allocation9_spill] sm:$0xff]  ;;  %v19286_v18 = vld [vmem:[#allocation18_spill] sm:$0xff] }
 0x3e3   :  { %v2924_v22 = vadd.f32 %v14264_v20, %v2656_v2  ;;  %v19283_v20 = vld [vmem:[#allocation73_spill] sm:$0xff]  ;;  %v457_v44 = vadd.f32 %v19285_v25, %v19284_v36  ;;  %v789_v2 = vadd.f32 %v19286_v18, %v388_v38 }
 0x3e4   :  { %v15805_v24 = vpop.f32.mrf.mxu2  ;;  %v2389_v45 = vadd.f32 %v19277_v30, %v2121_v19  ;;  %v19289_v30 = vld [vmem:[#allocation81_spill] sm:$0xff] }
 0x3e5   :  { %19273 = vst [vmem:[#allocation170_spill] sm:$0xff] %v15805_v24  ;;  %v15807_v23 = vpop.f32.mrf.mxu3  ;;  %v15809_v14 = vpop.f32.mrf.mxu1  ;;  %v3192_v9 = vadd.f32 %v19278_v56, %v2924_v22  ;;  %v19290_v56 = vld [vmem:[#allocation14_spill] sm:$0xff]  ;;  %v1057_v55 = vadd.f32 %v19291_v50, %v789_v2 }
 0x3e6   :  { %19274 = vst [vmem:[#allocation171_spill] sm:$0xff] %v15807_v23  ;;  %v2657_v6 = vadd.f32 %v19282_v42, %v2389_v45  ;;  %v1592_v23 = vadd.f32 %v19287_v35, %v1324_v51  ;;  %v19293_v45 = vld [vmem:[#allocation5_spill] sm:$0xff]  ;;  %v19294_v42 = vld [vmem:[#allocation7_spill] sm:$0xff]  ;;  %v15850_v38 = vpop.f32.mrf.mxu0  ;;  %v19299_v35 = vld [vmem:[#allocation12_spill] sm:$0xff] }
 0x3e7   :  { %19275 = vst [vmem:[#allocation172_spill] sm:$0xff] %v15809_v14  ;;  %v3460_v60 = vadd.f32 %v19283_v20, %v3192_v9  ;;  %v19288_v14 = vld [vmem:[#allocation68_spill] sm:$0xff]  ;;  %v454_v9 = vadd.f32 %v19294_v42, %v19293_v45  ;;  %v19303_v42 = vld [vmem:[#allocation46_spill] sm:$0xff] }
 0x3e8   :  { %v2925_v19 = vadd.f32 %v19288_v14, %v2657_v6  ;;  %v1860_v8 = vadd.f32 %v19292_v47, %v1592_v23  ;;  %v19295_v20 = vld [vmem:[#allocation76_spill] sm:$0xff]  ;;  %v19296_v14 = vld [vmem:[#allocation19_spill] sm:$0xff]  ;;  %v19306_v24 = vld [vmem:[#allocation42_spill] sm:$0xff] }
 0x3e9   :  { %v3728_v22 = vadd.f32 %v19289_v30, %v3460_v60  ;;  %v19297_v60 = vld [vmem:[#allocation30_spill] sm:$0xff]  ;;  %v784_v30 = vadd.f32 %v19299_v35, %v454_v9  ;;  %v19302_v47 = vld [vmem:[#allocation36_spill] sm:$0xff] }
 0x3ea   :  { %v3193_v1 = vadd.f32 %v19295_v20, %v2925_v19  ;;  %v1325_v25 = vadd.f32 %v19297_v60, %v1057_v55  ;;  %v19304_v20 = vld [vmem:[#allocation17_spill] sm:$0xff]  ;;  %v19305_v60 = vld [vmem:[#allocation31_spill] sm:$0xff]  ;;  %v19307_v35 = vld [vmem:[#allocation52_spill] sm:$0xff] }
 0x3eb   :  { %v3996_v36 = vadd.f32 %v14833_v57, %v3728_v22  ;;  %v19301_v22 = vld [vmem:[#allocation25_spill] sm:$0xff]  ;;  %v1052_v55 = vadd.f32 %v19304_v20, %v784_v30  ;;  %v19311_v30 = vld [vmem:[#allocation11_spill] sm:$0xff] }
 0x3ec   :  { %v15823_v58 = vpop.f32.mrf.mxu2  ;;  %v1593_v45 = vadd.f32 %v19302_v47, %v1325_v25  ;;  %v19312_v47 = vld [vmem:[#allocation16_spill] sm:$0xff]  ;;  %v19317_v20 = vld [vmem:[#allocation29_spill] sm:$0xff] }
 0x3ed   :  { %19276 = vst [vmem:[#allocation173_spill] sm:$0xff] %v15823_v58  ;;  %v15826_v32 = vpop.f32.mrf.mxu3  ;;  %v15828_v37 = vpop.f32.mrf.mxu1  ;;  %v792_v58 = vadd.f32 %v19290_v56, %v457_v44  ;;  %v19298_v44 = vld [vmem:[#allocation40_spill] sm:$0xff]  ;;  %v4264_v57 = vadd.f32 %v14967_v49, %v3996_v36  ;;  %v19309_v49 = vld [vmem:[#allocation15_spill] sm:$0xff] }
 0x3ee   :  { %v2128_v18 = vadd.f32 %v19298_v44, %v1860_v8  ;;  %v19300_v56 = vld [vmem:[#allocation84_spill] sm:$0xff]  ;;  %v1861_v9 = vadd.f32 %v19306_v24, %v1593_v45 }
 0x3ef   :  { %v1060_v6 = vadd.f32 %v19296_v14, %v792_v58  ;;  %v3461_v19 = vadd.f32 %v19300_v56, %v3193_v1  ;;  %v4532_v14 = vadd.f32 %v15081_v31, %v4264_v57  ;;  %v19308_v56 = vld [vmem:[#allocation10_spill] sm:$0xff]  ;;  %v19314_v57 = vld [vmem:[#allocation48_spill] sm:$0xff] }
 0x3f0   :  { %v2396_v58 = vadd.f32 %v19303_v42, %v2128_v18  ;;  %v477_v36 = vadd.f32 %v19309_v49, %v19308_v56  ;;  %v19315_v42 = vld [vmem:[#allocation59_spill] sm:$0xff]  ;;  %v19316_v45 = vld [vmem:[#allocation20_spill] sm:$0xff] }
 0x3f1   :  { %v1328_v50 = vadd.f32 %v19301_v22, %v1060_v6  ;;  %v3729_v8 = vadd.f32 %v14897_v26, %v3461_v19  ;;  %v19310_v6 = vld [vmem:[#allocation23_spill] sm:$0xff]  ;;  %v4800_v18 = vadd.f32 %v15196_v3, %v4532_v14  ;;  %v480_v26 = vadd.f32 %v19312_v47, %v19311_v30  ;;  %v19313_v19 = vld [vmem:[#allocation37_spill] sm:$0xff] }
 0x3f2   :  { %v2664_v1 = vadd.f32 %v19307_v35, %v2396_v58  ;;  %v1320_v22 = vadd.f32 %v19310_v6, %v1052_v55  ;;  %v785_v58 = vadd.f32 %v19316_v45, %v477_v36  ;;  %v19318_v3 = vld [vmem:[#allocation21_spill] sm:$0xff]  ;;  %v19319_v14 = vld [vmem:[#allocation43_spill] sm:$0xff]  ;;  %v19322_v36 = vld [vmem:[#allocation26_spill] sm:$0xff]  ;;  %v6472_v45 = vpop.f32.mrf.mxu0 }
 0x3f3   :  { %v1596_v44 = vadd.f32 %v19305_v60, %v1328_v50  ;;  %v3997_v25 = vadd.f32 %v15021_v53, %v3729_v8  ;;  %v2129_v50 = vadd.f32 %v19314_v57, %v1861_v9  ;;  %v5068_v55 = vadd.f32 %v15320_v4, %v4800_v18  ;;  %v19320_v49 = vld [vmem:[#allocation55_spill] sm:$0xff]  ;;  %v19326_v57 = vld [vmem:[#allocation62_spill] sm:$0xff] }
 0x3f4   :  { %v15852_v51 = vpop.f32.mrf.mxu2  ;;  %v2932_v24 = vadd.f32 %v19315_v42, %v2664_v1  ;;  %v1588_v60 = vadd.f32 %v19317_v20, %v1320_v22  ;;  %v793_v8 = vadd.f32 %v19318_v3, %v480_v26  ;;  %v19321_v6 = vld [vmem:[#allocation67_spill] sm:$0xff]  ;;  %v1053_v22 = vadd.f32 %v19322_v36, %v785_v58  ;;  %v19328_v20 = vld [vmem:[#allocation32_spill] sm:$0xff] }
 0x3f5   :  { %v15857_v2 = vpop.f32.mrf.mxu3  ;;  %v15859_v23 = vpop.f32.mrf.mxu1  ;;  %v1864_v31 = vadd.f32 %v19313_v19, %v1596_v44  ;;  %v4265_v35 = vadd.f32 %v15134_v39, %v3997_v25  ;;  %v2397_v44 = vadd.f32 %v19320_v49, %v2129_v50  ;;  %v19323_v47 = vld [vmem:[#allocation35_spill] sm:$0xff]  ;;  %v5336_v25 = vadd.f32 %v15442_v43, %v5068_v55  ;;  %v19325_v19 = vld [vmem:[#allocation49_spill] sm:$0xff]  ;;  %v19331_v43 = vld [vmem:[#allocation56_spill] sm:$0xff] }
 0x3f6   :  { %v3200_v9 = vadd.f32 %v19321_v6, %v2932_v24  ;;  %v1856_v39 = vadd.f32 %v19323_v47, %v1588_v60  ;;  %v19324_v18 = vld [vmem:[#allocation27_spill] sm:$0xff]  ;;  %v1321_v3 = vadd.f32 %v19328_v20, %v1053_v22  ;;  %v19341_v20 = vld [vmem:[#allocation54_spill] sm:$0xff] }
 0x3f7   :  { %v2132_v56 = vadd.f32 %v19319_v14, %v1864_v31  ;;  %v4533_v4 = vadd.f32 %v15252_v52, %v4265_v35  ;;  %v1061_v26 = vadd.f32 %v19324_v18, %v793_v8  ;;  %v2665_v50 = vadd.f32 %v19326_v57, %v2397_v44  ;;  %v19327_v42 = vld [vmem:[#allocation75_spill] sm:$0xff]  ;;  %v19329_v14 = vld [vmem:[#allocation41_spill] sm:$0xff]  ;;  %v19332_v8 = vld [vmem:[#allocation70_spill] sm:$0xff] }
 0x3f8   :  { %v3468_v24 = vadd.f32 %v19327_v42, %v3200_v9  ;;  %v2124_v49 = vadd.f32 %v19329_v14, %v1856_v39  ;;  %v5571_v60 = vadd.f32 %v15567_v10, %v5336_v25  ;;  %v19330_v52 = vld [vmem:[#allocation33_spill] sm:$0xff]  ;;  %v19334_v44 = vld [vmem:[#allocation38_spill] sm:$0xff]  ;;  %v19335_v9 = vld [vmem:[#allocation47_spill] sm:$0xff] }
 0x3f9   :  { %v2400_v31 = vadd.f32 %v19325_v19, %v2132_v56  ;;  %v4801_v58 = vadd.f32 %v15376_v61, %v4533_v4  ;;  %v1329_v35 = vadd.f32 %v19330_v52, %v1061_v26  ;;  %v2933_v6 = vadd.f32 %v19332_v8, %v2665_v50  ;;  %v19333_v56 = vld [vmem:[#allocation83_spill] sm:$0xff]  ;;  %v19338_v25 = vld [vmem:[#allocation78_spill] sm:$0xff]  ;;  %v19340_v42 = vld [vmem:[#allocation44_spill] sm:$0xff] }
 0x3fa   :  { %v3736_v36 = vadd.f32 %v19333_v56, %v3468_v24  ;;  %v1589_v47 = vadd.f32 %v19334_v44, %v1321_v3  ;;  %v2392_v18 = vadd.f32 %v19335_v9, %v2124_v49  ;;  %v5838_v39 = vadd.f32 %v15680_v29, %v5571_v60  ;;  %v19336_v19 = vld [vmem:[#allocation39_spill] sm:$0xff]  ;;  %v19339_v57 = vld [vmem:[#allocation90_spill] sm:$0xff] }
 0x3fb   :  { %v2668_v55 = vadd.f32 %v19331_v43, %v2400_v31  ;;  %v5069_v22 = vadd.f32 %v15498_v54, %v4801_v58  ;;  %v1597_v61 = vadd.f32 %v19336_v19, %v1329_v35  ;;  %v19337_v4 = vld [vmem:[#allocation63_spill] sm:$0xff]  ;;  %v3201_v26 = vadd.f32 %v19338_v25, %v2933_v6  ;;  %v19342_v54 = vld [vmem:[#allocation45_spill] sm:$0xff]  ;;  %v19344_v52 = vld [vmem:[#allocation86_spill] sm:$0xff] }
 0x3fc   :  { %v15887_v53 = vpop.f32.mrf.mxu2  ;;  %v4004_v31 = vadd.f32 %v19339_v57, %v3736_v36  ;;  %v1857_v50 = vadd.f32 %v19340_v42, %v1589_v47  ;;  %v2660_v24 = vadd.f32 %v19341_v20, %v2392_v18  ;;  %v6105_v14 = vadd.f32 %v15746_v16, %v5838_v39  ;;  %v19343_v58 = vld [vmem:[#allocation71_spill] sm:$0xff]  ;;  %v19345_v6 = vld [vmem:[#allocation61_spill] sm:$0xff]  ;;  %v19346_v44 = vld [vmem:[#allocation50_spill] sm:$0xff]  ;;  %v15953_v20 = vpop.permute.xlu0 %6659 }
 0x3fd   :  { %v15893_v30 = vpop.f32.mrf.mxu3  ;;  %v15895_v1 = vpop.f32.mrf.mxu1  ;;  %v2936_v10 = vadd.f32 %v19337_v4, %v2668_v55  ;;  %v5337_v3 = vadd.f32 %v15617_v41, %v5069_v22  ;;  %v1865_v29 = vadd.f32 %v19342_v54, %v1597_v61  ;;  %v3469_v35 = vadd.f32 %v19344_v52, %v3201_v26  ;;  %v19347_v9 = vld [vmem:[#allocation79_spill] sm:$0xff]  ;;  %v19348_v22 = vld [vmem:[#allocation92_spill] sm:$0xff]  ;;  %v19350_v61 = vld [vmem:[#allocation69_spill] sm:$0xff] }
 0x3fe   :  { %v4272_v43 = vadd.f32 %v15001_v15, %v4004_v31  ;;  %v2928_v56 = vadd.f32 %v19345_v6, %v2660_v24  ;;  %v5339_v41 = vadd.f32 %v15615_v34, %v15504_v17  ;;  %v6372_v36 = vadd.f32 %v15784_v21, %v6105_v14  ;;  %v19349_v15 = vld [vmem:[#allocation101_spill] sm:$0xff]  ;;  %v19351_v17 = vld [vmem:[#allocation51_spill] sm:$0xff]  ;;  %v15955_v24 = vpop.f32.mrf.mxu0 }
 0x3ff   :  { %v3204_v60 = vadd.f32 %v19343_v58, %v2936_v10  ;;  %v5572_v16 = vadd.f32 %v15692_v13, %v5337_v3  ;;  %v2125_v47 = vadd.f32 %v19346_v44, %v1857_v50  ;;  %v3737_v39 = vadd.f32 %v19348_v22, %v3469_v35  ;;  %v19352_v13 = vld [vmem:[#allocation87_spill] sm:$0xff]  ;;  %v19353_v57 = vld [vmem:[#allocation97_spill] sm:$0xff]  ;;  %v19360_v44 = vld [vmem:[#allocation98_spill] sm:$0xff] }
 0x400   :  { %v4540_v19 = vadd.f32 %v19349_v15, %v4272_v43  ;;  %v3196_v4 = vadd.f32 %v19350_v61, %v2928_v56  ;;  %v5574_v10 = vadd.f32 %v15690_v40, %v5339_v41  ;;  %v6639_v26 = vadd.f32 %v6472_v45, %v6372_v36  ;;  %v19354_v42 = vld [vmem:[#allocation107_spill] sm:$0xff]  ;;  %v19355_v3 = vld [vmem:[#allocation57_spill] sm:$0xff]  ;;  %v19364_v61 = vld [vmem:[#allocation104_spill] sm:$0xff] }
 0x401   :  { %v3472_v18 = vadd.f32 %v19347_v9, %v3204_v60  ;;  %v5839_v25 = vadd.f32 %v15744_v28, %v5572_v16  ;;  %v15948_v34 = vadd.f32 %v19351_v17, %v1865_v29  ;;  %v4005_v31 = vadd.f32 %v19353_v57, %v3737_v39  ;;  %v19356_v54 = vld [vmem:[#allocation77_spill] sm:$0xff]  ;;  %v19358_v60 = vld [vmem:[#allocation103_spill] sm:$0xff]  ;;  %v15969_v16 = vpop.permute.xlu1 %6687 }
 0x402   :  { %v4808_v50 = vadd.f32 %v19354_v42, %v4540_v19  ;;  %v2393_v14 = vadd.f32 %v19355_v3, %v2125_v47  ;;  %v3464_v40 = vadd.f32 %v19356_v54, %v3196_v4  ;;  %v5841_v28 = vadd.f32 %v15742_v5, %v5574_v10  ;;  %v19357_v29 = vld [vmem:[#allocation93_spill] sm:$0xff]  ;;  %v19362_v22 = vld [vmem:[#allocation119_spill] sm:$0xff] }
 0x403   :  { %v3740_v21 = vadd.f32 %v19352_v13, %v3472_v18  ;;  %v6106_v45 = vadd.f32 %v15776_v27, %v5839_v25  ;;  %v4273_v52 = vadd.f32 %v19358_v60, %v4005_v31  ;;  %v19359_v35 = vld [vmem:[#allocation113_spill] sm:$0xff]  ;;  %v5338_v6 = vadd.f32 %v15639_v46, %v15533_v48  ;;  %v19365_v10 = vld [vmem:[#allocation115_spill] sm:$0xff]  ;;  %v19367_v13 = vld [vmem:[#allocation152_spill] sm:$0xff] }
 0x404   :  { %v15925_v49 = vpop.f32.mrf.mxu2  ;;  %v5076_v43 = vadd.f32 %v19359_v35, %v4808_v50  ;;  %v5347_v56 = vadd.f32 %v15641_v0, %v15538_v11  ;;  %v6108_v41 = vadd.f32 %v15774_v33, %v5841_v28  ;;  %v6667_v27 = vmul.f32 %v15953_v20, %v6639_v26  ;;  %v19361_v9 = vld [vmem:[#allocation109_spill] sm:$0xff] }
 0x405   :  { %v15931_v55 = vpop.f32.mrf.mxu3  ;;  %v15933_v8 = vpop.f32.mrf.mxu1  ;;  %v4008_v58 = vadd.f32 %v19357_v29, %v3740_v21  ;;  %v6373_v5 = vadd.f32 %v15828_v37, %v6106_v45  ;;  %v4541_v18 = vadd.f32 %v19361_v9, %v4273_v52  ;;  %v5573_v48 = vadd.f32 %v15702_v7, %v5338_v6  ;;  %v19363_v0 = vld [vmem:[#allocation85_spill] sm:$0xff]  ;;  %v19374_v52 = vld [vmem:[#allocation91_spill] sm:$0xff] }
 0x406   :  { %v5344_v39 = vadd.f32 %v19362_v22, %v5076_v43  ;;  %v3732_v33 = vadd.f32 %v19363_v0, %v3464_v40  ;;  %v5582_v15 = vadd.f32 %v15704_v62, %v5347_v56  ;;  %v6375_v37 = vadd.f32 %v15826_v32, %v6108_v41  ;;  %v19366_v26 = vld [vmem:[#allocation129_spill] sm:$0xff]  ;;  %v19369_v62 = vld [vmem:[#allocation110_spill] sm:$0xff]  ;;  %v19376_v41 = vld [vmem:[#allocation116_spill] sm:$0xff] }
 0x407   :  { %v4276_v47 = vadd.f32 %v19360_v44, %v4008_v58  ;;  %v4809_v25 = vadd.f32 %v19365_v10, %v4541_v18  ;;  %v5840_v21 = vadd.f32 %v19367_v13, %v5573_v48  ;;  %v19368_v57 = vld [vmem:[#allocation153_spill] sm:$0xff]  ;;  %v15989_v50 = vadd.f32 %v15969_v16, %v6667_v27  ;;  %v19373_v58 = vld [vmem:[#allocation64_spill] sm:$0xff]  ;;  %v19375_v43 = vld [vmem:[#allocation166_spill] sm:$0xff]  ;;  %v16004_v18 = vpop.f32.mrf.mxu0 }
 0x408   :  { %v5579_v17 = vadd.f32 %v19366_v26, %v5344_v39  ;;  %v5849_v31 = vadd.f32 %v19368_v57, %v5582_v15  ;;  %v19370_v32 = vld [vmem:[#allocation121_spill] sm:$0xff]  ;;  %v2661_v60 = vadd.f32 %v19373_v58, %v2393_v14  ;;  %v4000_v35 = vadd.f32 %v19374_v52, %v3732_v33  ;;  %v19377_v27 = vld [vmem:[#allocation132_spill] sm:$0xff]  ;;  %v19380_v15 = vld [vmem:[#allocation122_spill] sm:$0xff] }
 0x409   :  { %v4544_v4 = vadd.f32 %v19364_v61, %v4276_v47  ;;  %v5077_v54 = vadd.f32 %v19370_v32, %v4809_v25  ;;  %v19371_v40 = vld [vmem:[#allocation141_spill] sm:$0xff]  ;;  %v19378_v47 = vld [vmem:[#allocation155_spill] sm:$0xff]  ;;  %v19379_v0 = vld [vmem:[#allocation96_spill] sm:$0xff] }
 0x40a   :  { %v5846_v28 = vadd.f32 %v19371_v40, %v5579_v17  ;;  %v19372_v45 = vld [vmem:[#allocation165_spill] sm:$0xff]  ;;  %v6116_v6 = vadd.f32 %v19375_v43, %v5849_v31  ;;  %v4268_v33 = vadd.f32 %v19379_v0, %v4000_v35  ;;  %v19382_v26 = vld [vmem:[#allocation102_spill] sm:$0xff]  ;;  %v19386_v32 = vld [vmem:[#allocation147_spill] sm:$0xff]  ;;  %v16031_v40 = vpop.permute.xlu2 %6664 }
 0x40b   :  { %v4812_v3 = vadd.f32 %v19369_v62, %v4544_v4  ;;  %v6107_v29 = vadd.f32 %v19372_v45, %v5840_v21  ;;  %v5345_v44 = vadd.f32 %v19377_v27, %v5077_v54  ;;  %v19383_v13 = vld [vmem:[#allocation133_spill] sm:$0xff]  ;;  %v19384_v31 = vld [vmem:[#allocation154_spill] sm:$0xff]  ;;  %v19389_v52 = vld [vmem:[#allocation167_spill] sm:$0xff] }
 0x40c   :  { %v15972_v36 = vpop.f32.mrf.mxu2  ;;  %v6113_v9 = vadd.f32 %v19378_v47, %v5846_v28  ;;  %v6383_v39 = vadd.f32 %v15857_v2, %v6116_v6  ;;  %v4536_v17 = vadd.f32 %v19382_v26, %v4268_v33  ;;  %v19390_v6 = vld [vmem:[#allocation114_spill] sm:$0xff]  ;;  %v19393_v47 = vld [vmem:[#allocation163_spill] sm:$0xff]  ;;  %v19395_v33 = vld [vmem:[#allocation80_spill] sm:$0xff] }
 0x40d   :  { %v6541_v46 = vpop.f32.mrf.mxu3  ;;  %v6495_v11 = vpop.f32.mrf.mxu1  ;;  %v6374_v22 = vadd.f32 %v15852_v51, %v6107_v29  ;;  %v19388_v29 = vld [vmem:[#allocation72_spill] sm:$0xff]  ;;  %v19392_v27 = vld [vmem:[#allocation134_spill] sm:$0xff] }
 0x40e   :  { %v6640_v19 = vadd.f32 %v6495_v11, %v6373_v5  ;;  %v6642_v7 = vadd.f32 %v6541_v46, %v6375_v37  ;;  %v5080_v5 = vadd.f32 %v19376_v41, %v4812_v3  ;;  %v6711_v11 = vmax.f32 %v15989_v50, 0.0  ;;  %v7215_v50 = vld [vmem:[%s19075_s7 + $0x710] sm:$0xff] }
 0x40f   :  { %v6380_v25 = vadd.f32 %v15799_v12, %v6113_v9  ;;  %v19385_v12 = vld [vmem:[#allocation108_spill] sm:$0xff]  ;;  %v2929_v58 = vadd.f32 %v19388_v29, %v2661_v60 }
 0x410   :  { %v6668_v42 = vmul.f32 %v15953_v20, %v6640_v19  ;;  %v6670_v14 = vmul.f32 %v15953_v20, %v6642_v7  ;;  %v5348_v37 = vadd.f32 %v19380_v15, %v5080_v5  ;;  %v19381_v19 = vld [vmem:[#allocation142_spill] sm:$0xff]  ;;  %v4804_v3 = vadd.f32 %v19385_v12, %v4536_v17  ;;  %v19391_v5 = vld [vmem:[#allocation123_spill] sm:$0xff]  ;;  %v19398_v17 = vld [vmem:[#allocation88_spill] sm:$0xff] }
 0x411   :  { %v5580_v61 = vadd.f32 %v19381_v19, %v5345_v44  ;;  %v5346_v44 = vadd.f32 %v19392_v27, %v19391_v5  ;;  %v3197_v15 = vadd.f32 %v19395_v33, %v2929_v58  ;;  %v19406_v27 = vld [vmem:[#allocation159_spill] sm:$0xff]  ;;  %v19410_v33 = vld [vmem:[#allocation105_spill] sm:$0xff] }
 0x412   :  { %v15999_v56 = vadd.f32 %v15969_v16, %v6668_v42  ;;  %v5583_v21 = vadd.f32 %v19383_v13, %v5348_v37  ;;  %v6647_v42 = vadd.f32 %v15955_v24, %v6380_v25  ;;  %v16025_v62 = vadd.f32 %v15969_v16, %v6670_v14  ;;  %v19387_v24 = vld [vmem:[#allocation58_spill] sm:$0xff]  ;;  %v19396_v37 = vld [vmem:[#allocation120_spill] sm:$0xff]  ;;  %v16055_v25 = vpop.permute.xlu1 %6692 }
 0x413   :  { %v5847_v7 = vadd.f32 %v19384_v31, %v5580_v61  ;;  %v2401_v45 = vadd.f32 %v19387_v24, %v15948_v34  ;;  %v5072_v41 = vadd.f32 %v19390_v6, %v4804_v3  ;;  %v19394_v14 = vld [vmem:[#allocation66_spill] sm:$0xff]  ;;  %v19397_v61 = vld [vmem:[#allocation144_spill] sm:$0xff]  ;;  %v3465_v13 = vadd.f32 %v19398_v17, %v3197_v15  ;;  %v19414_v17 = vld [vmem:[#allocation95_spill] sm:$0xff] }
 0x414   :  { %v6712_v48 = vmax.f32 %v15999_v56, 0.0  ;;  %v6518_v46 = vpop.f32.mrf.mxu2  ;;  %v5850_v54 = vadd.f32 %v19386_v32, %v5583_v21  ;;  %v6714_v60 = vmax.f32 %v16025_v62, 0.0  ;;  %v6675_v0 = vmul.f32 %v16031_v40, %v6647_v42  ;;  %v19399_v21 = vld [vmem:[#allocation131_spill] sm:$0xff]  ;;  %v19400_v31 = vld [vmem:[#allocation156_spill] sm:$0xff] }
 0x415   :  { %v6641_v4 = vadd.f32 %v6518_v46, %v6374_v22  ;;  %v6544_v10 = vpop.f32.mrf.mxu3  ;;  %v6114_v35 = vadd.f32 %v19389_v52, %v5847_v7  ;;  %v2669_v46 = vadd.f32 %v19394_v14, %v2401_v45  ;;  %v5340_v19 = vadd.f32 %v19396_v37, %v5072_v41  ;;  %v19403_v45 = vld [vmem:[#allocation143_spill] sm:$0xff]  ;;  %v19404_v52 = vld [vmem:[#allocation82_spill] sm:$0xff]  ;;  %v19411_v37 = vld [vmem:[#allocation125_spill] sm:$0xff] }
 0x416   :  { %v6650_v51 = vadd.f32 %v6544_v10, %v6383_v39  ;;  %v12089_v2 = vpack.i.bf16 %v6712_v48, %v6711_v11  ;;  %v6117_v9 = vadd.f32 %v19393_v47, %v5850_v54  ;;  %v6498_v39 = vpop.f32.mrf.mxu1  ;;  %v16071_v32 = vadd.f32 %v16055_v25, %v6675_v0  ;;  %v19402_v54 = vld [vmem:[#allocation94_spill] sm:$0xff]  ;;  %v19405_v41 = vld [vmem:[#allocation99_spill] sm:$0xff] }
 0x417   :  { %v6669_v57 = vmul.f32 %v15953_v20, %v6641_v4  ;;  %v6381_v34 = vadd.f32 %v15859_v23, %v6114_v35  ;;  %v5581_v4 = vadd.f32 %v19397_v61, %v5346_v44  ;;  %v3733_v24 = vadd.f32 %v19402_v54, %v3465_v13  ;;  %v19408_v14 = vld [vmem:[#allocation126_spill] sm:$0xff] }
 0x418   :  { %12090 = vrot.lane.b32.xlu0 %v12089_v2, %s12383_s19  ;;  %12085 = vrot.lane.b32.xlu1 %v12089_v2, %s12382_s27  ;;  %v6678_v43 = vmul.f32 %v16031_v40, %v6650_v51  ;;  %v6384_v10 = vadd.f32 %v15850_v38, %v6117_v9  ;;  %v6567_v51 = vpop.f32.mrf.mxu0  ;;  %v19401_v38 = vld [vmem:[#allocation74_spill] sm:$0xff]  ;;  %v19407_v9 = vld [vmem:[#allocation89_spill] sm:$0xff]  ;;  %v6719_v0 = vmax.f32 %v16071_v32, 0.0 }
 0x419   :  { %v16034_v28 = vadd.f32 %v15969_v16, %v6669_v57  ;;  %12080 = vrot.lane.b32.xlu2 %v12089_v2, %s12378_s22  ;;  %v6648_v26 = vadd.f32 %v6498_v39, %v6381_v34  ;;  %v5575_v57 = vadd.f32 %v19399_v21, %v5340_v19  ;;  %v5848_v7 = vadd.f32 %v19400_v31, %v5581_v4  ;;  %v19412_v19 = vld [vmem:[#allocation135_spill] sm:$0xff] }
 0x41a   :  { %v16058_v2 = vadd.f32 %v16055_v25, %v6678_v43  ;;  %v2937_v12 = vadd.f32 %v19401_v38, %v2669_v46  ;;  %v6651_v3 = vadd.f32 %v6567_v51, %v6384_v10  ;;  %v4001_v5 = vadd.f32 %v19405_v41, %v3733_v24  ;;  %v19409_v46 = vld [vmem:[#allocation137_spill] sm:$0xff]  ;;  %v19413_v51 = vld [vmem:[#allocation148_spill] sm:$0xff]  ;;  %v19415_v21 = vld [vmem:[#allocation111_spill] sm:$0xff] }
 0x41b   :  { %v6713_v22 = vmax.f32 %v16034_v28, 0.0  ;;  %v5842_v29 = vadd.f32 %v19403_v45, %v5575_v57  ;;  %v6115_v58 = vadd.f32 %v15789_v63, %v5848_v7  ;;  %v6676_v6 = vmul.f32 %v16031_v40, %v6648_v26  ;;  %v19416_v7 = vld [vmem:[#allocation145_spill] sm:$0xff]  ;;  %v7052_v56 = vld [vmem:[%s19075_s7 + $0x1f8] sm:$0xff] }
 0x41c   :  { %v6521_v42 = vpop.f32.mrf.mxu2  ;;  %v3205_v35 = vadd.f32 %v19404_v52, %v2937_v12  ;;  %v19098_v43 = vmax.f32 %v16058_v2, 0.0  ;;  %v5342_v34 = vadd.f32 %v19409_v46, %v19408_v14  ;;  %v6679_v63 = vmul.f32 %v16031_v40, %v6651_v3  ;;  %v19418_v3 = vld [vmem:[#allocation100_spill] sm:$0xff]  ;;  %v19419_v24 = vld [vmem:[#allocation117_spill] sm:$0xff]  ;;  %v7036_v32 = vld [vmem:[%s19075_s7 + $0x178] sm:$0xff] }
 0x41d   :  { %v12099_v23 = vpack.i.bf16 %v6714_v60, %v6713_v22  ;;  %v6109_v44 = vadd.f32 %v19406_v27, %v5842_v29  ;;  %v6382_v47 = vadd.f32 %v15887_v53, %v6115_v58  ;;  %v4269_v15 = vadd.f32 %v19410_v33, %v4001_v5  ;;  %v19422_v5 = vld [vmem:[#allocation106_spill] sm:$0xff] }
 0x41e   :  { %v3473_v39 = vadd.f32 %v19407_v9, %v3205_v35  ;;  %v5343_v61 = vadd.f32 %v19412_v19, %v19411_v37  ;;  %v5577_v26 = vadd.f32 %v19413_v51, %v5342_v34  ;;  %v16094_v53 = vadd.f32 %v16055_v25, %v6676_v6  ;;  %v19421_v35 = vld [vmem:[#allocation170_spill] sm:$0xff]  ;;  %v19426_v34 = vld [vmem:[#allocation168_spill] sm:$0xff] }
 0x41f   :  { %v6376_v4 = vadd.f32 %v15817_v59, %v6109_v44  ;;  %v6649_v10 = vadd.f32 %v6521_v42, %v6382_v47  ;;  %v4537_v57 = vadd.f32 %v19415_v21, %v4269_v15  ;;  %v19417_v59 = vld [vmem:[#allocation160_spill] sm:$0xff]  ;;  %v16106_v12 = vadd.f32 %v16055_v25, %v6679_v63  ;;  %v19424_v9 = vld [vmem:[#allocation130_spill] sm:$0xff] }
 0x420   :  { %12100 = vrot.lane.b32.xlu0 %v12099_v23, %s12382_s27  ;;  %12105 = vrot.lane.b32.xlu1 %v12099_v23, %s12383_s19  ;;  %v3741_v13 = vadd.f32 %v19414_v17, %v3473_v39  ;;  %v5578_v38 = vadd.f32 %v19416_v7, %v5343_v61  ;;  %v5844_v42 = vadd.f32 %v19417_v59, %v5577_v26  ;;  %v6720_v41 = vmax.f32 %v16094_v53, 0.0  ;;  %v19423_v44 = vld [vmem:[#allocation124_spill] sm:$0xff] }
 0x421   :  { %12095 = vrot.lane.b32.xlu2 %v12099_v23, %s12378_s22  ;;  %v12114_v23 = vpack.i.bf16 %v6719_v0, %v19098_v43  ;;  %v6643_v31 = vadd.f32 %v16004_v18, %v6376_v4  ;;  %v4805_v45 = vadd.f32 %v19419_v24, %v4537_v57  ;;  %v6677_v29 = vmul.f32 %v16031_v40, %v6649_v10  ;;  %v19420_v18 = vld [vmem:[#allocation157_spill] sm:$0xff]  ;;  %v19425_v39 = vld [vmem:[#allocation140_spill] sm:$0xff]  ;;  %v19429_v10 = vld [vmem:[#allocation151_spill] sm:$0xff] }
 0x422   :  { %v4009_v54 = vadd.f32 %v19418_v3, %v3741_v13  ;;  %v5845_v52 = vadd.f32 %v19420_v18, %v5578_v38  ;;  %v6111_v6 = vadd.f32 %v19421_v35, %v5844_v42  ;;  %v5350_v14 = vadd.f32 %v19425_v39, %v19424_v9  ;;  %v19427_v37 = vld [vmem:[#allocation112_spill] sm:$0xff]  ;;  %v19430_v57 = vld [vmem:[#allocation118_spill] sm:$0xff]  ;;  %v19436_v39 = vld [vmem:[#allocation139_spill] sm:$0xff] }
 0x423   :  { %v5073_v47 = vadd.f32 %v19423_v44, %v4805_v45  ;;  %v6671_v46 = vmul.f32 %v15953_v20, %v6643_v31  ;;  %v19090_v33 = vmax.f32 %v16106_v12, 0.0  ;;  %v19428_v61 = vld [vmem:[#allocation136_spill] sm:$0xff]  ;;  %v16129_v26 = vadd.f32 %v16055_v25, %v6677_v29  ;;  %v19431_v31 = vld [vmem:[#allocation146_spill] sm:$0xff] }
 0x424   :  { %v6610_v58 = vpop.f32.mrf.mxu2  ;;  %v4277_v27 = vadd.f32 %v19422_v5, %v4009_v54  ;;  %v6112_v63 = vadd.f32 %v19426_v34, %v5845_v52  ;;  %v6378_v15 = vadd.f32 %v15925_v49, %v6111_v6  ;;  %v5585_v51 = vadd.f32 %v19429_v10, %v5350_v14  ;;  %v19432_v59 = vld [vmem:[#allocation164_spill] sm:$0xff]  ;;  %v6587_v54 = vpop.f32.mrf.mxu1  ;;  %v19434_v45 = vld [vmem:[#allocation158_spill] sm:$0xff]  ;;  %v19435_v6 = vld [vmem:[#allocation173_spill] sm:$0xff] }
 0x425   :  { %v5341_v4 = vadd.f32 %v19428_v61, %v5073_v47  ;;  %v12129_v21 = vpack.i.bf16 %v19090_v33, %v6720_v41  ;;  %v16139_v38 = vadd.f32 %v15969_v16, %v6671_v46  ;;  %v7019_v18 = vld [vmem:[%s19075_s7 + $0xf0] sm:$0xff]  ;;  %v7017_v44 = vld [vmem:[%s19075_s7 + $0xe0] sm:$0xff] }
 0x426   :  { %v4545_v19 = vadd.f32 %v19427_v37, %v4277_v27  ;;  %v6379_v17 = vadd.f32 %v15893_v30, %v6112_v63  ;;  %v6645_v13 = vadd.f32 %v6610_v58, %v6378_v15  ;;  %v5852_v42 = vadd.f32 %v19432_v59, %v5585_v51  ;;  %v19433_v30 = vld [vmem:[#allocation127_spill] sm:$0xff]  ;;  %v7051_v52 = vld [vmem:[%s19075_s7 + $0x1f0] sm:$0xff]  ;;  %7245 = vmatpush.msrb.mxu0 %v7019_v18  ;;  %v19438_v51 = vld [vmem:[#allocation128_spill] sm:$0xff] }
 0x427   :  { %v5576_v7 = vadd.f32 %v19431_v31, %v5341_v4  ;;  %v6721_v58 = vmax.f32 %v16129_v26, 0.0  ;;  %v7083_v35 = vld [vmem:[%s19075_s7 + $0x2f0] sm:$0xff]  ;;  %7268 = vmatpush.msrb.mxu1 %v7051_v52  ;;  %v7049_v47 = vld [vmem:[%s19075_s7 + $0x1e0] sm:$0xff]  ;;  %v19092_v63 = vmax.f32 %v16139_v38, 0.0 }
 0x428   :  { %12115 = vrot.lane.b32.xlu0 %v12114_v23, %s12382_s27  ;;  %12120 = vrot.lane.b32.xlu1 %v12114_v23, %s12383_s19  ;;  %v4813_v49 = vadd.f32 %v19430_v57, %v4545_v19  ;;  %v6119_v5 = vadd.f32 %v19435_v6, %v5852_v42  ;;  %v6673_v27 = vmul.f32 %v15953_v20, %v6645_v13  ;;  %v7081_v9 = vld [vmem:[%s19075_s7 + $0x2e0] sm:$0xff]  ;;  %v19437_v46 = vld [vmem:[#allocation169_spill] sm:$0xff]  ;;  %v19440_v13 = vld [vmem:[#allocation150_spill] sm:$0xff] }
 0x429   :  { %12110 = vrot.lane.b32.xlu2 %v12114_v23, %s12378_s22  ;;  %v6633_v23 = vpop.f32.mrf.mxu3  ;;  %v5843_v29 = vadd.f32 %v19434_v45, %v5576_v7  ;;  %7291 = vmatpush.msrb.mxu2 %v7083_v35  ;;  %v7015_v37 = vld [vmem:[%s19075_s7 + $0xd0] sm:$0xff]  ;;  %v7013_v7 = vld [vmem:[%s19075_s7 + $0xc0] sm:$0xff] }
 0x42a   :  { %v6646_v3 = vadd.f32 %v6633_v23, %v6379_v17  ;;  %v5081_v24 = vadd.f32 %v19433_v30, %v4813_v49  ;;  %v7047_v19 = vld [vmem:[%s19075_s7 + $0x1d0] sm:$0xff]  ;;  %v6386_v61 = vadd.f32 %v15972_v36, %v6119_v5  ;;  %7246 = vmatpush.msrb.mxu0 %v7017_v44  ;;  %7269 = vmatpush.msrb.mxu1 %v7049_v47  ;;  %v7045_v30 = vld [vmem:[%s19075_s7 + $0x1c0] sm:$0xff] }
 0x42b   :  { %v6110_v34 = vadd.f32 %v19437_v46, %v5843_v29  ;;  %v7079_v10 = vld [vmem:[%s19075_s7 + $0x2d0] sm:$0xff]  ;;  %v12139_v36 = vpack.i.bf16 %v6721_v58, %v19092_v63  ;;  %7292 = vmatpush.msrb.mxu2 %v7081_v9  ;;  %v16191_v49 = vadd.f32 %v15969_v16, %v6673_v27  ;;  %v19444_v6 = vld [vmem:[#allocation172_spill] sm:$0xff] }
 0x42c   :  { %v5349_v14 = vadd.f32 %v19436_v39, %v5081_v24  ;;  %v6613_v15 = vpop.f32.mrf.mxu2  ;;  %v6674_v4 = vmul.f32 %v15953_v20, %v6646_v3  ;;  %v19439_v23 = vld [vmem:[#allocation138_spill] sm:$0xff]  ;;  %7247 = vmatpush.msrb.mxu0 %v7015_v37  ;;  %7270 = vmatpush.msrb.mxu1 %v7047_v19  ;;  %v19441_v59 = vld [vmem:[#allocation149_spill] sm:$0xff]  ;;  %v7077_v24 = vld [vmem:[%s19075_s7 + $0x2c0] sm:$0xff]  ;;  %v6590_v47 = vpop.f32.mrf.mxu1 }
 0x42d   :  { %v5351_v17 = vadd.f32 %v19439_v23, %v19438_v51  ;;  %v6377_v57 = vadd.f32 %v15895_v1, %v6110_v34  ;;  %v6653_v31 = vadd.f32 %v6613_v15, %v6386_v61  ;;  %v19442_v3 = vld [vmem:[#allocation162_spill] sm:$0xff]  ;;  %7293 = vmatpush.msrb.mxu2 %v7079_v10  ;;  %v19443_v52 = vld [vmem:[#allocation161_spill] sm:$0xff]  ;;  %v6717_v44 = vmax.f32 %v16191_v49, 0.0  ;;  %v7009_v39 = vld [vmem:[%s19075_s7 + $0xa0] sm:$0xff] }
 0x42e   :  { %v16205_v45 = vadd.f32 %v15969_v16, %v6674_v4  ;;  %v7011_v18 = vld [vmem:[%s19075_s7 + $0xb0] sm:$0xff]  ;;  %7248 = vmatpush.msrb.mxu0 %v7013_v7  ;;  %7271 = vmatpush.msrb.mxu1 %v7045_v30  ;;  %v7041_v15 = vld [vmem:[%s19075_s7 + $0x1a0] sm:$0xff]  ;;  %v7056_v49 = vld [vmem:[%s19075_s7 + $0x218] sm:$0xff] }
 0x42f   :  { %v5586_v42 = vadd.f32 %v19441_v59, %v5351_v17  ;;  %v6644_v29 = vadd.f32 %v6587_v54, %v6377_v57  ;;  %v7043_v27 = vld [vmem:[%s19075_s7 + $0x1b0] sm:$0xff]  ;;  %v6681_v9 = vmul.f32 %v16031_v40, %v6653_v31  ;;  %7294 = vmatpush.msrb.mxu2 %v7077_v24  ;;  %v7073_v37 = vld [vmem:[%s19075_s7 + $0x2a0] sm:$0xff] }
 0x430   :  { %12130 = vrot.lane.b32.xlu0 %v12129_v21, %s12382_s27  ;;  %12135 = vrot.lane.b32.xlu1 %v12129_v21, %s12383_s19  ;;  %v7075_v54 = vld [vmem:[%s19075_s7 + $0x2b0] sm:$0xff]  ;;  %v19091_v19 = vmax.f32 %v16205_v45, 0.0  ;;  %v7037_v30 = vld [vmem:[%s19075_s7 + $0x180] sm:$0xff] }
 0x431   :  { %12125 = vrot.lane.b32.xlu2 %v12129_v21, %s12378_s22  ;;  %v5584_v21 = vadd.f32 %v19440_v13, %v5349_v14  ;;  %v5853_v35 = vadd.f32 %v19443_v52, %v5586_v42  ;;  %v19445_v14 = vld [vmem:[#allocation171_spill] sm:$0xff]  ;;  %7249 = vmatpush.msrb.mxu0 %v7011_v18  ;;  %v6672_v61 = vmul.f32 %v15953_v20, %v6644_v29  ;;  %v7007_v4 = vld [vmem:[%s19075_s7 + $0x90] sm:$0xff]  ;;  %v6636_v10 = vpop.f32.mrf.mxu3 }
 0x432   :  { %7272 = vmatpush.msrb.mxu1 %v7043_v27  ;;  %7295 = vmatpush.msrb.mxu2 %v7075_v54  ;;  %v16241_v23 = vadd.f32 %v16055_v25, %v6681_v9  ;;  %v12159_v17 = vpack.i.bf16 %v19091_v19, %v6717_v44  ;;  %v7039_v20 = vld [vmem:[%s19075_s7 + $0x190] sm:$0xff]  ;;  %v7069_v24 = vld [vmem:[%s19075_s7 + $0x280] sm:$0xff] }
 0x433   :  { %v5851_v1 = vadd.f32 %v19442_v3, %v5584_v21  ;;  %v6120_v46 = vadd.f32 %v19445_v14, %v5853_v35  ;;  %7250 = vmatpush.msrb.mxu0 %v7009_v39  ;;  %v16254_v13 = vadd.f32 %v15969_v16, %v6672_v61  ;;  %v7115_v29 = vld [vmem:[%s19075_s7 + $0x3f0] sm:$0xff]  ;;  %v7033_v27 = vld [vmem:[%s19075_s7 + $0x160] sm:$0xff] }
 0x434   :  { %7273 = vmatpush.msrb.mxu1 %v7041_v15  ;;  %7296 = vmatpush.msrb.mxu2 %v7073_v37  ;;  %v7003_v18 = vld [vmem:[%s19075_s7 + $0x70] sm:$0xff]  ;;  %v7065_v54 = vld [vmem:[%s19075_s7 + $0x260] sm:$0xff] }
 0x435   :  { %v6118_v5 = vadd.f32 %v19444_v6, %v5851_v1  ;;  %7251 = vmatpush.msrb.mxu0 %v7007_v4  ;;  %v19093_v31 = vmax.f32 %v16254_v13, 0.0  ;;  %v7035_v52 = vld [vmem:[%s19075_s7 + $0x170] sm:$0xff]  ;;  %7314 = vmatpush.msra.mxu3 %v7115_v29  ;;  %v7113_v6 = vld [vmem:[%s19075_s7 + $0x3e0] sm:$0xff] }
 0x436   :  { %7274 = vmatpush.msrb.mxu1 %v7039_v20  ;;  %v7067_v35 = vld [vmem:[%s19075_s7 + $0x270] sm:$0xff]  ;;  %v7029_v15 = vld [vmem:[%s19075_s7 + $0x140] sm:$0xff] }
 0x437   :  { %v6385_v34 = vadd.f32 %v15933_v8, %v6118_v5  ;;  %v6387_v8 = vadd.f32 %v15931_v55, %v6120_v46  ;;  %v7071_v55 = vld [vmem:[%s19075_s7 + $0x290] sm:$0xff]  ;;  %v7001_v5 = vld [vmem:[%s19075_s7 + $0x60] sm:$0xff]  ;;  %7315 = vmatpush.msra.mxu3 %v7113_v6 }
 0x438   :  { %12140 = vrot.lane.b32.xlu0 %v12139_v36, %s12378_s22  ;;  %12150 = vrot.lane.b32.xlu1 %v12139_v36, %s12383_s19  ;;  %v6999_v9 = vld [vmem:[%s19075_s7 + $0x50] sm:$0xff]  ;;  %v7109_v46 = vld [vmem:[%s19075_s7 + $0x3c0] sm:$0xff] }
 0x439   :  { %12145 = vrot.lane.b32.xlu2 %v12139_v36, %s12382_s27  ;;  %v6652_v51 = vadd.f32 %v6590_v47, %v6385_v34  ;;  %v6654_v21 = vadd.f32 %v6636_v10, %v6387_v8  ;;  %v19086_v36 = vmax.f32 %v16241_v23, 0.0  ;;  %7297 = vmatpush.msrb.mxu2 %v7071_v55  ;;  %v7111_v47 = vld [vmem:[%s19075_s7 + $0x3d0] sm:$0xff]  ;;  %v6997_v34 = vld [vmem:[%s19075_s7 + $0x40] sm:$0xff] }
 0x43a   :  { %7275 = vmatpush.msrb.mxu1 %v7037_v30  ;;  %v7031_v39 = vld [vmem:[%s19075_s7 + $0x150] sm:$0xff]  ;;  %7316 = vmatpush.msra.mxu3 %v7111_v47  ;;  %v7061_v37 = vld [vmem:[%s19075_s7 + $0x240] sm:$0xff] }
 0x43b   :  { %v6680_v57 = vmul.f32 %v16031_v40, %v6652_v51  ;;  %v6682_v7 = vmul.f32 %v16031_v40, %v6654_v21  ;;  %v12179_v59 = vpack.i.bf16 %v19086_v36, %v19093_v31  ;;  %7298 = vmatpush.msrb.mxu2 %v7069_v24  ;;  %v7063_v14 = vld [vmem:[%s19075_s7 + $0x250] sm:$0xff]  ;;  %v7105_v51 = vld [vmem:[%s19075_s7 + $0x3a0] sm:$0xff] }
 0x43c   :  { %7276 = vmatpush.msrb.mxu1 %v7035_v52  ;;  %7317 = vmatpush.msra.mxu3 %v7109_v46  ;;  %v7107_v61 = vld [vmem:[%s19075_s7 + $0x3b0] sm:$0xff]  ;;  %v7025_v20 = vld [vmem:[%s19075_s7 + $0x120] sm:$0xff] }
 0x43d   :  { %v16264_v16 = vadd.f32 %v16055_v25, %v6680_v57  ;;  %v16271_v42 = vadd.f32 %v16055_v25, %v6682_v7  ;;  %v7005_v25 = vld [vmem:[%s19075_s7 + $0x80] sm:$0xff]  ;;  %7299 = vmatpush.msrb.mxu2 %v7067_v35  ;;  %v6995_v4 = vld [vmem:[%s19075_s7 + $0x30] sm:$0xff] }
 0x43e   :  { %7252 = vmatpush.msrb.mxu0 %v7005_v25  ;;  %7277 = vmatpush.msrb.mxu1 %v7033_v27  ;;  %v7027_v8 = vld [vmem:[%s19075_s7 + $0x130] sm:$0xff]  ;;  %v7057_v55 = vld [vmem:[%s19075_s7 + $0x220] sm:$0xff] }
 0x43f   :  { %v19089_v3 = vmax.f32 %v16264_v16, 0.0  ;;  %v19084_v40 = vmax.f32 %v16271_v42, 0.0  ;;  %7300 = vmatpush.msrb.mxu2 %v7065_v54  ;;  %7318 = vmatpush.msra.mxu3 %v7107_v61  ;;  %v7059_v10 = vld [vmem:[%s19075_s7 + $0x230] sm:$0xff]  ;;  %v6989_v25 = vld [vmem:[%s19075_s7] sm:$0xff] }
 0x440   :  { %12160 = vrot.lane.b32.xlu0 %v12159_v17, %s12382_s27  ;;  %12165 = vrot.lane.b32.xlu1 %v12159_v17, %s12383_s19  ;;  %v7103_v21 = vld [vmem:[%s19075_s7 + $0x390] sm:$0xff]  ;;  %v7021_v30 = vld [vmem:[%s19075_s7 + $0x100] sm:$0xff] }
 0x441   :  { %12155 = vrot.lane.b32.xlu2 %v12159_v17, %s12378_s22  ;;  %v12184_v1 = vpack.i.bf16 %v19089_v3, %v19084_v40  ;;  %7253 = vmatpush.msrb.mxu0 %v7003_v18  ;;  %v6993_v17 = vld [vmem:[%s19075_s7 + $0x20] sm:$0xff]  ;;  %v6991_v57 = vld [vmem:[%s19075_s7 + $0x10] sm:$0xff]  ;;  %v7000_v40 = vld [vmem:[%s19075_s7 + $0x58] sm:$0xff] }
 0x442   :  { %7278 = vmatpush.msrb.mxu1 %v7031_v39  ;;  %7301 = vmatpush.msrb.mxu2 %v7063_v14  ;;  %v7023_v7 = vld [vmem:[%s19075_s7 + $0x110] sm:$0xff]  ;;  %v7053_v24 = vld [vmem:[%s19075_s7 + $0x200] sm:$0xff]  ;;  %v7066_v3 = vld [vmem:[%s19075_s7 + $0x268] sm:$0xff] }
 0x443   :  { %7254 = vmatpush.msrb.mxu0 %v7001_v5  ;;  %7319 = vmatpush.msra.mxu3 %v7105_v51  ;;  %v7099_v29 = vld [vmem:[%s19075_s7 + $0x370] sm:$0xff]  ;;  %v7097_v6 = vld [vmem:[%s19075_s7 + $0x360] sm:$0xff] }
 0x444   :  { %7279 = vmatpush.msrb.mxu1 %v7029_v15  ;;  %7302 = vmatpush.msrb.mxu2 %v7061_v37  ;;  %v7147_v18 = vld [vmem:[%s19075_s7 + $0x4f0] sm:$0xff]  ;;  %v7145_v5 = vld [vmem:[%s19075_s7 + $0x4e0] sm:$0xff] }
 0x445   :  { %7255 = vmatpush.msrb.mxu0 %v6999_v9  ;;  %7320 = vmatpush.msra.mxu3 %v7103_v21  ;;  %v7179_v52 = vld [vmem:[%s19075_s7 + $0x5f0] sm:$0xff]  ;;  %v7177_v27 = vld [vmem:[%s19075_s7 + $0x5e0] sm:$0xff] }
 0x446   :  { %7280 = vmatpush.msrb.mxu1 %v7027_v8  ;;  %7303 = vmatpush.msrb.mxu2 %v7059_v10  ;;  %v7211_v35 = vld [vmem:[%s19075_s7 + $0x6f0] sm:$0xff]  ;;  %v7209_v54 = vld [vmem:[%s19075_s7 + $0x6e0] sm:$0xff] }
 0x447   :  { %7256 = vmatpush.msrb.mxu0 %v6997_v34  ;;  %v7095_v47 = vld [vmem:[%s19075_s7 + $0x350] sm:$0xff]  ;;  %v7093_v46 = vld [vmem:[%s19075_s7 + $0x340] sm:$0xff] }
 0x448   :  { %12180 = vrot.lane.b32.xlu0 %v12179_v59, %s12382_s27  ;;  %12190 = vrot.lane.b32.xlu1 %v12179_v59, %s12383_s19  ;;  %v7143_v9 = vld [vmem:[%s19075_s7 + $0x4d0] sm:$0xff]  ;;  %v7141_v34 = vld [vmem:[%s19075_s7 + $0x4c0] sm:$0xff] }
 0x449   :  { %12170 = vrot.lane.b32.xlu2 %v12179_v59, %s12378_s22  ;;  %7257 = vmatpush.msrb.mxu0 %v6995_v4  ;;  %v7055_v59 = vld [vmem:[%s19075_s7 + $0x210] sm:$0xff]  ;;  %v7173_v15 = vld [vmem:[%s19075_s7 + $0x5c0] sm:$0xff] }
 0x44a   :  { %7281 = vmatpush.msrb.mxu1 %v7025_v20  ;;  %7304 = vmatpush.msrb.mxu2 %v7057_v55  ;;  %v7175_v39 = vld [vmem:[%s19075_s7 + $0x5d0] sm:$0xff]  ;;  %v7205_v37 = vld [vmem:[%s19075_s7 + $0x6c0] sm:$0xff] }
 0x44b   :  { %7258 = vmatpush.msrb.mxu0 %v6993_v17  ;;  %v7207_v14 = vld [vmem:[%s19075_s7 + $0x6d0] sm:$0xff]  ;;  %v7089_v51 = vld [vmem:[%s19075_s7 + $0x320] sm:$0xff] }
 0x44c   :  { %7282 = vmatpush.msrb.mxu1 %v7023_v7  ;;  %7305 = vmatpush.msrb.mxu2 %v7055_v59  ;;  %v7091_v61 = vld [vmem:[%s19075_s7 + $0x330] sm:$0xff]  ;;  %v7137_v17 = vld [vmem:[%s19075_s7 + $0x4a0] sm:$0xff] }
 0x44d   :  { %7259 = vmatpush.msrb.mxu0 %v6991_v57  ;;  %v7139_v4 = vld [vmem:[%s19075_s7 + $0x4b0] sm:$0xff]  ;;  %v7169_v20 = vld [vmem:[%s19075_s7 + $0x5a0] sm:$0xff] }
 0x44e   :  { %7283 = vmatpush.msrb.mxu1 %v7021_v30  ;;  %7306 = vmatpush.msrb.mxu2 %v7053_v24  ;;  %v7171_v8 = vld [vmem:[%s19075_s7 + $0x5b0] sm:$0xff]  ;;  %v7201_v55 = vld [vmem:[%s19075_s7 + $0x6a0] sm:$0xff] }
 0x44f   :  { %7260 = vmatpush.msrb.mxu0 %v6989_v25  ;;  %v7203_v10 = vld [vmem:[%s19075_s7 + $0x6b0] sm:$0xff]  ;;  %v7085_v25 = vld [vmem:[%s19075_s7 + $0x300] sm:$0xff] }
 0x450   :  { %12185 = vrot.lane.b32.xlu0 %v12184_v1, %s12382_s27  ;;  %12195 = vrot.lane.b32.xlu1 %v12184_v1, %s12383_s19  ;;  %v7087_v21 = vld [vmem:[%s19075_s7 + $0x310] sm:$0xff]  ;;  %v7133_v30 = vld [vmem:[%s19075_s7 + $0x480] sm:$0xff]  ;;  %s12408_s19 = smov 50  }
 0x451   :  { %12175 = vrot.lane.b32.xlu2 %v12184_v1, %s12378_s22  ;;  %v7101_v1 = vld [vmem:[%s19075_s7 + $0x380] sm:$0xff]  ;;  %7337 = vmatpush.msra.mxu0 %v7147_v18  ;;  %v7135_v57 = vld [vmem:[%s19075_s7 + $0x490] sm:$0xff] }
 0x452   :  { %7321 = vmatpush.msra.mxu3 %v7101_v1  ;;  %7360 = vmatpush.msra.mxu1 %v7179_v52  ;;  %v7167_v7 = vld [vmem:[%s19075_s7 + $0x590] sm:$0xff]  ;;  %v7165_v24 = vld [vmem:[%s19075_s7 + $0x580] sm:$0xff] }
 0x453   :  { %7383 = vmatpush.msra.mxu2 %v7211_v35  ;;  %7338 = vmatpush.msra.mxu0 %v7145_v5  ;;  %v7199_v1 = vld [vmem:[%s19075_s7 + $0x690] sm:$0xff]  ;;  %v7241_v5 = vld [vmem:[%s19075_s7 + $0x7e0] sm:$0xff] }
 0x454   :  { %7322 = vmatpush.msra.mxu3 %v7099_v29  ;;  %7361 = vmatpush.msra.mxu1 %v7177_v27  ;;  %v7197_v29 = vld [vmem:[%s19075_s7 + $0x680] sm:$0xff]  ;;  %v7243_v18 = vld [vmem:[%s19075_s7 + $0x7f0] sm:$0xff] }
 0x455   :  { %7384 = vmatpush.msra.mxu2 %v7209_v54  ;;  %7339 = vmatpush.msra.mxu0 %v7143_v9  ;;  %v7131_v52 = vld [vmem:[%s19075_s7 + $0x470] sm:$0xff]  ;;  %v7129_v27 = vld [vmem:[%s19075_s7 + $0x460] sm:$0xff] }
 0x456   :  { %7323 = vmatpush.msra.mxu3 %v7097_v6  ;;  %7362 = vmatpush.msra.mxu1 %v7175_v39  ;;  %v7163_v35 = vld [vmem:[%s19075_s7 + $0x570] sm:$0xff]  ;;  %v7161_v54 = vld [vmem:[%s19075_s7 + $0x560] sm:$0xff] }
 0x457   :  { %7385 = vmatpush.msra.mxu2 %v7207_v14  ;;  %7340 = vmatpush.msra.mxu0 %v7141_v34  ;;  %v7195_v6 = vld [vmem:[%s19075_s7 + $0x670] sm:$0xff] }
 0x458   :  { %7324 = vmatpush.msra.mxu3 %v7095_v47  ;;  %7363 = vmatpush.msra.mxu1 %v7173_v15  ;;  %v7193_v47 = vld [vmem:[%s19075_s7 + $0x660] sm:$0xff]  ;;  %v7239_v9 = vld [vmem:[%s19075_s7 + $0x7d0] sm:$0xff] }
 0x459   :  { %7386 = vmatpush.msra.mxu2 %v7205_v37  ;;  %7341 = vmatpush.msra.mxu0 %v7139_v4  ;;  %v7127_v39 = vld [vmem:[%s19075_s7 + $0x450] sm:$0xff]  ;;  %v7237_v15 = vld [vmem:[%s19075_s7 + $0x7c0] sm:$0xff] }
 0x45a   :  { %7325 = vmatpush.msra.mxu3 %v7093_v46  ;;  %7364 = vmatpush.msra.mxu1 %v7171_v8  ;;  %v7159_v14 = vld [vmem:[%s19075_s7 + $0x550] sm:$0xff]  ;;  %v7125_v37 = vld [vmem:[%s19075_s7 + $0x440] sm:$0xff] }
 0x45b   :  { %7387 = vmatpush.msra.mxu2 %v7203_v10  ;;  %7342 = vmatpush.msra.mxu0 %v7137_v17  ;;  %v7191_v34 = vld [vmem:[%s19075_s7 + $0x650] sm:$0xff]  ;;  %v7189_v4 = vld [vmem:[%s19075_s7 + $0x640] sm:$0xff] }
 0x45c   :  { %7326 = vmatpush.msra.mxu3 %v7091_v61  ;;  %7365 = vmatpush.msra.mxu1 %v7169_v20  ;;  %v7157_v61 = vld [vmem:[%s19075_s7 + $0x540] sm:$0xff]  ;;  %v7235_v8 = vld [vmem:[%s19075_s7 + $0x7b0] sm:$0xff] }
 0x45d   :  { %7388 = vmatpush.msra.mxu2 %v7201_v55  ;;  %7343 = vmatpush.msra.mxu0 %v7135_v57  ;;  %v7123_v10 = vld [vmem:[%s19075_s7 + $0x430] sm:$0xff]  ;;  %v7233_v20 = vld [vmem:[%s19075_s7 + $0x7a0] sm:$0xff] }
 0x45e   :  { %7327 = vmatpush.msra.mxu3 %v7089_v51  ;;  %7366 = vmatpush.msra.mxu1 %v7167_v7  ;;  %v7155_v51 = vld [vmem:[%s19075_s7 + $0x530] sm:$0xff]  ;;  %v7121_v55 = vld [vmem:[%s19075_s7 + $0x420] sm:$0xff] }
 0x45f   :  { %7389 = vmatpush.msra.mxu2 %v7199_v1  ;;  %7344 = vmatpush.msra.mxu0 %v7133_v30  ;;  %v7187_v17 = vld [vmem:[%s19075_s7 + $0x630] sm:$0xff]  ;;  %v7185_v57 = vld [vmem:[%s19075_s7 + $0x620] sm:$0xff] }
 0x460   :  { %7328 = vmatpush.msra.mxu3 %v7087_v21  ;;  %7367 = vmatpush.msra.mxu1 %v7165_v24  ;;  %v7153_v21 = vld [vmem:[%s19075_s7 + $0x520] sm:$0xff]  ;;  %v7231_v7 = vld [vmem:[%s19075_s7 + $0x790] sm:$0xff] }
 0x461   :  { %7390 = vmatpush.msra.mxu2 %v7197_v29  ;;  %7345 = vmatpush.msra.mxu0 %v7131_v52  ;;  %v7119_v1 = vld [vmem:[%s19075_s7 + $0x410] sm:$0xff]  ;;  %v7229_v24 = vld [vmem:[%s19075_s7 + $0x780] sm:$0xff] }
 0x462   :  { %7329 = vmatpush.msra.mxu3 %v7085_v25  ;;  %7368 = vmatpush.msra.mxu1 %v7163_v35  ;;  %v7151_v25 = vld [vmem:[%s19075_s7 + $0x510] sm:$0xff]  ;;  %v7149_v52 = vld [vmem:[%s19075_s7 + $0x500] sm:$0xff] }
 0x463   :  { %7391 = vmatpush.msra.mxu2 %v7195_v6  ;;  %7346 = vmatpush.msra.mxu0 %v7129_v27  ;;  %v7183_v30 = vld [vmem:[%s19075_s7 + $0x610] sm:$0xff]  ;;  %v7181_v35 = vld [vmem:[%s19075_s7 + $0x600] sm:$0xff] }
 0x464   :  { %7406 = vmatpush.msrb.mxu3 %v7243_v18  ;;  %7369 = vmatpush.msra.mxu1 %v7161_v54  ;;  %v7117_v18 = vld [vmem:[%s19075_s7 + $0x400] sm:$0xff]  ;;  %v7227_v27 = vld [vmem:[%s19075_s7 + $0x770] sm:$0xff] }
 0x465   :  { %7392 = vmatpush.msra.mxu2 %v7193_v47  ;;  %7347 = vmatpush.msra.mxu0 %v7127_v39  ;;  %v7225_v54 = vld [vmem:[%s19075_s7 + $0x760] sm:$0xff]  ;;  %v7223_v47 = vld [vmem:[%s19075_s7 + $0x750] sm:$0xff] }
 0x466   :  { %7407 = vmatpush.msrb.mxu3 %v7241_v5  ;;  %7370 = vmatpush.msra.mxu1 %v7159_v14 }
 0x467   :  { %7393 = vmatpush.msra.mxu2 %v7191_v34  ;;  %7348 = vmatpush.msra.mxu0 %v7125_v37 }
 0x468   :  { %7408 = vmatpush.msrb.mxu3 %v7239_v9  ;;  %7371 = vmatpush.msra.mxu1 %v7157_v61 }
 0x469   :  { %7394 = vmatpush.msra.mxu2 %v7189_v4  ;;  %7349 = vmatpush.msra.mxu0 %v7123_v10  ;;  %v7221_v4 = vld [vmem:[%s19075_s7 + $0x740] sm:$0xff] }
 0x46a   :  { %7409 = vmatpush.msrb.mxu3 %v7237_v15  ;;  %7372 = vmatpush.msra.mxu1 %v7155_v51  ;;  %v7219_v51 = vld [vmem:[%s19075_s7 + $0x730] sm:$0xff] }
 0x46b   :  { %7395 = vmatpush.msra.mxu2 %v7187_v17  ;;  %7350 = vmatpush.msra.mxu0 %v7121_v55 }
 0x46c   :  { %7410 = vmatpush.msrb.mxu3 %v7235_v8  ;;  %7373 = vmatpush.msra.mxu1 %v7153_v21 }
 0x46d   :  { %7396 = vmatpush.msra.mxu2 %v7185_v57  ;;  %7351 = vmatpush.msra.mxu0 %v7119_v1 }
 0x46e   :  { %7411 = vmatpush.msrb.mxu3 %v7233_v20  ;;  %7374 = vmatpush.msra.mxu1 %v7151_v25  ;;  %v7020_v25 = vld [vmem:[%s19075_s7 + $0xf8] sm:$0xff] }
 0x46f   :  { %7397 = vmatpush.msra.mxu2 %v7183_v30  ;;  %7352 = vmatpush.msra.mxu0 %v7117_v18 }
 0x470   :  { %7412 = vmatpush.msrb.mxu3 %v7231_v7  ;;  %7375 = vmatpush.msra.mxu1 %v7149_v52  ;;  %v7217_v7 = vld [vmem:[%s19075_s7 + $0x720] sm:$0xff]  ;;  %v7018_v52 = vld [vmem:[%s19075_s7 + $0xe8] sm:$0xff] }
 0x471   :  { %7398 = vmatpush.msra.mxu2 %v7181_v35 }
 0x472   :  { %7413 = vmatpush.msrb.mxu3 %v7229_v24 }
 0x473   :  { %v16471_v59 = vpop.permute.xlu2 %12080 }
 0x474   :  { %v12083_v6 = vunpack.i.h.bf16 %v16471_v59  ;;  %v19095_v5 = vunpack.i.l.bf16 %v16471_v59  ;;  %7414 = vmatpush.msrb.mxu3 %v7227_v27 }
 0x476   :  { %v6775_v9 = vsel %vm87_vm0, %v19095_v5, %v12083_v6  ;;  %7415 = vmatpush.msrb.mxu3 %v7225_v54 }
 0x477   :  { %v6809_v17 = vmax.f32 %v6711_v11, %v6775_v9  ;;  %v7016_v9 = vld [vmem:[%s19075_s7 + $0xd8] sm:$0xff] }
 0x478   :  { %7416 = vmatpush.msrb.mxu3 %v7223_v47  ;;  %v7213_v47 = vld [vmem:[%s19075_s7 + $0x700] sm:$0xff] }
 0x47a   :  { %7417 = vmatpush.msrb.mxu3 %v7221_v4 }
 0x47b   :  { %v16521_v46 = vpop.permute.xlu2 %12095 }
 0x47c   :  { %v12098_v20 = vunpack.i.h.bf16 %v16521_v46  ;;  %v12097_v55 = vunpack.i.l.bf16 %v16521_v46  ;;  %7418 = vmatpush.msrb.mxu3 %v7219_v51 }
 0x47e   :  { %v6776_v11 = vsel %vm87_vm0, %v12083_v6, %v12097_v55  ;;  %v6777_v30 = vsel %vm87_vm0, %v12097_v55, %v12098_v20  ;;  %7419 = vmatpush.msrb.mxu3 %v7217_v7 }
 0x47f   :  { %v6811_v55 = vmax.f32 %v6713_v22, %v6777_v30  ;;  %v7012_v22 = vld [vmem:[%s19075_s7 + $0xb8] sm:$0xff]  ;;  %v7050_v30 = vld [vmem:[%s19075_s7 + $0x1e8] sm:$0xff] }
 0x480   :  { %7420 = vmatpush.msrb.mxu3 %v7215_v50 }
 0x482   :  { %7421 = vmatpush.msrb.mxu3 %v7213_v47  ;;  %v7080_v47 = vld [vmem:[%s19075_s7 + $0x2d8] sm:$0xff] }
 0x483   :  { %v16577_v29 = vpop.permute.xlu2 %12110 }
 0x48a   :  { %v16602_v39 = vpop.permute.xlu0 %12090  ;;  %v16604_v14 = vpop.permute.xlu1 %12085 }
 0x48b   :  { %v12093_v34 = vunpack.i.h.bf16 %v16602_v39  ;;  %v19096_v15 = vunpack.i.l.bf16 %v16602_v39  ;;  %v12088_v37 = vunpack.i.h.bf16 %v16604_v14  ;;  %v19097_v61 = vunpack.i.l.bf16 %v16604_v14  ;;  %v16626_v57 = vpop.permute.xlu2 %12125 }
 0x48d   :  { %v6923_v8 = vsel %vm1630_vm7, %v19096_v15, %v12093_v34  ;;  %v6857_v10 = vsel %vm1362_vm6, %v19097_v61, %v12088_v37  ;;  %v7064_v61 = vld [vmem:[%s19075_s7 + $0x258] sm:$0xff] }
 0x48e   :  { %v6957_v21 = vmax.f32 %v6857_v10, %v6923_v8 }
 0x490   :  { %v16631_v1 = vmax.f32 %v6809_v17, %v6957_v21  ;;  %v6810_v17 = vmax.f32 %v6712_v48, %v6776_v11  ;;  %v7084_v48 = vld [vmem:[%s19075_s7 + $0x2f8] sm:$0xff] }
 0x492   :  { %v16643_v24 = vpop.permute.xlu0 %12100  ;;  %v16645_v18 = vpop.permute.xlu1 %12105  ;;  %7261 = vmatmul.f32.vlgmr.msrb.gmra.mxu0 %v16631_v1 }
 0x493   :  { %v12103_v35 = vunpack.i.h.bf16 %v16643_v24  ;;  %v12102_v27 = vunpack.i.l.bf16 %v16643_v24  ;;  %v12108_v6 = vunpack.i.h.bf16 %v16645_v18  ;;  %v12107_v54 = vunpack.i.l.bf16 %v16645_v18  ;;  %7429 = vmatpush.msrb.mxu0 %v7020_v25  ;;  %v16686_v28 = vpop.permute.xlu2 %12145 }
 0x495   :  { %v6858_v4 = vsel %vm1362_vm6, %v12088_v37, %v12102_v27  ;;  %v6859_v8 = vsel %vm1362_vm6, %v12102_v27, %v12103_v35  ;;  %v6924_v10 = vsel %vm1630_vm7, %v12093_v34, %v12107_v54  ;;  %v6925_v51 = vsel %vm1630_vm7, %v12107_v54, %v12108_v6  ;;  %7430 = vmatpush.msrb.mxu0 %v7018_v52  ;;  %v7014_v37 = vld [vmem:[%s19075_s7 + $0xc8] sm:$0xff]  ;;  %v7048_v54 = vld [vmem:[%s19075_s7 + $0x1d8] sm:$0xff] }
 0x496   :  { %v6958_v21 = vmax.f32 %v6858_v4, %v6924_v10  ;;  %v6959_v7 = vmax.f32 %v6859_v8, %v6925_v51  ;;  %v7082_v52 = vld [vmem:[%s19075_s7 + $0x2e8] sm:$0xff]  ;;  %v12127_v4 = vunpack.i.l.bf16 %v16626_v57 }
 0x497   :  { %7431 = vmatpush.msrb.mxu0 %v7016_v9  ;;  %v7010_v27 = vld [vmem:[%s19075_s7 + $0xa8] sm:$0xff]  ;;  %v7008_v9 = vld [vmem:[%s19075_s7 + $0x98] sm:$0xff] }
 0x498   :  { %v16676_v34 = vmax.f32 %v6810_v17, %v6958_v21  ;;  %v16678_v25 = vmax.f32 %v6811_v55, %v6959_v7  ;;  %v7046_v8 = vld [vmem:[%s19075_s7 + $0x1c8] sm:$0xff]  ;;  %v19085_v17 = vunpack.i.h.bf16 %v16577_v29  ;;  %v7044_v55 = vld [vmem:[%s19075_s7 + $0x1b8] sm:$0xff] }
 0x499   :  { %7432 = vmatpush.msrb.mxu0 %v7014_v37  ;;  %v7078_v10 = vld [vmem:[%s19075_s7 + $0x2c8] sm:$0xff]  ;;  %v7076_v21 = vld [vmem:[%s19075_s7 + $0x2b8] sm:$0xff] }
 0x49a   :  { %v16691_v50 = vpop.permute.xlu0 %12115  ;;  %v16693_v11 = vpop.permute.xlu1 %12120  ;;  %7284 = vmatmul.f32.vlgmr.msrb.gmra.mxu1 %v16676_v34  ;;  %7307 = vmatmul.f32.vlgmr.msrb.gmra.mxu2 %v16678_v25  ;;  %v7006_v51 = vld [vmem:[%s19075_s7 + $0x88] sm:$0xff]  ;;  %v7004_v7 = vld [vmem:[%s19075_s7 + $0x78] sm:$0xff] }
 0x49b   :  { %7452 = vmatpush.msrb.mxu1 %v7052_v56  ;;  %7475 = vmatpush.msrb.mxu2 %v7084_v48  ;;  %v6782_v48 = vsel %vm87_vm0, %v19085_v17, %v12127_v4 }
 0x49c   :  { %7433 = vmatpush.msrb.mxu0 %v7012_v22  ;;  %v7042_v22 = vld [vmem:[%s19075_s7 + $0x1a8] sm:$0xff]  ;;  %v6817_v17 = vmax.f32 %v6719_v0, %v6782_v48  ;;  %v7068_v0 = vld [vmem:[%s19075_s7 + $0x278] sm:$0xff]  ;;  %v12112_v48 = vunpack.i.l.bf16 %v16577_v29 }
 0x49d   :  { %7453 = vmatpush.msrb.mxu1 %v7050_v30  ;;  %7476 = vmatpush.msrb.mxu2 %v7082_v52  ;;  %v7074_v30 = vld [vmem:[%s19075_s7 + $0x2a8] sm:$0xff]  ;;  %v19087_v52 = vunpack.i.h.bf16 %v16691_v50 }
 0x49e   :  { %7434 = vmatpush.msrb.mxu0 %v7010_v27  ;;  %v19088_v27 = vunpack.i.h.bf16 %v16693_v11 }
 0x49f   :  { %7454 = vmatpush.msrb.mxu1 %v7048_v54  ;;  %7477 = vmatpush.msrb.mxu2 %v7080_v47 }
 0x4a0   :  { %7435 = vmatpush.msrb.mxu0 %v7008_v9  ;;  %v7002_v9 = vld [vmem:[%s19075_s7 + $0x68] sm:$0xff] }
 0x4a1   :  { %7455 = vmatpush.msrb.mxu1 %v7046_v8  ;;  %7478 = vmatpush.msrb.mxu2 %v7078_v10  ;;  %v16757_v8 = vpop.permute.xlu2 %12155  ;;  %v7040_v10 = vld [vmem:[%s19075_s7 + $0x198] sm:$0xff] }
 0x4a2   :  { %v16735_v37 = vpop.permute.xlu0 %12130  ;;  %v16737_v56 = vpop.permute.xlu1 %12135  ;;  %7436 = vmatpush.msrb.mxu0 %v7006_v51  ;;  %v7072_v51 = vld [vmem:[%s19075_s7 + $0x298] sm:$0xff]  ;;  %v12158_v33 = vunpack.i.h.bf16 %v16757_v8  ;;  %v12157_v19 = vunpack.i.l.bf16 %v16757_v8 }
 0x4a3   :  { %v12132_v54 = vunpack.i.l.bf16 %v16735_v37  ;;  %v12137_v47 = vunpack.i.l.bf16 %v16737_v56  ;;  %7456 = vmatpush.msrb.mxu1 %v7044_v55  ;;  %7479 = vmatpush.msrb.mxu2 %v7076_v21  ;;  %v12133_v63 = vunpack.i.h.bf16 %v16735_v37  ;;  %v7094_v37 = vld [vmem:[%s19075_s7 + $0x348] sm:$0xff] }
 0x4a4   :  { %7437 = vmatpush.msrb.mxu0 %v7004_v7  ;;  %v19094_v7 = vunpack.i.l.bf16 %v16686_v28 }
 0x4a5   :  { %v6864_v55 = vsel %vm1362_vm6, %v19087_v52, %v12132_v54  ;;  %v6930_v21 = vsel %vm1630_vm7, %v19088_v27, %v12137_v47  ;;  %7457 = vmatpush.msrb.mxu1 %v7042_v22  ;;  %7480 = vmatpush.msrb.mxu2 %v7074_v30  ;;  %v7038_v52 = vld [vmem:[%s19075_s7 + $0x188] sm:$0xff]  ;;  %v12117_v22 = vunpack.i.l.bf16 %v16691_v50 }
 0x4a6   :  { %v6965_v36 = vmax.f32 %v6864_v55, %v6930_v21  ;;  %v7070_v27 = vld [vmem:[%s19075_s7 + $0x288] sm:$0xff]  ;;  %7438 = vmatpush.msrb.mxu0 %v7002_v9 }
 0x4a7   :  { %7458 = vmatpush.msrb.mxu1 %v7040_v10  ;;  %7481 = vmatpush.msrb.mxu2 %v7072_v51  ;;  %v6998_v9 = vld [vmem:[%s19075_s7 + $0x48] sm:$0xff]  ;;  %v6860_v10 = vsel %vm1362_vm6, %v12103_v35, %v19094_v7  ;;  %v7032_v7 = vld [vmem:[%s19075_s7 + $0x158] sm:$0xff] }
 0x4a8   :  { %v16788_v30 = vmax.f32 %v6817_v17, %v6965_v36  ;;  %7439 = vmatpush.msrb.mxu0 %v7000_v40  ;;  %v12128_v36 = vunpack.i.h.bf16 %v16626_v57  ;;  %v12148_v17 = vunpack.i.h.bf16 %v16686_v28  ;;  %v12122_v40 = vunpack.i.l.bf16 %v16693_v11 }
 0x4a9   :  { %7459 = vmatpush.msrb.mxu1 %v7038_v52  ;;  %7482 = vmatpush.msrb.mxu2 %v7070_v27  ;;  %v7034_v27 = vld [vmem:[%s19075_s7 + $0x168] sm:$0xff]  ;;  %v16850_v43 = vpop.permute.xlu2 %12170 }
 0x4aa   :  { %v16808_v51 = vpop.permute.xlu0 %12140  ;;  %v16810_v52 = vpop.permute.xlu1 %12150  ;;  %7264 = vmatmul.f32.gmra.mxu0 %v16788_v30  ;;  %v6866_v31 = vsel %vm1362_vm6, %v12148_v17, %v12117_v22 }
 0x4ab   :  { %v12143_v55 = vunpack.i.h.bf16 %v16808_v51  ;;  %v12142_v21 = vunpack.i.l.bf16 %v16808_v51  ;;  %v12153_v24 = vunpack.i.h.bf16 %v16810_v52  ;;  %v12152_v35 = vunpack.i.l.bf16 %v16810_v52  ;;  %7460 = vmatpush.msrb.mxu1 %v7036_v32  ;;  %7483 = vmatpush.msrb.mxu2 %v7068_v0  ;;  %v6996_v32 = vld [vmem:[%s19075_s7 + $0x38] sm:$0xff]  ;;  %v7210_v52 = vld [vmem:[%s19075_s7 + $0x6e8] sm:$0xff] }
 0x4ac   :  { %7440 = vmatpush.msrb.mxu0 %v6998_v9  ;;  %v12138_v0 = vunpack.i.h.bf16 %v16737_v56  ;;  %v7174_v56 = vld [vmem:[%s19075_s7 + $0x5c8] sm:$0xff] }
 0x4ad   :  { %v6778_v5 = vsel %vm87_vm0, %v12098_v20, %v12142_v21  ;;  %v6926_v15 = vsel %vm1630_vm7, %v12108_v6, %v12152_v35  ;;  %v6783_v9 = vsel %vm87_vm0, %v12127_v4, %v12143_v55  ;;  %7461 = vmatpush.msrb.mxu1 %v7034_v27  ;;  %v6865_v6 = vsel %vm1362_vm6, %v12132_v54, %v12148_v17  ;;  %v7030_v4 = vld [vmem:[%s19075_s7 + $0x148] sm:$0xff] }
 0x4ae   :  { %v6812_v46 = vmax.f32 %v6714_v60, %v6778_v5  ;;  %v6960_v20 = vmax.f32 %v6860_v10, %v6926_v15  ;;  %v6818_v18 = vmax.f32 %v6720_v41, %v6783_v9  ;;  %7484 = vmatpush.msrb.mxu2 %v7066_v3  ;;  %v6994_v27 = vld [vmem:[%s19075_s7 + $0x28] sm:$0xff]  ;;  %v6931_v62 = vsel %vm1630_vm7, %v12137_v47, %v12153_v24  ;;  %v7116_v47 = vld [vmem:[%s19075_s7 + $0x3f8] sm:$0xff] }
 0x4af   :  { %v6784_v60 = vsel %vm87_vm0, %v12143_v55, %v12112_v48  ;;  %v6932_v53 = vsel %vm1630_vm7, %v12153_v24, %v12122_v40  ;;  %7462 = vmatpush.msrb.mxu1 %v7032_v7  ;;  %v7062_v41 = vld [vmem:[%s19075_s7 + $0x248] sm:$0xff]  ;;  %7441 = vmatpush.msrb.mxu0 %v6996_v32  ;;  %v6966_v5 = vmax.f32 %v6865_v6, %v6931_v62  ;;  %v7028_v7 = vld [vmem:[%s19075_s7 + $0x138] sm:$0xff] }
 0x4b0   :  { %v16873_v3 = vmax.f32 %v6812_v46, %v6960_v20  ;;  %v6819_v15 = vmax.f32 %v6721_v58, %v6784_v60  ;;  %v6967_v54 = vmax.f32 %v6866_v31, %v6932_v53  ;;  %7485 = vmatpush.msrb.mxu2 %v7064_v61  ;;  %v6785_v17 = vsel %vm87_vm0, %v12112_v48, %v12128_v36  ;;  %v7060_v46 = vld [vmem:[%s19075_s7 + $0x238] sm:$0xff]  ;;  %v7026_v20 = vld [vmem:[%s19075_s7 + $0x128] sm:$0xff] }
 0x4b1   :  { %v6867_v10 = vsel %vm1362_vm6, %v12117_v22, %v12133_v63  ;;  %v6933_v26 = vsel %vm1630_vm7, %v12122_v40, %v12138_v0  ;;  %7463 = vmatpush.msrb.mxu1 %v7030_v4  ;;  %7442 = vmatpush.msrb.mxu0 %v6994_v27  ;;  %v6781_v58 = vsel %vm87_vm0, %v12157_v19, %v12158_v33  ;;  %v7114_v22 = vld [vmem:[%s19075_s7 + $0x3e8] sm:$0xff]  ;;  %v6992_v4 = vld [vmem:[%s19075_s7 + $0x18] sm:$0xff] }
 0x4b2   :  { %v16897_v31 = vpop.permute.xlu0 %12160  ;;  %v16899_v61 = vpop.permute.xlu1 %12165  ;;  %v16901_v48 = vmax.f32 %v6818_v18, %v6966_v5  ;;  %v16903_v55 = vmax.f32 %v6819_v15, %v6967_v54  ;;  %7330 = vmatmul.f32.vlgmr.msra.gmra.mxu3 %v16873_v3  ;;  %7486 = vmatpush.msrb.mxu2 %v7062_v41  ;;  %v7112_v18 = vld [vmem:[%s19075_s7 + $0x3d8] sm:$0xff]  ;;  %v6968_v6 = vmax.f32 %v6867_v10, %v6933_v26  ;;  %v7058_v60 = vld [vmem:[%s19075_s7 + $0x228] sm:$0xff]  ;;  %v12172_v5 = vunpack.i.l.bf16 %v16850_v43 }
 0x4b3   :  { %v12163_v40 = vunpack.i.h.bf16 %v16897_v31  ;;  %v12162_v24 = vunpack.i.l.bf16 %v16897_v31  ;;  %v12168_v32 = vunpack.i.h.bf16 %v16899_v61  ;;  %v12167_v9 = vunpack.i.l.bf16 %v16899_v61  ;;  %7498 = vmatpush.msra.mxu3 %v7116_v47  ;;  %7464 = vmatpush.msrb.mxu1 %v7028_v7  ;;  %v7024_v53 = vld [vmem:[%s19075_s7 + $0x118] sm:$0xff]  ;;  %v7110_v54 = vld [vmem:[%s19075_s7 + $0x3c8] sm:$0xff] }
 0x4b4   :  { %7287 = vmatmul.f32.gmra.mxu1 %v16901_v48  ;;  %7310 = vmatmul.f32.gmra.mxu2 %v16903_v55  ;;  %v6815_v41 = vmax.f32 %v6717_v44, %v6781_v58  ;;  %v19446_v47 = vmax.f32 %v16058_v2, 0.0  ;;  %v6990_v10 = vld [vmem:[%s19075_s7 + $0x8] sm:$0xff]  ;;  %v16949_v44 = vpop.permute.xlu2 %12175  ;;  %v7108_v2 = vld [vmem:[%s19075_s7 + $0x3b8] sm:$0xff]  ;;  %v19447_v31 = vunpack.i.l.bf16 %v16604_v14 }
 0x4b5   :  { %v6863_v27 = vsel %vm1362_vm6, %v12162_v24, %v12163_v40  ;;  %v6929_v62 = vsel %vm1630_vm7, %v12167_v9, %v12168_v32  ;;  %7499 = vmatpush.msra.mxu3 %v7114_v22  ;;  %7487 = vmatpush.msrb.mxu2 %v7060_v46  ;;  %v19448_v22 = vunpack.i.l.bf16 %v16602_v39  ;;  %v7106_v14 = vld [vmem:[%s19075_s7 + $0x3a8] sm:$0xff]  ;;  %v6779_v39 = vsel %vm87_vm0, %v12142_v21, %v12172_v5 }
 0x4b6   :  { %v6963_v15 = vmax.f32 %v6863_v27, %v6929_v62  ;;  %v6820_v7 = vmax.f32 %v19446_v47, %v6785_v17  ;;  %7465 = vmatpush.msrb.mxu1 %v7026_v20  ;;  %7443 = vmatpush.msrb.mxu0 %v6992_v4  ;;  %v7022_v17 = vld [vmem:[%s19075_s7 + $0x108] sm:$0xff]  ;;  %v6889_v61 = vsel %vm1362_vm6, %v12163_v40, %v19447_v31  ;;  %v12178_v40 = vunpack.i.h.bf16 %v16949_v44 }
 0x4b7   :  { %7500 = vmatpush.msra.mxu3 %v7112_v18  ;;  %7488 = vmatpush.msrb.mxu2 %v7058_v60  ;;  %v6955_v46 = vsel %vm1630_vm7, %v12168_v32, %v19448_v22  ;;  %v6780_v20 = vsel %vm87_vm0, %v12172_v5, %v12157_v19  ;;  %v7054_v4 = vld [vmem:[%s19075_s7 + $0x208] sm:$0xff]  ;;  %v19449_v27 = vunpack.i.l.bf16 %v16471_v59  ;;  %v12177_v21 = vunpack.i.l.bf16 %v16949_v44  ;;  %v7104_v60 = vld [vmem:[%s19075_s7 + $0x398] sm:$0xff] }
 0x4b8   :  { %v16951_v26 = vmax.f32 %v6815_v41, %v6963_v15  ;;  %v16953_v58 = vmax.f32 %v6820_v7, %v6968_v6  ;;  %7466 = vmatpush.msrb.mxu1 %v7024_v53  ;;  %7444 = vmatpush.msrb.mxu0 %v6990_v10  ;;  %v6964_v62 = vmax.f32 %v6889_v61, %v6955_v46  ;;  %v7212_v53 = vld [vmem:[%s19075_s7 + $0x6f8] sm:$0xff]  ;;  %v19450_v41 = vunpack.i.l.bf16 %v16686_v28  ;;  %v7102_v28 = vld [vmem:[%s19075_s7 + $0x388] sm:$0xff] }
 0x4b9   :  { %7501 = vmatpush.msra.mxu3 %v7110_v54  ;;  %7489 = vmatpush.msrb.mxu2 %v7056_v49  ;;  %v6807_v51 = vsel %vm87_vm0, %v12158_v33, %v19449_v27  ;;  %v19451_v15 = vmax.f32 %v16254_v13, 0.0  ;;  %v19452_v47 = vmax.f32 %v16139_v38, 0.0  ;;  %v12173_v13 = vunpack.i.h.bf16 %v16850_v43  ;;  %v7100_v43 = vld [vmem:[%s19075_s7 + $0x378] sm:$0xff]  ;;  %v7146_v46 = vld [vmem:[%s19075_s7 + $0x4e8] sm:$0xff] }
 0x4ba   :  { %v16970_v18 = vpop.permute.xlu0 %12180  ;;  %v16972_v6 = vpop.permute.xlu1 %12190  ;;  %7333 = vmatmul.f32.gmra.mxu3 %v16953_v58  ;;  %7467 = vmatpush.msrb.mxu1 %v7022_v17  ;;  %v6786_v38 = vsel %vm87_vm0, %v12128_v36, %v12178_v40  ;;  %v7178_v27 = vld [vmem:[%s19075_s7 + $0x5e8] sm:$0xff] }
 0x4bb   :  { %v12182_v32 = vunpack.i.l.bf16 %v16970_v18  ;;  %v12192_v19 = vunpack.i.l.bf16 %v16972_v6  ;;  %7502 = vmatpush.msra.mxu3 %v7108_v2  ;;  %v6814_v54 = vmax.f32 %v19451_v15, %v6780_v20  ;;  %v6813_v7 = vmax.f32 %v19452_v47, %v6779_v39  ;;  %7490 = vmatpush.msrb.mxu2 %v7054_v4  ;;  %v7148_v2 = vld [vmem:[%s19075_s7 + $0x4f8] sm:$0xff]  ;;  %v7098_v4 = vld [vmem:[%s19075_s7 + $0x368] sm:$0xff] }
 0x4bc   :  { %7399 = vmatmul.f32.vlgmr.msra.gmra.mxu2 %v16951_v26  ;;  %v6787_v57 = vsel %vm87_vm0, %v12178_v40, %v12173_v13  ;;  %v6788_v36 = vsel %vm87_vm0, %v12173_v13, %v12177_v21  ;;  %v12183_v31 = vunpack.i.h.bf16 %v16970_v18  ;;  %v7208_v20 = vld [vmem:[%s19075_s7 + $0x6d8] sm:$0xff] }
 0x4bd   :  { %v6861_v59 = vsel %vm1362_vm6, %v19450_v41, %v12182_v32  ;;  %v6862_v8 = vsel %vm1362_vm6, %v12182_v32, %v12162_v24  ;;  %v6927_v33 = vsel %vm1630_vm7, %v12152_v35, %v12192_v19  ;;  %v6928_v5 = vsel %vm1630_vm7, %v12192_v19, %v12167_v9  ;;  %7503 = vmatpush.msra.mxu3 %v7106_v14 }
 0x4be   :  { %v6961_v10 = vmax.f32 %v6861_v59, %v6927_v33  ;;  %v6962_v49 = vmax.f32 %v6862_v8, %v6928_v5  ;;  %v19453_v35 = vmax.f32 %v16205_v45, 0.0  ;;  %7567 = vmatpush.msra.mxu2 %v7212_v53  ;;  %v7180_v45 = vld [vmem:[%s19075_s7 + $0x5f8] sm:$0xff]  ;;  %v19454_v14 = vmax.f32 %v16106_v12, 0.0 }
 0x4bf   :  { %7504 = vmatpush.msra.mxu3 %v7104_v60  ;;  %v7144_v12 = vld [vmem:[%s19075_s7 + $0x4d8] sm:$0xff]  ;;  %v19455_v60 = vmax.f32 %v16264_v16, 0.0  ;;  %v19456_v41 = vmax.f32 %v16241_v23, 0.0  ;;  %v19457_v8 = vunpack.i.h.bf16 %v16577_v29 }
 0x4c0   :  { %v6816_v24 = vmax.f32 %v19453_v35, %v6807_v51  ;;  %v17024_v9 = vmax.f32 %v6813_v7, %v6961_v10  ;;  %v17026_v44 = vmax.f32 %v6814_v54, %v6962_v49  ;;  %7568 = vmatpush.msra.mxu2 %v7210_v52  ;;  %v6821_v39 = vmax.f32 %v19454_v14, %v6786_v38  ;;  %v7096_v33 = vld [vmem:[%s19075_s7 + $0x358] sm:$0xff] }
 0x4c1   :  { %7505 = vmatpush.msra.mxu3 %v7102_v28  ;;  %v12193_v51 = vunpack.i.h.bf16 %v16972_v6  ;;  %v6822_v53 = vmax.f32 %v19455_v60, %v6787_v57  ;;  %v6823_v59 = vmax.f32 %v19456_v41, %v6788_v36  ;;  %v6808_v6 = vsel %vm87_vm0, %v12177_v21, %v19457_v8  ;;  %v7176_v5 = vld [vmem:[%s19075_s7 + $0x5d8] sm:$0xff]  ;;  %v7142_v21 = vld [vmem:[%s19075_s7 + $0x4c8] sm:$0xff] }
 0x4c2   :  { %v17031_v17 = vmax.f32 %v6816_v24, %v6964_v62  ;;  %v12186_v61 = vpop.permute.xlu0 %12185  ;;  %v12196_v22 = vpop.permute.xlu1 %12195  ;;  %7353 = vmatmul.f32.vlgmr.msra.gmra.mxu0 %v17024_v9  ;;  %7376 = vmatmul.f32.vlgmr.msra.gmra.mxu1 %v17026_v44  ;;  %v7206_v62 = vld [vmem:[%s19075_s7 + $0x6c8] sm:$0xff]  ;;  %v19458_v10 = vunpack.i.h.bf16 %v16691_v50  ;;  %v19459_v35 = vunpack.i.h.bf16 %v16693_v11  ;;  %v19460_v38 = vmax.f32 %v16271_v42, 0.0  ;;  %v7092_v50 = vld [vmem:[%s19075_s7 + $0x338] sm:$0xff] }
 0x4c3   :  { %v12188_v40 = vunpack.i.h.bf16 %v12186_v61  ;;  %v12187_v32 = vunpack.i.l.bf16 %v12186_v61  ;;  %v12198_v18 = vunpack.i.h.bf16 %v12196_v22  ;;  %v12197_v19 = vunpack.i.l.bf16 %v12196_v22  ;;  %7521 = vmatpush.msra.mxu0 %v7148_v2  ;;  %7506 = vmatpush.msra.mxu3 %v7100_v43  ;;  %v7140_v11 = vld [vmem:[%s19075_s7 + $0x4b8] sm:$0xff]  ;;  %v7090_v36 = vld [vmem:[%s19075_s7 + $0x328] sm:$0xff] }
 0x4c4   :  { %7422 = vmatmul.f32.vlgmr.msrb.gmra.mxu3 %v17031_v17  ;;  %7544 = vmatpush.msra.mxu1 %v7180_v45  ;;  %v6824_v2 = vmax.f32 %v19460_v38, %v6808_v6  ;;  %v7172_v57 = vld [vmem:[%s19075_s7 + $0x5b8] sm:$0xff]  ;;  %v7202_v61 = vld [vmem:[%s19075_s7 + $0x6a8] sm:$0xff] }
 0x4c5   :  { %7522 = vmatpush.msra.mxu0 %v7146_v46  ;;  %7569 = vmatpush.msra.mxu2 %v7208_v20  ;;  %v6868_v16 = vsel %vm1362_vm6, %v12133_v63, %v12188_v40  ;;  %v6934_v23 = vsel %vm1630_vm7, %v12138_v0, %v12198_v18  ;;  %v6869_v29 = vsel %vm1362_vm6, %v12188_v40, %v12183_v31  ;;  %v7204_v63 = vld [vmem:[%s19075_s7 + $0x6b8] sm:$0xff]  ;;  %v7170_v22 = vld [vmem:[%s19075_s7 + $0x5a8] sm:$0xff] }
 0x4c6   :  { %7507 = vmatpush.msra.mxu3 %v7098_v4  ;;  %7545 = vmatpush.msra.mxu1 %v7178_v27  ;;  %v6969_v15 = vmax.f32 %v6868_v16, %v6934_v23  ;;  %v6935_v54 = vsel %vm1630_vm7, %v12198_v18, %v12193_v51  ;;  %v6870_v47 = vsel %vm1362_vm6, %v12183_v31, %v12187_v32  ;;  %v7138_v31 = vld [vmem:[%s19075_s7 + $0x4a8] sm:$0xff]  ;;  %v7088_v46 = vld [vmem:[%s19075_s7 + $0x318] sm:$0xff] }
 0x4c7   :  { %7523 = vmatpush.msra.mxu0 %v7144_v12  ;;  %7570 = vmatpush.msra.mxu2 %v7206_v62  ;;  %v6970_v0 = vmax.f32 %v6869_v29, %v6935_v54  ;;  %v6936_v7 = vsel %vm1630_vm7, %v12193_v51, %v12197_v19  ;;  %v6890_v49 = vsel %vm1362_vm6, %v12187_v32, %v19458_v10  ;;  %v7136_v20 = vld [vmem:[%s19075_s7 + $0x498] sm:$0xff]  ;;  %v7086_v40 = vld [vmem:[%s19075_s7 + $0x308] sm:$0xff] }
 0x4c8   :  { %7508 = vmatpush.msra.mxu3 %v7096_v33  ;;  %7546 = vmatpush.msra.mxu1 %v7176_v5  ;;  %v17104_v28 = vmax.f32 %v6821_v39, %v6969_v15  ;;  %v6971_v52 = vmax.f32 %v6870_v47, %v6936_v7  ;;  %v6956_v24 = vsel %vm1630_vm7, %v12197_v19, %v19459_v35  ;;  %v7200_v14 = vld [vmem:[%s19075_s7 + $0x698] sm:$0xff]  ;;  %v7134_v32 = vld [vmem:[%s19075_s7 + $0x488] sm:$0xff]  ;;  %vm7645_vm7 = vcmask 547840  }
 0x4c9   :  { %7524 = vmatpush.msra.mxu0 %v7142_v21  ;;  %v17109_v13 = vmax.f32 %v6822_v53, %v6970_v0  ;;  %v6972_v43 = vmax.f32 %v6890_v49, %v6956_v24  ;;  %7571 = vmatpush.msra.mxu2 %v7204_v63  ;;  %v7168_v39 = vld [vmem:[%s19075_s7 + $0x598] sm:$0xff]  ;;  %v7198_v18 = vld [vmem:[%s19075_s7 + $0x688] sm:$0xff] }
 0x4ca   :  { %7509 = vmatpush.msra.mxu3 %v7094_v37  ;;  %7547 = vmatpush.msra.mxu1 %v7174_v56  ;;  %v17116_v45 = vmax.f32 %v6823_v59, %v6971_v52  ;;  %v7166_v19 = vld [vmem:[%s19075_s7 + $0x588] sm:$0xff]  ;;  %v7244_v4 = vld [vmem:[%s19075_s7 + $0x7f8] sm:$0xff] }
 0x4cb   :  { %7356 = vmatmul.f32.gmra.mxu0 %v17104_v28  ;;  %7379 = vmatmul.f32.gmra.mxu1 %v17109_v13  ;;  %v17123_v42 = vmax.f32 %v6824_v2, %v6972_v43  ;;  %v7132_v27 = vld [vmem:[%s19075_s7 + $0x478] sm:$0xff]  ;;  %v7242_v62 = vld [vmem:[%s19075_s7 + $0x7e8] sm:$0xff] }
 0x4cc   :  { %7402 = vmatmul.f32.gmra.mxu2 %v17116_v45  ;;  %7510 = vmatpush.msra.mxu3 %v7092_v50  ;;  %v7164_v51 = vld [vmem:[%s19075_s7 + $0x578] sm:$0xff]  ;;  %v7130_v60 = vld [vmem:[%s19075_s7 + $0x468] sm:$0xff] }
 0x4cd   :  { %7425 = vmatmul.f32.gmra.mxu3 %v17123_v42  ;;  %7525 = vmatpush.msra.mxu0 %v7140_v11  ;;  %v7196_v12 = vld [vmem:[%s19075_s7 + $0x678] sm:$0xff]  ;;  %v7238_v59 = vld [vmem:[%s19075_s7 + $0x7c8] sm:$0xff] }
 0x4ce   :  { %7548 = vmatpush.msra.mxu1 %v7172_v57  ;;  %7511 = vmatpush.msra.mxu3 %v7090_v36  ;;  %v7160_v53 = vld [vmem:[%s19075_s7 + $0x558] sm:$0xff]  ;;  %v7126_v8 = vld [vmem:[%s19075_s7 + $0x448] sm:$0xff] }
 0x4cf   :  { %7526 = vmatpush.msra.mxu0 %v7138_v31  ;;  %7572 = vmatpush.msra.mxu2 %v7202_v61  ;;  %v7192_v41 = vld [vmem:[%s19075_s7 + $0x658] sm:$0xff]  ;;  %v7158_v6 = vld [vmem:[%s19075_s7 + $0x548] sm:$0xff] }
 0x4d0   :  { %7549 = vmatpush.msra.mxu1 %v7170_v22  ;;  %7512 = vmatpush.msra.mxu3 %v7088_v46  ;;  %v7190_v33 = vld [vmem:[%s19075_s7 + $0x648] sm:$0xff]  ;;  %v7236_v5 = vld [vmem:[%s19075_s7 + $0x7b8] sm:$0xff] }
 0x4d1   :  { %7527 = vmatpush.msra.mxu0 %v7136_v20  ;;  %7573 = vmatpush.msra.mxu2 %v7200_v14  ;;  %v7124_v16 = vld [vmem:[%s19075_s7 + $0x438] sm:$0xff]  ;;  %v7234_v21 = vld [vmem:[%s19075_s7 + $0x7a8] sm:$0xff] }
 0x4d2   :  { %7550 = vmatpush.msra.mxu1 %v7168_v39  ;;  %7513 = vmatpush.msra.mxu3 %v7086_v40  ;;  %v7156_v23 = vld [vmem:[%s19075_s7 + $0x538] sm:$0xff]  ;;  %v7122_v15 = vld [vmem:[%s19075_s7 + $0x428] sm:$0xff] }
 0x4d3   :  { %7528 = vmatpush.msra.mxu0 %v7134_v32  ;;  %7574 = vmatpush.msra.mxu2 %v7198_v18  ;;  %v7188_v29 = vld [vmem:[%s19075_s7 + $0x638] sm:$0xff]  ;;  %v7230_v63 = vld [vmem:[%s19075_s7 + $0x788] sm:$0xff] }
 0x4d4   :  { %7551 = vmatpush.msra.mxu1 %v7166_v19  ;;  %7590 = vmatpush.msrb.mxu3 %v7244_v4  ;;  %v7152_v54 = vld [vmem:[%s19075_s7 + $0x518] sm:$0xff]  ;;  %v7118_v37 = vld [vmem:[%s19075_s7 + $0x408] sm:$0xff] }
 0x4d5   :  { %7445 = vmatmul.f32.vlgmr.msrb.gmra.mxu0 %v16631_v1  ;;  %7468 = vmatmul.f32.vlgmr.msrb.gmra.mxu1 %v16676_v34  ;;  %v7162_v1 = vld [vmem:[%s19075_s7 + $0x568] sm:$0xff]  ;;  %v7184_v47 = vld [vmem:[%s19075_s7 + $0x618] sm:$0xff] }
 0x4d6   :  { %7491 = vmatmul.f32.vlgmr.msrb.gmra.mxu2 %v16678_v25  ;;  %7514 = vmatmul.f32.vlgmr.msra.gmra.mxu3 %v16873_v3  ;;  %v7194_v34 = vld [vmem:[%s19075_s7 + $0x668] sm:$0xff]  ;;  %v7240_v25 = vld [vmem:[%s19075_s7 + $0x7d8] sm:$0xff] }
 0x4d7   :  { %7529 = vmatpush.msra.mxu0 %v7132_v27  ;;  %7552 = vmatpush.msra.mxu1 %v7164_v51  ;;  %v7128_v3 = vld [vmem:[%s19075_s7 + $0x458] sm:$0xff]  ;;  %v7150_v56 = vld [vmem:[%s19075_s7 + $0x508] sm:$0xff] }
 0x4d8   :  { %7575 = vmatpush.msra.mxu2 %v7196_v12  ;;  %7591 = vmatpush.msrb.mxu3 %v7242_v62  ;;  %v7182_v0 = vld [vmem:[%s19075_s7 + $0x608] sm:$0xff]  ;;  %v7228_v7 = vld [vmem:[%s19075_s7 + $0x778] sm:$0xff] }
 0x4d9   :  { %7530 = vmatpush.msra.mxu0 %v7130_v60  ;;  %7553 = vmatpush.msra.mxu1 %v7162_v1  ;;  %v7226_v10 = vld [vmem:[%s19075_s7 + $0x768] sm:$0xff]  ;;  %v7224_v49 = vld [vmem:[%s19075_s7 + $0x758] sm:$0xff] }
 0x4da   :  { %7576 = vmatpush.msra.mxu2 %v7194_v34  ;;  %7592 = vmatpush.msrb.mxu3 %v7240_v25  ;;  %v7222_v52 = vld [vmem:[%s19075_s7 + $0x748] sm:$0xff]  ;;  %v7220_v35 = vld [vmem:[%s19075_s7 + $0x738] sm:$0xff] }
 0x4db   :  { %7531 = vmatpush.msra.mxu0 %v7128_v3  ;;  %7554 = vmatpush.msra.mxu1 %v7160_v53 }
 0x4dc   :  { %7577 = vmatpush.msra.mxu2 %v7192_v41  ;;  %7593 = vmatpush.msrb.mxu3 %v7238_v59 }
 0x4dd   :  { %7532 = vmatpush.msra.mxu0 %v7126_v8  ;;  %7555 = vmatpush.msra.mxu1 %v7158_v6 }
 0x4de   :  { %7578 = vmatpush.msra.mxu2 %v7190_v33  ;;  %7594 = vmatpush.msrb.mxu3 %v7236_v5 }
 0x4df   :  { %7448 = vmatmul.f32.gmra.mxu0 %v16788_v30  ;;  %7471 = vmatmul.f32.gmra.mxu1 %v16901_v48  ;;  %v7154_v30 = vld [vmem:[%s19075_s7 + $0x528] sm:$0xff] }
 0x4e0   :  { %7494 = vmatmul.f32.gmra.mxu2 %v16903_v55  ;;  %7517 = vmatmul.f32.gmra.mxu3 %v16953_v58  ;;  %v7186_v48 = vld [vmem:[%s19075_s7 + $0x628] sm:$0xff]  ;;  %v7232_v55 = vld [vmem:[%s19075_s7 + $0x798] sm:$0xff] }
 0x4e1   :  { %7533 = vmatpush.msra.mxu0 %v7124_v16  ;;  %7556 = vmatpush.msra.mxu1 %v7156_v23  ;;  %v7120_v58 = vld [vmem:[%s19075_s7 + $0x418] sm:$0xff] }
 0x4e2   :  { %7579 = vmatpush.msra.mxu2 %v7188_v29  ;;  %7595 = vmatpush.msrb.mxu3 %v7234_v21 }
 0x4e3   :  { %7534 = vmatpush.msra.mxu0 %v7122_v15  ;;  %7557 = vmatpush.msra.mxu1 %v7154_v30 }
 0x4e4   :  { %7580 = vmatpush.msra.mxu2 %v7186_v48  ;;  %7596 = vmatpush.msrb.mxu3 %v7232_v55 }
 0x4e5   :  { %7535 = vmatpush.msra.mxu0 %v7120_v58  ;;  %7558 = vmatpush.msra.mxu1 %v7152_v54 }
 0x4e6   :  { %7581 = vmatpush.msra.mxu2 %v7184_v47  ;;  %7597 = vmatpush.msrb.mxu3 %v7230_v63 }
 0x4e7   :  { %7536 = vmatpush.msra.mxu0 %v7118_v37  ;;  %7559 = vmatpush.msra.mxu1 %v7150_v56 }
 0x4e8   :  { %7582 = vmatpush.msra.mxu2 %v7182_v0  ;;  %7598 = vmatpush.msrb.mxu3 %v7228_v7 }
 0x4e9   :  { %7537 = vmatmul.f32.vlgmr.msra.gmra.mxu0 %v17024_v9  ;;  %7560 = vmatmul.f32.vlgmr.msra.gmra.mxu1 %v17026_v44  ;;  %v7218_v9 = vld [vmem:[%s19075_s7 + $0x728] sm:$0xff] }
 0x4ea   :  { %7583 = vmatmul.f32.vlgmr.msra.gmra.mxu2 %v16951_v26  ;;  %7599 = vmatpush.msrb.mxu3 %v7226_v10  ;;  %v7216_v26 = vld [vmem:[%s19075_s7 + $0x718] sm:$0xff]  ;;  %v7214_v44 = vld [vmem:[%s19075_s7 + $0x708] sm:$0xff]  ;;  %s12398_s7 = smov 67  }
 0x4ec   :  { %7600 = vmatpush.msrb.mxu3 %v7224_v49 }
 0x4ee   :  { %7601 = vmatpush.msrb.mxu3 %v7222_v52 }
 0x4f0   :  { %7602 = vmatpush.msrb.mxu3 %v7220_v35 }
 0x4f1   :  { %7540 = vmatmul.f32.gmra.mxu0 %v17104_v28  ;;  %7563 = vmatmul.f32.gmra.mxu1 %v17109_v13 }
 0x4f2   :  { %7586 = vmatmul.f32.gmra.mxu2 %v17116_v45  ;;  %7603 = vmatpush.msrb.mxu3 %v7218_v9 }
 0x4f4   :  { %7604 = vmatpush.msrb.mxu3 %v7216_v26  ;;  %v7613_v26 = vld [vmem:[%s19072_s4] sm:$0xff] }
 0x4f6   :  { %7605 = vmatpush.msrb.mxu3 %v7214_v44 }
 0x4f7   :  { %7606 = vmatmul.f32.vlgmr.msrb.gmra.mxu3 %v17031_v17 }
 0x4ff   :  { %7609 = vmatmul.f32.gmra.mxu3 %v17123_v42 }
 0x50f   :  { %v7262_v28 = vpop.f32.mrf.mxu0 }
 0x517   :  { %v7285_v24 = vpop.f32.mrf.mxu1 }
 0x518   :  { %v7286_v57 = vadd.f32 %v7285_v24, %v7262_v28  ;;  %v7614_v24 = vld [vmem:[%s19072_s4 + $0x8] sm:$0xff] }
 0x51d   :  { %v7308_v13 = vpop.f32.mrf.mxu2 }
 0x51e   :  { %v7309_v61 = vadd.f32 %v7308_v13, %v7286_v57 }
 0x527   :  { %v7265_v2 = vpop.f32.mrf.mxu0 }
 0x531   :  { %v7288_v43 = vpop.f32.mrf.mxu1 }
 0x532   :  { %v7289_v31 = vadd.f32 %v7288_v43, %v7265_v2 }
 0x535   :  { %v7331_v38 = vpop.f32.mrf.mxu3 }
 0x536   :  { %v7332_v46 = vadd.f32 %v7331_v38, %v7309_v61  ;;  %v7615_v38 = vld [vmem:[%s19072_s4 + $0x10] sm:$0xff] }
 0x537   :  { %v7311_v50 = vpop.f32.mrf.mxu2 }
 0x538   :  { %v7312_v22 = vadd.f32 %v7311_v50, %v7289_v31  ;;  %v7616_v50 = vld [vmem:[%s19072_s4 + $0x18] sm:$0xff] }
 0x53d   :  { %v7334_v11 = vpop.f32.mrf.mxu3 }
 0x53e   :  { %v7335_v17 = vadd.f32 %v7334_v11, %v7312_v22 }
 0x53f   :  { %v7354_v45 = vpop.f32.mrf.mxu0  ;;  %v7377_v36 = vpop.f32.mrf.mxu1 }
 0x540   :  { %v7400_v20 = vpop.f32.mrf.mxu2  ;;  %v7355_v42 = vadd.f32 %v7354_v45, %v7332_v46 }
 0x542   :  { %v7378_v32 = vadd.f32 %v7377_v36, %v7355_v42 }
 0x544   :  { %v7401_v51 = vadd.f32 %v7400_v20, %v7378_v32  ;;  %v11651_v20 = vld [vmem:[%s19072_s4 + $0x20] sm:$0xff] }
 0x547   :  { %v7423_v14 = vpop.f32.mrf.mxu3 }
 0x548   :  { %v7357_v39 = vpop.f32.mrf.mxu0  ;;  %v7380_v18 = vpop.f32.mrf.mxu1  ;;  %v17308_v60 = vadd.f32 %v7423_v14, %v7401_v51 }
 0x549   :  { %v7358_v40 = vadd.f32 %v7357_v39, %v7335_v17 }
 0x54b   :  { %v7381_v19 = vadd.f32 %v7380_v18, %v7358_v40 }
 0x54f   :  { %v7403_v4 = vpop.f32.mrf.mxu2 }
 0x550   :  { %v7404_v27 = vadd.f32 %v7403_v4, %v7381_v19  ;;  %v7426_v12 = vpop.f32.mrf.mxu3 }
 0x552   :  { %v17302_v62 = vadd.f32 %v7426_v12, %v7404_v27  ;;  %v7446_v1 = vpop.f32.mrf.mxu0  ;;  %v7469_v34 = vpop.f32.mrf.mxu1  ;;  %v11652_v27 = vld [vmem:[%s19072_s4 + $0x28] sm:$0xff] }
 0x553   :  { %v7470_v8 = vadd.f32 %v7469_v34, %v7446_v1 }
 0x554   :  { %7641 = vrot.lane.b32.xlu1 %v17302_v62, %s12398_s7  ;;  %7630 = vrot.lane.b32.xlu2 %v17302_v62, %s12378_s22 }
 0x555   :  { %11665 = vmatpush.msk.msrb.mxu2 %vm7661_vm1, %v17302_v62 }
 0x557   :  { %7756 = vmatpush.msrb.mxu2 %v17308_v60 }
 0x558   :  { %11666 = vmatmul.msk.f32.vlgmr.msrb.gmra.mxu2 %vm7648_vm2, %v7613_v26 }
 0x559   :  { %v7492_v25 = vpop.f32.mrf.mxu2  ;;  %v7515_v53 = vpop.f32.mrf.mxu3 }
 0x55a   :  { %v7493_v6 = vadd.f32 %v7492_v25, %v7470_v8 }
 0x55c   :  { %7808 = vrot.lane.b32.xlu1 %v17302_v62, %s12379_s0  ;;  %v7449_v3 = vpop.f32.mrf.mxu0  ;;  %v7472_v41 = vpop.f32.mrf.mxu1  ;;  %v7516_v5 = vadd.f32 %v7515_v53, %v7493_v6 }
 0x55d   :  { %v7473_v23 = vadd.f32 %v7472_v41, %v7449_v3  ;;  %v11653_v3 = vld [vmem:[%s19072_s4 + $0x30] sm:$0xff] }
 0x560   :  { %11667 = vmatmul.msk.f32.gmra.mxu2 %vm7648_vm2, %v7614_v24 }
 0x563   :  { %v7495_v59 = vpop.f32.mrf.mxu2  ;;  %v7518_v16 = vpop.f32.mrf.mxu3 }
 0x564   :  { %v7496_v30 = vadd.f32 %v7495_v59, %v7473_v23 }
 0x566   :  { %v7538_v33 = vpop.f32.mrf.mxu0  ;;  %v7561_v21 = vpop.f32.mrf.mxu1  ;;  %v7519_v58 = vadd.f32 %v7518_v16, %v7496_v30  ;;  %v11689_v30 = vld [vmem:[%s19072_s4 + $0x60] sm:$0xff] }
 0x567   :  { %v7539_v29 = vadd.f32 %v7538_v33, %v7516_v5  ;;  %v11654_v33 = vld [vmem:[%s19072_s4 + $0x38] sm:$0xff] }
 0x568   :  { %11668 = vmatmul.msk.f32.gmra.mxu2 %vm7648_vm2, %v7615_v38 }
 0x569   :  { %v7562_v48 = vadd.f32 %v7561_v21, %v7539_v29 }
 0x56d   :  { %v7584_v15 = vpop.f32.mrf.mxu2 }
 0x56e   :  { %v7541_v55 = vpop.f32.mrf.mxu0  ;;  %v7585_v54 = vadd.f32 %v7584_v15, %v7562_v48  ;;  %v7564_v0 = vpop.f32.mrf.mxu1  ;;  %v11675_v15 = vld [vmem:[%s19072_s4 + $0x40] sm:$0xff] }
 0x56f   :  { %v7542_v63 = vadd.f32 %v7541_v55, %v7519_v58 }
 0x570   :  { %11669 = vmatmul.msk.f32.gmra.mxu2 %vm7648_vm2, %v7616_v50 }
 0x571   :  { %v7565_v10 = vadd.f32 %v7564_v0, %v7542_v63 }
 0x575   :  { %v7587_v7 = vpop.f32.mrf.mxu2 }
 0x576   :  { %v7588_v49 = vadd.f32 %v7587_v7, %v7565_v10 }
 0x57a   :  { %v7607_v47 = vpop.f32.mrf.mxu3 }
 0x57b   :  { %v7608_v37 = vadd.f32 %v7607_v47, %v7585_v54 }
 0x57d   :  { %v17316_v56 = vpack.i.bf16 %v7608_v37, %v17308_v60 }
 0x57f   :  { %12205 = vrot.lane.b32.xlu1 %v17316_v56, %s12379_s0  ;;  %12200 = vrot.lane.b32.xlu2 %v17316_v56, %s12378_s22 }
 0x582   :  { %v7610_v52 = vpop.f32.mrf.mxu3 }
 0x583   :  { %v17322_v35 = vadd.f32 %v7610_v52, %v7588_v49 }
 0x585   :  { %7632 = vrot.lane.b32.xlu0 %v17322_v35, %s12378_s22  ;;  %11670 = vmatpush.msk.msra.mxu3 %vm7661_vm1, %v17322_v35 }
 0x587   :  { %7785 = vmatpush.msra.mxu3 %v7608_v37  ;;  %7927 = vrot.lane.b32.xlu1 %v17308_v60, %s12399_s2 }
 0x588   :  { %7810 = vrot.lane.b32.xlu2 %v17322_v35, %s12379_s0  ;;  %s12401_s0 = smov 114   ;;  %11671 = vmatmul.msk.f32.vlgmr.msra.gmra.mxu3 %vm7648_vm2, %v7613_v26  ;;  %v11676_v26 = vld [vmem:[%s19072_s4 + $0x48] sm:$0xff] }
 0x58d   :  { %7639 = vrot.lane.b32.xlu0 %v17308_v60, %s12398_s7 }
 0x58f   :  { %7920 = vrot.lane.b32.xlu1 %v17322_v35, %s12380_s23 }
 0x590   :  { %7817 = vrot.lane.b32.xlu2 %v17308_v60, %s12400_s29  ;;  %11672 = vmatmul.msk.f32.gmra.mxu3 %vm7648_vm2, %v7614_v24 }
 0x595   :  { %7819 = vrot.lane.b32.xlu0 %v17302_v62, %s12400_s29  ;;  %s12411_s29 = smov 40  }
 0x597   :  { %8039 = vrot.lane.b32.xlu1 %v17302_v62, %s12387_s20 }
 0x598   :  { %7929 = vrot.lane.b32.xlu2 %v17302_v62, %s12399_s2  ;;  %s12410_s2 = smov 51   ;;  %11673 = vmatmul.msk.f32.gmra.mxu3 %vm7648_vm2, %v7615_v38 }
 0x59d   :  { %7918 = vrot.lane.b32.xlu0 %v17302_v62, %s12380_s23 }
 0x59f   :  { %8137 = vrot.lane.b32.xlu1 %v17302_v62, %s12401_s0 }
 0x5a0   :  { %8028 = vrot.lane.b32.xlu2 %v17302_v62, %s12381_s24  ;;  %11674 = vmatmul.msk.f32.gmra.mxu3 %vm7648_vm2, %v7616_v50  ;;  %v11691_v50 = vld [vmem:[%s19072_s4 + $0x70] sm:$0xff] }
 0x5a5   :  { %12210 = vrot.lane.b32.xlu0 %v17316_v56, %s12380_s23 }
 0x5a7   :  { %12220 = vrot.lane.b32.xlu1 %v17316_v56, %s12401_s0 }
 0x5a8   :  { %12215 = vrot.lane.b32.xlu2 %v17316_v56, %s12381_s24 }
 0x5ad   :  { %8030 = vrot.lane.b32.xlu0 %v17322_v35, %s12381_s24  ;;  %s12405_s24 = smov 52  }
 0x5ae   :  { %v7631_v9 = vpop.permute.xlu2 %7630 }
 0x5af   :  { %8250 = vrot.lane.b32.xlu1 %v17322_v35, %s12402_s16 }
 0x5b0   :  { %8147 = vrot.lane.b32.xlu2 %v17308_v60, %s12403_s30 }
 0x5b5   :  { %8037 = vrot.lane.b32.xlu0 %v17308_v60, %s12387_s20  ;;  %s12406_s20 = smov 111  }
 0x5b7   :  { %8258 = vrot.lane.b32.xlu1 %v17308_v60, %s12404_s17 }
 0x5b8   :  { %8139 = vrot.lane.b32.xlu2 %v17322_v35, %s12401_s0 }
 0x5bd   :  { %8149 = vrot.lane.b32.xlu0 %v17302_v62, %s12403_s30 }
 0x5bf   :  { %8371 = vrot.lane.b32.xlu1 %v17302_v62, %s12405_s24 }
 0x5c0   :  { %8260 = vrot.lane.b32.xlu2 %v17302_v62, %s12404_s17 }
 0x5c5   :  { %8248 = vrot.lane.b32.xlu0 %v17302_v62, %s12402_s16 }
 0x5c6   :  { %v7642_v28 = vpop.permute.xlu1 %7641 }
 0x5c7   :  { %8470 = vrot.lane.b32.xlu1 %v17302_v62, %s12406_s20 }
 0x5c8   :  { %8359 = vrot.lane.b32.xlu2 %v17302_v62, %s12407_s3 }
 0x5cd   :  { %12225 = vrot.lane.b32.xlu0 %v17316_v56, %s12402_s16 }
 0x5ce   :  { %v7809_v2 = vpop.permute.xlu1 %7808 }
 0x5cf   :  { %12235 = vrot.lane.b32.xlu1 %v17316_v56, %s12406_s20 }
 0x5d0   :  { %12230 = vrot.lane.b32.xlu2 %v17316_v56, %s12407_s3 }
 0x5d5   :  { %8369 = vrot.lane.b32.xlu0 %v17308_v60, %s12405_s24  ;;  %s12415_s24 = smov 39  }
 0x5d7   :  { %8591 = vrot.lane.b32.xlu1 %v17308_v60, %s12408_s19 }
 0x5d8   :  { %8472 = vrot.lane.b32.xlu2 %v17322_v35, %s12406_s20  ;;  %s12427_s20 = smov 23  }
 0x5d9   :  { %v17385_v44 = vpop.permute.xlu2 %12200 }
 0x5da   :  { %v12203_v57 = vunpack.i.h.bf16 %v17385_v44  ;;  %v12202_v36 = vunpack.i.l.bf16 %v17385_v44  ;;  %v11690_v44 = vld [vmem:[%s19072_s4 + $0x68] sm:$0xff] }
 0x5dc   :  { %v7634_v42 = vsel %vm87_vm0, %v12202_v36, %v12203_v57 }
 0x5dd   :  { %8361 = vrot.lane.b32.xlu0 %v17322_v35, %s12407_s3  ;;  %s12412_s3 = smov 99  }
 0x5df   :  { %8583 = vrot.lane.b32.xlu1 %v17322_v35, %s12409_s25 }
 0x5e0   :  { %8480 = vrot.lane.b32.xlu2 %v17308_v60, %s12410_s2 }
 0x5e2   :  { %v17396_v13 = vpop.permute.xlu2 %7810 }
 0x5e3   :  { %v7813_v40 = vsel %vm558_vm3, %v7809_v2, %v17396_v13 }
 0x5e5   :  { %8482 = vrot.lane.b32.xlu0 %v17302_v62, %s12410_s2  ;;  %s12414_s2 = smov 98  }
 0x5e7   :  { %8704 = vrot.lane.b32.xlu1 %v17302_v62, %s12411_s29 }
 0x5e8   :  { %8593 = vrot.lane.b32.xlu2 %v17302_v62, %s12408_s19 }
 0x5ea   :  { %v17408_v43 = vpop.permute.xlu2 %7817 }
 0x5ed   :  { %8581 = vrot.lane.b32.xlu0 %v17302_v62, %s12409_s25 }
 0x5ef   :  { %8803 = vrot.lane.b32.xlu1 %v17302_v62, %s12412_s3 }
 0x5f0   :  { %8692 = vrot.lane.b32.xlu2 %v17302_v62, %s19099_s1 }
 0x5f1   :  { %v12206_v11 = vpop.permute.xlu1 %12205 }
 0x5f2   :  { %v7930_v45 = vpop.permute.xlu2 %7929  ;;  %v12208_v14 = vunpack.i.h.bf16 %v12206_v11  ;;  %v12207_v17 = vunpack.i.l.bf16 %v12206_v11 }
 0x5f4   :  { %v7812_v32 = vsel %vm558_vm3, %v12207_v17, %v12208_v14  ;;  %vm7823_vm3 = vcmask 539648  }
 0x5f5   :  { %12240 = vrot.lane.b32.xlu0 %v17316_v56, %s12409_s25  ;;  %v7824_v41 = vsel %vm7823_vm3, %v12208_v14, %v17408_v43  ;;  %v11677_v43 = vld [vmem:[%s19072_s4 + $0x50] sm:$0xff] }
 0x5f7   :  { %v7633_v31 = vpop.permute.xlu0 %7632  ;;  %12250 = vrot.lane.b32.xlu1 %v17316_v56, %s12412_s3 }
 0x5f8   :  { %v7635_v61 = vsel %vm87_vm0, %v7631_v9, %v7633_v31  ;;  %v7647_v22 = vsel %vm7645_vm7, %v7633_v31, %v7642_v28  ;;  %12245 = vrot.lane.b32.xlu2 %v17316_v56, %s19099_s1 }
 0x5f9   :  { %11660 = vmatpush.msk.msrb.mxu1 %vm7661_vm1, %v7647_v22  ;;  %v17430_v46 = vpop.permute.xlu1 %7927  ;;  %11655 = vmatpush.msk.msrb.mxu0 %vm7661_vm1, %v7635_v61  ;;  %v11678_v61 = vld [vmem:[%s19072_s4 + $0x58] sm:$0xff] }
 0x5fa   :  { %v17436_v39 = vpop.permute.xlu2 %8028  ;;  %v11692_v22 = vld [vmem:[%s19072_s4 + $0x78] sm:$0xff] }
 0x5fb   :  { %7682 = vmatpush.msrb.mxu0 %v7634_v42  ;;  %v11703_v42 = vld [vmem:[%s19072_s4 + $0x80] sm:$0xff] }
 0x5fc   :  { %11656 = vmatmul.msk.f32.vlgmr.msrb.gmra.mxu0 %vm7648_vm2, %v11651_v20 }
 0x5fd   :  { %11679 = vmatpush.msk.msra.mxu0 %vm7661_vm1, %v7813_v40  ;;  %8694 = vrot.lane.b32.xlu0 %v17322_v35, %s19099_s1  ;;  %v11717_v40 = vld [vmem:[%s19072_s4 + $0xa0] sm:$0xff]  ;;  %s12434_s1 = smov 10  }
 0x5ff   :  { %7858 = vmatpush.msra.mxu0 %v7812_v32  ;;  %v7640_v18 = vpop.permute.xlu0 %7639  ;;  %8916 = vrot.lane.b32.xlu1 %v17322_v35, %s12414_s2 }
 0x600   :  { %8813 = vrot.lane.b32.xlu2 %v17308_v60, %s12415_s24  ;;  %v7646_v19 = vsel %vm7645_vm7, %v12203_v57, %v7640_v18 }
 0x601   :  { %v7921_v4 = vpop.permute.xlu1 %7920  ;;  %7711 = vmatpush.msrb.mxu1 %v7646_v19 }
 0x602   :  { %v7935_v51 = vsel %vm7933_vm15, %v7921_v4, %v7930_v45  ;;  %v17454_v12 = vpop.permute.xlu2 %12215  ;;  %11661 = vmatmul.msk.f32.vlgmr.msrb.gmra.mxu1 %vm7648_vm2, %v11651_v20 }
 0x603   :  { %11698 = vmatpush.msk.msrb.mxu3 %vm7661_vm1, %v7935_v51  ;;  %v12218_v0 = vunpack.i.h.bf16 %v17454_v12  ;;  %v12217_v7 = vunpack.i.l.bf16 %v17454_v12  ;;  %v11704_v51 = vld [vmem:[%s19072_s4 + $0x88] sm:$0xff] }
 0x604   :  { %11657 = vmatmul.msk.f32.gmra.mxu0 %vm7648_vm2, %v11652_v27  ;;  %v11718_v12 = vld [vmem:[%s19072_s4 + $0xa8] sm:$0xff] }
 0x605   :  { %8702 = vrot.lane.b32.xlu0 %v17308_v60, %s12411_s29  ;;  %s12417_s29 = smov 37   ;;  %v8032_v24 = vsel %vm1094_vm5, %v12217_v7, %v12218_v0 }
 0x607   :  { %v7820_v1 = vpop.permute.xlu0 %7819  ;;  %8924 = vrot.lane.b32.xlu1 %v17308_v60, %s12416_s21 }
 0x608   :  { %v7825_v34 = vsel %vm7823_vm3, %v17396_v13, %v7820_v1  ;;  %8805 = vrot.lane.b32.xlu2 %v17322_v35, %s12412_s3  ;;  %s12422_s3 = smov 25   ;;  %vm8486_vm3 = vcmask 416768  }
 0x609   :  { %v8040_v25 = vpop.permute.xlu1 %8039  ;;  %11684 = vmatpush.msk.msra.mxu1 %vm7661_vm1, %v7825_v34 }
 0x60a   :  { %v17469_v53 = vpop.permute.xlu2 %8147  ;;  %11662 = vmatmul.msk.f32.gmra.mxu1 %vm7648_vm2, %v11652_v27 }
 0x60b   :  { %7887 = vmatpush.msra.mxu1 %v7824_v41 }
 0x60c   :  { %11658 = vmatmul.msk.f32.gmra.mxu0 %vm7648_vm2, %v11653_v3 }
 0x60d   :  { %8815 = vrot.lane.b32.xlu0 %v17302_v62, %s12415_s24  ;;  %s19102_s24 = smov 97  }
 0x60f   :  { %v7919_v59 = vpop.permute.xlu0 %7918  ;;  %9037 = vrot.lane.b32.xlu1 %v17302_v62, %s12417_s29 }
 0x610   :  { %v7923_v8 = vsel %vm19104_vm4, %v7919_v59, %v7921_v4  ;;  %8926 = vrot.lane.b32.xlu2 %v17302_v62, %s12416_s21  ;;  %s12419_s21 = smov 26  }
 0x611   :  { %v8138_v6 = vpop.permute.xlu1 %8137  ;;  %11693 = vmatpush.msk.msra.mxu2 %vm7661_vm1, %v7923_v8 }
 0x612   :  { %v17483_v5 = vpop.permute.xlu2 %8139  ;;  %11663 = vmatmul.msk.f32.gmra.mxu1 %vm7648_vm2, %v11653_v3 }
 0x613   :  { %v8143_v63 = vsel %vm8141_vm9, %v8138_v6, %v17483_v5 }
 0x614   :  { %11659 = vmatmul.msk.f32.gmra.mxu0 %vm7648_vm2, %v11654_v33 }
 0x615   :  { %8914 = vrot.lane.b32.xlu0 %v17302_v62, %s12414_s2 }
 0x617   :  { %v12211_v16 = vpop.permute.xlu0 %12210  ;;  %9136 = vrot.lane.b32.xlu1 %v17302_v62, %s12382_s27 }
 0x618   :  { %v12213_v23 = vunpack.i.h.bf16 %v12211_v16  ;;  %v12212_v29 = vunpack.i.l.bf16 %v12211_v16  ;;  %9025 = vrot.lane.b32.xlu2 %v17302_v62, %s19102_s24 }
 0x619   :  { %v17493_v21 = vpop.permute.xlu1 %12220 }
 0x61a   :  { %v12223_v48 = vunpack.i.h.bf16 %v17493_v21  ;;  %v12222_v55 = vunpack.i.l.bf16 %v17493_v21  ;;  %v8261_v58 = vpop.permute.xlu2 %8260  ;;  %11664 = vmatmul.msk.f32.gmra.mxu1 %vm7648_vm2, %v11654_v33  ;;  %v7922_v54 = vsel %vm19104_vm4, %v12212_v29, %v12213_v23  ;;  %v7934_v47 = vsel %vm7933_vm15, %v12213_v23, %v17430_v46  ;;  %v11705_v33 = vld [vmem:[%s19072_s4 + $0x90] sm:$0xff] }
 0x61b   :  { %7968 = vmatpush.msra.mxu2 %v7922_v54  ;;  %7997 = vmatpush.msrb.mxu3 %v7934_v47  ;;  %vm19106_vm15 = vcmask 408576   ;;  %vm9927_vm4 = vcmask 89088  }
 0x61c   :  { %11680 = vmatmul.msk.f32.vlgmr.msra.gmra.mxu0 %vm7648_vm2, %v11675_v15  ;;  %11694 = vmatmul.msk.f32.vlgmr.msra.gmra.mxu2 %vm7648_vm2, %v11689_v30  ;;  %v8142_v37 = vsel %vm8141_vm9, %v12222_v55, %v12223_v48  ;;  %v11706_v55 = vld [vmem:[%s19072_s4 + $0x98] sm:$0xff] }
 0x61d   :  { %11699 = vmatmul.msk.f32.vlgmr.msrb.gmra.mxu3 %vm7648_vm2, %v11689_v30  ;;  %11721 = vmatpush.msk.msrb.mxu2 %vm7661_vm1, %v8143_v63 }
 0x61e   :  { %12255 = vrot.lane.b32.xlu0 %v17316_v56, %s12414_s2  ;;  %s12421_s2 = smov 36  }
 0x61f   :  { %8188 = vmatpush.msrb.mxu2 %v8142_v37  ;;  %v8031_v10 = vpop.permute.xlu0 %8030  ;;  %12265 = vrot.lane.b32.xlu1 %v17316_v56, %s12382_s27 }
 0x620   :  { %v8033_v49 = vsel %vm1094_vm5, %v17436_v39, %v8031_v10  ;;  %v8044_v52 = vsel %vm2702_vm11, %v8031_v10, %v8040_v25  ;;  %12260 = vrot.lane.b32.xlu2 %v17316_v56, %s19102_s24  ;;  %vm8153_vm5 = vcmask 441344  }
 0x621   :  { %v8251_v9 = vpop.permute.xlu1 %8250  ;;  %11707 = vmatpush.msk.msrb.mxu0 %vm7661_vm1, %v8033_v49  ;;  %11712 = vmatpush.msk.msrb.mxu1 %vm7661_vm1, %v8044_v52  ;;  %v8154_v20 = vsel %vm8153_vm5, %v12223_v48, %v17469_v53  ;;  %v11731_v49 = vld [vmem:[%s19072_s4 + $0xc0] sm:$0xff] }
 0x622   :  { %v17535_v28 = vpop.permute.xlu2 %8359  ;;  %11685 = vmatmul.msk.f32.vlgmr.msra.gmra.mxu1 %vm7648_vm2, %v11675_v15  ;;  %v8266_v11 = vsel %vm8264_vm10, %v8251_v9, %v8261_v58  ;;  %v11720_v58 = vld [vmem:[%s19072_s4 + $0xb8] sm:$0xff]  ;;  %v11745_v52 = vld [vmem:[%s19072_s4 + $0xe0] sm:$0xff] }
 0x623   :  { %8077 = vmatpush.msrb.mxu0 %v8032_v24 }
 0x624   :  { %11681 = vmatmul.msk.f32.gmra.mxu0 %vm7648_vm2, %v11676_v26  ;;  %11695 = vmatmul.msk.f32.gmra.mxu2 %vm7648_vm2, %v11690_v44 }
 0x625   :  { %11700 = vmatmul.msk.f32.gmra.mxu3 %vm7648_vm2, %v11690_v44 }
 0x626   :  { %9035 = vrot.lane.b32.xlu0 %v17308_v60, %s12417_s29  ;;  %s12431_s29 = smov 11  }
 0x627   :  { %v8038_v13 = vpop.permute.xlu0 %8037  ;;  %9256 = vrot.lane.b32.xlu1 %v17308_v60, %s12419_s21 }
 0x628   :  { %9138 = vrot.lane.b32.xlu2 %v17322_v35, %s12382_s27  ;;  %v8043_v38 = vsel %vm2702_vm11, %v12218_v0, %v8038_v13  ;;  %s12420_s27 = smov 86   ;;  %vm8252_vm11 = vcmask 924672   ;;  %v11732_v13 = vld [vmem:[%s19072_s4 + $0xc8] sm:$0xff] }
 0x629   :  { %v17549_v2 = vpop.permute.xlu1 %8258  ;;  %8106 = vmatpush.msrb.mxu1 %v8043_v38  ;;  %v11746_v38 = vld [vmem:[%s19072_s4 + $0xe8] sm:$0xff] }
 0x62a   :  { %v17558_v45 = vpop.permute.xlu2 %12230  ;;  %11686 = vmatmul.msk.f32.gmra.mxu1 %vm7648_vm2, %v11676_v26 }
 0x62b   :  { %11740 = vmatpush.msk.msra.mxu1 %vm7661_vm1, %v8266_v11  ;;  %v12233_v23 = vunpack.i.h.bf16 %v17558_v45  ;;  %v12232_v29 = vunpack.i.l.bf16 %v17558_v45 }
 0x62c   :  { %11682 = vmatmul.msk.f32.gmra.mxu0 %vm7648_vm2, %v11677_v43  ;;  %11696 = vmatmul.msk.f32.gmra.mxu2 %vm7648_vm2, %v11691_v50 }
 0x62d   :  { %11701 = vmatmul.msk.f32.gmra.mxu3 %vm7648_vm2, %v11691_v50  ;;  %v8364_v47 = vsel %vm8363_vm13, %v12232_v29, %v12233_v23 }
 0x62e   :  { %9027 = vrot.lane.b32.xlu0 %v17322_v35, %s19102_s24 }
 0x62f   :  { %v8150_v57 = vpop.permute.xlu0 %8149  ;;  %9248 = vrot.lane.b32.xlu1 %v17322_v35, %s12420_s27 }
 0x630   :  { %v8155_v36 = vsel %vm8153_vm5, %v17483_v5, %v8150_v57  ;;  %9145 = vrot.lane.b32.xlu2 %v17308_v60, %s12421_s2  ;;  %v11719_v5 = vld [vmem:[%s19072_s4 + $0xb0] sm:$0xff] }
 0x631   :  { %v17572_v31 = vpop.permute.xlu1 %8371  ;;  %11726 = vmatpush.msk.msra.mxu3 %vm7661_vm1, %v8155_v36  ;;  %v11733_v57 = vld [vmem:[%s19072_s4 + $0xd0] sm:$0xff] }
 0x632   :  { %v17581_v46 = vpop.permute.xlu2 %8472  ;;  %11687 = vmatmul.msk.f32.gmra.mxu1 %vm7648_vm2, %v11677_v43  ;;  %v11747_v36 = vld [vmem:[%s19072_s4 + $0xf0] sm:$0xff] }
 0x633   :  { %8217 = vmatpush.msra.mxu3 %v8154_v20 }
 0x634   :  { %11683 = vmatmul.msk.f32.gmra.mxu0 %vm7648_vm2, %v11678_v61  ;;  %11697 = vmatmul.msk.f32.gmra.mxu2 %vm7648_vm2, %v11692_v22 }
 0x635   :  { %11702 = vmatmul.msk.f32.gmra.mxu3 %vm7648_vm2, %v11692_v22 }
 0x636   :  { %9147 = vrot.lane.b32.xlu0 %v17302_v62, %s12421_s2  ;;  %s12424_s2 = smov 85  }
 0x637   :  { %v8249_v14 = vpop.permute.xlu0 %8248  ;;  %9369 = vrot.lane.b32.xlu1 %v17302_v62, %s12422_s3 }
 0x638   :  { %v8254_v17 = vsel %vm8252_vm11, %v8249_v14, %v8251_v9  ;;  %9258 = vrot.lane.b32.xlu2 %v17302_v62, %s12419_s21  ;;  %s12423_s21 = smov 84  }
 0x639   :  { %v8471_v39 = vpop.permute.xlu1 %8470  ;;  %11735 = vmatpush.msk.msra.mxu0 %vm7661_vm1, %v8254_v17 }
 0x63a   :  { %v17604_v32 = vpop.permute.xlu2 %8480  ;;  %11688 = vmatmul.msk.f32.gmra.mxu1 %vm7648_vm2, %v11678_v61  ;;  %v8476_v41 = vsel %vm8474_vm12, %v8471_v39, %v17581_v46 }
 0x63c   :  { %11708 = vmatmul.msk.f32.vlgmr.msrb.gmra.mxu0 %vm7648_vm2, %v11703_v42  ;;  %11722 = vmatmul.msk.f32.vlgmr.msrb.gmra.mxu2 %vm7648_vm2, %v11717_v40 }
 0x63d   :  { %11727 = vmatmul.msk.f32.vlgmr.msra.gmra.mxu3 %vm7648_vm2, %v11717_v40 }
 0x63e   :  { %9246 = vrot.lane.b32.xlu0 %v17302_v62, %s12420_s27 }
 0x63f   :  { %v12226_v18 = vpop.permute.xlu0 %12225  ;;  %9468 = vrot.lane.b32.xlu1 %v17302_v62, %s12423_s21 }
 0x640   :  { %v12228_v19 = vunpack.i.h.bf16 %v12226_v18  ;;  %v12227_v4 = vunpack.i.l.bf16 %v12226_v18  ;;  %9357 = vrot.lane.b32.xlu2 %v17302_v62, %s12424_s2 }
 0x641   :  { %v17616_v27 = vpop.permute.xlu1 %12235 }
 0x642   :  { %v12238_v1 = vunpack.i.h.bf16 %v17616_v27  ;;  %v12237_v34 = vunpack.i.l.bf16 %v17616_v27  ;;  %v8594_v25 = vpop.permute.xlu2 %8593  ;;  %11713 = vmatmul.msk.f32.vlgmr.msrb.gmra.mxu1 %vm7648_vm2, %v11703_v42  ;;  %v8253_v3 = vsel %vm8252_vm11, %v12227_v4, %v12228_v19  ;;  %v8265_v53 = vsel %vm8264_vm10, %v12228_v19, %v17549_v2  ;;  %v11734_v4 = vld [vmem:[%s19072_s4 + $0xd8] sm:$0xff] }
 0x643   :  { %8299 = vmatpush.msra.mxu0 %v8253_v3  ;;  %8328 = vmatpush.msra.mxu1 %v8265_v53  ;;  %v11748_v27 = vld [vmem:[%s19072_s4 + $0xf8] sm:$0xff]  ;;  %v17797_v3 = vpop.f32.mrf.mxu3 }
 0x644   :  { %11709 = vmatmul.msk.f32.gmra.mxu0 %vm7648_vm2, %v11704_v51  ;;  %11723 = vmatmul.msk.f32.gmra.mxu2 %vm7648_vm2, %v11718_v12  ;;  %v8475_v59 = vsel %vm8474_vm12, %v12237_v34, %v12238_v1  ;;  %v8487_v26 = vsel %vm8486_vm3, %v12238_v1, %v17604_v32  ;;  %vm8585_vm12 = vcmask 900096  }
 0x645   :  { %11728 = vmatmul.msk.f32.gmra.mxu3 %vm7648_vm2, %v11718_v12  ;;  %11763 = vmatpush.msk.msrb.mxu0 %vm7661_vm1, %v8476_v41 }
 0x646   :  { %12270 = vrot.lane.b32.xlu0 %v17316_v56, %s12420_s27  ;;  %s12425_s27 = smov 83  }
 0x647   :  { %8521 = vmatpush.msrb.mxu0 %v8475_v59  ;;  %v8370_v8 = vpop.permute.xlu0 %8369  ;;  %12280 = vrot.lane.b32.xlu1 %v17316_v56, %s12423_s21  ;;  %v11759_v59 = vld [vmem:[%s19072_s4 + $0x100] sm:$0xff] }
 0x648   :  { %12275 = vrot.lane.b32.xlu2 %v17316_v56, %s12424_s2  ;;  %v8376_v63 = vsel %vm8375_vm14, %v12233_v23, %v8370_v8  ;;  %v11773_v8 = vld [vmem:[%s19072_s4 + $0x120] sm:$0xff] }
 0x649   :  { %v17643_v6 = vpop.permute.xlu1 %8591 }
 0x64a   :  { %v17651_v16 = vpop.permute.xlu2 %8692  ;;  %11714 = vmatmul.msk.f32.gmra.mxu1 %vm7648_vm2, %v11704_v51 }
 0x64c   :  { %11710 = vmatmul.msk.f32.gmra.mxu0 %vm7648_vm2, %v11705_v33  ;;  %11724 = vmatmul.msk.f32.gmra.mxu2 %vm7648_vm2, %v11719_v5 }
 0x64d   :  { %11729 = vmatmul.msk.f32.gmra.mxu3 %vm7648_vm2, %v11719_v5 }
 0x64e   :  { %9359 = vrot.lane.b32.xlu0 %v17322_v35, %s12424_s2  ;;  %s12433_s2 = smov 12  }
 0x64f   :  { %v8362_v21 = vpop.permute.xlu0 %8361  ;;  %9581 = vrot.lane.b32.xlu1 %v17322_v35, %s12425_s27 }
 0x650   :  { %v8365_v15 = vsel %vm8363_vm13, %v17535_v28, %v8362_v21  ;;  %v8377_v30 = vsel %vm8375_vm14, %v8362_v21, %v17572_v31  ;;  %9478 = vrot.lane.b32.xlu2 %v17308_v60, %s12426_s18  ;;  %vm8807_vm13 = vcmask 809984   ;;  %vm8708_vm14 = vcmask 326656   ;;  %v11760_v21 = vld [vmem:[%s19072_s4 + $0x108] sm:$0xff] }
 0x651   :  { %v8584_v48 = vpop.permute.xlu1 %8583  ;;  %11754 = vmatpush.msk.msrb.mxu3 %vm7661_vm1, %v8377_v30  ;;  %11749 = vmatpush.msk.msra.mxu2 %vm7661_vm1, %v8365_v15  ;;  %v11774_v15 = vld [vmem:[%s19072_s4 + $0x128] sm:$0xff] }
 0x652   :  { %v17677_v54 = vpop.permute.xlu2 %12245  ;;  %11715 = vmatmul.msk.f32.gmra.mxu1 %vm7648_vm2, %v11705_v33  ;;  %v8599_v37 = vsel %vm19106_vm15, %v8584_v48, %v8594_v25  ;;  %v17795_v25 = vpop.f32.mrf.mxu2 }
 0x653   :  { %8410 = vmatpush.msra.mxu2 %v8364_v47  ;;  %8439 = vmatpush.msrb.mxu3 %v8376_v63  ;;  %v12248_v39 = vunpack.i.h.bf16 %v17677_v54  ;;  %v12247_v42 = vunpack.i.l.bf16 %v17677_v54 }
 0x654   :  { %11711 = vmatmul.msk.f32.gmra.mxu0 %vm7648_vm2, %v11706_v55  ;;  %11725 = vmatmul.msk.f32.gmra.mxu2 %vm7648_vm2, %v11720_v58 }
 0x655   :  { %11730 = vmatmul.msk.f32.gmra.mxu3 %vm7648_vm2, %v11720_v58  ;;  %v17845_v58 = vpop.f32.mrf.mxu3 }
 0x656   :  { %11782 = vmatpush.msk.msra.mxu3 %vm7661_vm1, %v8599_v37  ;;  %9367 = vrot.lane.b32.xlu0 %v17308_v60, %s12422_s3 }
 0x657   :  { %v8483_v0 = vpop.permute.xlu0 %8482  ;;  %9589 = vrot.lane.b32.xlu1 %v17308_v60, %s12427_s20 }
 0x658   :  { %v8488_v7 = vsel %vm8486_vm3, %v17581_v46, %v8483_v0  ;;  %9470 = vrot.lane.b32.xlu2 %v17322_v35, %s12423_s21  ;;  %s12428_s21 = smov 22   ;;  %vm19105_vm3 = vcmask 818176  }
 0x659   :  { %v17693_v10 = vpop.permute.xlu1 %8704  ;;  %11768 = vmatpush.msk.msrb.mxu1 %vm7661_vm1, %v8488_v7  ;;  %v8697_v12 = vsel %vm19105_vm3, %v12247_v42, %v12248_v39 }
 0x65a   :  { %v17702_v9 = vpop.permute.xlu2 %8813  ;;  %11716 = vmatmul.msk.f32.gmra.mxu1 %vm7648_vm2, %v11706_v55  ;;  %v17848_v54 = vpop.f32.mrf.mxu2 }
 0x65b   :  { %8550 = vmatpush.msrb.mxu1 %v8487_v26 }
 0x65c   :  { %11736 = vmatmul.msk.f32.vlgmr.msra.gmra.mxu0 %vm7648_vm2, %v11731_v49  ;;  %11750 = vmatmul.msk.f32.vlgmr.msra.gmra.mxu2 %vm7648_vm2, %v11745_v52 }
 0x65d   :  { %11755 = vmatmul.msk.f32.vlgmr.msrb.gmra.mxu3 %vm7648_vm2, %v11745_v52 }
 0x65e   :  { %9480 = vrot.lane.b32.xlu0 %v17302_v62, %s12426_s18  ;;  %s12429_s18 = smov 72  }
 0x65f   :  { %v8582_v44 = vpop.permute.xlu0 %8581  ;;  %9702 = vrot.lane.b32.xlu1 %v17302_v62, %s12428_s21 }
 0x660   :  { %v8587_v28 = vsel %vm8585_vm12, %v8582_v44, %v8584_v48  ;;  %9591 = vrot.lane.b32.xlu2 %v17302_v62, %s12427_s20  ;;  %s12430_s20 = smov 82  }
 0x661   :  { %v8804_v24 = vpop.permute.xlu1 %8803  ;;  %11777 = vmatpush.msk.msrb.mxu2 %vm7661_vm1, %v8587_v28 }
 0x662   :  { %v17724_v2 = vpop.permute.xlu2 %8805  ;;  %11741 = vmatmul.msk.f32.vlgmr.msra.gmra.mxu1 %vm7648_vm2, %v11731_v49  ;;  %v11775_v49 = vld [vmem:[%s19072_s4 + $0x130] sm:$0xff]  ;;  %v17879_v26 = vpop.f32.mrf.mxu2 }
 0x663   :  { %v8809_v14 = vsel %vm8807_vm13, %v8804_v24, %v17724_v2 }
 0x664   :  { %11737 = vmatmul.msk.f32.gmra.mxu0 %vm7648_vm2, %v11732_v13  ;;  %11751 = vmatmul.msk.f32.gmra.mxu2 %vm7648_vm2, %v11746_v38 }
 0x665   :  { %11756 = vmatmul.msk.f32.gmra.mxu3 %vm7648_vm2, %v11746_v38 }
 0x666   :  { %9579 = vrot.lane.b32.xlu0 %v17302_v62, %s12425_s27 }
 0x667   :  { %v12241_v43 = vpop.permute.xlu0 %12240  ;;  %9801 = vrot.lane.b32.xlu1 %v17302_v62, %s12429_s18 }
 0x668   :  { %v12243_v50 = vunpack.i.h.bf16 %v12241_v43  ;;  %v12242_v11 = vunpack.i.l.bf16 %v12241_v43  ;;  %9690 = vrot.lane.b32.xlu2 %v17302_v62, %s12430_s20 }
 0x669   :  { %v17736_v45 = vpop.permute.xlu1 %12250 }
 0x66a   :  { %v12253_v31 = vunpack.i.h.bf16 %v17736_v45  ;;  %v12252_v61 = vunpack.i.l.bf16 %v17736_v45  ;;  %v17746_v22 = vpop.permute.xlu2 %8926  ;;  %11742 = vmatmul.msk.f32.gmra.mxu1 %vm7648_vm2, %v11732_v13  ;;  %v8586_v46 = vsel %vm8585_vm12, %v12242_v11, %v12243_v50  ;;  %v8598_v20 = vsel %vm19106_vm15, %v12243_v50, %v17643_v6  ;;  %v11762_v50 = vld [vmem:[%s19072_s4 + $0x118] sm:$0xff] }
 0x66b   :  { %8632 = vmatpush.msrb.mxu2 %v8586_v46  ;;  %8661 = vmatpush.msra.mxu3 %v8598_v20  ;;  %vm8930_vm12 = vcmask 310272   ;;  %v11776_v11 = vld [vmem:[%s19072_s4 + $0x138] sm:$0xff]  ;;  %vm10038_vm15 = vcmask 80896  }
 0x66c   :  { %11738 = vmatmul.msk.f32.gmra.mxu0 %vm7648_vm2, %v11733_v57  ;;  %11752 = vmatmul.msk.f32.gmra.mxu2 %vm7648_vm2, %v11747_v36  ;;  %v8808_v17 = vsel %vm8807_vm13, %v12252_v61, %v12253_v31  ;;  %vm8819_vm13 = vcmask 318464   ;;  %v17914_v61 = vpop.f32.mrf.mxu2 }
 0x66d   :  { %11757 = vmatmul.msk.f32.gmra.mxu3 %vm7648_vm2, %v11747_v36  ;;  %11805 = vmatpush.msk.msra.mxu2 %vm7661_vm1, %v8809_v14  ;;  %v8820_v55 = vsel %vm8819_vm13, %v12253_v31, %v17702_v9  ;;  %v17876_v9 = vpop.f32.mrf.mxu3 }
 0x66e   :  { %12285 = vrot.lane.b32.xlu0 %v17316_v56, %s12425_s27  ;;  %s12432_s27 = smov 71  }
 0x66f   :  { %8854 = vmatpush.msra.mxu2 %v8808_v17  ;;  %v8695_v40 = vpop.permute.xlu0 %8694  ;;  %12295 = vrot.lane.b32.xlu1 %v17316_v56, %s12429_s18  ;;  %v11787_v17 = vld [vmem:[%s19072_s4 + $0x140] sm:$0xff] }
 0x670   :  { %v8698_v32 = vsel %vm19105_vm3, %v17651_v16, %v8695_v40  ;;  %v8710_v18 = vsel %vm8708_vm14, %v8695_v40, %v17693_v10  ;;  %12290 = vrot.lane.b32.xlu2 %v17316_v56, %s12430_s20  ;;  %v11761_v10 = vld [vmem:[%s19072_s4 + $0x110] sm:$0xff]  ;;  %vm9915_vm3 = vcmask 580608  }
 0x671   :  { %v17771_v19 = vpop.permute.xlu1 %8916  ;;  %11791 = vmatpush.msk.msra.mxu0 %vm7661_vm1, %v8698_v32  ;;  %11796 = vmatpush.msk.msra.mxu1 %vm7661_vm1, %v8710_v18 }
 0x672   :  { %v17781_v51 = vpop.permute.xlu2 %9025  ;;  %11743 = vmatmul.msk.f32.gmra.mxu1 %vm7648_vm2, %v11733_v57  ;;  %v8932_v30 = vsel %vm8930_vm12, %v17771_v19, %v17746_v22 }
 0x673   :  { %8743 = vmatpush.msra.mxu0 %v8697_v12 }
 0x674   :  { %11739 = vmatmul.msk.f32.gmra.mxu0 %vm7648_vm2, %v11734_v4  ;;  %11753 = vmatmul.msk.f32.gmra.mxu2 %vm7648_vm2, %v11748_v27 }
 0x675   :  { %11758 = vmatmul.msk.f32.gmra.mxu3 %vm7648_vm2, %v11748_v27  ;;  %v17908_v36 = vpop.f32.mrf.mxu3 }
 0x676   :  { %9700 = vrot.lane.b32.xlu0 %v17308_v60, %s12428_s21 }
 0x677   :  { %v8703_v1 = vpop.permute.xlu0 %8702  ;;  %9921 = vrot.lane.b32.xlu1 %v17308_v60, %s12431_s29 }
 0x678   :  { %9803 = vrot.lane.b32.xlu2 %v17322_v35, %s12429_s18  ;;  %v8709_v34 = vsel %vm8708_vm14, %v12248_v39, %v8703_v1  ;;  %vm8918_vm14 = vcmask 801792   ;;  %v11801_v39 = vld [vmem:[%s19072_s4 + $0x160] sm:$0xff] }
 0x679   :  { %v17799_v53 = vpop.permute.xlu1 %8924  ;;  %v17801_v41 = vpop.f32.mrf.mxu0  ;;  %8772 = vmatpush.msra.mxu1 %v8709_v34 }
 0x67a   :  { %v17809_v6 = vpop.permute.xlu2 %12260  ;;  %11744 = vmatmul.msk.f32.gmra.mxu1 %vm7648_vm2, %v11734_v4 }
 0x67b   :  { %v12263_v18 = vunpack.i.h.bf16 %v17809_v6 }
 0x67c   :  { %11764 = vmatmul.msk.f32.vlgmr.msrb.gmra.mxu0 %vm7648_vm2, %v11759_v59  ;;  %11778 = vmatmul.msk.f32.vlgmr.msrb.gmra.mxu2 %vm7648_vm2, %v11773_v8 }
 0x67d   :  { %11783 = vmatmul.msk.f32.vlgmr.msra.gmra.mxu3 %vm7648_vm2, %v11773_v8 }
 0x67e   :  { %9692 = vrot.lane.b32.xlu0 %v17322_v35, %s12430_s20  ;;  %s12436_s20 = smov 70  }
 0x67f   :  { %v8816_v33 = vpop.permute.xlu0 %8815  ;;  %9913 = vrot.lane.b32.xlu1 %v17322_v35, %s12432_s27  ;;  %v17819_v5 = vpop.f32.mrf.mxu1 }
 0x680   :  { %v8821_v16 = vsel %vm8819_vm13, %v17724_v2, %v8816_v33  ;;  %9811 = vrot.lane.b32.xlu2 %v17308_v60, %s12433_s2  ;;  %vm9041_vm13 = vcmask 302080  }
 0x681   :  { %v17824_v23 = vpop.permute.xlu1 %9037  ;;  %v17826_v29 = vpop.f32.mrf.mxu0  ;;  %11810 = vmatpush.msk.msrb.mxu3 %vm7661_vm1, %v8821_v16  ;;  %v11788_v16 = vld [vmem:[%s19072_s4 + $0x148] sm:$0xff] }
 0x682   :  { %v17838_v48 = vpop.permute.xlu2 %9138  ;;  %11769 = vmatmul.msk.f32.vlgmr.msrb.gmra.mxu1 %vm7648_vm2, %v11759_v59 }
 0x683   :  { %11824 = vmatpush.msk.msrb.mxu1 %vm7661_vm1, %v8932_v30  ;;  %8883 = vmatpush.msrb.mxu3 %v8820_v55 }
 0x684   :  { %11765 = vmatmul.msk.f32.gmra.mxu0 %vm7648_vm2, %v11760_v21  ;;  %11779 = vmatmul.msk.f32.gmra.mxu2 %vm7648_vm2, %v11774_v15 }
 0x685   :  { %11784 = vmatmul.msk.f32.gmra.mxu3 %vm7648_vm2, %v11774_v15 }
 0x686   :  { %9813 = vrot.lane.b32.xlu0 %v17302_v62, %s12433_s2 }
 0x687   :  { %v8915_v47 = vpop.permute.xlu0 %8914  ;;  %10034 = vrot.lane.b32.xlu1 %v17302_v62, %s12434_s1  ;;  %v17856_v63 = vpop.f32.mrf.mxu1 }
 0x688   :  { %v8920_v37 = vsel %vm8918_vm14, %v8915_v47, %v17771_v19  ;;  %9923 = vrot.lane.b32.xlu2 %v17302_v62, %s12431_s29  ;;  %s19101_s29 = smov 69   ;;  %v12262_v19 = vunpack.i.l.bf16 %v17809_v6 }
 0x689   :  { %v9137_v0 = vpop.permute.xlu1 %9136  ;;  %v17862_v7 = vpop.f32.mrf.mxu0  ;;  %11819 = vmatpush.msk.msrb.mxu0 %vm7661_vm1, %v8920_v37 }
 0x68a   :  { %v17871_v52 = vpop.permute.xlu2 %9145  ;;  %11770 = vmatmul.msk.f32.gmra.mxu1 %vm7648_vm2, %v11760_v21  ;;  %v9141_v32 = vsel %vm1362_vm6, %v9137_v0, %v17838_v48 }
 0x68c   :  { %11766 = vmatmul.msk.f32.gmra.mxu0 %vm7648_vm2, %v11761_v10  ;;  %11780 = vmatmul.msk.f32.gmra.mxu2 %vm7648_vm2, %v11775_v49 }
 0x68d   :  { %11785 = vmatmul.msk.f32.gmra.mxu3 %vm7648_vm2, %v11775_v49 }
 0x68e   :  { %9911 = vrot.lane.b32.xlu0 %v17302_v62, %s12432_s27 }
 0x68f   :  { %10133 = vrot.lane.b32.xlu1 %v17302_v62, %s19101_s29  ;;  %v17885_v44 = vpop.f32.mrf.mxu1 }
 0x690   :  { %v12256_v28 = vpop.permute.xlu0 %12255  ;;  %10022 = vrot.lane.b32.xlu2 %v17302_v62, %s12436_s20 }
 0x691   :  { %v12258_v24 = vunpack.i.h.bf16 %v12256_v28  ;;  %v12257_v13 = vunpack.i.l.bf16 %v12256_v28  ;;  %v17889_v38 = vpop.permute.xlu1 %12265  ;;  %v17891_v2 = vpop.f32.mrf.mxu0 }
 0x692   :  { %v9259_v43 = vpop.permute.xlu2 %9258  ;;  %11771 = vmatmul.msk.f32.gmra.mxu1 %vm7648_vm2, %v11761_v10  ;;  %v12268_v42 = vunpack.i.h.bf16 %v17889_v38  ;;  %v12267_v40 = vunpack.i.l.bf16 %v17889_v38 }
 0x693   :  { %v8919_v45 = vsel %vm8918_vm14, %v12257_v13, %v12258_v24  ;;  %v8931_v57 = vsel %vm8930_vm12, %v12258_v24, %v17799_v53  ;;  %vm9029_vm12 = vcmask 793600   ;;  %vm9151_vm14 = vcmask 293888   ;;  %v11789_v24 = vld [vmem:[%s19072_s4 + $0x150] sm:$0xff] }
 0x694   :  { %8965 = vmatpush.msrb.mxu0 %v8919_v45  ;;  %8994 = vmatpush.msrb.mxu1 %v8931_v57  ;;  %v9140_v4 = vsel %vm1362_vm6, %v12267_v40, %v12268_v42  ;;  %vm9262_vm6 = vcmask 211968  }
 0x695   :  { %11767 = vmatmul.msk.f32.gmra.mxu0 %vm7648_vm2, %v11762_v50  ;;  %11781 = vmatmul.msk.f32.gmra.mxu2 %vm7648_vm2, %v11776_v11 }
 0x696   :  { %11786 = vmatmul.msk.f32.gmra.mxu3 %vm7648_vm2, %v11776_v11  ;;  %12300 = vrot.lane.b32.xlu0 %v17316_v56, %s12432_s27  ;;  %s19464_s27 = smov 100  }
 0x697   :  { %12310 = vrot.lane.b32.xlu1 %v17316_v56, %s19101_s29  ;;  %v17912_v31 = vpop.f32.mrf.mxu1 }
 0x698   :  { %v9036_v22 = vpop.permute.xlu0 %9035  ;;  %12305 = vrot.lane.b32.xlu2 %v17316_v56, %s12436_s20  ;;  %v7797_v40 = vadd.f32 %v17908_v36, %v17912_v31 }
 0x699   :  { %v17918_v46 = vpop.permute.xlu1 %9256  ;;  %v17920_v20 = vpop.f32.mrf.mxu0  ;;  %v9042_v21 = vsel %vm9041_vm13, %v12263_v18, %v9036_v22  ;;  %v11790_v22 = vld [vmem:[%s19072_s4 + $0x158] sm:$0xff] }
 0x69a   :  { %v17922_v14 = vpop.permute.xlu2 %9357  ;;  %11772 = vmatmul.msk.f32.gmra.mxu1 %vm7648_vm2, %v11762_v50 }
 0x69d   :  { %11792 = vmatmul.msk.f32.vlgmr.msra.gmra.mxu0 %vm7648_vm2, %v11787_v17  ;;  %11806 = vmatmul.msk.f32.vlgmr.msra.gmra.mxu2 %vm7648_vm2, %v11801_v39 }
 0x69e   :  { %11811 = vmatmul.msk.f32.vlgmr.msrb.gmra.mxu3 %vm7648_vm2, %v11801_v39  ;;  %11847 = vmatpush.msk.msra.mxu0 %vm7661_vm1, %v9141_v32  ;;  %v10380_v39 = vld [vmem:[%s19074_s6 + $0x10] sm:$0xff]  ;;  %v7759_v32 = vadd.f32 %v17795_v25, %v17801_v41 }
 0x69f   :  { %10024 = vrot.lane.b32.xlu0 %v17322_v35, %s12436_s20  ;;  %10246 = vrot.lane.b32.xlu1 %v17322_v35, %s12437_s26  ;;  %v17946_v27 = vpop.f32.mrf.mxu1  ;;  %v17948_v12 = vpop.f32.mrf.mxu2  ;;  %s12439_s20 = smov 8  }
 0x6a0   :  { %9186 = vmatpush.msra.mxu0 %v9140_v4  ;;  %v9028_v1 = vpop.permute.xlu0 %9027  ;;  %10143 = vrot.lane.b32.xlu2 %v17308_v60, %s12438_s28  ;;  %v17952_v34 = vpop.f32.mrf.mxu3  ;;  %v7788_v4 = vadd.f32 %v17797_v3, %v17819_v5  ;;  %v7901_v36 = vadd.f32 %v17920_v20, %v7759_v32  ;;  %v11815_v5 = vld [vmem:[%s19072_s4 + $0x180] sm:$0xff]  ;;  %v10349_v32 = vld [vmem:[%s19073_s5 + $0x18] sm:$0xff] }
 0x6a1   :  { %v9031_v53 = vsel %vm9029_vm12, %v17781_v51, %v9028_v1  ;;  %v9043_v59 = vsel %vm9041_vm13, %v9028_v1, %v17824_v23  ;;  %v9249_v8 = vpop.permute.xlu1 %9248  ;;  %v17958_v6 = vpop.f32.mrf.mxu0  ;;  %v11802_v51 = vld [vmem:[%s19072_s4 + $0x168] sm:$0xff]  ;;  %v9030_v23 = vsel %vm9029_vm12, %v12262_v19, %v12263_v18  ;;  %vm9250_vm13 = vcmask 703488   ;;  %v11829_v20 = vld [vmem:[%s19072_s4 + $0x1a0] sm:$0xff] }
 0x6a2   :  { %v17960_v33 = vpop.permute.xlu2 %12275  ;;  %11833 = vmatpush.msk.msrb.mxu2 %vm7661_vm1, %v9031_v53  ;;  %11838 = vmatpush.msk.msra.mxu3 %vm7661_vm1, %v9043_v59  ;;  %v9264_v15 = vsel %vm9262_vm6, %v9249_v8, %v9259_v43 }
 0x6a3   :  { %11797 = vmatmul.msk.f32.vlgmr.msra.gmra.mxu1 %vm7648_vm2, %v11787_v17  ;;  %v11804_v17 = vld [vmem:[%s19072_s4 + $0x178] sm:$0xff] }
 0x6a4   :  { %9076 = vmatpush.msrb.mxu2 %v9030_v23  ;;  %9105 = vmatpush.msra.mxu3 %v9042_v21  ;;  %v8011_v21 = vadd.f32 %v17948_v12, %v7901_v36  ;;  %v7794_v36 = vadd.f32 %v17876_v9, %v17885_v44  ;;  %v11831_v9 = vld [vmem:[%s19072_s4 + $0x1b0] sm:$0xff] }
 0x6a5   :  { %11793 = vmatmul.msk.f32.gmra.mxu0 %vm7648_vm2, %v11788_v16  ;;  %11807 = vmatmul.msk.f32.gmra.mxu2 %vm7648_vm2, %v11802_v51  ;;  %v10348_v44 = vld [vmem:[%s19073_s5 + $0x10] sm:$0xff] }
 0x6a6   :  { %11812 = vmatmul.msk.f32.gmra.mxu3 %vm7648_vm2, %v11802_v51 }
 0x6a7   :  { %11866 = vmatpush.msk.msrb.mxu3 %vm7661_vm1, %v9264_v15  ;;  %10032 = vrot.lane.b32.xlu0 %v17308_v60, %s12434_s1  ;;  %v17980_v30 = vpop.f32.mrf.mxu1  ;;  %v17982_v55 = vpop.f32.mrf.mxu2  ;;  %s12442_s1 = smov 19  }
 0x6a8   :  { %v9148_v47 = vpop.permute.xlu0 %9147  ;;  %10254 = vrot.lane.b32.xlu1 %v17308_v60, %s12439_s20  ;;  %10135 = vrot.lane.b32.xlu2 %v17322_v35, %s19101_s29  ;;  %v17987_v37 = vpop.f32.mrf.mxu3  ;;  %v11803_v60 = vld [vmem:[%s19072_s4 + $0x170] sm:$0xff]  ;;  %v9152_v35 = vsel %vm9151_vm14, %v12268_v42, %v17871_v52  ;;  %v10346_v42 = vld [vmem:[%s19073_s5] sm:$0xff] }
 0x6a9   :  { %v9153_v0 = vsel %vm9151_vm14, %v17838_v48, %v9148_v47  ;;  %v17990_v10 = vpop.permute.xlu1 %9369  ;;  %v17992_v49 = vpop.f32.mrf.mxu0  ;;  %v10347_v48 = vld [vmem:[%s19073_s5 + $0x8] sm:$0xff]  ;;  %vm19103_vm14 = vcmask 687104  }
 0x6aa   :  { %v17994_v28 = vpop.permute.xlu2 %9478  ;;  %11852 = vmatpush.msk.msra.mxu1 %vm7661_vm1, %v9153_v0 }
 0x6ab   :  { %11798 = vmatmul.msk.f32.gmra.mxu1 %vm7648_vm2, %v11788_v16 }
 0x6ac   :  { %9215 = vmatpush.msra.mxu1 %v9152_v35  ;;  %v12278_v35 = vunpack.i.h.bf16 %v17960_v33 }
 0x6ad   :  { %11794 = vmatmul.msk.f32.gmra.mxu0 %vm7648_vm2, %v11789_v24  ;;  %11808 = vmatmul.msk.f32.gmra.mxu2 %vm7648_vm2, %v11803_v60 }
 0x6ae   :  { %11813 = vmatmul.msk.f32.gmra.mxu3 %vm7648_vm2, %v11803_v60  ;;  %v7762_v60 = vadd.f32 %v17848_v54, %v17826_v29 }
 0x6af   :  { %10145 = vrot.lane.b32.xlu0 %v17302_v62, %s12438_s28  ;;  %v18013_v13 = vpop.f32.mrf.mxu1  ;;  %v18015_v38 = vpop.f32.mrf.mxu2 }
 0x6b0   :  { %v9247_v52 = vpop.permute.xlu0 %9246  ;;  %10357 = vperm.xlu1 %12077, %v10347_v48   ;;  %10256 = vrot.lane.b32.xlu2 %v17302_v62, %s12439_s20  ;;  %v18018_v43 = vpop.f32.mrf.mxu3  ;;  %v12277_v48 = vunpack.i.l.bf16 %v17960_v33  ;;  %s19463_s20 = smov 69  }
 0x6b1   :  { %v9252_v50 = vsel %vm9250_vm13, %v9247_v52, %v9249_v8  ;;  %v9469_v11 = vpop.permute.xlu1 %9468  ;;  %v18021_v45 = vpop.f32.mrf.mxu0 }
 0x6b2   :  { %v18023_v57 = vpop.permute.xlu2 %9470  ;;  %11861 = vmatpush.msk.msra.mxu2 %vm7661_vm1, %v9252_v50 }
 0x6b3   :  { %11799 = vmatmul.msk.f32.gmra.mxu1 %vm7648_vm2, %v11789_v24  ;;  %v9474_v47 = vsel %vm19103_vm14, %v9469_v11, %v18023_v57 }
 0x6b5   :  { %11795 = vmatmul.msk.f32.gmra.mxu0 %vm7648_vm2, %v11790_v22  ;;  %11809 = vmatmul.msk.f32.gmra.mxu2 %vm7648_vm2, %v11804_v17 }
 0x6b6   :  { %11814 = vmatmul.msk.f32.gmra.mxu3 %vm7648_vm2, %v11804_v17 }
 0x6b7   :  { %10244 = vrot.lane.b32.xlu0 %v17302_v62, %s12437_s26  ;;  %v7898_v18 = vpop.f32.mrf.mxu1  ;;  %v18048_v19 = vpop.f32.mrf.mxu2  ;;  %v7902_v62 = vadd.f32 %v17946_v27, %v7788_v4 }
 0x6b8   :  { %v12271_v1 = vpop.permute.xlu0 %12270  ;;  %10394 = vperm.xlu1 %12077, %v10380_v39   ;;  %10352 = vperm.xlu2 %12078, %v10346_v42   ;;  %v7908_v53 = vadd.f32 %v7898_v18, %v7797_v40  ;;  %v8008_v59 = vpop.f32.mrf.mxu3  ;;  %v7903_v42 = vadd.f32 %v17958_v6, %v7762_v60  ;;  %v11816_v40 = vld [vmem:[%s19072_s4 + $0x188] sm:$0xff] }
 0x6b9   :  { %v12273_v31 = vunpack.i.h.bf16 %v12271_v1  ;;  %v12272_v8 = vunpack.i.l.bf16 %v12271_v1  ;;  %v18053_v25 = vpop.permute.xlu1 %12280  ;;  %v8079_v41 = vpop.f32.mrf.mxu0  ;;  %v8012_v12 = vadd.f32 %v17952_v34, %v7902_v62  ;;  %v7791_v34 = vadd.f32 %v17845_v58, %v17856_v63 }
 0x6ba   :  { %v12283_v16 = vunpack.i.h.bf16 %v18053_v25  ;;  %v12282_v51 = vunpack.i.l.bf16 %v18053_v25  ;;  %v18058_v3 = vadd.f32 %v8008_v59, %v7908_v53  ;;  %v18071_v15 = vpop.permute.xlu2 %9591  ;;  %v8120_v24 = vadd.f32 %v8079_v41, %v8011_v21 }
 0x6bb   :  { %11800 = vmatmul.msk.f32.gmra.mxu1 %vm7648_vm2, %v11790_v22  ;;  %v9251_v23 = vsel %vm9250_vm13, %v12272_v8, %v12273_v31  ;;  %v9263_v27 = vsel %vm9262_vm6, %v12273_v31, %v17918_v46  ;;  %v10379_v46 = vld [vmem:[%s19074_s6 + $0x8] sm:$0xff]  ;;  %vm19107_vm6 = vcmask 203776   ;;  %vm9361_vm13 = vcmask 695296  }
 0x6bc   :  { %9297 = vmatpush.msra.mxu2 %v9251_v23  ;;  %9326 = vmatpush.msrb.mxu3 %v9263_v27  ;;  %v9473_v0 = vsel %vm19103_vm14, %v12282_v51, %v12283_v16  ;;  %v7904_v58 = vadd.f32 %v17980_v30, %v7791_v34  ;;  %v8013_v6 = vadd.f32 %v17982_v55, %v7903_v42  ;;  %v10378_v30 = vld [vmem:[%s19074_s6] sm:$0xff]  ;;  %v10381_v34 = vld [vmem:[%s19074_s6 + $0x18] sm:$0xff]  ;;  %vm9595_vm14 = vcmask 187392  }
 0x6bd   :  { %11820 = vmatmul.msk.f32.vlgmr.msrb.gmra.mxu0 %vm7648_vm2, %v11815_v5  ;;  %11834 = vmatmul.msk.f32.vlgmr.msrb.gmra.mxu2 %vm7648_vm2, %v11829_v20  ;;  %v7765_v59 = vadd.f32 %v17879_v26, %v17862_v7  ;;  %v7906_v23 = vadd.f32 %v18013_v13, %v7794_v36  ;;  %v11817_v7 = vld [vmem:[%s19072_s4 + $0x190] sm:$0xff]  ;;  %v11843_v42 = vld [vmem:[%s19072_s4 + $0x1c0] sm:$0xff] }
 0x6be   :  { %11839 = vmatmul.msk.f32.vlgmr.msra.gmra.mxu3 %vm7648_vm2, %v11829_v20  ;;  %11889 = vmatpush.msk.msrb.mxu2 %vm7661_vm1, %v9474_v47  ;;  %v8014_v18 = vadd.f32 %v17987_v37, %v7904_v58  ;;  %v11857_v58 = vld [vmem:[%s19072_s4 + $0x1e0] sm:$0xff] }
 0x6bf   :  { %12315 = vrot.lane.b32.xlu0 %v17316_v56, %s12437_s26  ;;  %v8108_v52 = vpop.f32.mrf.mxu1  ;;  %v8190_v50 = vpop.f32.mrf.mxu2  ;;  %v7905_v20 = vadd.f32 %v17992_v49, %v7765_v59  ;;  %v8016_v49 = vadd.f32 %v18018_v43, %v7906_v23  ;;  %s12445_s26 = smov 75  }
 0x6c0   :  { %9519 = vmatpush.msrb.mxu2 %v9473_v0  ;;  %v9360_v11 = vpop.permute.xlu0 %9359  ;;  %10389 = vperm.xlu2 %12078, %v10379_v46   ;;  %v8121_v22 = vadd.f32 %v8108_v52, %v8012_v12  ;;  %v18094_v17 = vadd.f32 %v8190_v50, %v8120_v24  ;;  %v8219_v29 = vpop.f32.mrf.mxu3  ;;  %v7768_v0 = vadd.f32 %v17914_v61, %v17891_v2  ;;  %v11818_v2 = vld [vmem:[%s19072_s4 + $0x198] sm:$0xff] }
 0x6c1   :  { %v9363_v54 = vsel %vm9361_vm13, %v17922_v14, %v9360_v11  ;;  %v9375_v33 = vsel %vm19107_vm6, %v9360_v11, %v17990_v10  ;;  %v18100_v56 = vpop.permute.xlu1 %9581  ;;  %v8082_v39 = vpop.f32.mrf.mxu0  ;;  %v11830_v14 = vld [vmem:[%s19072_s4 + $0x1a8] sm:$0xff]  ;;  %v9362_v10 = vsel %vm9361_vm13, %v12277_v48, %v12278_v35  ;;  %v8015_v26 = vadd.f32 %v18015_v38, %v7905_v20  ;;  %v11832_v61 = vld [vmem:[%s19072_s4 + $0x1b8] sm:$0xff] }
 0x6c2   :  { %v18104_v63 = vadd.f32 %v8219_v29, %v8121_v22  ;;  %11875 = vmatpush.msk.msrb.mxu0 %vm7661_vm1, %v9363_v54  ;;  %v18126_v4 = vpop.permute.xlu2 %9690  ;;  %v8122_v55 = vadd.f32 %v8082_v39, %v8013_v6  ;;  %vm9484_vm13 = vcmask 195584   ;;  %v7907_v48 = vadd.f32 %v18021_v45, %v7768_v0 }
 0x6c3   :  { %11825 = vmatmul.msk.f32.vlgmr.msrb.gmra.mxu1 %vm7648_vm2, %v11815_v5  ;;  %v9485_v45 = vsel %vm9484_vm13, %v12283_v16, %v17994_v28 }
 0x6c4   :  { %11880 = vmatpush.msk.msrb.mxu1 %vm7661_vm1, %v9375_v33  ;;  %9408 = vmatpush.msrb.mxu0 %v9362_v10 }
 0x6c5   :  { %11821 = vmatmul.msk.f32.gmra.mxu0 %vm7648_vm2, %v11816_v40  ;;  %11835 = vmatmul.msk.f32.gmra.mxu2 %vm7648_vm2, %v11830_v14 }
 0x6c6   :  { %11840 = vmatmul.msk.f32.gmra.mxu3 %vm7648_vm2, %v11830_v14 }
 0x6c7   :  { %10384 = vperm.xlu0 %12076, %v10378_v30   ;;  %v8111_v1 = vpop.f32.mrf.mxu1  ;;  %v8193_v53 = vpop.f32.mrf.mxu2 }
 0x6c8   :  { %v9368_v31 = vpop.permute.xlu0 %9367  ;;  %10367 = vperm.xlu2 %12078, %v10349_v32   ;;  %v8123_v8 = vadd.f32 %v8111_v1, %v8014_v18  ;;  %v18133_v41 = vadd.f32 %v8193_v53, %v8122_v55  ;;  %v8222_v37 = vpop.f32.mrf.mxu3 }
 0x6c9   :  { %v18135_v62 = vpop.permute.xlu1 %9589  ;;  %v8085_v51 = vpop.f32.mrf.mxu0  ;;  %v9374_v5 = vsel %vm19107_vm6, %v12278_v35, %v9368_v31  ;;  %v11858_v31 = vld [vmem:[%s19072_s4 + $0x1e8] sm:$0xff]  ;;  %vm10149_vm6 = vcmask 72704  }
 0x6ca   :  { %v18140_v27 = vadd.f32 %v8222_v37, %v8123_v8  ;;  %9437 = vmatpush.msrb.mxu1 %v9374_v5  ;;  %v8124_v13 = vadd.f32 %v8085_v51, %v8015_v26  ;;  %v18165_v52 = vpop.permute.xlu2 %12290  ;;  %v9597_v8 = vsel %vm9595_vm14, %v18100_v56, %v18071_v15 }
 0x6cb   :  { %11826 = vmatmul.msk.f32.gmra.mxu1 %vm7648_vm2, %v11816_v40 }
 0x6cd   :  { %11822 = vmatmul.msk.f32.gmra.mxu0 %vm7648_vm2, %v11817_v7  ;;  %11836 = vmatmul.msk.f32.gmra.mxu2 %vm7648_vm2, %v11831_v9 }
 0x6ce   :  { %11841 = vmatmul.msk.f32.gmra.mxu3 %vm7648_vm2, %v11831_v9 }
 0x6cf   :  { %10362 = vperm.xlu0 %12076, %v10348_v44   ;;  %v8114_v21 = vpop.f32.mrf.mxu1  ;;  %v8196_v47 = vpop.f32.mrf.mxu2 }
 0x6d0   :  { %v9481_v38 = vpop.permute.xlu0 %9480  ;;  %v8125_v46 = vadd.f32 %v8114_v21, %v8016_v49  ;;  %v18159_v12 = vadd.f32 %v8196_v47, %v8124_v13  ;;  %v8225_v24 = vpop.f32.mrf.mxu3  ;;  %v11845_v49 = vld [vmem:[%s19072_s4 + $0x1d0] sm:$0xff]  ;;  %v12293_v21 = vunpack.i.h.bf16 %v18165_v52  ;;  %v12292_v47 = vunpack.i.l.bf16 %v18165_v52  ;;  %v11846_v52 = vld [vmem:[%s19072_s4 + $0x1d8] sm:$0xff] }
 0x6d1   :  { %v9486_v60 = vsel %vm9484_vm13, %v18023_v57, %v9481_v38  ;;  %v18162_v35 = vpop.permute.xlu1 %9702  ;;  %v8088_v43 = vpop.f32.mrf.mxu0  ;;  %v8017_v57 = vadd.f32 %v18048_v19, %v7907_v48  ;;  %vm9583_vm13 = vcmask 678912  }
 0x6d2   :  { %v18167_v50 = vadd.f32 %v8225_v24, %v8125_v46  ;;  %11894 = vmatpush.msk.msra.mxu3 %vm7661_vm1, %v9486_v60 }
 0x6d3   :  { %11827 = vmatmul.msk.f32.gmra.mxu1 %vm7648_vm2, %v11817_v7  ;;  %v8126_v11 = vadd.f32 %v8088_v43, %v8017_v57 }
 0x6d4   :  { %9548 = vmatpush.msra.mxu3 %v9485_v45 }
 0x6d5   :  { %11823 = vmatmul.msk.f32.gmra.mxu0 %vm7648_vm2, %v11818_v2  ;;  %11837 = vmatmul.msk.f32.gmra.mxu2 %vm7648_vm2, %v11832_v61 }
 0x6d6   :  { %11842 = vmatmul.msk.f32.gmra.mxu3 %vm7648_vm2, %v11832_v61 }
 0x6d7   :  { %10399 = vperm.xlu0 %12076, %v10381_v34   ;;  %v8117_v22 = vpop.f32.mrf.mxu1  ;;  %v8199_v29 = vpop.f32.mrf.mxu2 }
 0x6d8   :  { %v9580_v54 = vpop.permute.xlu0 %9579  ;;  %v8127_v28 = vadd.f32 %v8117_v22, %v18058_v3  ;;  %v18188_v25 = vadd.f32 %v8199_v29, %v8126_v11  ;;  %v8228_v19 = vpop.f32.mrf.mxu3 }
 0x6d9   :  { %v8301_v16 = vpop.f32.mrf.mxu0  ;;  %v18190_v33 = vpop.permute.xlu1 %9801  ;;  %v9585_v40 = vsel %vm9583_vm13, %v9580_v54, %v18100_v56 }
 0x6da   :  { %v18192_v39 = vadd.f32 %v8228_v19, %v8127_v28  ;;  %v18201_v3 = vpop.permute.xlu2 %9803  ;;  %v8342_v14 = vadd.f32 %v8301_v16, %v18094_v17  ;;  %v11844_v17 = vld [vmem:[%s19072_s4 + $0x1c8] sm:$0xff] }
 0x6db   :  { %11828 = vmatmul.msk.f32.gmra.mxu1 %vm7648_vm2, %v11818_v2 }
 0x6dd   :  { %11848 = vmatmul.msk.f32.vlgmr.msra.gmra.mxu0 %vm7648_vm2, %v11843_v42  ;;  %11862 = vmatmul.msk.f32.vlgmr.msra.gmra.mxu2 %vm7648_vm2, %v11857_v58 }
 0x6de   :  { %11867 = vmatmul.msk.f32.vlgmr.msrb.gmra.mxu3 %vm7648_vm2, %v11857_v58  ;;  %11903 = vmatpush.msk.msra.mxu0 %vm7661_vm1, %v9585_v40  ;;  %v11871_v58 = vld [vmem:[%s19072_s4 + $0x200] sm:$0xff] }
 0x6df   :  { %v8330_v10 = vpop.f32.mrf.mxu1  ;;  %v8412_v6 = vpop.f32.mrf.mxu2 }
 0x6e0   :  { %v12286_v30 = vpop.permute.xlu0 %12285  ;;  %v8343_v32 = vadd.f32 %v8330_v10, %v18104_v63  ;;  %v18211_v18 = vadd.f32 %v8412_v6, %v8342_v14  ;;  %v8441_v55 = vpop.f32.mrf.mxu3 }
 0x6e1   :  { %v12288_v1 = vunpack.i.h.bf16 %v12286_v30  ;;  %v12287_v53 = vunpack.i.l.bf16 %v12286_v30  ;;  %v8304_v59 = vpop.f32.mrf.mxu0  ;;  %v18226_v51 = vpop.permute.xlu1 %12295 }
 0x6e2   :  { %v18213_v36 = vadd.f32 %v8441_v55, %v8343_v32  ;;  %v18231_v5 = vpop.permute.xlu2 %9811  ;;  %v8344_v20 = vadd.f32 %v8304_v59, %v18133_v41  ;;  %v11859_v41 = vld [vmem:[%s19072_s4 + $0x1f0] sm:$0xff]  ;;  %v12298_v40 = vunpack.i.h.bf16 %v18226_v51 }
 0x6e3   :  { %11853 = vmatmul.msk.f32.vlgmr.msra.gmra.mxu1 %vm7648_vm2, %v11843_v42  ;;  %v9584_v63 = vsel %vm9583_vm13, %v12287_v53, %v12288_v1  ;;  %v9596_v37 = vsel %vm9595_vm14, %v12288_v1, %v18135_v62  ;;  %vm9694_vm14 = vcmask 670720   ;;  %vm9706_vm13 = vcmask 179200  }
 0x6e4   :  { %11908 = vmatpush.msk.msra.mxu1 %vm7661_vm1, %v9597_v8  ;;  %9630 = vmatpush.msra.mxu0 %v9584_v63  ;;  %v11872_v63 = vld [vmem:[%s19072_s4 + $0x208] sm:$0xff] }
 0x6e5   :  { %11849 = vmatmul.msk.f32.gmra.mxu0 %vm7648_vm2, %v11844_v17  ;;  %11863 = vmatmul.msk.f32.gmra.mxu2 %vm7648_vm2, %v11858_v31 }
 0x6e6   :  { %11868 = vmatmul.msk.f32.gmra.mxu3 %vm7648_vm2, %v11858_v31  ;;  %9659 = vmatpush.msra.mxu1 %v9596_v37  ;;  %v11886_v37 = vld [vmem:[%s19072_s4 + $0x228] sm:$0xff] }
 0x6e7   :  { %v8333_v15 = vpop.f32.mrf.mxu1  ;;  %v8415_v56 = vpop.f32.mrf.mxu2 }
 0x6e8   :  { %v9701_v23 = vpop.permute.xlu0 %9700  ;;  %v8345_v62 = vadd.f32 %v8333_v15, %v18140_v27  ;;  %v18236_v7 = vadd.f32 %v8415_v56, %v8344_v20  ;;  %v8444_v9 = vpop.f32.mrf.mxu3  ;;  %v9817_v20 = vsel %vm7648_vm2, %v12298_v40, %v18231_v5  ;;  %v11873_v5 = vld [vmem:[%s19072_s4 + $0x210] sm:$0xff] }
 0x6e9   :  { %v8307_v26 = vpop.f32.mrf.mxu0  ;;  %v18249_v27 = vpop.permute.xlu1 %9921 }
 0x6ea   :  { %v18238_v44 = vadd.f32 %v8444_v9, %v8345_v62  ;;  %v8346_v13 = vadd.f32 %v8307_v26, %v18159_v12  ;;  %v9924_v61 = vpop.permute.xlu2 %9923 }
 0x6eb   :  { %11854 = vmatmul.msk.f32.gmra.mxu1 %vm7648_vm2, %v11844_v17 }
 0x6ed   :  { %11850 = vmatmul.msk.f32.gmra.mxu0 %vm7648_vm2, %v11845_v49  ;;  %11864 = vmatmul.msk.f32.gmra.mxu2 %vm7648_vm2, %v11859_v41 }
 0x6ee   :  { %11869 = vmatmul.msk.f32.gmra.mxu3 %vm7648_vm2, %v11859_v41 }
 0x6ef   :  { %v8336_v0 = vpop.f32.mrf.mxu1  ;;  %v8418_v38 = vpop.f32.mrf.mxu2 }
 0x6f0   :  { %v9693_v46 = vpop.permute.xlu0 %9692  ;;  %v8347_v24 = vadd.f32 %v8336_v0, %v18167_v50  ;;  %v18256_v60 = vadd.f32 %v8418_v38, %v8346_v13  ;;  %v8447_v43 = vpop.f32.mrf.mxu3  ;;  %v11860_v50 = vld [vmem:[%s19072_s4 + $0x1f8] sm:$0xff] }
 0x6f1   :  { %v9696_v48 = vsel %vm9694_vm14, %v18126_v4, %v9693_v46  ;;  %v9708_v12 = vsel %vm9706_vm13, %v9693_v46, %v18162_v35  ;;  %v8310_v2 = vpop.f32.mrf.mxu0  ;;  %v9695_v4 = vsel %vm9694_vm14, %v12292_v47, %v12293_v21  ;;  %v9707_v35 = vsel %vm9706_vm13, %v12293_v21, %v9701_v23  ;;  %v9914_v16 = vpop.permute.xlu1 %9913 }
 0x6f2   :  { %v18262_v45 = vadd.f32 %v8447_v43, %v8347_v24  ;;  %11917 = vmatpush.msk.msra.mxu2 %vm7661_vm1, %v9696_v48  ;;  %11922 = vmatpush.msk.msrb.mxu3 %vm7661_vm1, %v9708_v12  ;;  %v8348_v57 = vadd.f32 %v8310_v2, %v18188_v25  ;;  %vm9805_vm14 = vcmask 588800   ;;  %v11885_v25 = vld [vmem:[%s19072_s4 + $0x220] sm:$0xff]  ;;  %v18293_v14 = vpop.permute.xlu2 %10022  ;;  %v9929_v6 = vsel %vm9927_vm4, %v9914_v16, %v9924_v61 }
 0x6f3   :  { %11855 = vmatmul.msk.f32.gmra.mxu1 %vm7648_vm2, %v11845_v49  ;;  %v9807_v10 = vsel %vm9805_vm14, %v18190_v33, %v18201_v3 }
 0x6f4   :  { %9741 = vmatpush.msra.mxu2 %v9695_v4  ;;  %9770 = vmatpush.msrb.mxu3 %v9707_v35  ;;  %v11874_v4 = vld [vmem:[%s19072_s4 + $0x218] sm:$0xff] }
 0x6f5   :  { %11851 = vmatmul.msk.f32.gmra.mxu0 %vm7648_vm2, %v11846_v52  ;;  %11865 = vmatmul.msk.f32.gmra.mxu2 %vm7648_vm2, %v11860_v50 }
 0x6f6   :  { %11870 = vmatmul.msk.f32.gmra.mxu3 %vm7648_vm2, %v11860_v50 }
 0x6f7   :  { %v8339_v34 = vpop.f32.mrf.mxu1  ;;  %v8421_v11 = vpop.f32.mrf.mxu2 }
 0x6f8   :  { %v9814_v22 = vpop.permute.xlu0 %9813  ;;  %v8349_v29 = vadd.f32 %v8339_v34, %v18192_v39  ;;  %v18280_v54 = vadd.f32 %v8421_v11, %v8348_v57  ;;  %v8450_v28 = vpop.f32.mrf.mxu3  ;;  %v12297_v39 = vunpack.i.l.bf16 %v18226_v51 }
 0x6f9   :  { %v8523_v19 = vpop.f32.mrf.mxu0  ;;  %v18322_v51 = vpop.permute.xlu1 %10034 }
 0x6fa   :  { %v18282_v42 = vadd.f32 %v8450_v28, %v8349_v29  ;;  %v8564_v30 = vadd.f32 %v8523_v19, %v18211_v18  ;;  %v9806_v32 = vsel %vm9805_vm14, %v12297_v39, %v12298_v40  ;;  %v18329_v15 = vpop.permute.xlu2 %12305 }
 0x6fb   :  { %11856 = vmatmul.msk.f32.gmra.mxu1 %vm7648_vm2, %v11846_v52 }
 0x6fd   :  { %11876 = vmatmul.msk.f32.vlgmr.msrb.gmra.mxu0 %vm7648_vm2, %v11871_v58  ;;  %11890 = vmatmul.msk.f32.vlgmr.msrb.gmra.mxu2 %vm7648_vm2, %v11885_v25 }
 0x6fe   :  { %11895 = vmatmul.msk.f32.vlgmr.msra.gmra.mxu3 %vm7648_vm2, %v11885_v25  ;;  %11931 = vmatpush.msk.msrb.mxu0 %vm7661_vm1, %v9807_v10  ;;  %v12308_v25 = vunpack.i.h.bf16 %v18329_v15 }
 0x6ff   :  { %11950 = vmatpush.msk.msra.mxu3 %vm7661_vm1, %v9929_v6  ;;  %v8552_v55 = vpop.f32.mrf.mxu1  ;;  %v8634_v1 = vpop.f32.mrf.mxu2 }
 0x700   :  { %9851 = vmatpush.msrb.mxu0 %v9806_v32  ;;  %v9912_v33 = vpop.permute.xlu0 %9911  ;;  %v8565_v53 = vadd.f32 %v8552_v55, %v18213_v36  ;;  %v18307_v59 = vadd.f32 %v8634_v1, %v8564_v30  ;;  %v8663_v17 = vpop.f32.mrf.mxu3  ;;  %v9818_v36 = vsel %vm7648_vm2, %v18201_v3, %v9814_v22 }
 0x701   :  { %v9917_v18 = vsel %vm9915_vm3, %v9912_v33, %v9914_v16  ;;  %v8526_v31 = vpop.f32.mrf.mxu0  ;;  %v10134_v38 = vpop.permute.xlu1 %10133 }
 0x702   :  { %v18310_v8 = vadd.f32 %v8663_v17, %v8565_v53  ;;  %11945 = vmatpush.msk.msrb.mxu2 %vm7661_vm1, %v9917_v18  ;;  %v8566_v56 = vadd.f32 %v8526_v31, %v18236_v7  ;;  %v11887_v7 = vld [vmem:[%s19072_s4 + $0x230] sm:$0xff]  ;;  %v18352_v48 = vpop.permute.xlu2 %10143 }
 0x703   :  { %11881 = vmatmul.msk.f32.vlgmr.msrb.gmra.mxu1 %vm7648_vm2, %v11871_v58  ;;  %v11899_v58 = vld [vmem:[%s19072_s4 + $0x240] sm:$0xff] }
 0x704   :  { %11936 = vmatpush.msk.msrb.mxu1 %vm7661_vm1, %v9818_v36 }
 0x705   :  { %11877 = vmatmul.msk.f32.gmra.mxu0 %vm7648_vm2, %v11872_v63  ;;  %11891 = vmatmul.msk.f32.gmra.mxu2 %vm7648_vm2, %v11886_v37 }
 0x706   :  { %9880 = vmatpush.msrb.mxu1 %v9817_v20  ;;  %11896 = vmatmul.msk.f32.gmra.mxu3 %vm7648_vm2, %v11886_v37 }
 0x707   :  { %v8555_v3 = vpop.f32.mrf.mxu1  ;;  %v8637_v23 = vpop.f32.mrf.mxu2 }
 0x708   :  { %v12301_v62 = vpop.permute.xlu0 %12300  ;;  %v8567_v9 = vadd.f32 %v8555_v3, %v18238_v44  ;;  %v18334_v26 = vadd.f32 %v8637_v23, %v8566_v56  ;;  %v8666_v49 = vpop.f32.mrf.mxu3 }
 0x709   :  { %v12303_v41 = vunpack.i.h.bf16 %v12301_v62  ;;  %v12302_v13 = vunpack.i.l.bf16 %v12301_v62  ;;  %v8529_v21 = vpop.f32.mrf.mxu0  ;;  %v12311_v57 = vpop.permute.xlu1 %12310 }
 0x70a   :  { %v18336_v47 = vadd.f32 %v8666_v49, %v8567_v9  ;;  %v8568_v46 = vadd.f32 %v8529_v21, %v18256_v60  ;;  %v11888_v60 = vld [vmem:[%s19072_s4 + $0x238] sm:$0xff]  ;;  %v10136_v19 = vpop.permute.xlu2 %10135  ;;  %v12313_v40 = vunpack.i.h.bf16 %v12311_v57  ;;  %v12312_v39 = vunpack.i.l.bf16 %v12311_v57 }
 0x70b   :  { %11882 = vmatmul.msk.f32.gmra.mxu1 %vm7648_vm2, %v11872_v63  ;;  %v9916_v44 = vsel %vm9915_vm3, %v12302_v13, %v12303_v41  ;;  %v9928_v0 = vsel %vm9927_vm4, %v12303_v41, %v18249_v27  ;;  %vm10137_vm4 = vcmask 564224   ;;  %vm10026_vm3 = vcmask 572416   ;;  %v11901_v41 = vld [vmem:[%s19072_s4 + $0x250] sm:$0xff] }
 0x70c   :  { %9962 = vmatpush.msrb.mxu2 %v9916_v44  ;;  %9991 = vmatpush.msra.mxu3 %v9928_v0  ;;  %v10139_v6 = vsel %vm10137_vm4, %v10134_v38, %v10136_v19  ;;  %v10138_v1 = vsel %vm10137_vm4, %v12312_v39, %v12313_v40 }
 0x70d   :  { %11878 = vmatmul.msk.f32.gmra.mxu0 %vm7648_vm2, %v11873_v5  ;;  %11892 = vmatmul.msk.f32.gmra.mxu2 %vm7648_vm2, %v11887_v7 }
 0x70e   :  { %11897 = vmatmul.msk.f32.gmra.mxu3 %vm7648_vm2, %v11887_v7 }
 0x70f   :  { %v8558_v24 = vpop.f32.mrf.mxu1  ;;  %v8640_v43 = vpop.f32.mrf.mxu2 }
 0x710   :  { %v8569_v12 = vadd.f32 %v8558_v24, %v18262_v45  ;;  %v18355_v2 = vadd.f32 %v8640_v43, %v8568_v46  ;;  %v8669_v27 = vpop.f32.mrf.mxu3  ;;  %v11902_v24 = vld [vmem:[%s19072_s4 + $0x258] sm:$0xff] }
 0x711   :  { %v10025_v61 = vpop.permute.xlu0 %10024 }
 0x712   :  { %v8532_v52 = vpop.f32.mrf.mxu0  ;;  %v18357_v50 = vadd.f32 %v8669_v27, %v8569_v12  ;;  %v10028_v30 = vsel %vm10026_vm3, %v18293_v14, %v10025_v61  ;;  %v10040_v37 = vsel %vm10038_vm15, %v10025_v61, %v18322_v51  ;;  %v11916_v12 = vld [vmem:[%s19072_s4 + $0x278] sm:$0xff] }
 0x713   :  { %11883 = vmatmul.msk.f32.gmra.mxu1 %vm7648_vm2, %v11873_v5  ;;  %v8570_v45 = vadd.f32 %v8532_v52, %v18280_v54  ;;  %v11913_v54 = vld [vmem:[%s19072_s4 + $0x260] sm:$0xff] }
 0x715   :  { %11879 = vmatmul.msk.f32.gmra.mxu0 %vm7648_vm2, %v11874_v4  ;;  %11893 = vmatmul.msk.f32.gmra.mxu2 %vm7648_vm2, %v11888_v60 }
 0x716   :  { %11898 = vmatmul.msk.f32.gmra.mxu3 %vm7648_vm2, %v11888_v60 }
 0x717   :  { %v8561_v35 = vpop.f32.mrf.mxu1 }
 0x718   :  { %v8571_v34 = vadd.f32 %v8561_v35, %v18282_v42  ;;  %v8643_v11 = vpop.f32.mrf.mxu2  ;;  %v12307_v42 = vunpack.i.l.bf16 %v18329_v15  ;;  %v10150_v15 = vsel %vm10149_vm6, %v12313_v40, %v18352_v48  ;;  %v11927_v35 = vld [vmem:[%s19072_s4 + $0x280] sm:$0xff] }
 0x719   :  { %v10033_v22 = vpop.permute.xlu0 %10032  ;;  %v18371_v29 = vadd.f32 %v8643_v11, %v8570_v45  ;;  %v8672_v28 = vpop.f32.mrf.mxu3 }
 0x71a   :  { %v18373_v16 = vadd.f32 %v8672_v28, %v8571_v34  ;;  %v8745_v10 = vpop.f32.mrf.mxu0  ;;  %v10027_v55 = vsel %vm10026_vm3, %v12307_v42, %v12308_v25  ;;  %v10039_v51 = vsel %vm10038_vm15, %v12308_v25, %v10033_v22  ;;  %v10247_v45 = vpop.permute.xlu1 %10246  ;;  %vm10248_vm15 = vcmask 556032   ;;  %v11928_v42 = vld [vmem:[%s19072_s4 + $0x288] sm:$0xff] }
 0x71b   :  { %11884 = vmatmul.msk.f32.gmra.mxu1 %vm7648_vm2, %v11874_v4  ;;  %v8786_v32 = vadd.f32 %v8745_v10, %v18307_v59  ;;  %v11900_v59 = vld [vmem:[%s19072_s4 + $0x248] sm:$0xff]  ;;  %v10257_v25 = vpop.permute.xlu2 %10256  ;;  %vm19468_vm3 = vcmask 1022976  }
 0x71c   :  { %v11942_v10 = vld [vmem:[%s19072_s4 + $0x2a8] sm:$0xff] }
 0x71d   :  { %11904 = vmatmul.msk.f32.vlgmr.msra.gmra.mxu0 %vm7648_vm2, %v11899_v58  ;;  %11918 = vmatmul.msk.f32.vlgmr.msra.gmra.mxu2 %vm7648_vm2, %v11913_v54 }
 0x71e   :  { %11959 = vmatpush.msk.msra.mxu0 %vm7661_vm1, %v10028_v30  ;;  %11973 = vmatpush.msk.msra.mxu2 %vm7661_vm1, %v10139_v6 }
 0x71f   :  { %11923 = vmatmul.msk.f32.vlgmr.msrb.gmra.mxu3 %vm7648_vm2, %v11913_v54 }
 0x720   :  { %10073 = vmatpush.msra.mxu0 %v10027_v55  ;;  %10184 = vmatpush.msra.mxu2 %v10138_v1  ;;  %v8774_v33 = vpop.f32.mrf.mxu1  ;;  %v8856_v14 = vpop.f32.mrf.mxu2 }
 0x721   :  { %v10146_v53 = vpop.permute.xlu0 %10145  ;;  %v8787_v17 = vadd.f32 %v8774_v33, %v18310_v8  ;;  %v18394_v18 = vadd.f32 %v8856_v14, %v8786_v32  ;;  %v8885_v31 = vpop.f32.mrf.mxu3  ;;  %v11914_v8 = vld [vmem:[%s19072_s4 + $0x268] sm:$0xff]  ;;  %v11929_v33 = vld [vmem:[%s19072_s4 + $0x290] sm:$0xff] }
 0x722   :  { %v10151_v63 = vsel %vm10149_vm6, %v10136_v19, %v10146_v53  ;;  %v8748_v36 = vpop.f32.mrf.mxu0  ;;  %vm10260_vm6 = vcmask 64512   ;;  %v10255_v6 = vpop.permute.xlu1 %10254  ;;  %v11943_v53 = vld [vmem:[%s19072_s4 + $0x2b0] sm:$0xff] }
 0x723   :  { %v18401_v20 = vadd.f32 %v8885_v31, %v8787_v17  ;;  %11978 = vmatpush.msk.msrb.mxu3 %vm7661_vm1, %v10151_v63  ;;  %11909 = vmatmul.msk.f32.vlgmr.msra.gmra.mxu1 %vm7648_vm2, %v11899_v58  ;;  %v8788_v56 = vadd.f32 %v8748_v36, %v18334_v26  ;;  %v11915_v26 = vld [vmem:[%s19072_s4 + $0x270] sm:$0xff]  ;;  %v10262_v40 = vsel %vm10260_vm6, %v10247_v45, %v10257_v25  ;;  %v11944_v36 = vld [vmem:[%s19072_s4 + $0x2b8] sm:$0xff] }
 0x724   :  { %11964 = vmatpush.msk.msra.mxu1 %vm7661_vm1, %v10040_v37  ;;  %v11958_v25 = vld [vmem:[%s19072_s4 + $0x2d8] sm:$0xff] }
 0x725   :  { %10213 = vmatpush.msrb.mxu3 %v10150_v15  ;;  %11905 = vmatmul.msk.f32.gmra.mxu0 %vm7648_vm2, %v11900_v59 }
 0x726   :  { %11919 = vmatmul.msk.f32.gmra.mxu2 %vm7648_vm2, %v11914_v8  ;;  %10102 = vmatpush.msra.mxu1 %v10039_v51 }
 0x727   :  { %11924 = vmatmul.msk.f32.gmra.mxu3 %vm7648_vm2, %v11914_v8 }
 0x728   :  { %v8777_v3 = vpop.f32.mrf.mxu1  ;;  %v8859_v23 = vpop.f32.mrf.mxu2 }
 0x729   :  { %v8789_v62 = vadd.f32 %v8777_v3, %v18336_v47  ;;  %v18416_v9 = vadd.f32 %v8859_v23, %v8788_v56  ;;  %v8888_v49 = vpop.f32.mrf.mxu3  ;;  %v10245_v5 = vpop.permute.xlu0 %10244  ;;  %v11955_v56 = vld [vmem:[%s19072_s4 + $0x2c0] sm:$0xff] }
 0x72a   :  { %v8751_v13 = vpop.f32.mrf.mxu0  ;;  %v10250_v28 = vsel %vm10248_vm15, %v10245_v5, %v10247_v45  ;;  %v11969_v23 = vld [vmem:[%s19072_s4 + $0x2e0] sm:$0xff] }
 0x72b   :  { %v18421_v21 = vadd.f32 %v8888_v49, %v8789_v62  ;;  %11910 = vmatmul.msk.f32.gmra.mxu1 %vm7648_vm2, %v11900_v59  ;;  %v8790_v47 = vadd.f32 %v8751_v13, %v18355_v2  ;;  %v11930_v59 = vld [vmem:[%s19072_s4 + $0x298] sm:$0xff]  ;;  %v11956_v13 = vld [vmem:[%s19072_s4 + $0x2c8] sm:$0xff] }
 0x72d   :  { %11906 = vmatmul.msk.f32.gmra.mxu0 %vm7648_vm2, %v11901_v41 }
 0x72e   :  { %11920 = vmatmul.msk.f32.gmra.mxu2 %vm7648_vm2, %v11915_v26 }
 0x72f   :  { %11925 = vmatmul.msk.f32.gmra.mxu3 %vm7648_vm2, %v11915_v26 }
 0x730   :  { %v8780_v7 = vpop.f32.mrf.mxu1  ;;  %v8862_v44 = vpop.f32.mrf.mxu2 }
 0x731   :  { %v8791_v0 = vadd.f32 %v8780_v7, %v18357_v50  ;;  %v18432_v38 = vadd.f32 %v8862_v44, %v8790_v47  ;;  %v8891_v46 = vpop.f32.mrf.mxu3  ;;  %v12316_v2 = vpop.permute.xlu0 %12315  ;;  %v11970_v7 = vld [vmem:[%s19072_s4 + $0x2e8] sm:$0xff] }
 0x732   :  { %v8754_v43 = vpop.f32.mrf.mxu0  ;;  %v12318_v57 = vunpack.i.h.bf16 %v12316_v2  ;;  %v12317_v34 = vunpack.i.l.bf16 %v12316_v2 }
 0x733   :  { %v18437_v48 = vadd.f32 %v8891_v46, %v8791_v0  ;;  %11911 = vmatmul.msk.f32.gmra.mxu1 %vm7648_vm2, %v11901_v41  ;;  %v8792_v27 = vadd.f32 %v8754_v43, %v18371_v29  ;;  %v11941_v29 = vld [vmem:[%s19072_s4 + $0x2a0] sm:$0xff] }
 0x734   :  { %v10249_v19 = vsel %vm10248_vm15, %v12317_v34, %v12318_v57  ;;  %v10261_v30 = vsel %vm10260_vm6, %v12318_v57, %v10255_v6 }
 0x735   :  { %11907 = vmatmul.msk.f32.gmra.mxu0 %vm7648_vm2, %v11902_v24 }
 0x736   :  { %11921 = vmatmul.msk.f32.gmra.mxu2 %vm7648_vm2, %v11916_v12 }
 0x737   :  { %11926 = vmatmul.msk.f32.gmra.mxu3 %vm7648_vm2, %v11916_v12 }
 0x738   :  { %v8783_v61 = vpop.f32.mrf.mxu1  ;;  %v8865_v52 = vpop.f32.mrf.mxu2 }
 0x739   :  { %v8793_v50 = vadd.f32 %v8783_v61, %v18373_v16  ;;  %v18448_v4 = vadd.f32 %v8865_v52, %v8792_v27  ;;  %v8894_v60 = vpop.f32.mrf.mxu3  ;;  %v11957_v61 = vld [vmem:[%s19072_s4 + $0x2d0] sm:$0xff] }
 0x73a   :  { %v18455_v22 = vpop.f32.mrf.mxu0 }
 0x73b   :  { %v18453_v11 = vadd.f32 %v8894_v60, %v8793_v50  ;;  %11912 = vmatmul.msk.f32.gmra.mxu1 %vm7648_vm2, %v11902_v24  ;;  %v11971_v60 = vld [vmem:[%s19072_s4 + $0x2f0] sm:$0xff] }
 0x73d   :  { %11932 = vmatmul.msk.f32.vlgmr.msrb.gmra.mxu0 %vm7648_vm2, %v11927_v35 }
 0x73e   :  { %11946 = vmatmul.msk.f32.vlgmr.msrb.gmra.mxu2 %vm7648_vm2, %v11941_v29  ;;  %11987 = vmatpush.msk.msrb.mxu0 %vm7661_vm1, %v10250_v28 }
 0x73f   :  { %11951 = vmatmul.msk.f32.vlgmr.msra.gmra.mxu3 %vm7648_vm2, %v11941_v29 }
 0x740   :  { %10295 = vmatpush.msrb.mxu0 %v10249_v19  ;;  %v18467_v16 = vpop.f32.mrf.mxu1  ;;  %v18469_v58 = vpop.f32.mrf.mxu2 }
 0x741   :  { %v18471_v54 = vpop.f32.mrf.mxu3 }
 0x742   :  { %v8970_v39 = vpop.f32.mrf.mxu0 }
 0x743   :  { %11937 = vmatmul.msk.f32.vlgmr.msrb.gmra.mxu1 %vm7648_vm2, %v11927_v35  ;;  %v9010_v26 = vadd.f32 %v8970_v39, %v18416_v9 }
 0x744   :  { %11992 = vmatpush.msk.msrb.mxu1 %vm7661_vm1, %v10262_v40 }
 0x745   :  { %11933 = vmatmul.msk.f32.gmra.mxu0 %vm7648_vm2, %v11928_v42 }
 0x746   :  { %11947 = vmatmul.msk.f32.gmra.mxu2 %vm7648_vm2, %v11942_v10  ;;  %10324 = vmatpush.msrb.mxu1 %v10261_v30  ;;  %v9009_v30 = vadd.f32 %v18467_v16, %v18401_v20  ;;  %v11983_v20 = vld [vmem:[%s19072_s4 + $0x300] sm:$0xff] }
 0x747   :  { %11952 = vmatmul.msk.f32.gmra.mxu3 %vm7648_vm2, %v11942_v10  ;;  %v9008_v10 = vadd.f32 %v18455_v22, %v18394_v18 }
 0x748   :  { %v8999_v32 = vpop.f32.mrf.mxu1  ;;  %v9081_v55 = vpop.f32.mrf.mxu2 }
 0x749   :  { %v9110_v1 = vpop.f32.mrf.mxu3  ;;  %v9011_v5 = vadd.f32 %v8999_v32, %v18421_v21  ;;  %v9121_v44 = vadd.f32 %v9081_v55, %v9010_v26  ;;  %v9119_v32 = vadd.f32 %v18469_v58, %v9008_v10 }
 0x74a   :  { %v8973_v14 = vpop.f32.mrf.mxu0 }
 0x74b   :  { %11938 = vmatmul.msk.f32.gmra.mxu1 %vm7648_vm2, %v11928_v42  ;;  %v9122_v0 = vadd.f32 %v9110_v1, %v9011_v5  ;;  %v9012_v9 = vadd.f32 %v8973_v14, %v18432_v38  ;;  %v9120_v14 = vadd.f32 %v18471_v54, %v9009_v30 }
 0x74d   :  { %11934 = vmatmul.msk.f32.gmra.mxu0 %vm7648_vm2, %v11929_v33 }
 0x74e   :  { %11948 = vmatmul.msk.f32.gmra.mxu2 %vm7648_vm2, %v11943_v53 }
 0x74f   :  { %11953 = vmatmul.msk.f32.gmra.mxu3 %vm7648_vm2, %v11943_v53 }
 0x750   :  { %v9002_v17 = vpop.f32.mrf.mxu1  ;;  %v9084_v31 = vpop.f32.mrf.mxu2 }
 0x751   :  { %v9113_v63 = vpop.f32.mrf.mxu3  ;;  %v9123_v27 = vadd.f32 %v9084_v31, %v9012_v9  ;;  %v9013_v52 = vadd.f32 %v9002_v17, %v18437_v48 }
 0x752   :  { %v8976_v37 = vpop.f32.mrf.mxu0 }
 0x753   :  { %11939 = vmatmul.msk.f32.gmra.mxu1 %vm7648_vm2, %v11929_v33  ;;  %v9124_v45 = vadd.f32 %v9113_v63, %v9013_v52  ;;  %v9014_v35 = vadd.f32 %v8976_v37, %v18448_v4  ;;  %v11972_v4 = vld [vmem:[%s19072_s4 + $0x2f8] sm:$0xff] }
 0x755   :  { %11935 = vmatmul.msk.f32.gmra.mxu0 %vm7648_vm2, %v11930_v59 }
 0x756   :  { %11949 = vmatmul.msk.f32.gmra.mxu2 %vm7648_vm2, %v11944_v36 }
 0x757   :  { %11954 = vmatmul.msk.f32.gmra.mxu3 %vm7648_vm2, %v11944_v36 }
 0x758   :  { %v9005_v8 = vpop.f32.mrf.mxu1  ;;  %v9087_v15 = vpop.f32.mrf.mxu2 }
 0x759   :  { %v9116_v51 = vpop.f32.mrf.mxu3  ;;  %v9125_v19 = vadd.f32 %v9087_v15, %v9014_v35  ;;  %v9015_v42 = vadd.f32 %v9005_v8, %v18453_v11 }
 0x75a   :  { %v9188_v3 = vpop.f32.mrf.mxu0 }
 0x75b   :  { %11940 = vmatmul.msk.f32.gmra.mxu1 %vm7648_vm2, %v11930_v59  ;;  %v9126_v11 = vadd.f32 %v9116_v51, %v9015_v42  ;;  %v9229_v55 = vadd.f32 %v9188_v3, %v9119_v32  ;;  %v11984_v51 = vld [vmem:[%s19072_s4 + $0x308] sm:$0xff] }
 0x75d   :  { %11960 = vmatmul.msk.f32.vlgmr.msra.gmra.mxu0 %vm7648_vm2, %v11955_v56 }
 0x75e   :  { %11974 = vmatmul.msk.f32.vlgmr.msra.gmra.mxu2 %vm7648_vm2, %v11969_v23 }
 0x75f   :  { %11979 = vmatmul.msk.f32.vlgmr.msrb.gmra.mxu3 %vm7648_vm2, %v11969_v23 }
 0x760   :  { %v9217_v62 = vpop.f32.mrf.mxu1  ;;  %v9299_v49 = vpop.f32.mrf.mxu2 }
 0x761   :  { %v18514_v41 = vpop.f32.mrf.mxu3  ;;  %v9340_v17 = vadd.f32 %v9299_v49, %v9229_v55  ;;  %v9230_v16 = vadd.f32 %v9217_v62, %v9120_v14 }
 0x762   :  { %v9191_v47 = vpop.f32.mrf.mxu0 }
 0x763   :  { %11965 = vmatmul.msk.f32.vlgmr.msra.gmra.mxu1 %vm7648_vm2, %v11955_v56  ;;  %v9231_v46 = vadd.f32 %v9191_v47, %v9121_v44  ;;  %v9341_v59 = vadd.f32 %v18514_v41, %v9230_v16  ;;  %v11985_v47 = vld [vmem:[%s19072_s4 + $0x310] sm:$0xff] }
 0x765   :  { %11961 = vmatmul.msk.f32.gmra.mxu0 %vm7648_vm2, %v11956_v13 }
 0x766   :  { %11975 = vmatmul.msk.f32.gmra.mxu2 %vm7648_vm2, %v11970_v7 }
 0x767   :  { %11980 = vmatmul.msk.f32.gmra.mxu3 %vm7648_vm2, %v11970_v7 }
 0x768   :  { %v9220_v24 = vpop.f32.mrf.mxu1  ;;  %v9302_v21 = vpop.f32.mrf.mxu2 }
 0x769   :  { %v9232_v43 = vadd.f32 %v9220_v24, %v9122_v0  ;;  %v9342_v12 = vadd.f32 %v9302_v21, %v9231_v46  ;;  %v9331_v2 = vpop.f32.mrf.mxu3 }
 0x76a   :  { %v9194_v50 = vpop.f32.mrf.mxu0 }
 0x76b   :  { %11966 = vmatmul.msk.f32.gmra.mxu1 %vm7648_vm2, %v11956_v13  ;;  %v9233_v38 = vadd.f32 %v9194_v50, %v9123_v27  ;;  %v9343_v62 = vadd.f32 %v9331_v2, %v9232_v43 }
 0x76d   :  { %11962 = vmatmul.msk.f32.gmra.mxu0 %vm7648_vm2, %v11957_v61 }
 0x76e   :  { %11976 = vmatmul.msk.f32.gmra.mxu2 %vm7648_vm2, %v11971_v60 }
 0x76f   :  { %11981 = vmatmul.msk.f32.gmra.mxu3 %vm7648_vm2, %v11971_v60 }
 0x770   :  { %v9223_v57 = vpop.f32.mrf.mxu1  ;;  %v9305_v34 = vpop.f32.mrf.mxu2 }
 0x771   :  { %v9234_v48 = vadd.f32 %v9223_v57, %v9124_v45  ;;  %v9344_v29 = vadd.f32 %v9305_v34, %v9233_v38  ;;  %v9334_v28 = vpop.f32.mrf.mxu3 }
 0x772   :  { %v9197_v40 = vpop.f32.mrf.mxu0 }
 0x773   :  { %v9345_v39 = vadd.f32 %v9334_v28, %v9234_v48  ;;  %11967 = vmatmul.msk.f32.gmra.mxu1 %vm7648_vm2, %v11957_v61  ;;  %v9235_v6 = vadd.f32 %v9197_v40, %v9125_v19 }
 0x775   :  { %11963 = vmatmul.msk.f32.gmra.mxu0 %vm7648_vm2, %v11958_v25 }
 0x776   :  { %11977 = vmatmul.msk.f32.gmra.mxu2 %vm7648_vm2, %v11972_v4 }
 0x777   :  { %11982 = vmatmul.msk.f32.gmra.mxu3 %vm7648_vm2, %v11972_v4 }
 0x778   :  { %v9226_v1 = vpop.f32.mrf.mxu1  ;;  %v9308_v33 = vpop.f32.mrf.mxu2 }
 0x779   :  { %v9236_v53 = vadd.f32 %v9226_v1, %v9126_v11  ;;  %v9346_v18 = vadd.f32 %v9308_v33, %v9235_v6  ;;  %v9337_v22 = vpop.f32.mrf.mxu3 }
 0x77a   :  { %v9410_v31 = vpop.f32.mrf.mxu0 }
 0x77b   :  { %v9347_v58 = vadd.f32 %v9337_v22, %v9236_v53  ;;  %11968 = vmatmul.msk.f32.gmra.mxu1 %vm7648_vm2, %v11958_v25  ;;  %v9451_v63 = vadd.f32 %v9410_v31, %v9340_v17 }
 0x77d   :  { %11988 = vmatmul.msk.f32.vlgmr.msrb.gmra.mxu0 %vm7648_vm2, %v11983_v20 }
 0x780   :  { %v9439_v37 = vpop.f32.mrf.mxu1  ;;  %v9521_v54 = vpop.f32.mrf.mxu2 }
 0x781   :  { %v9452_v36 = vadd.f32 %v9439_v37, %v9341_v59  ;;  %v9562_v8 = vadd.f32 %v9521_v54, %v9451_v63  ;;  %v9550_v15 = vpop.f32.mrf.mxu3 }
 0x782   :  { %v9413_v56 = vpop.f32.mrf.mxu0 }
 0x783   :  { %v9563_v3 = vadd.f32 %v9550_v15, %v9452_v36  ;;  %11993 = vmatmul.msk.f32.vlgmr.msrb.gmra.mxu1 %vm7648_vm2, %v11983_v20  ;;  %v9453_v23 = vadd.f32 %v9413_v56, %v9342_v12  ;;  %v11986_v12 = vld [vmem:[%s19072_s4 + $0x318] sm:$0xff] }
 0x785   :  { %11989 = vmatmul.msk.f32.gmra.mxu0 %vm7648_vm2, %v11984_v51 }
 0x788   :  { %v9442_v49 = vpop.f32.mrf.mxu1  ;;  %v9524_v13 = vpop.f32.mrf.mxu2 }
 0x789   :  { %v9454_v41 = vadd.f32 %v9442_v49, %v9343_v62  ;;  %v9564_v26 = vadd.f32 %v9524_v13, %v9453_v23  ;;  %v9553_v5 = vpop.f32.mrf.mxu3 }
 0x78a   :  { %v9416_v7 = vpop.f32.mrf.mxu0 }
 0x78b   :  { %v9565_v44 = vadd.f32 %v9553_v5, %v9454_v41  ;;  %11994 = vmatmul.msk.f32.gmra.mxu1 %vm7648_vm2, %v11984_v51  ;;  %v9455_v0 = vadd.f32 %v9416_v7, %v9344_v29 }
 0x78d   :  { %11990 = vmatmul.msk.f32.gmra.mxu0 %vm7648_vm2, %v11985_v47 }
 0x790   :  { %v9445_v46 = vpop.f32.mrf.mxu1  ;;  %v9527_v9 = vpop.f32.mrf.mxu2 }
 0x791   :  { %v9456_v24 = vadd.f32 %v9445_v46, %v9345_v39  ;;  %v9566_v21 = vadd.f32 %v9527_v9, %v9455_v0  ;;  %v9556_v43 = vpop.f32.mrf.mxu3 }
 0x792   :  { %v9419_v2 = vpop.f32.mrf.mxu0 }
 0x793   :  { %v9567_v27 = vadd.f32 %v9556_v43, %v9456_v24  ;;  %11995 = vmatmul.msk.f32.gmra.mxu1 %vm7648_vm2, %v11985_v47  ;;  %v9457_v61 = vadd.f32 %v9419_v2, %v9346_v18 }
 0x795   :  { %11991 = vmatmul.msk.f32.gmra.mxu0 %vm7648_vm2, %v11986_v12 }
 0x798   :  { %v9448_v52 = vpop.f32.mrf.mxu1  ;;  %v9530_v50 = vpop.f32.mrf.mxu2 }
 0x799   :  { %v9458_v60 = vadd.f32 %v9448_v52, %v9347_v58  ;;  %v9568_v38 = vadd.f32 %v9530_v50, %v9457_v61  ;;  %v9559_v45 = vpop.f32.mrf.mxu3 }
 0x79a   :  { %v9632_v57 = vpop.f32.mrf.mxu0 }
 0x79b   :  { %v9569_v35 = vadd.f32 %v9559_v45, %v9458_v60  ;;  %11996 = vmatmul.msk.f32.gmra.mxu1 %vm7648_vm2, %v11986_v12  ;;  %v9673_v34 = vadd.f32 %v9632_v57, %v9562_v8  ;;  %vm10752_vm2 = vcmask 998400  }
 0x7a0   :  { %v9661_v48 = vpop.f32.mrf.mxu1  ;;  %v9743_v29 = vpop.f32.mrf.mxu2 }
 0x7a1   :  { %v9674_v28 = vadd.f32 %v9661_v48, %v9563_v3  ;;  %v9784_v2 = vadd.f32 %v9743_v29, %v9673_v34  ;;  %v10353_v29 = vpop.permute.xlu2 %10352 }
 0x7a2   :  { %v9772_v19 = vpop.f32.mrf.mxu3  ;;  %v9635_v25 = vpop.f32.mrf.mxu0 }
 0x7a3   :  { %v9675_v42 = vadd.f32 %v9635_v25, %v9564_v26  ;;  %v9785_v61 = vadd.f32 %v9772_v19, %v9674_v28  ;;  %v10385_v19 = vpop.permute.xlu0 %10384 }
 0x7a8   :  { %v9664_v40 = vpop.f32.mrf.mxu1 }
 0x7a9   :  { %v9676_v39 = vadd.f32 %v9664_v40, %v9565_v44  ;;  %v9746_v4 = vpop.f32.mrf.mxu2 }
 0x7aa   :  { %v9775_v10 = vpop.f32.mrf.mxu3  ;;  %v9638_v6 = vpop.f32.mrf.mxu0  ;;  %v9786_v25 = vadd.f32 %v9746_v4, %v9675_v42 }
 0x7ab   :  { %v9787_v30 = vadd.f32 %v9775_v10, %v9676_v39  ;;  %v9677_v32 = vadd.f32 %v9638_v6, %v9566_v21 }
 0x7b0   :  { %v9667_v11 = vpop.f32.mrf.mxu1 }
 0x7b1   :  { %v9678_v55 = vadd.f32 %v9667_v11, %v9567_v27  ;;  %v9749_v1 = vpop.f32.mrf.mxu2 }
 0x7b2   :  { %v9788_v33 = vadd.f32 %v9749_v1, %v9677_v32  ;;  %v9778_v14 = vpop.f32.mrf.mxu3  ;;  %v9641_v53 = vpop.f32.mrf.mxu0 }
 0x7b3   :  { %v9789_v18 = vadd.f32 %v9778_v14, %v9678_v55  ;;  %v9679_v22 = vadd.f32 %v9641_v53, %v9568_v38 }
 0x7b8   :  { %v9670_v17 = vpop.f32.mrf.mxu1 }
 0x7b9   :  { %v9680_v20 = vadd.f32 %v9670_v17, %v9569_v35  ;;  %v9752_v16 = vpop.f32.mrf.mxu2 }
 0x7ba   :  { %v9790_v58 = vadd.f32 %v9752_v16, %v9679_v22  ;;  %v9781_v31 = vpop.f32.mrf.mxu3  ;;  %v9853_v59 = vpop.f32.mrf.mxu0 }
 0x7bb   :  { %v9791_v63 = vadd.f32 %v9781_v31, %v9680_v20  ;;  %v9894_v50 = vadd.f32 %v9853_v59, %v9784_v2  ;;  %v10358_v20 = vpop.permute.xlu1 %10357 }
 0x7c0   :  { %v9882_v37 = vpop.f32.mrf.mxu1 }
 0x7c1   :  { %v9964_v56 = vpop.f32.mrf.mxu2  ;;  %v9895_v60 = vadd.f32 %v9882_v37, %v9785_v61 }
 0x7c2   :  { %v9856_v54 = vpop.f32.mrf.mxu0  ;;  %v9993_v49 = vpop.f32.mrf.mxu3  ;;  %v10005_v45 = vadd.f32 %v9964_v56, %v9894_v50 }
 0x7c3   :  { %v10006_v48 = vadd.f32 %v9993_v49, %v9895_v60  ;;  %v9896_v6 = vadd.f32 %v9856_v54, %v9786_v25 }
 0x7c8   :  { %v9885_v36 = vpop.f32.mrf.mxu1 }
 0x7c9   :  { %v9897_v8 = vadd.f32 %v9885_v36, %v9787_v30  ;;  %v9967_v41 = vpop.f32.mrf.mxu2 }
 0x7ca   :  { %v9859_v15 = vpop.f32.mrf.mxu0  ;;  %v9996_v7 = vpop.f32.mrf.mxu3  ;;  %v10007_v32 = vadd.f32 %v9967_v41, %v9896_v6 }
 0x7cb   :  { %v18580_v51 = vadd.f32 %v9859_v15, %v9788_v33 }
 0x7d0   :  { %v9888_v3 = vpop.f32.mrf.mxu1 }
 0x7d1   :  { %v18582_v23 = vadd.f32 %v9888_v3, %v9789_v18  ;;  %v18588_v0 = vpop.f32.mrf.mxu2 }
 0x7d2   :  { %v9862_v62 = vpop.f32.mrf.mxu0  ;;  %v18590_v9 = vpop.f32.mrf.mxu3 }
 0x7d3   :  { %v18584_v13 = vadd.f32 %v9862_v62, %v9790_v58  ;;  %v10008_v58 = vadd.f32 %v9996_v7, %v9897_v8  ;;  %v10009_v7 = vadd.f32 %v18588_v0, %v18580_v51 }
 0x7d8   :  { %v9891_v26 = vpop.f32.mrf.mxu1 }
 0x7d9   :  { %v18586_v5 = vadd.f32 %v9891_v26, %v9791_v63  ;;  %v18592_v21 = vpop.f32.mrf.mxu2  ;;  %v10390_v63 = vpop.permute.xlu2 %10389 }
 0x7da   :  { %v10075_v47 = vpop.f32.mrf.mxu0  ;;  %v18596_v27 = vpop.f32.mrf.mxu3  ;;  %v10011_v50 = vadd.f32 %v18592_v21, %v18584_v13 }
 0x7db   :  { %v10116_v35 = vadd.f32 %v10075_v47, %v10005_v45  ;;  %v10363_v45 = vpop.permute.xlu0 %10362  ;;  %v10395_v13 = vpop.permute.xlu1 %10394 }
 0x7e0   :  { %v10104_v44 = vpop.f32.mrf.mxu1 }
 0x7e1   :  { %v10186_v38 = vpop.f32.mrf.mxu2  ;;  %v10117_v39 = vadd.f32 %v10104_v44, %v10006_v48 }
 0x7e2   :  { %v10078_v46 = vpop.f32.mrf.mxu0  ;;  %v10227_v40 = vadd.f32 %v10186_v38, %v10116_v35  ;;  %v10215_v30 = vpop.f32.mrf.mxu3 }
 0x7e3   :  { %v10228_v11 = vadd.f32 %v10215_v30, %v10117_v39  ;;  %v10118_v1 = vadd.f32 %v10078_v46, %v10007_v32  ;;  %v10400_v6 = vpop.permute.xlu0 %10399 }
 0x7e8   :  { %v10107_v24 = vpop.f32.mrf.mxu1 }
 0x7e9   :  { %v10189_v55 = vpop.f32.mrf.mxu2  ;;  %v10119_v37 = vadd.f32 %v10107_v24, %v10008_v58  ;;  %v10010_v24 = vadd.f32 %v18590_v9, %v18582_v23  ;;  %v10593_v58 = vld [vmem:[%s19076_s8 + $0x58] sm:$0xff] }
 0x7ea   :  { %v10081_v43 = vpop.f32.mrf.mxu0  ;;  %v10229_v18 = vadd.f32 %v10189_v55, %v10118_v1  ;;  %v10218_v36 = vpop.f32.mrf.mxu3 }
 0x7eb   :  { %v10230_v3 = vadd.f32 %v10218_v36, %v10119_v37  ;;  %v10120_v44 = vadd.f32 %v10081_v43, %v10009_v7  ;;  %v10602_v37 = vld [vmem:[%s19076_s8 + $0xa0] sm:$0xff]  ;;  %v10591_v36 = vld [vmem:[%s19076_s8 + $0x48] sm:$0xff] }
 0x7f0   :  { %v18594_v12 = vpop.f32.mrf.mxu1 }
 0x7f1   :  { %v10192_v41 = vpop.f32.mrf.mxu2  ;;  %v10121_v61 = vadd.f32 %v18594_v12, %v10010_v24  ;;  %v10585_v24 = vld [vmem:[%s19076_s8 + $0x18] sm:$0xff] }
 0x7f2   :  { %v18598_v52 = vpop.f32.mrf.mxu0  ;;  %v10231_v2 = vadd.f32 %v10192_v41, %v10120_v44  ;;  %v10221_v60 = vpop.f32.mrf.mxu3  ;;  %v10588_v41 = vld [vmem:[%s19076_s8 + $0x30] sm:$0xff]  ;;  %v10586_v44 = vld [vmem:[%s19076_s8 + $0x20] sm:$0xff] }
 0x7f3   :  { %v10122_v43 = vadd.f32 %v18598_v52, %v10011_v50  ;;  %v10232_v35 = vadd.f32 %v10221_v60, %v10121_v61  ;;  %v10368_v52 = vpop.permute.xlu2 %10367  ;;  %v10584_v61 = vld [vmem:[%s19076_s8 + $0x10] sm:$0xff]  ;;  %v10583_v50 = vld [vmem:[%s19076_s8 + $0x8] sm:$0xff]  ;;  %v10582_v60 = vld [vmem:[%s19076_s8] sm:$0xff] }
 0x7f8   :  { %v18600_v57 = vpop.f32.mrf.mxu1 }
 0x7f9   :  { %v10195_v0 = vpop.f32.mrf.mxu2 }
 0x7fa   :  { %v10297_v10 = vpop.f32.mrf.mxu0  ;;  %v10233_v9 = vadd.f32 %v10195_v0, %v10122_v43 }
 0x7fb   :  { %v10338_v34 = vadd.f32 %v10297_v10, %v10227_v40 }
 0x7fd   :  { %v10370_v28 = vmul.f32 %v10353_v29, %v10338_v34 }
 0x7ff   :  { %v10402_v33 = vadd.f32 %v10385_v19, %v10370_v28 }
 0x800   :  { %v10326_v14 = vpop.f32.mrf.mxu1 }
 0x801   :  { %v10339_v53 = vadd.f32 %v10326_v14, %v10228_v11  ;;  %v18602_v22 = vmax.f32 %v10402_v33, 0.0  ;;  %v10224_v11 = vpop.f32.mrf.mxu3 }
 0x802   :  { %v10300_v4 = vpop.f32.mrf.mxu0 }
 0x803   :  { %v10371_v42 = vmul.f32 %v10353_v29, %v10339_v53  ;;  %v10340_v17 = vadd.f32 %v10300_v4, %v10229_v18  ;;  %10454 = vrot.lane.b32.xlu0 %v18602_v22, %s12398_s7  ;;  %v10012_v29 = vadd.f32 %v18596_v27, %v18586_v5  ;;  %v10597_v53 = vld [vmem:[%s19076_s8 + $0x78] sm:$0xff]  ;;  %v10596_v18 = vld [vmem:[%s19076_s8 + $0x70] sm:$0xff]  ;;  %v10595_v4 = vld [vmem:[%s19076_s8 + $0x68] sm:$0xff] }
 0x804   :  { %10622 = vmatpush.msrb.mxu2 %v10597_v53 }
 0x805   :  { %v10403_v16 = vadd.f32 %v10385_v19, %v10371_v42  ;;  %v10372_v31 = vmul.f32 %v10358_v20, %v10340_v17  ;;  %v10123_v28 = vadd.f32 %v18600_v57, %v10012_v29  ;;  %v10606_v42 = vld [vmem:[%s19076_s8 + $0xc0] sm:$0xf]  ;;  %v10605_v17 = vld [vmem:[%s19076_s8 + $0xb8] sm:$0xff] }
 0x806   :  { %11997 = vmatpush.msk.msra.mxu3 %vm7661_vm1, %v10606_v42  ;;  %10623 = vmatpush.msrb.mxu2 %v10596_v18 }
 0x807   :  { %v18606_v59 = vmax.f32 %v10403_v16, 0.0  ;;  %v10404_v54 = vadd.f32 %v10390_v63, %v10372_v31  ;;  %v10234_v1 = vadd.f32 %v10224_v11, %v10123_v28  ;;  %v10604_v16 = vld [vmem:[%s19076_s8 + $0xb0] sm:$0xff]  ;;  %v10603_v31 = vld [vmem:[%s19076_s8 + $0xa8] sm:$0xff] }
 0x808   :  { %v10329_v56 = vpop.f32.mrf.mxu1  ;;  %10659 = vmatpush.msra.mxu3 %v10605_v17  ;;  %10624 = vmatpush.msrb.mxu2 %v10595_v4 }
 0x809   :  { %10428 = vrot.lane.b32.xlu2 %v18606_v59, %s12378_s22  ;;  %v18610_v15 = vmax.f32 %v10404_v54, 0.0  ;;  %v10341_v62 = vadd.f32 %v10329_v56, %v10230_v3  ;;  %v10601_v56 = vld [vmem:[%s19076_s8 + $0x98] sm:$0xff]  ;;  %v10590_v3 = vld [vmem:[%s19076_s8 + $0x40] sm:$0xff] }
 0x80a   :  { %v10303_v47 = vpop.f32.mrf.mxu0  ;;  %10660 = vmatpush.msra.mxu3 %v10604_v16 }
 0x80b   :  { %10506 = vrot.lane.b32.xlu0 %v18602_v22, %s12403_s30  ;;  %v12319_v8 = vpack.i.bf16 %v18610_v15, %v18602_v22  ;;  %v10373_v49 = vmul.f32 %v10358_v20, %v10341_v62  ;;  %v10342_v51 = vadd.f32 %v10303_v47, %v10231_v2  ;;  %v10594_v20 = vld [vmem:[%s19076_s8 + $0x60] sm:$0xff]  ;;  %v10589_v62 = vld [vmem:[%s19076_s8 + $0x38] sm:$0xff]  ;;  %v10587_v47 = vld [vmem:[%s19076_s8 + $0x28] sm:$0xff] }
 0x80c   :  { %10625 = vmatpush.msrb.mxu2 %v10594_v20  ;;  %10661 = vmatpush.msra.mxu3 %v10603_v31 }
 0x80d   :  { %12320 = vrot.lane.b32.xlu1 %v12319_v8, %s12378_s22  ;;  %v10405_v26 = vadd.f32 %v10390_v63, %v10373_v49  ;;  %v10374_v48 = vmul.f32 %v10363_v45, %v10342_v51  ;;  %v10592_v63 = vld [vmem:[%s19076_s8 + $0x50] sm:$0xff]  ;;  %v10599_v49 = vld [vmem:[%s19076_s8 + $0x88] sm:$0xff] }
 0x80e   :  { %10626 = vmatpush.msrb.mxu2 %v10593_v58  ;;  %10662 = vmatpush.msra.mxu3 %v10602_v37 }
 0x80f   :  { %v18626_v46 = vmax.f32 %v10405_v26, 0.0  ;;  %v10406_v21 = vadd.f32 %v10395_v13, %v10374_v48  ;;  %v10598_v26 = vld [vmem:[%s19076_s8 + $0x80] sm:$0xff] }
 0x810   :  { %v10332_v38 = vpop.f32.mrf.mxu1  ;;  %10627 = vmatpush.msrb.mxu2 %v10592_v63  ;;  %10663 = vmatpush.msra.mxu3 %v10601_v56 }
 0x811   :  { %10480 = vrot.lane.b32.xlu2 %v18606_v59, %s12401_s0  ;;  %v10343_v12 = vadd.f32 %v10332_v38, %v10232_v35  ;;  %v18645_v10 = vmax.f32 %v10406_v21, 0.0 }
 0x812   :  { %v10306_v23 = vpop.f32.mrf.mxu0  ;;  %10628 = vmatpush.msrb.mxu2 %v10591_v36 }
 0x813   :  { %10550 = vrot.lane.b32.xlu0 %v18602_v22, %s12404_s17  ;;  %v10344_v25 = vadd.f32 %v10306_v23, %v10233_v9  ;;  %v10375_v40 = vmul.f32 %v10363_v45, %v10343_v12 }
 0x814   :  { %10629 = vmatpush.msrb.mxu2 %v10590_v3 }
 0x815   :  { %12325 = vrot.lane.b32.xlu1 %v12319_v8, %s12401_s0  ;;  %v10376_v39 = vmul.f32 %v10368_v52, %v10344_v25  ;;  %v10407_v30 = vadd.f32 %v10395_v13, %v10375_v40 }
 0x816   :  { %10630 = vmatpush.msrb.mxu2 %v10589_v62 }
 0x817   :  { %v10408_v34 = vadd.f32 %v10400_v6, %v10376_v39  ;;  %v18653_v32 = vmax.f32 %v10407_v30, 0.0 }
 0x818   :  { %v10335_v55 = vpop.f32.mrf.mxu1  ;;  %10631 = vmatpush.msrb.mxu2 %v10588_v41 }
 0x819   :  { %10524 = vrot.lane.b32.xlu2 %v18606_v59, %s12402_s16  ;;  %v18656_v19 = vmax.f32 %v10408_v34, 0.0  ;;  %v10345_v27 = vadd.f32 %v10335_v55, %v10234_v1 }
 0x81a   :  { %10632 = vmatpush.msrb.mxu2 %v10587_v47 }
 0x81b   :  { %10484 = vrot.lane.b32.xlu0 %v18626_v46, %s12401_s0  ;;  %v12334_v5 = vpack.i.bf16 %v18656_v19, %v18645_v10  ;;  %v10377_v57 = vmul.f32 %v10368_v52, %v10345_v27 }
 0x81c   :  { %10633 = vmatpush.msrb.mxu2 %v10586_v44 }
 0x81d   :  { %12330 = vrot.lane.b32.xlu1 %v12319_v8, %s12402_s16  ;;  %v10409_v33 = vadd.f32 %v10400_v6, %v10377_v57  ;;  %v10600_v8 = vld [vmem:[%s19076_s8 + $0x90] sm:$0xff]  ;;  %s12440_s8 = smov 47  }
 0x81e   :  { %10664 = vmatpush.msra.mxu3 %v10600_v8  ;;  %10634 = vmatpush.msrb.mxu2 %v10585_v24 }
 0x81f   :  { %v18672_v14 = vmax.f32 %v10409_v33, 0.0 }
 0x820   :  { %10665 = vmatpush.msra.mxu3 %v10599_v49  ;;  %10635 = vmatpush.msrb.mxu2 %v10584_v61 }
 0x821   :  { %10456 = vrot.lane.b32.xlu2 %v18610_v15, %s12398_s7 }
 0x822   :  { %10666 = vmatpush.msra.mxu3 %v10598_v26  ;;  %10636 = vmatpush.msrb.mxu2 %v10583_v50 }
 0x823   :  { %10552 = vrot.lane.b32.xlu0 %v18610_v15, %s12404_s17 }
 0x824   :  { %10637 = vmatpush.msrb.mxu2 %v10582_v60 }
 0x825   :  { %10432 = vrot.lane.b32.xlu1 %v18626_v46, %s12378_s22 }
 0x829   :  { %10528 = vrot.lane.b32.xlu2 %v18626_v46, %s12402_s16 }
 0x82b   :  { %10458 = vrot.lane.b32.xlu0 %v18645_v10, %s12398_s7 }
 0x82d   :  { %10508 = vrot.lane.b32.xlu1 %v18610_v15, %s12403_s30 }
 0x831   :  { %10436 = vrot.lane.b32.xlu2 %v18653_v32, %s12378_s22 }
 0x833   :  { %10510 = vrot.lane.b32.xlu0 %v18645_v10, %s12403_s30 }
 0x835   :  { %12335 = vrot.lane.b32.xlu1 %v12334_v5, %s12378_s22 }
 0x839   :  { %10488 = vrot.lane.b32.xlu2 %v18653_v32, %s12401_s0 }
 0x83b   :  { %10554 = vrot.lane.b32.xlu0 %v18645_v10, %s12404_s17 }
 0x83d   :  { %12340 = vrot.lane.b32.xlu1 %v12334_v5, %s12401_s0 }
 0x841   :  { %10532 = vrot.lane.b32.xlu2 %v18653_v32, %s12402_s16 }
 0x843   :  { %10492 = vrot.lane.b32.xlu0 %v18672_v14, %s12401_s0 }
 0x845   :  { %12345 = vrot.lane.b32.xlu1 %v12334_v5, %s12402_s16 }
 0x849   :  { %10460 = vrot.lane.b32.xlu2 %v18656_v19, %s12398_s7 }
 0x84b   :  { %10556 = vrot.lane.b32.xlu0 %v18656_v19, %s12404_s17  ;;  %s12446_s17 = smov [#allocation2]  }
 0x84c   :  { %s10992_s24 = sshll.u32 %s12446_s17, 4  ;;  %s10993_s24 = int_to_ptr.vmem [resolvable:$true] %s10992_s24 }
 0x84d   :  { %10440 = vrot.lane.b32.xlu1 %v18672_v14, %s12378_s22 }
 0x851   :  { %10536 = vrot.lane.b32.xlu2 %v18672_v14, %s12402_s16 }
 0x855   :  { %10512 = vrot.lane.b32.xlu1 %v18656_v19, %s12403_s30 }
 0x863   :  { %v10429_v54 = vpop.permute.xlu2 %10428 }
 0x86b   :  { %v10481_v7 = vpop.permute.xlu2 %10480 }
 0x873   :  { %v10525_v51 = vpop.permute.xlu2 %10524 }
 0x875   :  { %v10455_v2 = vpop.permute.xlu0 %10454 }
 0x876   :  { %v10466_v45 = vsel %vm7645_vm7, %v10429_v54, %v10455_v2 }
 0x877   :  { %v10471_v48 = vmax.f32 %v18606_v59, %v10466_v45 }
 0x87b   :  { %v10457_v38 = vpop.permute.xlu2 %10456 }
 0x87d   :  { %v10507_v0 = vpop.permute.xlu0 %10506 }
 0x87e   :  { %v10518_v23 = vsel %vm8153_vm5, %v10481_v7, %v10507_v0 }
 0x87f   :  { %v12321_v43 = vpop.permute.xlu1 %12320 }
 0x880   :  { %v12322_v21 = vunpack.i.l.bf16 %v12321_v43  ;;  %v12323_v27 = vunpack.i.h.bf16 %v12321_v43 }
 0x882   :  { %v10442_v30 = vsel %vm87_vm0, %v12322_v21, %v10429_v54 }
 0x883   :  { %v10529_v52 = vpop.permute.xlu2 %10528  ;;  %v10470_v11 = vmax.f32 %v18602_v22, %v10442_v30 }
 0x885   :  { %v10551_v35 = vpop.permute.xlu0 %10550 }
 0x886   :  { %v10562_v9 = vsel %vm8264_vm10, %v10525_v51, %v10551_v35 }
 0x887   :  { %v10567_v12 = vmax.f32 %v10518_v23, %v10562_v9  ;;  %v12326_v25 = vpop.permute.xlu1 %12325 }
 0x888   :  { %v12327_v39 = vunpack.i.l.bf16 %v12326_v25  ;;  %v12328_v53 = vunpack.i.h.bf16 %v12326_v25 }
 0x889   :  { %v10575_v13 = vmax.f32 %v10471_v48, %v10567_v12 }
 0x88a   :  { %v10494_v29 = vsel %vm8141_vm9, %v12327_v39, %v10481_v7 }
 0x88b   :  { %11998 = vmatmul.msk.f32.vlgmr.msra.gmra.mxu3 %vm10248_vm15, %v10575_v13  ;;  %v10437_v57 = vpop.permute.xlu2 %10436 }
 0x88d   :  { %v10485_v40 = vpop.permute.xlu0 %10484 }
 0x88e   :  { %v10495_v17 = vsel %vm8141_vm9, %v12328_v53, %v10485_v40 }
 0x88f   :  { %v12331_v6 = vpop.permute.xlu1 %12330 }
 0x890   :  { %v12332_v34 = vunpack.i.l.bf16 %v12331_v6  ;;  %v12333_v55 = vunpack.i.h.bf16 %v12331_v6 }
 0x892   :  { %v10538_v28 = vsel %vm8252_vm11, %v12332_v34, %v10525_v51  ;;  %v10539_v18 = vsel %vm8252_vm11, %v12333_v55, %v10529_v52 }
 0x893   :  { %v10566_v59 = vmax.f32 %v10494_v29, %v10538_v28  ;;  %v10568_v20 = vmax.f32 %v10495_v17, %v10539_v18  ;;  %v10489_v54 = vpop.permute.xlu2 %10488 }
 0x895   :  { %v10574_v1 = vmax.f32 %v10470_v11, %v10566_v59  ;;  %v10553_v5 = vpop.permute.xlu0 %10552 }
 0x896   :  { %v10563_v63 = vsel %vm8264_vm10, %v10529_v52, %v10553_v5 }
 0x897   :  { %v10433_v33 = vpop.permute.xlu1 %10432  ;;  %10638 = vmatmul.f32.vlgmr.msrb.gmra.mxu2 %v10574_v1 }
 0x898   :  { %v10443_v42 = vsel %vm87_vm0, %v12323_v27, %v10433_v33  ;;  %v10467_v58 = vsel %vm7645_vm7, %v10433_v33, %v10457_v38 }
 0x899   :  { %v10472_v4 = vmax.f32 %v18610_v15, %v10443_v42  ;;  %v10473_v36 = vmax.f32 %v18626_v46, %v10467_v58 }
 0x89b   :  { %v10576_v22 = vmax.f32 %v10472_v4, %v10568_v20  ;;  %v10533_v62 = vpop.permute.xlu2 %10532 }
 0x89d   :  { %v10459_v16 = vpop.permute.xlu0 %10458 }
 0x89e   :  { %v10468_v49 = vsel %vm7645_vm7, %v10437_v57, %v10459_v16 }
 0x89f   :  { %v10509_v31 = vpop.permute.xlu1 %10508  ;;  %10641 = vmatmul.f32.gmra.mxu2 %v10576_v22  ;;  %v10475_v7 = vmax.f32 %v18653_v32, %v10468_v49  ;;  %v10792_v49 = vld [vmem:[%s19077_s9 + $0xf0] sm:$0xff] }
 0x8a0   :  { %v10519_v37 = vsel %vm8153_vm5, %v10485_v40, %v10509_v31 }
 0x8a1   :  { %v10569_v56 = vmax.f32 %v10519_v37, %v10563_v63 }
 0x8a3   :  { %v10577_v3 = vmax.f32 %v10473_v36, %v10569_v56  ;;  %v10461_v61 = vpop.permute.xlu2 %10460 }
 0x8a5   :  { %11999 = vmatmul.msk.f32.gmra.mxu3 %vm10248_vm15, %v10577_v3  ;;  %v10511_v15 = vpop.permute.xlu0 %10510 }
 0x8a6   :  { %v10520_v26 = vsel %vm8153_vm5, %v10489_v54, %v10511_v15 }
 0x8a7   :  { %v12336_v8 = vpop.permute.xlu1 %12335 }
 0x8a8   :  { %v12337_v46 = vunpack.i.l.bf16 %v12336_v8  ;;  %v12338_v48 = vunpack.i.h.bf16 %v12336_v8 }
 0x8aa   :  { %v10444_v51 = vsel %vm87_vm0, %v12337_v46, %v10437_v57  ;;  %v10785_v46 = vld [vmem:[%s19077_s9 + $0xb8] sm:$0xff] }
 0x8ab   :  { %v10474_v35 = vmax.f32 %v18645_v10, %v10444_v51  ;;  %v10537_v12 = vpop.permute.xlu2 %10536  ;;  %v10806_v51 = vld [vmem:[%s19077_s9 + $0x160] sm:$0xff] }
 0x8ad   :  { %v10555_v41 = vpop.permute.xlu0 %10554 }
 0x8ae   :  { %v10564_v47 = vsel %vm8264_vm10, %v10533_v62, %v10555_v41  ;;  %v10791_v41 = vld [vmem:[%s19077_s9 + $0xe8] sm:$0xff] }
 0x8af   :  { %v10571_v44 = vmax.f32 %v10520_v26, %v10564_v47  ;;  %v12341_v24 = vpop.permute.xlu1 %12340  ;;  %v10790_v26 = vld [vmem:[%s19077_s9 + $0xe0] sm:$0xff]  ;;  %v10789_v47 = vld [vmem:[%s19077_s9 + $0xd8] sm:$0xff] }
 0x8b0   :  { %v12342_v50 = vunpack.i.l.bf16 %v12341_v24  ;;  %v12343_v13 = vunpack.i.h.bf16 %v12341_v24  ;;  %v10787_v24 = vld [vmem:[%s19077_s9 + $0xc8] sm:$0xff] }
 0x8b1   :  { %v10579_v2 = vmax.f32 %v10475_v7, %v10571_v44  ;;  %v10809_v7 = vld [vmem:[%s19077_s9 + $0x178] sm:$0xff]  ;;  %v10788_v44 = vld [vmem:[%s19077_s9 + $0xd0] sm:$0xff] }
 0x8b2   :  { %v10496_v43 = vsel %vm8141_vm9, %v12342_v50, %v10489_v54  ;;  %10859 = vmatpush.msra.mxu2 %v10809_v7  ;;  %v10784_v50 = vld [vmem:[%s19077_s9 + $0xb0] sm:$0xff] }
 0x8b3   :  { %12000 = vmatmul.msk.f32.gmra.mxu3 %vm10248_vm15, %v10579_v2  ;;  %v10786_v2 = vld [vmem:[%s19077_s9 + $0xc0] sm:$0xff] }
 0x8b5   :  { %v10493_v45 = vpop.permute.xlu0 %10492 }
 0x8b6   :  { %v10497_v39 = vsel %vm8141_vm9, %v12343_v13, %v10493_v45  ;;  %v10774_v13 = vld [vmem:[%s19077_s9 + $0x60] sm:$0xff]  ;;  %vm10754_vm9 = vcmask 154624  }
 0x8b7   :  { %v12346_v60 = vpop.permute.xlu1 %12345 }
 0x8b8   :  { %v12347_v0 = vunpack.i.l.bf16 %v12346_v60  ;;  %v12348_v23 = vunpack.i.h.bf16 %v12346_v60  ;;  %v10807_v60 = vld [vmem:[%s19077_s9 + $0x168] sm:$0xff] }
 0x8ba   :  { %v10540_v38 = vsel %vm8252_vm11, %v12347_v0, %v10533_v62  ;;  %v10541_v21 = vsel %vm8252_vm11, %v12348_v23, %v10537_v12  ;;  %v10793_v62 = vld [vmem:[%s19077_s9 + $0xf8] sm:$0xff]  ;;  %v10804_v23 = vld [vmem:[%s19077_s9 + $0x150] sm:$0xff]  ;;  %vm19465_vm11 = vcmask 203776  }
 0x8bb   :  { %v10570_v32 = vmax.f32 %v10496_v43, %v10540_v38  ;;  %v10572_v6 = vmax.f32 %v10497_v39, %v10541_v21  ;;  %10839 = vmatpush.msrb.mxu3 %v10793_v62  ;;  %v10777_v0 = vld [vmem:[%s19077_s9 + $0x78] sm:$0xff]  ;;  %v10783_v43 = vld [vmem:[%s19077_s9 + $0xa8] sm:$0xff]  ;;  %v10778_v21 = vld [vmem:[%s19077_s9 + $0x80] sm:$0xff] }
 0x8bc   :  { %10819 = vmatpush.msra.mxu0 %v10777_v0  ;;  %v10805_v38 = vld [vmem:[%s19077_s9 + $0x158] sm:$0xff] }
 0x8bd   :  { %v10578_v9 = vmax.f32 %v10474_v35, %v10570_v32  ;;  %v10557_v30 = vpop.permute.xlu0 %10556  ;;  %10840 = vmatpush.msrb.mxu3 %v10792_v49  ;;  %v10781_v35 = vld [vmem:[%s19077_s9 + $0x98] sm:$0xff]  ;;  %v10776_v32 = vld [vmem:[%s19077_s9 + $0x70] sm:$0xff] }
 0x8be   :  { %v10565_v28 = vsel %vm8264_vm10, %v10537_v12, %v10557_v30  ;;  %10820 = vmatpush.msra.mxu0 %v10776_v32  ;;  %v10779_v12 = vld [vmem:[%s19077_s9 + $0x88] sm:$0xff]  ;;  %v10801_v39 = vld [vmem:[%s19077_s9 + $0x138] sm:$0xff]  ;;  %v10800_v30 = vld [vmem:[%s19077_s9 + $0x130] sm:$0xff]  ;;  %vm10756_vm10 = vcmask 359424  }
 0x8bf   :  { %v10441_v25 = vpop.permute.xlu1 %10440  ;;  %10644 = vmatmul.f32.gmra.mxu2 %v10578_v9  ;;  %10841 = vmatpush.msrb.mxu3 %v10791_v41  ;;  %v10780_v9 = vld [vmem:[%s19077_s9 + $0x90] sm:$0xff]  ;;  %v10911_v32 = vld [vmem:[%s19079_s11 + $0x58] sm:$0xff] }
 0x8c0   :  { %v10445_v52 = vsel %vm87_vm0, %v12338_v48, %v10441_v25  ;;  %v10469_v10 = vsel %vm7645_vm7, %v10441_v25, %v10461_v61  ;;  %v10808_v61 = vld [vmem:[%s19077_s9 + $0x170] sm:$0xff]  ;;  %v10775_v48 = vld [vmem:[%s19077_s9 + $0x68] sm:$0xff]  ;;  %vm10748_vm0 = vcmask 384000   ;;  %vm10816_vm7 = vcmask 130048  }
 0x8c1   :  { %v10476_v40 = vmax.f32 %v18656_v19, %v10445_v52  ;;  %v10477_v59 = vmax.f32 %v18672_v14, %v10469_v10  ;;  %10842 = vmatpush.msrb.mxu3 %v10790_v26  ;;  %10860 = vmatpush.msra.mxu2 %v10808_v61  ;;  %v10803_v25 = vld [vmem:[%s19077_s9 + $0x148] sm:$0xff]  ;;  %v10802_v52 = vld [vmem:[%s19077_s9 + $0x140] sm:$0xff] }
 0x8c2   :  { %10821 = vmatpush.msra.mxu0 %v10775_v48  ;;  %v10771_v10 = vld [vmem:[%s19077_s9 + $0x48] sm:$0xff]  ;;  %v10908_v48 = vld [vmem:[%s19079_s11 + $0x40] sm:$0xff] }
 0x8c3   :  { %v10580_v34 = vmax.f32 %v10476_v40, %v10572_v6  ;;  %10843 = vmatpush.msrb.mxu3 %v10789_v47  ;;  %10861 = vmatpush.msra.mxu2 %v10807_v60  ;;  %v10773_v40 = vld [vmem:[%s19077_s9 + $0x58] sm:$0xff]  ;;  %v10772_v6 = vld [vmem:[%s19077_s9 + $0x50] sm:$0xff] }
 0x8c4   :  { %10822 = vmatpush.msra.mxu0 %v10774_v13  ;;  %v10905_v13 = vld [vmem:[%s19079_s11 + $0x28] sm:$0xff] }
 0x8c5   :  { %10844 = vmatpush.msrb.mxu3 %v10788_v44  ;;  %10862 = vmatpush.msra.mxu2 %v10806_v51 }
 0x8c6   :  { %10823 = vmatpush.msra.mxu0 %v10773_v40  ;;  %v10902_v40 = vld [vmem:[%s19079_s11 + $0x10] sm:$0xff] }
 0x8c7   :  { %v10513_v29 = vpop.permute.xlu1 %10512  ;;  %10647 = vmatmul.f32.gmra.mxu2 %v10580_v34  ;;  %10845 = vmatpush.msrb.mxu3 %v10787_v24 }
 0x8c8   :  { %v10521_v11 = vsel %vm8153_vm5, %v10493_v45, %v10513_v29  ;;  %v10782_v45 = vld [vmem:[%s19077_s9 + $0xa0] sm:$0xff]  ;;  %10863 = vmatpush.msra.mxu2 %v10805_v38  ;;  %10824 = vmatpush.msra.mxu0 %v10772_v6  ;;  %v10799_v29 = vld [vmem:[%s19077_s9 + $0x128] sm:$0xff]  ;;  %vm10760_vm5 = vcmask 973824  }
 0x8c9   :  { %v10573_v55 = vmax.f32 %v10521_v11, %v10565_v28  ;;  %10846 = vmatpush.msrb.mxu3 %v10786_v2  ;;  %v10811_v28 = vld [vmem:[%s19077_s9 + $0x188] sm:$0xff]  ;;  %v10770_v11 = vld [vmem:[%s19077_s9 + $0x40] sm:$0xff] }
 0x8ca   :  { %10864 = vmatpush.msra.mxu2 %v10804_v23  ;;  %10825 = vmatpush.msra.mxu0 %v10771_v10  ;;  %v10910_v23 = vld [vmem:[%s19079_s11 + $0x50] sm:$0xff]  ;;  %v10900_v6 = vld [vmem:[%s19079_s11] sm:$0xff] }
 0x8cb   :  { %v10581_v1 = vmax.f32 %v10477_v59, %v10573_v55  ;;  %10847 = vmatpush.msrb.mxu3 %v10785_v46  ;;  %v10798_v59 = vld [vmem:[%s19077_s9 + $0x120] sm:$0xff] }
 0x8cc   :  { %10865 = vmatpush.msra.mxu2 %v10803_v25  ;;  %v10810_v55 = vld [vmem:[%s19077_s9 + $0x180] sm:$0xff]  ;;  %10826 = vmatpush.msra.mxu0 %v10770_v11  ;;  %v10906_v25 = vld [vmem:[%s19079_s11 + $0x30] sm:$0xff]  ;;  %v10949_v11 = vld [vmem:[%s19081_s13 + $0x28] sm:$0xff] }
 0x8cd   :  { %12001 = vmatmul.msk.f32.gmra.mxu3 %vm10248_vm15, %v10581_v1  ;;  %v10769_v1 = vld [vmem:[%s19077_s9 + $0x38] sm:$0xff]  ;;  %v10952_v10 = vld [vmem:[%s19081_s13 + $0x40] sm:$0xff] }
 0x8ce   :  { %10848 = vmatpush.msrb.mxu3 %v10784_v50  ;;  %10866 = vmatpush.msra.mxu2 %v10802_v52  ;;  %v10903_v52 = vld [vmem:[%s19079_s11 + $0x18] sm:$0xff] }
 0x8cf   :  { %10827 = vmatpush.msra.mxu0 %v10769_v1 }
 0x8d0   :  { %10849 = vmatpush.msrb.mxu3 %v10783_v43  ;;  %10867 = vmatpush.msra.mxu2 %v10801_v39  ;;  %v10901_v39 = vld [vmem:[%s19079_s11 + $0x8] sm:$0xff] }
 0x8d2   :  { %10850 = vmatpush.msrb.mxu3 %v10782_v45  ;;  %10868 = vmatpush.msra.mxu2 %v10800_v30  ;;  %v10914_v45 = vld [vmem:[%s19079_s11 + $0x70] sm:$0xff] }
 0x8d3   :  { %v10954_v30 = vld [vmem:[%s19081_s13 + $0x50] sm:$0xf] }
 0x8d4   :  { %10851 = vmatpush.msrb.mxu3 %v10781_v35  ;;  %10869 = vmatpush.msra.mxu2 %v10799_v29  ;;  %v10912_v35 = vld [vmem:[%s19079_s11 + $0x60] sm:$0xff]  ;;  %v10951_v29 = vld [vmem:[%s19081_s13 + $0x38] sm:$0xff] }
 0x8d5   :  { %12004 = vmatpush.msk.msra.mxu1 %vm7661_vm1, %v10954_v30  ;;  %vm19469_vm1 = vcmask 687104  }
 0x8d6   :  { %10852 = vmatpush.msrb.mxu3 %v10780_v9  ;;  %10870 = vmatpush.msra.mxu2 %v10798_v59  ;;  %v10909_v9 = vld [vmem:[%s19079_s11 + $0x48] sm:$0xff]  ;;  %v10948_v59 = vld [vmem:[%s19081_s13 + $0x20] sm:$0xff] }
 0x8d8   :  { %10853 = vmatpush.msrb.mxu3 %v10779_v12  ;;  %v10907_v12 = vld [vmem:[%s19079_s11 + $0x38] sm:$0xff] }
 0x8da   :  { %10854 = vmatpush.msrb.mxu3 %v10778_v21  ;;  %v10904_v21 = vld [vmem:[%s19079_s11 + $0x20] sm:$0xff] }
 0x8dc   :  { %10893 = vmatpush.msra.mxu3 %v10811_v28  ;;  %v10950_v28 = vld [vmem:[%s19081_s13 + $0x30] sm:$0xff] }
 0x8de   :  { %10894 = vmatpush.msra.mxu3 %v10810_v55  ;;  %v10947_v55 = vld [vmem:[%s19081_s13 + $0x18] sm:$0xff] }
 0x90e   :  { %v10668_v19 = vpop.f32.mrf.mxu3 }
 0x91a   :  { %v10639_v5 = vpop.f32.mrf.mxu2 }
 0x91b   :  { %v18799_v27 = vadd.f32 %v10668_v19, %v10639_v5  ;;  %v10797_v19 = vld [vmem:[%s19077_s9 + $0x118] sm:$0xff]  ;;  %v10768_v5 = vld [vmem:[%s19077_s9 + $0x30] sm:$0xff] }
 0x91c   :  { %10871 = vmatpush.msra.mxu2 %v10797_v19  ;;  %10828 = vmatpush.msra.mxu0 %v10768_v5  ;;  %v12349_v19 = vld [vmem:[%s19078_s10] ss:$0 sm:$0xff] }
 0x91d   :  { %v10685_v57 = vrot.slane %v18799_v27, 4  ;;  %v10681_v33 = vrot.slane %v18799_v27, 2  ;;  %v10689_v8 = vrot.slane %v18799_v27, 6 }
 0x91f   :  { %10686 = vrot.lane.b32.xlu2 %v10685_v57, %s12408_s19  ;;  %10682 = vrot.lane.b32.xlu0 %v10681_v33, %s12422_s3  ;;  %s12441_s19 = smov 122   ;;  %s19461_s3 = smov 97   ;;  %v10796_v57 = vld [vmem:[%s19077_s9 + $0x110] sm:$0xff] }
 0x920   :  { %10872 = vmatpush.msra.mxu2 %v10796_v57 }
 0x922   :  { %v10642_v53 = vpop.f32.mrf.mxu2 }
 0x928   :  { %v10671_v18 = vpop.f32.mrf.mxu3 }
 0x929   :  { %v10672_v42 = vadd.f32 %v10671_v18, %v10642_v53  ;;  %v10767_v18 = vld [vmem:[%s19077_s9 + $0x28] sm:$0xff] }
 0x92a   :  { %10829 = vmatpush.msra.mxu0 %v10767_v18 }
 0x92b   :  { %v10705_v14 = vrot.slane %v10672_v42, 6  ;;  %v10701_v4 = vrot.slane %v10672_v42, 4  ;;  %v10697_v17 = vrot.slane %v10672_v42, 2 }
 0x92d   :  { %10706 = vrot.lane.b32.xlu0 %v10705_v14, %s12440_s8  ;;  %10702 = vrot.lane.b32.xlu2 %v10701_v4, %s12428_s21  ;;  %s12443_s21 = smov 44   ;;  %v10766_v14 = vld [vmem:[%s19077_s9 + $0x20] sm:$0xff] }
 0x92e   :  { %10698 = vrot.lane.b32.xlu1 %v10697_v17, %s12380_s23  ;;  %s19462_s23 = smov 94   ;;  %v10794_v4 = vld [vmem:[%s19077_s9 + $0x100] sm:$0xff]  ;;  %v10765_v17 = vld [vmem:[%s19077_s9 + $0x18] sm:$0xff]  ;;  %10830 = vmatpush.msra.mxu0 %v10766_v14 }
 0x930   :  { %10831 = vmatpush.msra.mxu0 %v10765_v17  ;;  %v10946_v17 = vld [vmem:[%s19081_s13 + $0x10] sm:$0xff] }
 0x936   :  { %v10674_v20 = vpop.f32.mrf.mxu3 }
 0x942   :  { %v10645_v16 = vpop.f32.mrf.mxu2 }
 0x943   :  { %v10675_v22 = vadd.f32 %v10674_v20, %v10645_v16  ;;  %v10764_v20 = vld [vmem:[%s19077_s9 + $0x10] sm:$0xff] }
 0x944   :  { %10832 = vmatpush.msra.mxu0 %v10764_v20  ;;  %v10945_v20 = vld [vmem:[%s19081_s13 + $0x8] sm:$0xff] }
 0x945   :  { %10710 = vrot.lane.b32.xlu1 %v10675_v22, %s12429_s18  ;;  %v10717_v58 = vrot.slane %v10675_v22, 4  ;;  %v10713_v31 = vrot.slane %v10675_v22, 2  ;;  %v10721_v63 = vrot.slane %v10675_v22, 6  ;;  %s12444_s18 = smov 119  }
 0x947   :  { %10718 = vrot.lane.b32.xlu0 %v10717_v58, %s12441_s19  ;;  %10714 = vrot.lane.b32.xlu2 %v10713_v31, %s19461_s3  ;;  %v10763_v31 = vld [vmem:[%s19077_s9 + $0x8] sm:$0xff] }
 0x948   :  { %10833 = vmatpush.msra.mxu0 %v10763_v31 }
 0x94a   :  { %v10648_v37 = vpop.f32.mrf.mxu2 }
 0x94d   :  { %10722 = vrot.lane.b32.xlu1 %v10721_v63, %s12442_s1  ;;  %v10762_v63 = vld [vmem:[%s19077_s9] sm:$0xff] }
 0x94e   :  { %10834 = vmatpush.msra.mxu0 %v10762_v63 }
 0x950   :  { %v10677_v54 = vpop.f32.mrf.mxu3  ;;  %10924 = vmatpush.msrb.mxu0 %v10914_v45 }
 0x951   :  { %v10678_v36 = vadd.f32 %v10677_v54, %v10648_v37 }
 0x953   :  { %10726 = vrot.lane.b32.xlu2 %v10678_v36, %s12443_s21  ;;  %v10733_v56 = vrot.slane %v10678_v36, 4  ;;  %v10729_v3 = vrot.slane %v10678_v36, 2  ;;  %v10737_v15 = vrot.slane %v10678_v36, 6 }
 0x955   :  { %10734 = vrot.lane.b32.xlu0 %v10733_v56, %s19462_s23  ;;  %10730 = vrot.lane.b32.xlu1 %v10729_v3, %s19463_s20 }
 0x95b   :  { %10738 = vrot.lane.b32.xlu2 %v10737_v15, %s12444_s18 }
 0x95d   :  { %10694 = vrot.lane.b32.xlu0 %v10672_v42, %s19464_s27  ;;  %10690 = vrot.lane.b32.xlu1 %v10689_v8, %s12445_s26  ;;  %v10795_v42 = vld [vmem:[%s19077_s9 + $0x108] sm:$0xff] }
 0x95e   :  { %10873 = vmatpush.msra.mxu2 %v10795_v42 }
 0x960   :  { %10874 = vmatpush.msra.mxu2 %v10794_v4 }
 0x979   :  { %v18909_v34 = vpop.permute.xlu2 %10686 }
 0x987   :  { %v10703_v33 = vpop.permute.xlu2 %10702 }
 0x991   :  { %v10683_v53 = vpop.permute.xlu0 %10682 }
 0x992   :  { %v10741_v61 = vsel %vm19465_vm11, %v18799_v27, %v10683_v53  ;;  %v10913_v27 = vld [vmem:[%s19079_s11 + $0x68] sm:$0xff] }
 0x993   :  { %10925 = vmatpush.msrb.mxu0 %v10913_v27 }
 0x995   :  { %10926 = vmatpush.msrb.mxu0 %v10912_v35 }
 0x997   :  { %10927 = vmatpush.msrb.mxu0 %v10911_v32 }
 0x999   :  { %10928 = vmatpush.msrb.mxu0 %v10910_v23 }
 0x99b   :  { %10929 = vmatpush.msrb.mxu0 %v10909_v9 }
 0x99d   :  { %10930 = vmatpush.msrb.mxu0 %v10908_v48 }
 0x99f   :  { %v10707_v58 = vpop.permute.xlu0 %10706  ;;  %10931 = vmatpush.msrb.mxu0 %v10907_v12 }
 0x9a0   :  { %v10699_v16 = vpop.permute.xlu1 %10698 }
 0x9a1   :  { %v10715_v22 = vpop.permute.xlu2 %10714  ;;  %v10747_v37 = vsel %vm9706_vm13, %v10699_v16, %v10703_v33  ;;  %vm19466_vm13 = vcmask 408576   ;;  %10932 = vmatpush.msrb.mxu0 %v10906_v25 }
 0x9a2   :  { %v10749_v54 = vsel %vm10748_vm0, %v10747_v37, %v10707_v58  ;;  %v10742_v60 = vsel %vm19466_vm13, %v10741_v61, %v18909_v34  ;;  %v10953_v34 = vld [vmem:[%s19081_s13 + $0x48] sm:$0xff]  ;;  %v12351_v37 = vld [vmem:[%s19082_s14] ss:$0 sm:$0xff] }
 0x9a3   :  { %10933 = vmatpush.msrb.mxu0 %v10905_v13  ;;  %10971 = vmatpush.msra.mxu1 %v10953_v34 }
 0x9a5   :  { %10934 = vmatpush.msrb.mxu0 %v10904_v21  ;;  %10972 = vmatpush.msra.mxu1 %v10952_v10 }
 0x9a7   :  { %10935 = vmatpush.msrb.mxu0 %v10903_v52  ;;  %10973 = vmatpush.msra.mxu1 %v10951_v29 }
 0x9a9   :  { %10936 = vmatpush.msrb.mxu0 %v10902_v40  ;;  %10974 = vmatpush.msra.mxu1 %v10950_v28 }
 0x9ab   :  { %10937 = vmatpush.msrb.mxu0 %v10901_v39  ;;  %10975 = vmatpush.msra.mxu1 %v10949_v11 }
 0x9ad   :  { %v10727_v56 = vpop.permute.xlu2 %10726  ;;  %10938 = vmatpush.msrb.mxu0 %v10900_v6  ;;  %10976 = vmatpush.msra.mxu1 %v10948_v59 }
 0x9af   :  { %10977 = vmatpush.msra.mxu1 %v10947_v55 }
 0x9b1   :  { %10978 = vmatpush.msra.mxu1 %v10946_v17 }
 0x9b3   :  { %10979 = vmatpush.msra.mxu1 %v10945_v20 }
 0x9b5   :  { %v10739_v41 = vpop.permute.xlu2 %10738 }
 0x9b7   :  { %v10711_v36 = vpop.permute.xlu1 %10710 }
 0x9b8   :  { %v10750_v3 = vsel %vm9805_vm14, %v10749_v54, %v10711_v36  ;;  %vm19467_vm14 = vcmask 818176  }
 0x9b9   :  { %v10751_v15 = vsel %vm9029_vm12, %v10750_v3, %v10715_v22  ;;  %v10719_v8 = vpop.permute.xlu0 %10718  ;;  %vm10743_vm12 = vcmask 613376   ;;  %v12350_v22 = vld [vmem:[%s19080_s12] ss:$0 sm:$0xff] }
 0x9ba   :  { %v10753_v62 = vsel %vm10752_vm2, %v10751_v15, %v10719_v8 }
 0x9bb   :  { %10855 = vmatmul.f32.vlgmr.msrb.gmra.mxu3 %v10753_v62 }
 0x9bf   :  { %v10723_v49 = vpop.permute.xlu1 %10722 }
 0x9c0   :  { %v10755_v26 = vsel %vm10754_vm9, %v10719_v8, %v10723_v49 }
 0x9c1   :  { %v10757_v7 = vsel %vm10756_vm10, %v10755_v26, %v10727_v56 }
 0x9c3   :  { %12002 = vmatmul.msk.f32.vlgmr.msra.gmra.mxu3 %vm10816_vm7, %v10739_v41 }
 0x9c7   :  { %v10731_v47 = vpop.permute.xlu1 %10730  ;;  %v10735_v44 = vpop.permute.xlu0 %10734 }
 0x9c8   :  { %v10758_v24 = vsel %vm10137_vm4, %v10757_v7, %v10731_v47  ;;  %vm10985_vm4 = vcmask 74752  }
 0x9c9   :  { %v10759_v2 = vsel %vm1898_vm8, %v10758_v24, %v10735_v44  ;;  %vm10919_vm8 = vcmask 982016  }
 0x9ca   :  { %v10761_v46 = vsel %vm10760_vm5, %v10759_v2, %v10739_v41 }
 0x9cb   :  { %10875 = vmatmul.f32.vlgmr.msra.gmra.mxu2 %v10761_v46 }
 0x9cf   :  { %v10691_v50 = vpop.permute.xlu1 %10690  ;;  %v10695_v51 = vpop.permute.xlu0 %10694 }
 0x9d0   :  { %v10744_v0 = vsel %vm10743_vm12, %v10742_v60, %v10691_v50 }
 0x9d1   :  { %v10745_v43 = vsel %vm19467_vm14, %v10744_v0, %v10695_v51 }
 0x9d2   :  { %v10746_v38 = vsel %vm19468_vm3, %v10745_v43, %v10699_v16  ;;  %v10944_v16 = vld [vmem:[%s19081_s13] sm:$0xff]  ;;  %s10994_s13 = sshll.u32 %s19083_s15, 4  ;;  %s10995_s13 = int_to_ptr.hbm [resolvable:$true] %s10994_s13 }
 0x9d3   :  { %10835 = vmatmul.f32.vlgmr.msra.gmra.mxu0 %v10746_v38  ;;  %10980 = vmatpush.msra.mxu1 %v10944_v16 }
 0xa3e   :  { %v10856_v1 = vpop.f32.mrf.mxu3 }
 0xa46   :  { %v10896_v42 = vpop.f32.mrf.mxu3 }
 0xa4e   :  { %v10876_v53 = vpop.f32.mrf.mxu2 }
 0xa50   :  { %v10836_v5 = vpop.f32.mrf.mxu0 }
 0xa51   :  { %v10837_v57 = vadd.f32 %v12349_v19, %v10836_v5 }
 0xa53   :  { %v10857_v33 = vadd.f32 %v10856_v1, %v10837_v57 }
 0xa55   :  { %v10877_v18 = vadd.f32 %v10876_v53, %v10857_v33 }
 0xa57   :  { %v10897_v14 = vadd.f32 %v10896_v42, %v10877_v18 }
 0xa59   :  { %v10899_v4 = vmax.f32 %v10897_v14, 0.0 }
 0xa5b   :  { %12003 = vmatmul.msk.f32.vlgmr.msrb.gmra.mxu0 %vm10919_vm8, %v10899_v4 }
 0xad8   :  { %v10940_v58 = vpop.f32.mrf.mxu0 }
 0xad9   :  { %v10941_v31 = vadd.f32 %v12350_v22, %v10940_v58 }
 0xadb   :  { %v10943_v63 = vmax.f32 %v10941_v31, 0.0 }
 0xadd   :  { %12005 = vmatmul.msk.f32.vlgmr.msra.gmra.mxu1 %vm19469_vm1, %v10943_v63 }
 0xb5a   :  { %v10982_v54 = vpop.f32.mrf.mxu1 }
 0xb5b   :  { %v10983_v36 = vadd.f32 %v12351_v37, %v10982_v54 }
 0xb5d   :  { %10986 = vst.msk [vmem:[#allocation2] sm:$0x3] %vm10985_vm4, %v10983_v36 }
 0xb5e   :  { %10997 = dma.vmem_to_hbm [thread:$0]  %s10993_s24, 32, %s10995_s13, [#allocation3]  }
 0xb5f   :  { %12376 = dma.done.wait [#allocation3], 32  }
 0xb60   :  { %12377 = vsyncadd [#allocation3], 4294967264 }
 0xb61   :  { %11002 = vsyncpa [#allocation3], 1 }

</bundles_post_ra>
